<compile_context>
chip_gen: v7x
topology: tpu7x:2x2x1
jax: 0.10.0
libtpu: 0.0.40
codegen_flags: <defaults>
</compile_context>

<pallas_src>
import functools
import math

import jax
import jax.numpy as jnp
from jax.experimental import pallas as pl
from jax.experimental.pallas import tpu as pltpu

DT = 0.01
INTEGRATION_STEPS = 10
TWO_PI = 2.0 * math.pi
INV_TWO_PI = 1.0 / TWO_PI


# --------------------------------------------------------------------------- #
# Kernel
# --------------------------------------------------------------------------- #
def _kuramoto_kernel(*refs, has_ext):
    """One column-tile of the Kuramoto integration (M on the lane axis).

    refs (has_ext=True):
        phases_ref : (N, TILE_M)           initial phases tile
        omega_ref  : (N, 1)                natural frequencies
        k_ref      : (N, N)                coupling matrix
        ext_ref    : (N, TILE_M)           external driving input
        traj_ref   : (STEPS+1, N, TILE_M)  full trajectory (traj[-1] == final)
    refs (has_ext=False): same, without ext_ref.
    """
    if has_ext:
        phases_ref, omega_ref, k_ref, ext_ref, traj_ref = refs
    else:
        phases_ref, omega_ref, k_ref, traj_ref = refs
        ext_ref = None

    phases = phases_ref[...]                       # (N, TM) f32
    k = k_ref[...]                                 # (N, N)
    n, tm = phases.shape
    inv_n = 1.0 / float(n)

    # Hoist the lane-broadcast of omega (and the ext add) out of the step loop.
    drive = jnp.broadcast_to(omega_ref[...], phases.shape)
    if ext_ref is not None:
        drive = drive + ext_ref[...]

    traj_ref[0] = phases                           # raw (unwrapped) initial phases
    for step in range(INTEGRATION_STEPS):
        c = jnp.cos(phases)                        # (N, TM)
        s = jnp.sin(phases)                        # (N, TM)
        # One fused MXU pass: K @ [cos | sin]  -> (N, 2*TM)
        cs = jnp.concatenate([c, s], axis=-1)
        kcs = jnp.dot(k, cs,
                      precision=jax.lax.Precision.HIGHEST,
                      preferred_element_type=jnp.float32)
        kc = kcs[:, :tm]                           # sum_j K[i,j] * cos(th_j)
        ks = kcs[:, tm:]                           # sum_j K[i,j] * sin(th_j)
        # coupling[i, m] = (1/N) * sum_j K[i,j] * sin(th_i - th_j)
        coupling = (s * kc - c * ks) * inv_n

        phases = phases + DT * (drive + coupling)
        # torch.fmod(phases, 2*pi): truncated (toward-zero) remainder.
        phases = phases - TWO_PI * jnp.trunc(phases * INV_TWO_PI)

        traj_ref[step + 1] = phases


# --------------------------------------------------------------------------- #
# Generation-aware tiling helpers
# --------------------------------------------------------------------------- #
def _tpu_generation_info():
    """(tensorcores_per_chip, physical_vmem_bytes), conservatively defaulted."""
    cores = 1
    vmem = 128 << 20
    kind = ""
    try:
        kind = jax.devices()[0].device_kind.lower()
    except Exception:
        pass
    if "v7" in kind:
        cores, vmem = 2, 64 << 20
    try:
        info = pltpu.get_tpu_info()
        vmem = int(getattr(info, "vmem_capacity_bytes", vmem))
        for attr in ("tensorcores_per_chip", "num_tensorcores",
                     "num_cores_per_chip", "num_cores"):
            v = getattr(info, attr, None)
            if isinstance(v, int) and v > 0:
                cores = v
                break
    except Exception:
        pass
    return cores, vmem


def _vmem_block_bytes(n, tile_m, t, has_ext):
    """Rough double-buffered VMEM footprint of one grid step (f32)."""
    f32 = 4
    n_pad = max(8 * ((n + 7) // 8), 8)
    lane_pad = max(128, 128 * ((n + 127) // 128))
    traj = 2 * t * n_pad * tile_m * f32            # dominant term
    phases = 2 * n_pad * tile_m * f32
    ext = 2 * n_pad * tile_m * f32 if has_ext else 0
    kmat = 2 * n_pad * lane_pad * f32
    omega = 2 * n_pad * 128 * f32
    return traj + phases + ext + kmat + omega


def _pick_tile_m(m_pad, num_cores, n, t, has_ext, vmem_phys):
    """Lane-dense tile: biggest that fits VMEM; split only on multi-TC chips.

    Cap at 512 lanes so the unrolled 10-step loop stays well under 64 vregs.
    """
    budget = int(0.75 * vmem_phys)
    candidates = [c for c in (512, 256, 128) if c <= m_pad and m_pad % c == 0]
    if not candidates:
        candidates = [128]
    fits = [c for c in candidates
            if _vmem_block_bytes(n, c, t, has_ext) <= budget] or [candidates[-1]]
    if num_cores >= 2:
        for c in fits:
            if m_pad // c >= num_cores:
                return c
    return fits[0]


# --------------------------------------------------------------------------- #
# Wrapper
# --------------------------------------------------------------------------- #
def kuramoto_forward(initial_phases, natural_frequencies, coupling_matrix,
                     external_input=None, *, tile_m=None):
    """Pallas equivalent of KuramotoOscillator.forward.

    initial_phases: (B, H, W, N) float32
    Returns (final_phases (B,H,W,N), trajectory (STEPS+1, B, H, W, N)).
    """
    B, H, W, N = initial_phases.shape
    M = B * H * W
    M_pad = ((M + 127) // 128) * 128               # unmasked full-lane stores
    T = INTEGRATION_STEPS + 1
    has_ext = external_input is not None

    num_cores, vmem_phys = _tpu_generation_info()
    if tile_m is None:
        tile_m = _pick_tile_m(M_pad, num_cores, N, T, has_ext, vmem_phys)
    assert M_pad % tile_m == 0

    # Wrapper-side layout plumbing: put M on the lane (last) axis, pad M.
    def to_nm(a):
        a2 = a.reshape(M, N).astype(jnp.float32)
        if M_pad != M:
            a2 = jnp.pad(a2, ((0, M_pad - M), (0, 0)))
        return jnp.transpose(a2)                   # (N, M_pad)

    x = to_nm(initial_phases)
    omega = natural_frequencies.reshape(N, 1).astype(jnp.float32)
    k = coupling_matrix.astype(jnp.float32)

    in_specs = [
        pl.BlockSpec((N, tile_m), lambda i: (0, i)),   # phases tile
        pl.BlockSpec((N, 1), lambda i: (0, 0)),        # omega (replicated)
        pl.BlockSpec((N, N), lambda i: (0, 0)),        # K (replicated)
    ]
    operands = [x, omega, k]
    if has_ext:
        in_specs.append(pl.BlockSpec((N, tile_m), lambda i: (0, i)))
        operands.append(to_nm(external_input))

    needed = _vmem_block_bytes(N, tile_m, T, has_ext)
    vmem_limit = int(min(max(needed + (4 << 20), 32 << 20),
                         max(vmem_phys - (8 << 20), needed + (2 << 20))))

    traj_tnm = pl.pallas_call(
        functools.partial(_kuramoto_kernel, has_ext=has_ext),
        out_shape=jax.ShapeDtypeStruct((T, N, M_pad), jnp.float32),
        grid=(M_pad // tile_m,),
        in_specs=in_specs,
        out_specs=pl.BlockSpec((T, N, tile_m), lambda i: (0, 0, i)),
        compiler_params=pltpu.CompilerParams(
            dimension_semantics=("parallel",),
            vmem_limit_bytes=vmem_limit),
    )(*operands)

    # TODO(synk): this transpose back to the torch (T,B,H,W,N) layout re-streams
    # the full trajectory through HBM; return (T, N, M) directly if the consumer
    # can accept the lane-dense layout.
    traj = jnp.transpose(traj_tnm, (0, 2, 1))
    if M_pad != M:
        traj = traj[:, :M, :]
    phase_trajectory = traj.reshape(T, B, H, W, N)
    final_phases = phase_trajectory[-1]            # traj[-1] == final phases
    return final_phases, phase_trajectory


# --------------------------------------------------------------------------- #
# Pure-JAX reference (mirrors the PyTorch module)
# --------------------------------------------------------------------------- #
def _reference_forward(initial_phases, natural_frequencies, coupling_matrix,
                       external_input=None):
    phases = initial_phases.astype(jnp.float32)
    n = phases.shape[-1]
    traj = [phases]
    for _ in range(INTEGRATION_STEPS):
        diffs = phases[..., :, None] - phases[..., None, :]        # th_i - th_j
        coupling = jnp.sum(coupling_matrix * jnp.sin(diffs), axis=-1) / n
        ext = external_input if external_input is not None else 0.0
        dpdt = natural_frequencies + coupling + ext
        phases = phases + DT * dpdt
        phases = phases - TWO_PI * jnp.trunc(phases * INV_TWO_PI)  # fmod(x, 2pi)
        traj.append(phases)
    return phases, jnp.stack(traj, axis=0)


if __name__ == "__main__":
    key = jax.random.PRNGKey(0)
    k_freq, k_coup, k_phase = jax.random.split(key, 3)

    B, H, W, N = 2, 16, 16, 8
    coupling_strength = 1.0

    # Deterministic parameter init (matches nn.Parameter shapes in __init__).
    natural_frequencies = 0.1 * jax.random.normal(k_freq, (N,), jnp.float32)
    coupling_matrix = (jnp.eye(N, dtype=jnp.float32) * coupling_strength
                       + 0.01 * jax.random.normal(k_coup, (N, N), jnp.float32))
    initial_phases = jax.random.normal(k_phase, (B, H, W, N), jnp.float32)

    final_phases, trajectory = kuramoto_forward(
        initial_phases, natural_frequencies, coupling_matrix, external_input=None)
    jax.block_until_ready((final_phases, trajectory))

    assert final_phases.shape == (B, H, W, N)
    assert final_phases.dtype == jnp.float32
    assert trajectory.shape == (INTEGRATION_STEPS + 1, B, H, W, N)
    assert trajectory.dtype == jnp.float32
    assert bool(jnp.all(jnp.isfinite(final_phases)))
    assert bool(jnp.all(jnp.isfinite(trajectory)))

    ref_final, ref_traj = _reference_forward(
        initial_phases, natural_frequencies, coupling_matrix, external_input=None)
    assert bool(jnp.allclose(final_phases, ref_final, atol=1e-3, rtol=1e-3))
    assert bool(jnp.allclose(trajectory, ref_traj, atol=1e-3, rtol=1e-3))

    print("KERNEL_OK")
</pallas_src>

<mosaic_0001>
module attributes {stable_mosaic.version = 11 : i64} {
  func.func @_kuramoto_kernel(%arg0: i32, %arg1: memref<8x512xf32, #tpu.memory_space<vmem>>, %arg2: memref<8x1xf32, #tpu.memory_space<vmem>>, %arg3: memref<8x8xf32, #tpu.memory_space<vmem>>, %arg4: memref<11x8x512xf32, #tpu.memory_space<vmem>>) attributes {dimension_semantics = [#tpu.dimension_semantics<parallel>], iteration_bounds = array<i64: 1>, scalar_prefetch = 0 : i64, scratch_operands = 0 : i64, tpu.core_type = #tpu.core_type<tc>, window_params = [{transform_indices = @transform_0, window_bounds = array<i64: 8, 512>}, {pipeline_mode = #tpu.pipeline_mode<synchronous>, transform_indices = @transform_1, window_bounds = array<i64: 8, 1>}, {pipeline_mode = #tpu.pipeline_mode<synchronous>, transform_indices = @transform_2, window_bounds = array<i64: 8, 8>}, {transform_indices = @transform_3, window_bounds = array<i64: 11, 8, 512>}]} {
    %c0 = arith.constant 0 : index
    %c0_0 = arith.constant 0 : index
    %0 = vector.load %arg1[%c0, %c0_0] : memref<8x512xf32, #tpu.memory_space<vmem>>, vector<8x512xf32>
    %c0_1 = arith.constant 0 : index
    %c0_2 = arith.constant 0 : index
    %1 = vector.load %arg3[%c0_1, %c0_2] : memref<8x8xf32, #tpu.memory_space<vmem>>, vector<8x8xf32>
    %c0_3 = arith.constant 0 : index
    %c0_4 = arith.constant 0 : index
    %2 = vector.load %arg2[%c0_3, %c0_4] : memref<8x1xf32, #tpu.memory_space<vmem>>, vector<8x1xf32>
    %3 = vector.shape_cast %2 : vector<8x1xf32> to vector<8x1xf32>
    %4 = vector.broadcast %3 : vector<8x1xf32> to vector<8x512xf32>
    %c0_5 = arith.constant 0 : index
    %c0_6 = arith.constant 0 : index
    %c0_7 = arith.constant 0 : index
    %5 = vector.load %arg4[%c0_5, %c0_6, %c0_7] : memref<11x8x512xf32, #tpu.memory_space<vmem>>, vector<1x8x512xf32>
    %6 = vector.shape_cast %5 : vector<1x8x512xf32> to vector<8x512xf32>
    %7 = vector.shape_cast %0 : vector<8x512xf32> to vector<1x8x512xf32>
    tpu.vector_store %arg4[%c0_5, %c0_6, %c0_7], %7 {strides = array<i32>} : memref<11x8x512xf32, #tpu.memory_space<vmem>>, vector<1x8x512xf32>,
    %8 = math.cos %0 : vector<8x512xf32>
    %9 = math.sin %0 : vector<8x512xf32>
    %10 = tpu.concatenate %8, %9 in 1 : vector<8x512xf32>, vector<8x512xf32> -> vector<8x1024xf32>
    %cst = arith.constant dense<0.000000e+00> : vector<8x1024xf32>
    %11 = tpu.matmul %1, %10, %cst {dimension_numbers = #tpu.dot_dimension_numbers<[1], [0], [0], [1], [0, 0, 1, 1], [], []>, precision = #tpu.contract_precision<fp32>} : vector<8x8xf32>, vector<8x1024xf32>, vector<8x1024xf32> -> vector<8x1024xf32>
    %12 = vector.extract_strided_slice %11 {offsets = [0, 0], sizes = [8, 512], strides = [1, 1]} : vector<8x1024xf32> to vector<8x512xf32>
    %13 = vector.extract_strided_slice %11 {offsets = [0, 512], sizes = [8, 512], strides = [1, 1]} : vector<8x1024xf32> to vector<8x512xf32>
    %14 = arith.mulf %9, %12 : vector<8x512xf32>
    %15 = arith.mulf %8, %13 : vector<8x512xf32>
    %16 = arith.subf %14, %15 : vector<8x512xf32>
    %cst_8 = arith.constant 1.250000e-01 : f32
    %17 = vector.broadcast %cst_8 : f32 to vector<8x512xf32>
    %18 = arith.mulf %16, %17 : vector<8x512xf32>
    %19 = arith.addf %4, %18 : vector<8x512xf32>
    %cst_9 = arith.constant 0.00999999977 : f32
    %20 = vector.broadcast %cst_9 : f32 to vector<8x512xf32>
    %21 = arith.mulf %20, %19 : vector<8x512xf32>
    %22 = arith.addf %0, %21 : vector<8x512xf32>
    %cst_10 = arith.constant 0.159154937 : f32
    %23 = vector.broadcast %cst_10 : f32 to vector<8x512xf32>
    %24 = arith.mulf %22, %23 : vector<8x512xf32>
    %cst_11 = arith.constant 0.000000e+00 : f32
    %25 = vector.broadcast %cst_11 : f32 to vector<8x512xf32>
    %26 = arith.cmpf olt, %24, %25 : vector<8x512xf32>
    %27 = math.ceil %24 : vector<8x512xf32>
    %28 = math.floor %24 : vector<8x512xf32>
    %29 = arith.select %26, %27, %28 : vector<8x512xi1>, vector<8x512xf32>
    %cst_12 = arith.constant 6.28318548 : f32
    %30 = vector.broadcast %cst_12 : f32 to vector<8x512xf32>
    %31 = arith.mulf %30, %29 : vector<8x512xf32>
    %32 = arith.subf %22, %31 : vector<8x512xf32>
    %c1 = arith.constant 1 : index
    %c0_13 = arith.constant 0 : index
    %c0_14 = arith.constant 0 : index
    %33 = vector.load %arg4[%c1, %c0_13, %c0_14] : memref<11x8x512xf32, #tpu.memory_space<vmem>>, vector<1x8x512xf32>
    %34 = vector.shape_cast %33 : vector<1x8x512xf32> to vector<8x512xf32>
    %35 = vector.shape_cast %32 : vector<8x512xf32> to vector<1x8x512xf32>
    tpu.vector_store %arg4[%c1, %c0_13, %c0_14], %35 {strides = array<i32>} : memref<11x8x512xf32, #tpu.memory_space<vmem>>, vector<1x8x512xf32>,
    %36 = math.cos %32 : vector<8x512xf32>
    %37 = math.sin %32 : vector<8x512xf32>
    %38 = tpu.concatenate %36, %37 in 1 : vector<8x512xf32>, vector<8x512xf32> -> vector<8x1024xf32>
    %cst_15 = arith.constant dense<0.000000e+00> : vector<8x1024xf32>
    %39 = tpu.matmul %1, %38, %cst_15 {dimension_numbers = #tpu.dot_dimension_numbers<[1], [0], [0], [1], [0, 0, 1, 1], [], []>, precision = #tpu.contract_precision<fp32>} : vector<8x8xf32>, vector<8x1024xf32>, vector<8x1024xf32> -> vector<8x1024xf32>
    %40 = vector.extract_strided_slice %39 {offsets = [0, 0], sizes = [8, 512], strides = [1, 1]} : vector<8x1024xf32> to vector<8x512xf32>
    %41 = vector.extract_strided_slice %39 {offsets = [0, 512], sizes = [8, 512], strides = [1, 1]} : vector<8x1024xf32> to vector<8x512xf32>
    %42 = arith.mulf %37, %40 : vector<8x512xf32>
    %43 = arith.mulf %36, %41 : vector<8x512xf32>
    %44 = arith.subf %42, %43 : vector<8x512xf32>
    %cst_16 = arith.constant 1.250000e-01 : f32
    %45 = vector.broadcast %cst_16 : f32 to vector<8x512xf32>
    %46 = arith.mulf %44, %45 : vector<8x512xf32>
    %47 = arith.addf %4, %46 : vector<8x512xf32>
    %cst_17 = arith.constant 0.00999999977 : f32
    %48 = vector.broadcast %cst_17 : f32 to vector<8x512xf32>
    %49 = arith.mulf %48, %47 : vector<8x512xf32>
    %50 = arith.addf %32, %49 : vector<8x512xf32>
    %cst_18 = arith.constant 0.159154937 : f32
    %51 = vector.broadcast %cst_18 : f32 to vector<8x512xf32>
    %52 = arith.mulf %50, %51 : vector<8x512xf32>
    %cst_19 = arith.constant 0.000000e+00 : f32
    %53 = vector.broadcast %cst_19 : f32 to vector<8x512xf32>
    %54 = arith.cmpf olt, %52, %53 : vector<8x512xf32>
    %55 = math.ceil %52 : vector<8x512xf32>
    %56 = math.floor %52 : vector<8x512xf32>
    %57 = arith.select %54, %55, %56 : vector<8x512xi1>, vector<8x512xf32>
    %cst_20 = arith.constant 6.28318548 : f32
    %58 = vector.broadcast %cst_20 : f32 to vector<8x512xf32>
    %59 = arith.mulf %58, %57 : vector<8x512xf32>
    %60 = arith.subf %50, %59 : vector<8x512xf32>
    %c2 = arith.constant 2 : index
    %c0_21 = arith.constant 0 : index
    %c0_22 = arith.constant 0 : index
    %61 = vector.load %arg4[%c2, %c0_21, %c0_22] : memref<11x8x512xf32, #tpu.memory_space<vmem>>, vector<1x8x512xf32>
    %62 = vector.shape_cast %61 : vector<1x8x512xf32> to vector<8x512xf32>
    %63 = vector.shape_cast %60 : vector<8x512xf32> to vector<1x8x512xf32>
    tpu.vector_store %arg4[%c2, %c0_21, %c0_22], %63 {strides = array<i32>} : memref<11x8x512xf32, #tpu.memory_space<vmem>>, vector<1x8x512xf32>,
    %64 = math.cos %60 : vector<8x512xf32>
    %65 = math.sin %60 : vector<8x512xf32>
    %66 = tpu.concatenate %64, %65 in 1 : vector<8x512xf32>, vector<8x512xf32> -> vector<8x1024xf32>
    %cst_23 = arith.constant dense<0.000000e+00> : vector<8x1024xf32>
    %67 = tpu.matmul %1, %66, %cst_23 {dimension_numbers = #tpu.dot_dimension_numbers<[1], [0], [0], [1], [0, 0, 1, 1], [], []>, precision = #tpu.contract_precision<fp32>} : vector<8x8xf32>, vector<8x1024xf32>, vector<8x1024xf32> -> vector<8x1024xf32>
    %68 = vector.extract_strided_slice %67 {offsets = [0, 0], sizes = [8, 512], strides = [1, 1]} : vector<8x1024xf32> to vector<8x512xf32>
    %69 = vector.extract_strided_slice %67 {offsets = [0, 512], sizes = [8, 512], strides = [1, 1]} : vector<8x1024xf32> to vector<8x512xf32>
    %70 = arith.mulf %65, %68 : vector<8x512xf32>
    %71 = arith.mulf %64, %69 : vector<8x512xf32>
    %72 = arith.subf %70, %71 : vector<8x512xf32>
    %cst_24 = arith.constant 1.250000e-01 : f32
    %73 = vector.broadcast %cst_24 : f32 to vector<8x512xf32>
    %74 = arith.mulf %72, %73 : vector<8x512xf32>
    %75 = arith.addf %4, %74 : vector<8x512xf32>
    %cst_25 = arith.constant 0.00999999977 : f32
    %76 = vector.broadcast %cst_25 : f32 to vector<8x512xf32>
    %77 = arith.mulf %76, %75 : vector<8x512xf32>
    %78 = arith.addf %60, %77 : vector<8x512xf32>
    %cst_26 = arith.constant 0.159154937 : f32
    %79 = vector.broadcast %cst_26 : f32 to vector<8x512xf32>
    %80 = arith.mulf %78, %79 : vector<8x512xf32>
    %cst_27 = arith.constant 0.000000e+00 : f32
    %81 = vector.broadcast %cst_27 : f32 to vector<8x512xf32>
    %82 = arith.cmpf olt, %80, %81 : vector<8x512xf32>
    %83 = math.ceil %80 : vector<8x512xf32>
    %84 = math.floor %80 : vector<8x512xf32>
    %85 = arith.select %82, %83, %84 : vector<8x512xi1>, vector<8x512xf32>
    %cst_28 = arith.constant 6.28318548 : f32
    %86 = vector.broadcast %cst_28 : f32 to vector<8x512xf32>
    %87 = arith.mulf %86, %85 : vector<8x512xf32>
    %88 = arith.subf %78, %87 : vector<8x512xf32>
    %c3 = arith.constant 3 : index
    %c0_29 = arith.constant 0 : index
    %c0_30 = arith.constant 0 : index
    %89 = vector.load %arg4[%c3, %c0_29, %c0_30] : memref<11x8x512xf32, #tpu.memory_space<vmem>>, vector<1x8x512xf32>
    %90 = vector.shape_cast %89 : vector<1x8x512xf32> to vector<8x512xf32>
    %91 = vector.shape_cast %88 : vector<8x512xf32> to vector<1x8x512xf32>
    tpu.vector_store %arg4[%c3, %c0_29, %c0_30], %91 {strides = array<i32>} : memref<11x8x512xf32, #tpu.memory_space<vmem>>, vector<1x8x512xf32>,
    %92 = math.cos %88 : vector<8x512xf32>
    %93 = math.sin %88 : vector<8x512xf32>
    %94 = tpu.concatenate %92, %93 in 1 : vector<8x512xf32>, vector<8x512xf32> -> vector<8x1024xf32>
    %cst_31 = arith.constant dense<0.000000e+00> : vector<8x1024xf32>
    %95 = tpu.matmul %1, %94, %cst_31 {dimension_numbers = #tpu.dot_dimension_numbers<[1], [0], [0], [1], [0, 0, 1, 1], [], []>, precision = #tpu.contract_precision<fp32>} : vector<8x8xf32>, vector<8x1024xf32>, vector<8x1024xf32> -> vector<8x1024xf32>
    %96 = vector.extract_strided_slice %95 {offsets = [0, 0], sizes = [8, 512], strides = [1, 1]} : vector<8x1024xf32> to vector<8x512xf32>
    %97 = vector.extract_strided_slice %95 {offsets = [0, 512], sizes = [8, 512], strides = [1, 1]} : vector<8x1024xf32> to vector<8x512xf32>
    %98 = arith.mulf %93, %96 : vector<8x512xf32>
    %99 = arith.mulf %92, %97 : vector<8x512xf32>
    %100 = arith.subf %98, %99 : vector<8x512xf32>
    %cst_32 = arith.constant 1.250000e-01 : f32
    %101 = vector.broadcast %cst_32 : f32 to vector<8x512xf32>
    %102 = arith.mulf %100, %101 : vector<8x512xf32>
    %103 = arith.addf %4, %102 : vector<8x512xf32>
    %cst_33 = arith.constant 0.00999999977 : f32
    %104 = vector.broadcast %cst_33 : f32 to vector<8x512xf32>
    %105 = arith.mulf %104, %103 : vector<8x512xf32>
    %106 = arith.addf %88, %105 : vector<8x512xf32>
    %cst_34 = arith.constant 0.159154937 : f32
    %107 = vector.broadcast %cst_34 : f32 to vector<8x512xf32>
    %108 = arith.mulf %106, %107 : vector<8x512xf32>
    %cst_35 = arith.constant 0.000000e+00 : f32
    %109 = vector.broadcast %cst_35 : f32 to vector<8x512xf32>
    %110 = arith.cmpf olt, %108, %109 : vector<8x512xf32>
    %111 = math.ceil %108 : vector<8x512xf32>
    %112 = math.floor %108 : vector<8x512xf32>
    %113 = arith.select %110, %111, %112 : vector<8x512xi1>, vector<8x512xf32>
    %cst_36 = arith.constant 6.28318548 : f32
    %114 = vector.broadcast %cst_36 : f32 to vector<8x512xf32>
    %115 = arith.mulf %114, %113 : vector<8x512xf32>
    %116 = arith.subf %106, %115 : vector<8x512xf32>
    %c4 = arith.constant 4 : index
    %c0_37 = arith.constant 0 : index
    %c0_38 = arith.constant 0 : index
    %117 = vector.load %arg4[%c4, %c0_37, %c0_38] : memref<11x8x512xf32, #tpu.memory_space<vmem>>, vector<1x8x512xf32>
    %118 = vector.shape_cast %117 : vector<1x8x512xf32> to vector<8x512xf32>
    %119 = vector.shape_cast %116 : vector<8x512xf32> to vector<1x8x512xf32>
    tpu.vector_store %arg4[%c4, %c0_37, %c0_38], %119 {strides = array<i32>} : memref<11x8x512xf32, #tpu.memory_space<vmem>>, vector<1x8x512xf32>,
    %120 = math.cos %116 : vector<8x512xf32>
    %121 = math.sin %116 : vector<8x512xf32>
    %122 = tpu.concatenate %120, %121 in 1 : vector<8x512xf32>, vector<8x512xf32> -> vector<8x1024xf32>
    %cst_39 = arith.constant dense<0.000000e+00> : vector<8x1024xf32>
    %123 = tpu.matmul %1, %122, %cst_39 {dimension_numbers = #tpu.dot_dimension_numbers<[1], [0], [0], [1], [0, 0, 1, 1], [], []>, precision = #tpu.contract_precision<fp32>} : vector<8x8xf32>, vector<8x1024xf32>, vector<8x1024xf32> -> vector<8x1024xf32>
    %124 = vector.extract_strided_slice %123 {offsets = [0, 0], sizes = [8, 512], strides = [1, 1]} : vector<8x1024xf32> to vector<8x512xf32>
    %125 = vector.extract_strided_slice %123 {offsets = [0, 512], sizes = [8, 512], strides = [1, 1]} : vector<8x1024xf32> to vector<8x512xf32>
    %126 = arith.mulf %121, %124 : vector<8x512xf32>
    %127 = arith.mulf %120, %125 : vector<8x512xf32>
    %128 = arith.subf %126, %127 : vector<8x512xf32>
    %cst_40 = arith.constant 1.250000e-01 : f32
    %129 = vector.broadcast %cst_40 : f32 to vector<8x512xf32>
    %130 = arith.mulf %128, %129 : vector<8x512xf32>
    %131 = arith.addf %4, %130 : vector<8x512xf32>
    %cst_41 = arith.constant 0.00999999977 : f32
    %132 = vector.broadcast %cst_41 : f32 to vector<8x512xf32>
    %133 = arith.mulf %132, %131 : vector<8x512xf32>
    %134 = arith.addf %116, %133 : vector<8x512xf32>
    %cst_42 = arith.constant 0.159154937 : f32
    %135 = vector.broadcast %cst_42 : f32 to vector<8x512xf32>
    %136 = arith.mulf %134, %135 : vector<8x512xf32>
    %cst_43 = arith.constant 0.000000e+00 : f32
    %137 = vector.broadcast %cst_43 : f32 to vector<8x512xf32>
    %138 = arith.cmpf olt, %136, %137 : vector<8x512xf32>
    %139 = math.ceil %136 : vector<8x512xf32>
    %140 = math.floor %136 : vector<8x512xf32>
    %141 = arith.select %138, %139, %140 : vector<8x512xi1>, vector<8x512xf32>
    %cst_44 = arith.constant 6.28318548 : f32
    %142 = vector.broadcast %cst_44 : f32 to vector<8x512xf32>
    %143 = arith.mulf %142, %141 : vector<8x512xf32>
    %144 = arith.subf %134, %143 : vector<8x512xf32>
    %c5 = arith.constant 5 : index
    %c0_45 = arith.constant 0 : index
    %c0_46 = arith.constant 0 : index
    %145 = vector.load %arg4[%c5, %c0_45, %c0_46] : memref<11x8x512xf32, #tpu.memory_space<vmem>>, vector<1x8x512xf32>
    %146 = vector.shape_cast %145 : vector<1x8x512xf32> to vector<8x512xf32>
    %147 = vector.shape_cast %144 : vector<8x512xf32> to vector<1x8x512xf32>
    tpu.vector_store %arg4[%c5, %c0_45, %c0_46], %147 {strides = array<i32>} : memref<11x8x512xf32, #tpu.memory_space<vmem>>, vector<1x8x512xf32>,
    %148 = math.cos %144 : vector<8x512xf32>
    %149 = math.sin %144 : vector<8x512xf32>
    %150 = tpu.concatenate %148, %149 in 1 : vector<8x512xf32>, vector<8x512xf32> -> vector<8x1024xf32>
    %cst_47 = arith.constant dense<0.000000e+00> : vector<8x1024xf32>
    %151 = tpu.matmul %1, %150, %cst_47 {dimension_numbers = #tpu.dot_dimension_numbers<[1], [0], [0], [1], [0, 0, 1, 1], [], []>, precision = #tpu.contract_precision<fp32>} : vector<8x8xf32>, vector<8x1024xf32>, vector<8x1024xf32> -> vector<8x1024xf32>
    %152 = vector.extract_strided_slice %151 {offsets = [0, 0], sizes = [8, 512], strides = [1, 1]} : vector<8x1024xf32> to vector<8x512xf32>
    %153 = vector.extract_strided_slice %151 {offsets = [0, 512], sizes = [8, 512], strides = [1, 1]} : vector<8x1024xf32> to vector<8x512xf32>
    %154 = arith.mulf %149, %152 : vector<8x512xf32>
    %155 = arith.mulf %148, %153 : vector<8x512xf32>
    %156 = arith.subf %154, %155 : vector<8x512xf32>
    %cst_48 = arith.constant 1.250000e-01 : f32
    %157 = vector.broadcast %cst_48 : f32 to vector<8x512xf32>
    %158 = arith.mulf %156, %157 : vector<8x512xf32>
    %159 = arith.addf %4, %158 : vector<8x512xf32>
    %cst_49 = arith.constant 0.00999999977 : f32
    %160 = vector.broadcast %cst_49 : f32 to vector<8x512xf32>
    %161 = arith.mulf %160, %159 : vector<8x512xf32>
    %162 = arith.addf %144, %161 : vector<8x512xf32>
    %cst_50 = arith.constant 0.159154937 : f32
    %163 = vector.broadcast %cst_50 : f32 to vector<8x512xf32>
    %164 = arith.mulf %162, %163 : vector<8x512xf32>
    %cst_51 = arith.constant 0.000000e+00 : f32
    %165 = vector.broadcast %cst_51 : f32 to vector<8x512xf32>
    %166 = arith.cmpf olt, %164, %165 : vector<8x512xf32>
    %167 = math.ceil %164 : vector<8x512xf32>
    %168 = math.floor %164 : vector<8x512xf32>
    %169 = arith.select %166, %167, %168 : vector<8x512xi1>, vector<8x512xf32>
    %cst_52 = arith.constant 6.28318548 : f32
    %170 = vector.broadcast %cst_52 : f32 to vector<8x512xf32>
    %171 = arith.mulf %170, %169 : vector<8x512xf32>
    %172 = arith.subf %162, %171 : vector<8x512xf32>
    %c6 = arith.constant 6 : index
    %c0_53 = arith.constant 0 : index
    %c0_54 = arith.constant 0 : index
    %173 = vector.load %arg4[%c6, %c0_53, %c0_54] : memref<11x8x512xf32, #tpu.memory_space<vmem>>, vector<1x8x512xf32>
    %174 = vector.shape_cast %173 : vector<1x8x512xf32> to vector<8x512xf32>
    %175 = vector.shape_cast %172 : vector<8x512xf32> to vector<1x8x512xf32>
    tpu.vector_store %arg4[%c6, %c0_53, %c0_54], %175 {strides = array<i32>} : memref<11x8x512xf32, #tpu.memory_space<vmem>>, vector<1x8x512xf32>,
    %176 = math.cos %172 : vector<8x512xf32>
    %177 = math.sin %172 : vector<8x512xf32>
    %178 = tpu.concatenate %176, %177 in 1 : vector<8x512xf32>, vector<8x512xf32> -> vector<8x1024xf32>
    %cst_55 = arith.constant dense<0.000000e+00> : vector<8x1024xf32>
    %179 = tpu.matmul %1, %178, %cst_55 {dimension_numbers = #tpu.dot_dimension_numbers<[1], [0], [0], [1], [0, 0, 1, 1], [], []>, precision = #tpu.contract_precision<fp32>} : vector<8x8xf32>, vector<8x1024xf32>, vector<8x1024xf32> -> vector<8x1024xf32>
    %180 = vector.extract_strided_slice %179 {offsets = [0, 0], sizes = [8, 512], strides = [1, 1]} : vector<8x1024xf32> to vector<8x512xf32>
    %181 = vector.extract_strided_slice %179 {offsets = [0, 512], sizes = [8, 512], strides = [1, 1]} : vector<8x1024xf32> to vector<8x512xf32>
    %182 = arith.mulf %177, %180 : vector<8x512xf32>
    %183 = arith.mulf %176, %181 : vector<8x512xf32>
    %184 = arith.subf %182, %183 : vector<8x512xf32>
    %cst_56 = arith.constant 1.250000e-01 : f32
    %185 = vector.broadcast %cst_56 : f32 to vector<8x512xf32>
    %186 = arith.mulf %184, %185 : vector<8x512xf32>
    %187 = arith.addf %4, %186 : vector<8x512xf32>
    %cst_57 = arith.constant 0.00999999977 : f32
    %188 = vector.broadcast %cst_57 : f32 to vector<8x512xf32>
    %189 = arith.mulf %188, %187 : vector<8x512xf32>
    %190 = arith.addf %172, %189 : vector<8x512xf32>
    %cst_58 = arith.constant 0.159154937 : f32
    %191 = vector.broadcast %cst_58 : f32 to vector<8x512xf32>
    %192 = arith.mulf %190, %191 : vector<8x512xf32>
    %cst_59 = arith.constant 0.000000e+00 : f32
    %193 = vector.broadcast %cst_59 : f32 to vector<8x512xf32>
    %194 = arith.cmpf olt, %192, %193 : vector<8x512xf32>
    %195 = math.ceil %192 : vector<8x512xf32>
    %196 = math.floor %192 : vector<8x512xf32>
    %197 = arith.select %194, %195, %196 : vector<8x512xi1>, vector<8x512xf32>
    %cst_60 = arith.constant 6.28318548 : f32
    %198 = vector.broadcast %cst_60 : f32 to vector<8x512xf32>
    %199 = arith.mulf %198, %197 : vector<8x512xf32>
    %200 = arith.subf %190, %199 : vector<8x512xf32>
    %c7 = arith.constant 7 : index
    %c0_61 = arith.constant 0 : index
    %c0_62 = arith.constant 0 : index
    %201 = vector.load %arg4[%c7, %c0_61, %c0_62] : memref<11x8x512xf32, #tpu.memory_space<vmem>>, vector<1x8x512xf32>
    %202 = vector.shape_cast %201 : vector<1x8x512xf32> to vector<8x512xf32>
    %203 = vector.shape_cast %200 : vector<8x512xf32> to vector<1x8x512xf32>
    tpu.vector_store %arg4[%c7, %c0_61, %c0_62], %203 {strides = array<i32>} : memref<11x8x512xf32, #tpu.memory_space<vmem>>, vector<1x8x512xf32>,
    %204 = math.cos %200 : vector<8x512xf32>
    %205 = math.sin %200 : vector<8x512xf32>
    %206 = tpu.concatenate %204, %205 in 1 : vector<8x512xf32>, vector<8x512xf32> -> vector<8x1024xf32>
    %cst_63 = arith.constant dense<0.000000e+00> : vector<8x1024xf32>
    %207 = tpu.matmul %1, %206, %cst_63 {dimension_numbers = #tpu.dot_dimension_numbers<[1], [0], [0], [1], [0, 0, 1, 1], [], []>, precision = #tpu.contract_precision<fp32>} : vector<8x8xf32>, vector<8x1024xf32>, vector<8x1024xf32> -> vector<8x1024xf32>
    %208 = vector.extract_strided_slice %207 {offsets = [0, 0], sizes = [8, 512], strides = [1, 1]} : vector<8x1024xf32> to vector<8x512xf32>
    %209 = vector.extract_strided_slice %207 {offsets = [0, 512], sizes = [8, 512], strides = [1, 1]} : vector<8x1024xf32> to vector<8x512xf32>
    %210 = arith.mulf %205, %208 : vector<8x512xf32>
    %211 = arith.mulf %204, %209 : vector<8x512xf32>
    %212 = arith.subf %210, %211 : vector<8x512xf32>
    %cst_64 = arith.constant 1.250000e-01 : f32
    %213 = vector.broadcast %cst_64 : f32 to vector<8x512xf32>
    %214 = arith.mulf %212, %213 : vector<8x512xf32>
    %215 = arith.addf %4, %214 : vector<8x512xf32>
    %cst_65 = arith.constant 0.00999999977 : f32
    %216 = vector.broadcast %cst_65 : f32 to vector<8x512xf32>
    %217 = arith.mulf %216, %215 : vector<8x512xf32>
    %218 = arith.addf %200, %217 : vector<8x512xf32>
    %cst_66 = arith.constant 0.159154937 : f32
    %219 = vector.broadcast %cst_66 : f32 to vector<8x512xf32>
    %220 = arith.mulf %218, %219 : vector<8x512xf32>
    %cst_67 = arith.constant 0.000000e+00 : f32
    %221 = vector.broadcast %cst_67 : f32 to vector<8x512xf32>
    %222 = arith.cmpf olt, %220, %221 : vector<8x512xf32>
    %223 = math.ceil %220 : vector<8x512xf32>
    %224 = math.floor %220 : vector<8x512xf32>
    %225 = arith.select %222, %223, %224 : vector<8x512xi1>, vector<8x512xf32>
    %cst_68 = arith.constant 6.28318548 : f32
    %226 = vector.broadcast %cst_68 : f32 to vector<8x512xf32>
    %227 = arith.mulf %226, %225 : vector<8x512xf32>
    %228 = arith.subf %218, %227 : vector<8x512xf32>
    %c8 = arith.constant 8 : index
    %c0_69 = arith.constant 0 : index
    %c0_70 = arith.constant 0 : index
    %229 = vector.load %arg4[%c8, %c0_69, %c0_70] : memref<11x8x512xf32, #tpu.memory_space<vmem>>, vector<1x8x512xf32>
    %230 = vector.shape_cast %229 : vector<1x8x512xf32> to vector<8x512xf32>
    %231 = vector.shape_cast %228 : vector<8x512xf32> to vector<1x8x512xf32>
    tpu.vector_store %arg4[%c8, %c0_69, %c0_70], %231 {strides = array<i32>} : memref<11x8x512xf32, #tpu.memory_space<vmem>>, vector<1x8x512xf32>,
    %232 = math.cos %228 : vector<8x512xf32>
    %233 = math.sin %228 : vector<8x512xf32>
    %234 = tpu.concatenate %232, %233 in 1 : vector<8x512xf32>, vector<8x512xf32> -> vector<8x1024xf32>
    %cst_71 = arith.constant dense<0.000000e+00> : vector<8x1024xf32>
    %235 = tpu.matmul %1, %234, %cst_71 {dimension_numbers = #tpu.dot_dimension_numbers<[1], [0], [0], [1], [0, 0, 1, 1], [], []>, precision = #tpu.contract_precision<fp32>} : vector<8x8xf32>, vector<8x1024xf32>, vector<8x1024xf32> -> vector<8x1024xf32>
    %236 = vector.extract_strided_slice %235 {offsets = [0, 0], sizes = [8, 512], strides = [1, 1]} : vector<8x1024xf32> to vector<8x512xf32>
    %237 = vector.extract_strided_slice %235 {offsets = [0, 512], sizes = [8, 512], strides = [1, 1]} : vector<8x1024xf32> to vector<8x512xf32>
    %238 = arith.mulf %233, %236 : vector<8x512xf32>
    %239 = arith.mulf %232, %237 : vector<8x512xf32>
    %240 = arith.subf %238, %239 : vector<8x512xf32>
    %cst_72 = arith.constant 1.250000e-01 : f32
    %241 = vector.broadcast %cst_72 : f32 to vector<8x512xf32>
    %242 = arith.mulf %240, %241 : vector<8x512xf32>
    %243 = arith.addf %4, %242 : vector<8x512xf32>
    %cst_73 = arith.constant 0.00999999977 : f32
    %244 = vector.broadcast %cst_73 : f32 to vector<8x512xf32>
    %245 = arith.mulf %244, %243 : vector<8x512xf32>
    %246 = arith.addf %228, %245 : vector<8x512xf32>
    %cst_74 = arith.constant 0.159154937 : f32
    %247 = vector.broadcast %cst_74 : f32 to vector<8x512xf32>
    %248 = arith.mulf %246, %247 : vector<8x512xf32>
    %cst_75 = arith.constant 0.000000e+00 : f32
    %249 = vector.broadcast %cst_75 : f32 to vector<8x512xf32>
    %250 = arith.cmpf olt, %248, %249 : vector<8x512xf32>
    %251 = math.ceil %248 : vector<8x512xf32>
    %252 = math.floor %248 : vector<8x512xf32>
    %253 = arith.select %250, %251, %252 : vector<8x512xi1>, vector<8x512xf32>
    %cst_76 = arith.constant 6.28318548 : f32
    %254 = vector.broadcast %cst_76 : f32 to vector<8x512xf32>
    %255 = arith.mulf %254, %253 : vector<8x512xf32>
    %256 = arith.subf %246, %255 : vector<8x512xf32>
    %c9 = arith.constant 9 : index
    %c0_77 = arith.constant 0 : index
    %c0_78 = arith.constant 0 : index
    %257 = vector.load %arg4[%c9, %c0_77, %c0_78] : memref<11x8x512xf32, #tpu.memory_space<vmem>>, vector<1x8x512xf32>
    %258 = vector.shape_cast %257 : vector<1x8x512xf32> to vector<8x512xf32>
    %259 = vector.shape_cast %256 : vector<8x512xf32> to vector<1x8x512xf32>
    tpu.vector_store %arg4[%c9, %c0_77, %c0_78], %259 {strides = array<i32>} : memref<11x8x512xf32, #tpu.memory_space<vmem>>, vector<1x8x512xf32>,
    %260 = math.cos %256 : vector<8x512xf32>
    %261 = math.sin %256 : vector<8x512xf32>
    %262 = tpu.concatenate %260, %261 in 1 : vector<8x512xf32>, vector<8x512xf32> -> vector<8x1024xf32>
    %cst_79 = arith.constant dense<0.000000e+00> : vector<8x1024xf32>
    %263 = tpu.matmul %1, %262, %cst_79 {dimension_numbers = #tpu.dot_dimension_numbers<[1], [0], [0], [1], [0, 0, 1, 1], [], []>, precision = #tpu.contract_precision<fp32>} : vector<8x8xf32>, vector<8x1024xf32>, vector<8x1024xf32> -> vector<8x1024xf32>
    %264 = vector.extract_strided_slice %263 {offsets = [0, 0], sizes = [8, 512], strides = [1, 1]} : vector<8x1024xf32> to vector<8x512xf32>
    %265 = vector.extract_strided_slice %263 {offsets = [0, 512], sizes = [8, 512], strides = [1, 1]} : vector<8x1024xf32> to vector<8x512xf32>
    %266 = arith.mulf %261, %264 : vector<8x512xf32>
    %267 = arith.mulf %260, %265 : vector<8x512xf32>
    %268 = arith.subf %266, %267 : vector<8x512xf32>
    %cst_80 = arith.constant 1.250000e-01 : f32
    %269 = vector.broadcast %cst_80 : f32 to vector<8x512xf32>
    %270 = arith.mulf %268, %269 : vector<8x512xf32>
    %271 = arith.addf %4, %270 : vector<8x512xf32>
    %cst_81 = arith.constant 0.00999999977 : f32
    %272 = vector.broadcast %cst_81 : f32 to vector<8x512xf32>
    %273 = arith.mulf %272, %271 : vector<8x512xf32>
    %274 = arith.addf %256, %273 : vector<8x512xf32>
    %cst_82 = arith.constant 0.159154937 : f32
    %275 = vector.broadcast %cst_82 : f32 to vector<8x512xf32>
    %276 = arith.mulf %274, %275 : vector<8x512xf32>
    %cst_83 = arith.constant 0.000000e+00 : f32
    %277 = vector.broadcast %cst_83 : f32 to vector<8x512xf32>
    %278 = arith.cmpf olt, %276, %277 : vector<8x512xf32>
    %279 = math.ceil %276 : vector<8x512xf32>
    %280 = math.floor %276 : vector<8x512xf32>
    %281 = arith.select %278, %279, %280 : vector<8x512xi1>, vector<8x512xf32>
    %cst_84 = arith.constant 6.28318548 : f32
    %282 = vector.broadcast %cst_84 : f32 to vector<8x512xf32>
    %283 = arith.mulf %282, %281 : vector<8x512xf32>
    %284 = arith.subf %274, %283 : vector<8x512xf32>
    %c10 = arith.constant 10 : index
    %c0_85 = arith.constant 0 : index
    %c0_86 = arith.constant 0 : index
    %285 = vector.load %arg4[%c10, %c0_85, %c0_86] : memref<11x8x512xf32, #tpu.memory_space<vmem>>, vector<1x8x512xf32>
    %286 = vector.shape_cast %285 : vector<1x8x512xf32> to vector<8x512xf32>
    %287 = vector.shape_cast %284 : vector<8x512xf32> to vector<1x8x512xf32>
    tpu.vector_store %arg4[%c10, %c0_85, %c0_86], %287 {strides = array<i32>} : memref<11x8x512xf32, #tpu.memory_space<vmem>>, vector<1x8x512xf32>,
    return
  }
  func.func @transform_0(%arg0: i32) -> (i32, i32) {
    %c0_i32 = arith.constant 0 : i32
    %c0_i32_0 = arith.constant 0 : i32
    return %c0_i32, %arg0 : i32, i32
  }
  func.func @transform_1(%arg0: i32) -> (i32, i32) {
    %c0_i32 = arith.constant 0 : i32
    %c0_i32_0 = arith.constant 0 : i32
    %c0_i32_1 = arith.constant 0 : i32
    return %c0_i32, %c0_i32_0 : i32, i32
  }
  func.func @transform_2(%arg0: i32) -> (i32, i32) {
    %c0_i32 = arith.constant 0 : i32
    %c0_i32_0 = arith.constant 0 : i32
    %c0_i32_1 = arith.constant 0 : i32
    return %c0_i32, %c0_i32_0 : i32, i32
  }
  func.func @transform_3(%arg0: i32) -> (i32, i32, i32) {
    %c0_i32 = arith.constant 0 : i32
    %c0_i32_0 = arith.constant 0 : i32
    %c0_i32_1 = arith.constant 0 : i32
    return %c0_i32, %c0_i32_0, %arg0 : i32, i32, i32
  }
}

</mosaic_0001>

<bundles_post_ra>
// kernel: tpu_custom_call.1
= control target key start
LH: loop header
LB: loop body
LE: loop exit
PB: predicated region body
PF: predicated region fallthrough
CT: control target
= control target key end

     0   :  { %8 = vsyncpa [#allocation3], 0  ;;  %s34165_s0 = inlined_call_operand.hbm [shape: f32[8,512], index: 0, kind: input, shape index: {}]   ;;  %s34166_s1 = inlined_call_operand.vmem [shape: f32[8,1], index: 1, kind: input, shape index: {}]   ;;  %s34167_s2 = inlined_call_operand.vmem [shape: f32[8,8], index: 2, kind: input, shape index: {}]   ;;  %s34168_s3 = inlined_call_operand.hbm [shape: f32[11,8,512], index: 3, kind: output, shape index: {}]  }
   0x1   :  { %9 = vsyncpa [#allocation4], 0  ;;  %s28694_s12 = smov [#allocation2]   ;;  %s28646_s16 = scalar_lea.hbm %s34165_s0, 512 }
   0x2   :  { %s16_s13 = sshll.u32 %s28694_s12, 4  ;;  %p28647_p0 = scmp.ne.s32.totalorder %s34165_s0, %s28646_s16  ;;  %s17_s13 = int_to_ptr.vmem [resolvable:$true] %s16_s13 }
   0x3   :  { %p28650_p1 = scmp.lt.u32.totalorder %s28646_s16, %s34165_s0 }
   0x5   :  { %p28652_p2 = pnand %p28650_p1, %p28647_p0 }
   0x7   :  { %28655 = shalt.err (!%p28652_p2)
}
   0x8   :  { %s28656_s21 = scalar_lea.vmem %s17_s13, 512  ;;  %p28661_p4 = scmp.lt.s32.totalorder %s17_s13, %s17_s13 }
   0x9   :  { %p28657_p3 = scmp.ne.s32.totalorder %s17_s13, %s28656_s21  ;;  %p28662_p5 = scmp.lt.s32.totalorder %s28656_s21, %s28656_s21 }
   0xb   :  { %p28663_p6 = por %p28662_p5, %p28661_p4 }
   0xd   :  { %p28664_p7 = pnand %p28663_p6, %p28657_p3 }
   0xf   :  { %28667 = shalt.err (!%p28664_p7)
}
  0x10   :  { %19 = dma.hbm_to_vmem [thread:$0]  %s34165_s0, 512, %s17_s13, [#allocation3]  }
  0x11   :  { %28690 = dma.done.wait [#allocation3], 512  }
  0x12   :  { %28691 = vsyncadd [#allocation3], 4294966784  ;;  %v28695_v0 = vmov 0.0   ;;  %v28740_v1 = vld [vmem:[#allocation2 + $0x8] sm:$0xff]  ;;  %v28742_v2 = vld [vmem:[#allocation2 + $0x18] sm:$0xff] }
  0x13   :  { %940 = vmatprep.mubr.f32.mxu0 %v28695_v0  ;;  %1405 = vmatprep.mubr.f32.mxu1 %v28695_v0  ;;  %v28744_v3 = vld [vmem:[#allocation2] sm:$0xff]  ;;  %39 = vst [vmem:[#allocation5 + $0x8] sm:$0xff] %v28740_v1  ;;  %v145_v4 = vand.u32 2147483647, %v28740_v1  ;;  %v148_v5 = vand.u32 2139095040, %v28740_v1  ;;  %41 = vst [vmem:[#allocation5 + $0x18] sm:$0xff] %v28742_v2 }
  0x14   :  { %38 = vst [vmem:[#allocation5] sm:$0xff] %v28744_v3  ;;  %v28751_v6 = vld [vmem:[#allocation2 + $0x10] sm:$0xff]  ;;  %v351_v7 = vand.u32 2147483647, %v28742_v2  ;;  %v354_v8 = vand.u32 2139095040, %v28742_v2  ;;  %v45_v13 = vand.u32 2139095040, %v28744_v3 }
  0x15   :  { %40 = vst [vmem:[#allocation5 + $0x10] sm:$0xff] %v28751_v6  ;;  %v149_v9 = vshrl.u32 %v148_v5, 23  ;;  %v152_v10 = vand.u32 8388607, %v145_v4  ;;  %v42_v26 = vand.u32 2147483647, %v28744_v3 }
  0x16   :  { %v355_v11 = vshrl.u32 %v354_v8, 23  ;;  %v358_v12 = vand.u32 8388607, %v351_v7  ;;  %v46_v16 = vshrl.u32 %v45_v13, 23  ;;  %v28696_v32 = vmov 683565275  }
  0x17   :  { %v27557_v14 = vadd.s32 4294967169, %v149_v9  ;;  %v153_v18 = vor.u32 8388608, %v152_v10  ;;  %v28697_v34 = vmov 2475754826   ;;  %v28698_v36 = vmov 2131351028  }
  0x18   :  { %v27565_v15 = vadd.s32 4294967169, %v355_v11  ;;  %v359_v19 = vor.u32 8388608, %v358_v12  ;;  %v27553_v21 = vadd.s32 4294967169, %v46_v16  ;;  %v28699_v38 = vmov 2102212464  }
  0x19   :  { %v155_v17 = vadd.s32 1, %v27557_v14  ;;  %v28762_v27 = vshll.u32 %v153_v18, 8  ;;  %v28700_v40 = vmov 920167782   ;;  %v28701_v48 = vmov 1326507024  }
  0x1a   :  { %v361_v20 = vadd.s32 1, %v27565_v15  ;;  %v28764_v29 = vshll.u32 %v359_v19, 8  ;;  %v28766_v30 = vadd.s32 1, %v27553_v21  ;;  %vm147_vm13 = vcmp.lt.s32.totalorder %v28740_v1, 0 }
  0x1b   :  { %vm156_vm0 = vcmp.gt.s32.totalorder %v155_v17, 0 }
  0x1c   :  { %v157_v22 = vsel %vm156_vm0, %v155_v17, 0  ;;  %vm362_vm1 = vcmp.gt.s32.totalorder %v361_v20, 0  ;;  %vm53_vm6 = vcmp.gt.s32.totalorder %v28766_v30, 0 }
  0x1d   :  { %v158_v23 = vshrl.u32 %v157_v22, 5  ;;  %v159_v24 = vand.u32 31, %v157_v22  ;;  %v363_v25 = vsel %vm362_vm1, %v361_v20, 0 }
  0x1e   :  { %v365_v28 = vand.u32 31, %v363_v25  ;;  %v28773_v42 = vshrl.u32 %v363_v25, 5 }
  0x1f   :  { %v160_v31 = vsub.s32 32, %v159_v24  ;;  %v162_v33 = vshll.u32 %v28696_v32, %v159_v24  ;;  %v165_v35 = vshll.u32 %v28697_v34, %v159_v24  ;;  %v168_v37 = vshll.u32 %v28698_v36, %v159_v24 }
  0x20   :  { %v171_v39 = vshll.u32 %v28699_v38, %v159_v24  ;;  %v174_v41 = vshll.u32 %v28700_v40, %v159_v24  ;;  %vm177_vm2 = vcmp.lt.s32.totalorder %v158_v23, 1  ;;  %vm178_vm3 = vcmp.lt.s32.totalorder %v158_v23, 2 }
  0x21   :  { %v161_v43 = vshrl.u32 %v28696_v32, %v160_v31  ;;  %v163_v44 = vshrl.u32 %v28697_v34, %v160_v31  ;;  %v166_v45 = vshrl.u32 %v28698_v36, %v160_v31  ;;  %v169_v46 = vshrl.u32 %v28699_v38, %v160_v31 }
  0x22   :  { %v172_v47 = vshrl.u32 %v28700_v40, %v160_v31  ;;  %v175_v49 = vshrl.u32 %v28701_v48, %v160_v31  ;;  %vm180_vm4 = vcmp.lt.s32.totalorder %v158_v23, 4  ;;  %v366_v53 = vsub.s32 32, %v365_v28 }
  0x23   :  { %v164_v50 = vor.u32 %v163_v44, %v162_v33  ;;  %v167_v51 = vor.u32 %v166_v45, %v165_v35  ;;  %v170_v52 = vor.u32 %v169_v46, %v168_v37  ;;  %vm179_vm5 = vcmp.lt.s32.totalorder %v158_v23, 3 }
  0x24   :  { %v173_v54 = vor.u32 %v172_v47, %v171_v39  ;;  %v176_v55 = vor.u32 %v175_v49, %v174_v41  ;;  %v368_v56 = vshll.u32 %v28696_v32, %v365_v28  ;;  %v371_v5 = vshll.u32 %v28697_v34, %v365_v28 }
  0x25   :  { %v181_v57 = vsel %vm177_vm2, %v161_v43, %v164_v50  ;;  %v182_v58 = vsel %vm180_vm4, %v170_v52, 2102212464  ;;  %v185_v59 = vsel %vm177_vm2, %v164_v50, %v167_v51  ;;  %v189_v60 = vsel %vm177_vm2, %v167_v51, %v170_v52 }
  0x26   :  { %v183_v61 = vsel %vm179_vm5, %v167_v51, %v182_v58  ;;  %v186_v62 = vsel %vm180_vm4, %v173_v54, 920167782  ;;  %v190_v63 = vsel %vm180_vm4, %v176_v55, 1326507024  ;;  %v367_v10 = vshrl.u32 %v28696_v32, %v366_v53 }
  0x27   :  { %v187_v8 = vsel %vm179_vm5, %v170_v52, %v186_v62  ;;  %v191_v9 = vsel %vm179_vm5, %v173_v54, %v190_v63  ;;  %v369_v11 = vshrl.u32 %v28697_v34, %v366_v53  ;;  %v184_v12 = vsel %vm178_vm3, %v181_v57, %v183_v61 }
  0x28   :  { %v188_v13 = vsel %vm178_vm3, %v185_v59, %v187_v8  ;;  %v192_v14 = vsel %vm178_vm3, %v189_v60, %v191_v9  ;;  %v372_v15 = vshrl.u32 %v28698_v36, %v366_v53  ;;  %v374_v22 = vshll.u32 %v28698_v36, %v365_v28 }
  0x29   :  { %v28794_v16 = vmul.u32.u64.low %v28762_v27, %v192_v14  ;;  %v28795_v17 = vmul.u32.u64.high %v28762_v27, %v192_v14, %v28794_v16  ;;  %v28798_v18 = vmul.u32.u64.low %v28762_v27, %v188_v13  ;;  %v28799_v19 = vmul.u32.u64.high %v28762_v27, %v188_v13, %v28798_v18 }
  0x2a   :  { %v370_v20 = vor.u32 %v369_v11, %v368_v56  ;;  %v373_v21 = vor.u32 %v372_v15, %v371_v5  ;;  %v375_v24 = vshrl.u32 %v28699_v38, %v366_v53  ;;  %v377_v23 = vshll.u32 %v28699_v38, %v365_v28 }
  0x2b   :  { %v378_v25 = vshrl.u32 %v28700_v40, %v366_v53  ;;  %v380_v31 = vshll.u32 %v28700_v40, %v365_v28  ;;  %v381_v33 = vshrl.u32 %v28701_v48, %v366_v53  ;;  %v200_v35 = vmul.u32 %v28762_v27, %v184_v12 }
  0x2c   :  { %v376_v37 = vor.u32 %v375_v24, %v374_v22  ;;  %vm383_vm7 = vcmp.lt.s32.totalorder %v28773_v42, 1  ;;  %vm384_vm8 = vcmp.lt.s32.totalorder %v28773_v42, 2  ;;  %vm202_vm9 = vc.u32 %v28795_v17, %v28798_v18 }
  0x2d   :  { %v203_v39 = vadd.s32 1, %v28799_v19  ;;  %v379_v41 = vor.u32 %v378_v25, %v377_v23  ;;  %vm385_vm10 = vcmp.lt.s32.totalorder %v28773_v42, 3  ;;  %v382_v43 = vor.u32 %v381_v33, %v380_v31 }
  0x2e   :  { %vm386_vm11 = vcmp.lt.s32.totalorder %v28773_v42, 4  ;;  %v387_v28 = vsel %vm383_vm7, %v367_v10, %v370_v20  ;;  %v391_v44 = vsel %vm383_vm7, %v370_v20, %v373_v21  ;;  %v395_v47 = vsel %vm383_vm7, %v373_v21, %v376_v37 }
  0x2f   :  { %v204_v27 = vsel %vm202_vm9, %v203_v39, %v28799_v19  ;;  %v388_v45 = vsel %vm386_vm11, %v376_v37, 2102212464  ;;  %v392_v46 = vsel %vm386_vm11, %v379_v41, 920167782  ;;  %v396_v52 = vsel %vm386_vm11, %v382_v43, 1326507024 }
  0x30   :  { %v205_v49 = vadd.s32 %v204_v27, %v200_v35  ;;  %v389_v50 = vsel %vm385_vm10, %v373_v21, %v388_v45  ;;  %v393_v51 = vsel %vm385_vm10, %v376_v37, %v392_v46  ;;  %v397_v55 = vsel %vm385_vm10, %v379_v41, %v396_v52 }
  0x31   :  { %v390_v53 = vsel %vm384_vm8, %v387_v28, %v389_v50  ;;  %v394_v54 = vsel %vm384_vm8, %v391_v44, %v393_v51  ;;  %v54_v56 = vsel %vm53_vm6, %v28766_v30, 0  ;;  %v398_v58 = vsel %vm384_vm8, %v395_v47, %v397_v55 }
  0x32   :  { %v206_v57 = vadd.s32 536870912, %v205_v49  ;;  %v28827_v59 = vmul.u32.u64.low %v28764_v29, %v394_v54  ;;  %v28828_v60 = vmul.u32.u64.high %v28764_v29, %v394_v54, %v28827_v59  ;;  %v49_v63 = vand.u32 8388607, %v42_v26 }
  0x33   :  { %v28832_v61 = vmul.u32.u64.low %v28764_v29, %v398_v58  ;;  %v28833_v62 = vmul.u32.u64.high %v28764_v29, %v398_v58, %v28832_v61  ;;  %v56_v8 = vand.u32 31, %v54_v56  ;;  %v251_v30 = vand.u32 2139095040, %v28751_v6 }
  0x34   :  { %v28837_v5 = vshrl.u32 %v206_v57, 30  ;;  %v406_v42 = vmul.u32 %v28764_v29, %v390_v53  ;;  %v409_v10 = vadd.s32 1, %v28828_v60  ;;  %v50_v12 = vor.u32 8388608, %v49_v63 }
  0x35   :  { %v57_v11 = vsub.s32 32, %v56_v8  ;;  %vm408_vm12 = vc.u32 %v28833_v62, %v28827_v59  ;;  %v55_v15 = vshrl.u32 %v54_v56, 5  ;;  %v252_v16 = vshrl.u32 %v251_v30, 23 }
  0x36   :  { %v208_v9 = vshll.u32 %v28837_v5, 30  ;;  %v410_v14 = vsel %vm408_vm12, %v409_v10, %v28828_v60  ;;  %v59_v20 = vshll.u32 %v28696_v32, %v56_v8  ;;  %v62_v21 = vshll.u32 %v28697_v34, %v56_v8 }
  0x37   :  { %v411_v19 = vadd.s32 %v410_v14, %v406_v42  ;;  %v60_v29 = vshrl.u32 %v28697_v34, %v57_v11  ;;  %v63_v24 = vshrl.u32 %v28698_v36, %v57_v11  ;;  %v65_v23 = vshll.u32 %v28698_v36, %v56_v8 }
  0x38   :  { %v28845_v13 = vsub.s32 %v205_v49, %v208_v9  ;;  %v66_v25 = vshrl.u32 %v28699_v38, %v57_v11  ;;  %v201_v31 = vadd.s32 %v28798_v18, %v28795_v17  ;;  %v68_v35 = vshll.u32 %v28699_v38, %v56_v8 }
  0x39   :  { %v412_v33 = vadd.s32 536870912, %v411_v19  ;;  %v28858_v37 = vshll.u32 %v50_v12, 8  ;;  %v58_v41 = vshrl.u32 %v28696_v32, %v57_v11  ;;  %vm77_vm14 = vcmp.lt.s32.totalorder %v55_v15, 4 }
  0x3a   :  { %v211_v22 = vsub.s32 0, %v28845_v13  ;;  %v27561_v43 = vadd.s32 4294967169, %v252_v16  ;;  %v61_v44 = vor.u32 %v60_v29, %v59_v20  ;;  %v69_v27 = vshrl.u32 %v28700_v40, %v57_v11 }
  0x3b   :  { %v28863_v28 = vshrl.u32 %v412_v33, 30  ;;  %v71_v17 = vshll.u32 %v28700_v40, %v56_v8  ;;  %v64_v45 = vor.u32 %v63_v24, %v62_v21  ;;  %v67_v46 = vor.u32 %v66_v25, %v65_v23 }
  0x3c   :  { %v27558_v39 = vmin.u32 %v211_v22, %v28845_v13  ;;  %v72_v47 = vshrl.u32 %v28701_v48, %v57_v11  ;;  %v70_v50 = vor.u32 %v69_v27, %v68_v35  ;;  %vm74_vm15 = vcmp.lt.s32.totalorder %v55_v15, 1 }
  0x3d   :  { %v414_v49 = vshll.u32 %v28863_v28, 30  ;;  %vm76_vm0 = vcmp.lt.s32.totalorder %v55_v15, 3  ;;  %vm75_vm1 = vcmp.lt.s32.totalorder %v55_v15, 2  ;;  %v79_v53 = vsel %vm77_vm14, %v67_v46, 2102212464 }
  0x3e   :  { %v213_v18 = vclz %v27558_v39  ;;  %v73_v52 = vor.u32 %v72_v47, %v71_v17  ;;  %vm28872_vm2 = vcmp.le.f32.partialorder %v145_v4, 0.7853982  ;;  %v231_v55 = vsub.s32 4, %v28837_v5 }
  0x3f   :  { %v28877_v56 = vsub.s32 %v411_v19, %v414_v49  ;;  %v78_v57 = vsel %vm74_vm15, %v58_v41, %v61_v44  ;;  %v83_v58 = vsel %vm77_vm14, %v70_v50, 920167782  ;;  %v82_v60 = vsel %vm74_vm15, %v61_v44, %v64_v45 }
  0x40   :  { %v27559_v51 = vadd.s32 4294967294, %v213_v18  ;;  %v84_v61 = vsel %vm76_vm0, %v67_v46, %v83_v58  ;;  %v87_v63 = vsel %vm77_vm14, %v73_v52, 1326507024  ;;  %v80_v30 = vsel %vm76_vm0, %v64_v45, %v79_v53 }
  0x41   :  { %v417_v4 = vsub.s32 0, %v28877_v56  ;;  %v86_v42 = vsel %vm74_vm15, %v64_v45, %v67_v46  ;;  %v88_v12 = vsel %vm76_vm0, %v70_v50, %v87_v63  ;;  %v232_v14 = vsel %vm147_vm13, %v231_v55, %v28837_v5 }
  0x42   :  { %vm27560_vm3 = vcmp.lt.s32.totalorder %v27559_v51, 0  ;;  %v85_v19 = vsel %vm75_vm1, %v82_v60, %v84_v61  ;;  %v248_v20 = vand.u32 2147483647, %v28751_v6  ;;  %vm353_vm4 = vcmp.lt.s32.totalorder %v28742_v2, 0 }
  0x43   :  { %v216_v8 = vsel %vm27560_vm3, 0, %v27559_v51  ;;  %v27566_v16 = vmin.u32 %v417_v4, %v28877_v56  ;;  %v81_v22 = vsel %vm75_vm1, %v78_v57, %v80_v30  ;;  %v258_v5 = vadd.s32 1, %v27561_v43 }
  0x44   :  { %v217_v9 = vsub.s32 32, %v216_v8  ;;  %v218_v10 = vshll.u32 %v28845_v13, %v216_v8  ;;  %v221_v11 = vsub.s32 4294967266, %v216_v8  ;;  %v89_v13 = vsel %vm75_vm1, %v86_v42, %v88_v12 }
  0x45   :  { %v419_v24 = vclz %v27566_v16  ;;  %v28899_v23 = vmul.u32.u64.low %v28858_v37, %v89_v13  ;;  %v28900_v25 = vmul.u32.u64.high %v28858_v37, %v89_v13, %v28899_v23  ;;  %v28911_v15 = vand.u32 8388607, %v248_v20 }
  0x46   :  { %v219_v29 = vshrl.u32 %v201_v31, %v217_v9  ;;  %v222_v21 = vadd.s32 127, %v221_v11  ;;  %v28903_v39 = vmul.u32.u64.low %v28858_v37, %v85_v19  ;;  %v28904_v41 = vmul.u32.u64.high %v28858_v37, %v85_v19, %v28903_v39 }
  0x47   :  { %v407_v31 = vadd.s32 %v28827_v59, %v28833_v62  ;;  %v27567_v44 = vadd.s32 4294967294, %v419_v24  ;;  %vm259_vm5 = vcmp.gt.s32.totalorder %v258_v5, 0  ;;  %v28915_v43 = vsel %vm28872_vm2, 0, %v232_v14 }
  0x48   :  { %v220_v33 = vor.u32 %v219_v29, %v218_v10  ;;  %v223_v35 = vshll.u32 %v222_v21, 23  ;;  %v260_v18 = vsel %vm259_vm5, %v258_v5, 0  ;;  %v437_v45 = vsub.s32 4, %v28863_v28 }
  0x49   :  { %vm27568_vm6 = vcmp.lt.s32.totalorder %v27567_v44, 0  ;;  %v97_v46 = vmul.u32 %v28858_v37, %v81_v22  ;;  %vm99_vm7 = vc.u32 %v28900_v25, %v28903_v39  ;;  %v100_v47 = vadd.s32 1, %v28904_v41 }
  0x4a   :  { %v224_v27 = vor.u32 4788187, %v223_v35  ;;  %v227_v17 = vcvt.s32.f32 %v220_v33  ;;  %v422_v62 = vsel %vm27568_vm6, 0, %v27567_v44  ;;  %v262_v49 = vand.u32 31, %v260_v18 }
  0x4b   :  { %v423_v50 = vsub.s32 32, %v422_v62  ;;  %v424_v51 = vshll.u32 %v28877_v56, %v422_v62  ;;  %v427_v52 = vsub.s32 4294967266, %v422_v62  ;;  %v256_v53 = vor.u32 8388608, %v28911_v15 }
  0x4c   :  { %v225_v59 = vand.u32 2147483647, %v224_v27  ;;  %v28925_v57 = vand.u32 3, %v28915_v43  ;;  %v101_v37 = vsel %vm99_vm7, %v100_v47, %v28904_v41  ;;  %v263_v58 = vsub.s32 32, %v262_v49 }
  0x4d   :  { %v425_v60 = vshrl.u32 %v407_v31, %v423_v50  ;;  %v428_v61 = vadd.s32 127, %v427_v52  ;;  %v438_v63 = vsel %vm353_vm4, %v437_v45, %v28863_v28  ;;  %v102_v8 = vadd.s32 %v101_v37, %v97_v46 }
  0x4e   :  { %v228_v55 = vmul.f32 %v227_v17, %v225_v59  ;;  %v28931_v30 = vshrl.u32 %v260_v18, 5  ;;  %v265_v56 = vshll.u32 %v28696_v32, %v262_v49  ;;  %v268_v42 = vshll.u32 %v28697_v34, %v262_v49 }
  0x4f   :  { %vm28937_vm8 = vcmp.le.f32.partialorder %v351_v7, 0.7853982  ;;  %v426_v10 = vor.u32 %v425_v60, %v424_v51  ;;  %v429_v11 = vshll.u32 %v428_v61, 23  ;;  %v103_v12 = vadd.s32 536870912, %v102_v8 }
  0x50   :  { %v229_v4 = vxor.u32 2147483648, %v228_v55  ;;  %v266_v14 = vshrl.u32 %v28697_v34, %v263_v58  ;;  %v269_v16 = vshrl.u32 %v28698_v36, %v263_v58  ;;  %v271_v19 = vshll.u32 %v28698_v36, %v262_v49 }
  0x51   :  { %v272_v29 = vshrl.u32 %v28699_v38, %v263_v58  ;;  %v430_v21 = vor.u32 4788187, %v429_v11  ;;  %v433_v22 = vcvt.s32.f32 %v426_v10  ;;  %v28950_v13 = vshrl.u32 %v103_v12, 30 }
  0x52   :  { %v230_v28 = vsel %vm147_vm13, %v229_v4, %v228_v55  ;;  %v264_v24 = vshrl.u32 %v28696_v32, %v263_v58  ;;  %v274_v23 = vshll.u32 %v28699_v38, %v262_v49  ;;  %v275_v5 = vshrl.u32 %v28700_v40, %v263_v58 }
  0x53   :  { %v233_v7 = vsel %vm28872_vm2, %v28740_v1, %v230_v28  ;;  %v431_v33 = vand.u32 2147483647, %v430_v21  ;;  %v105_v35 = vshll.u32 %v28950_v13, 30  ;;  %v267_v41 = vor.u32 %v266_v14, %v265_v56 }
  0x54   :  { %28446 = vcosq.f32 %v233_v7  ;;  %v270_v31 = vor.u32 %v269_v16, %v268_v42  ;;  %v276_v44 = vor.u32 %v275_v5, %v274_v23  ;;  %v277_v54 = vshll.u32 %v28700_v40, %v262_v49 }
  0x55   :  { %28448 = vsinq.f32 %v233_v7  ;;  %v278_v15 = vshrl.u32 %v28701_v48, %v263_v58  ;;  %v434_v27 = vmul.f32 %v433_v22, %v431_v33  ;;  %v28958_v17 = vsub.s32 %v102_v8, %v105_v35 }
  0x56   :  { %v273_v18 = vor.u32 %v272_v29, %v271_v19  ;;  %vm280_vm9 = vcmp.lt.s32.totalorder %v28931_v30, 1  ;;  %vm239_vm10 = vcmp.lt.s32.totalorder %v28925_v57, 2  ;;  %vm282_vm11 = vcmp.lt.s32.totalorder %v28931_v30, 3 }
  0x57   :  { %v279_v45 = vor.u32 %v278_v15, %v277_v54  ;;  %vm283_vm12 = vcmp.lt.s32.totalorder %v28931_v30, 4  ;;  %v296_v46 = vshll.u32 %v256_v53, 8  ;;  %vm237_vm13 = vweird.f32 %v28740_v1 }
  0x58   :  { %v435_v59 = vxor.u32 2147483648, %v434_v27  ;;  %v108_v62 = vsub.s32 0, %v28958_v17  ;;  %v284_v47 = vsel %vm280_vm9, %v264_v24, %v267_v41  ;;  %v285_v49 = vsel %vm283_vm12, %v273_v18, 2102212464 }
  0x59   :  { %vm281_vm14 = vcmp.lt.s32.totalorder %v28931_v30, 2  ;;  %v286_v50 = vsel %vm282_vm11, %v270_v31, %v285_v49  ;;  %v288_v51 = vsel %vm280_vm9, %v267_v41, %v270_v31  ;;  %v289_v52 = vsel %vm283_vm12, %v276_v44, 920167782 }
  0x5a   :  { %vm243_vm15 = vcmp.eq.s32.totalorder %v28925_v57, 2  ;;  %v436_v53 = vsel %vm353_vm4, %v435_v59, %v434_v27  ;;  %v440_v55 = vsel %vm28937_vm8, 0, %v438_v63  ;;  %v27554_v37 = vmin.u32 %v108_v62, %v28958_v17 }
  0x5b   :  { %v439_v58 = vsel %vm28937_vm8, %v28742_v2, %v436_v53  ;;  %v287_v60 = vsel %vm281_vm14, %v284_v47, %v286_v50  ;;  %v290_v61 = vsel %vm282_vm11, %v273_v18, %v289_v52  ;;  %v292_v8 = vsel %vm280_vm9, %v270_v31, %v273_v18 }
  0x5c   :  { %28450 = vcosq.f32 %v439_v58  ;;  %v110_v4 = vclz %v27554_v37  ;;  %v291_v63 = vsel %vm281_vm14, %v288_v51, %v290_v61  ;;  %v293_v56 = vsel %vm283_vm12, %v279_v45, 1326507024 }
  0x5d   :  { %28452 = vsinq.f32 %v439_v58  ;;  %v294_v9 = vsel %vm282_vm11, %v276_v44, %v293_v56  ;;  %v28998_v10 = vmul.u32.u64.low %v296_v46, %v291_v63  ;;  %v28999_v11 = vmul.u32.u64.high %v296_v46, %v291_v63, %v28998_v10 }
  0x5e   :  { %v28447_v42 = vpop.eup %28446  ;;  %vm240_vm0 = vcmp.eq.s32.totalorder %v28925_v57, 0  ;;  %v27555_v28 = vadd.s32 4294967294, %v110_v4  ;;  %v295_v16 = vsel %vm281_vm14, %v292_v8, %v294_v9  ;;  %v444_v29 = vand.u32 3, %v440_v55 }
  0x5f   :  { %v28449_v12 = vpop.eup %28448  ;;  %v244_v14 = vxor.u32 2147483648, %v28447_v42  ;;  %v29005_v7 = vmul.u32.u64.low %v296_v46, %v295_v16  ;;  %v29006_v21 = vmul.u32.u64.high %v296_v46, %v295_v16, %v29005_v7  ;;  %v98_v24 = vadd.s32 %v28903_v39, %v28900_v25 }
  0x60   :  { %v241_v19 = vxor.u32 2147483648, %v28449_v12  ;;  %vm27556_vm1 = vcmp.lt.s32.totalorder %v27555_v28, 0  ;;  %v303_v23 = vmul.u32 %v296_v46, %v287_v60  ;;  %v306_v35 = vadd.s32 1, %v28999_v11 }
  0x61   :  { %v245_v22 = vsel %vm243_vm15, %v244_v14, %v28449_v12  ;;  %v113_v33 = vsel %vm27556_vm1, 0, %v27555_v28  ;;  %v651_v30 = vadd.s32 3, %v28915_v43  ;;  %vm305_vm2 = vc.u32 %v29006_v21, %v28998_v10 }
  0x62   :  { %v242_v5 = vsel %vm240_vm0, %v28447_v42, %v241_v19  ;;  %v114_v31 = vsub.s32 32, %v113_v33  ;;  %v115_v44 = vshll.u32 %v28958_v17, %v113_v33  ;;  %v118_v54 = vsub.s32 4294967266, %v113_v33 }
  0x63   :  { %v246_v41 = vsel %vm239_vm10, %v242_v5, %v245_v22  ;;  %v307_v43 = vsel %vm305_vm2, %v306_v35, %v28999_v11  ;;  %vm443_vm3 = vweird.f32 %v28742_v2  ;;  %v652_v18 = vand.u32 3, %v651_v30  ;;  %v31_v11 = vld [vmem:[%s34167_s2] sm:$0xff] }
  0x64   :  { %v29019_v15 = vsel %vm237_vm13, nan, %v246_v41  ;;  %v116_v39 = vshrl.u32 %v98_v24, %v114_v31  ;;  %v119_v27 = vadd.s32 127, %v118_v54  ;;  %v308_v57 = vadd.s32 %v307_v43, %v303_v23 }
  0x65   :  { %v29024_v25 = vand.u32 4294901760, %v29019_v15  ;;  %vm445_vm4 = vcmp.lt.s32.totalorder %v444_v29, 2  ;;  %vm449_vm5 = vcmp.eq.s32.totalorder %v444_v29, 2  ;;  %vm446_vm6 = vcmp.eq.s32.totalorder %v444_v29, 0 }
  0x66   :  { %v28451_v17 = vpop.eup %28450  ;;  %v117_v45 = vor.u32 %v116_v39, %v115_v44  ;;  %v120_v46 = vshll.u32 %v119_v27, 23  ;;  %v309_v47 = vadd.s32 536870912, %v308_v57  ;;  %v859_v49 = vadd.s32 3, %v440_v55  ;;  %v32_v39 = vld [vmem:[%s34166_s1] sm:$0xff]  ;;  %s28703_s1 = smov [#allocation5]  }
  0x67   :  { %875 = vmatprep.subr.mxu0 %v29024_v25  ;;  %v28453_v59 = vpop.eup %28452  ;;  %v450_v62 = vxor.u32 2147483648, %v28451_v17  ;;  %vm653_vm7 = vcmp.lt.s32.totalorder %v652_v18, 2  ;;  %vm654_vm8 = vcmp.eq.s32.totalorder %v652_v18, 0  ;;  %vm657_vm9 = vcmp.eq.s32.totalorder %v652_v18, 2  ;;  %s27541_s26 = sshll.u32 %s28703_s1, 4  ;;  %s27542_s26 = int_to_ptr.vmem [resolvable:$true] %s27541_s26 }
  0x68   :  { %v447_v50 = vxor.u32 2147483648, %v28453_v59  ;;  %v121_v51 = vor.u32 4788187, %v120_v46  ;;  %v124_v52 = vcvt.s32.f32 %v117_v45  ;;  %v29029_v37 = vshrl.u32 %v309_v47, 30  ;;  %s28668_s27 = scalar_lea.vmem %s27542_s26, 5632  ;;  %p28673_p9 = scmp.lt.s32.totalorder %s27542_s26, %s27542_s26 }
  0x69   :  { %v451_v53 = vsel %vm449_vm5, %v450_v62, %v28453_v59  ;;  %v656_v61 = vsel %vm654_vm8, %v28447_v42, %v241_v19  ;;  %v659_v63 = vsel %vm657_vm9, %v244_v14, %v28449_v12  ;;  %v860_v56 = vand.u32 3, %v859_v49  ;;  %p28669_p8 = scmp.ne.s32.totalorder %s27542_s26, %s28668_s27  ;;  %p28674_p10 = scmp.lt.s32.totalorder %s28668_s27, %s28668_s27 }
  0x6a   :  { %v448_v58 = vsel %vm446_vm6, %v28451_v17, %v447_v50  ;;  %v122_v60 = vand.u32 2147483647, %v121_v51  ;;  %v311_v4 = vshll.u32 %v29029_v37, 30  ;;  %vm870_vm10 = vcmask 64512  }
  0x6b   :  { %v452_v8 = vsel %vm445_vm4, %v448_v58, %v451_v53  ;;  %v660_v28 = vsel %vm653_vm7, %v656_v61, %v659_v63  ;;  %vm44_vm11 = vcmp.lt.s32.totalorder %v28744_v3, 0  ;;  %vm29051_vm12 = vcmp.le.f32.partialorder %v42_v26, 0.7853982  ;;  %p28675_p11 = por %p28674_p10, %p28673_p9 }
  0x6c   :  { %v29035_v55 = vsel %vm443_vm3, nan, %v452_v8  ;;  %v125_v9 = vmul.f32 %v124_v52, %v122_v60  ;;  %v312_v16 = vsub.s32 %v308_v57, %v311_v4  ;;  %v29047_v12 = vsel %vm237_vm13, nan, %v660_v28 }
  0x6d   :  { %v29042_v42 = vand.u32 4294901760, %v29035_v55  ;;  %v128_v29 = vsub.s32 4, %v28950_v13  ;;  %v872_v22 = vsel %vm870_vm10, %v31_v11, 0  ;;  %vm862_vm14 = vcmp.eq.s32.totalorder %v860_v56, 0  ;;  %p28676_p12 = pnand %p28675_p11, %p28669_p8 }
  0x6e   :  { %v126_v19 = vxor.u32 2147483648, %v125_v9  ;;  %v314_v7 = vsub.s32 0, %v312_v16  ;;  %vm861_vm15 = vcmp.lt.s32.totalorder %v860_v56, 2  ;;  %v864_v1 = vsel %vm862_vm14, %v28451_v17, %v447_v50 }
  0x6f   :  { %1340 = vmatprep.subr.mxu1 %v29042_v42  ;;  %vm865_vm13 = vcmp.eq.s32.totalorder %v860_v56, 2  ;;  %v129_v5 = vsel %vm44_vm11, %v128_v29, %v28950_v13  ;;  %v29065_v33 = vand.u32 4294901760, %v872_v22  ;;  %v29081_v27 = vsub.f32 %v29019_v15, %v29024_v25 }
  0x70   :  { %v127_v24 = vsel %vm44_vm11, %v126_v19, %v125_v9  ;;  %v27562_v23 = vmin.u32 %v314_v7, %v312_v16  ;;  %v867_v35 = vsel %vm865_vm13, %v450_v62, %v28453_v59  ;;  %v131_v44 = vsel %vm29051_vm12, 0, %v129_v5 }
  0x71   :  { %v130_v26 = vsel %vm29051_vm12, %v28744_v3, %v127_v24  ;;  %v868_v41 = vsel %vm861_vm15, %v864_v1, %v867_v35  ;;  %v29077_v13 = vsub.f32 %v872_v22, %v29065_v33  ;;  %v304_v2 = vadd.s32 %v28998_v10, %v29006_v21 }
  0x72   :  { %28454 = vcosq.f32 %v130_v26  ;;  %v316_v30 = vclz %v27562_v23  ;;  %v29069_v31 = vsel %vm443_vm3, nan, %v868_v41  ;;  %v28702_v43 = vmov 0  }
  0x73   :  { %28456 = vsinq.f32 %v130_v26  ;;  %28445 = vset.pattern.permute.xlu0 %v28702_v43  ;;  %v135_v57 = vand.u32 3, %v131_v44  ;;  %v29086_v59 = vand.u32 4294901760, %v29077_v13  ;;  %v954_v62 = vand.u32 4294901760, %v29081_v27 }
  0x74   :  { %v27563_v54 = vadd.s32 4294967294, %v316_v30  ;;  %35 = vperm.xlu0 %28445, %v32_v39   ;;  %vm134_vm4 = vweird.f32 %v28744_v3  ;;  %vm250_vm5 = vcmp.lt.s32.totalorder %v28751_v6, 0  ;;  %vm249_vm6 = vcmp.le.f32.partialorder %v248_v20, 0.7853982 }
  0x75   :  { %vm140_vm1 = vcmp.eq.s32.totalorder %v135_v57, 2  ;;  %vm137_vm2 = vcmp.eq.s32.totalorder %v135_v57, 0  ;;  %vm136_vm3 = vcmp.lt.s32.totalorder %v135_v57, 2  ;;  %v944_v58 = vsub.f32 %v29077_v13, %v29086_v59 }
  0x76   :  { %vm27564_vm0 = vcmp.lt.s32.totalorder %v27563_v54, 0  ;;  %v955_v60 = vsub.f32 %v29081_v27, %v954_v62  ;;  %v334_v22 = vsub.s32 4, %v29029_v37  ;;  %v547_v20 = vadd.s32 3, %v131_v44 }
  0x77   :  { %v319_v18 = vsel %vm27564_vm0, 0, %v27563_v54  ;;  %v29109_v28 = vand.u32 4294901760, %v944_v58  ;;  %v29127_v41 = vsub.f32 %v29035_v55, %v29042_v42  ;;  %vm340_vm12 = vweird.f32 %v28751_v6 }
  0x78   :  { %v320_v17 = vsub.s32 32, %v319_v18  ;;  %v321_v45 = vshll.u32 %v312_v16, %v319_v18  ;;  %v324_v46 = vsub.s32 4294967266, %v319_v18  ;;  %v956_v16 = vand.u32 4294901760, %v955_v60 }
  0x79   :  { %v335_v23 = vsel %vm250_vm5, %v334_v22, %v29029_v37  ;;  %v548_v37 = vand.u32 3, %v547_v20  ;;  %v1419_v39 = vand.u32 4294901760, %v29127_v41 }
  0x7a   :  { %v322_v47 = vshrl.u32 %v304_v2, %v320_v17  ;;  %v325_v49 = vadd.s32 127, %v324_v46  ;;  %v337_v30 = vsel %vm249_vm6, 0, %v335_v23 }
  0x7b   :  { %v341_v54 = vand.u32 3, %v337_v30  ;;  %vm550_vm9 = vcmp.eq.s32.totalorder %v548_v37, 0  ;;  %vm553_vm10 = vcmp.eq.s32.totalorder %v548_v37, 2  ;;  %v1420_v18 = vsub.f32 %v29127_v41, %v1419_v39 }
  0x7c   :  { %v29089_v50 = vpop.eup %28454  ;;  %v323_v51 = vor.u32 %v322_v47, %v321_v45  ;;  %v326_v52 = vshll.u32 %v325_v49, 23  ;;  %vm549_vm14 = vcmp.lt.s32.totalorder %v548_v37, 2 }
  0x7d   :  { %v29091_v10 = vpop.eup %28456  ;;  %v141_v21 = vxor.u32 2147483648, %v29089_v50  ;;  %vm346_vm7 = vcmp.eq.s32.totalorder %v341_v54, 2  ;;  %vm343_vm8 = vcmp.eq.s32.totalorder %v341_v54, 0  ;;  %vm342_vm11 = vcmp.lt.s32.totalorder %v341_v54, 2 }
  0x7e   :  { %v138_v53 = vxor.u32 2147483648, %v29091_v10  ;;  %v327_v8 = vor.u32 4788187, %v326_v52  ;;  %v330_v4 = vcvt.s32.f32 %v323_v51  ;;  %v1421_v52 = vand.u32 4294901760, %v1420_v18 }
  0x7f   :  { %v142_v61 = vsel %vm140_vm1, %v141_v21, %v29091_v10  ;;  %v555_v47 = vsel %vm553_vm10, %v141_v21, %v29091_v10 }
  0x80   :  { %v139_v63 = vsel %vm137_vm2, %v29089_v50, %v138_v53  ;;  %v328_v9 = vand.u32 2147483647, %v327_v8  ;;  %v552_v46 = vsel %vm550_vm9, %v29089_v50, %v138_v53  ;;  %v755_v8 = vadd.s32 3, %v337_v30 }
  0x81   :  { %v143_v56 = vsel %vm136_vm3, %v139_v63, %v142_v61  ;;  %v556_v60 = vsel %vm549_vm14, %v552_v46, %v555_v47 }
  0x82   :  { %v29107_v11 = vsel %vm134_vm4, nan, %v143_v56  ;;  %v331_v19 = vmul.f32 %v330_v4, %v328_v9  ;;  %v756_v63 = vand.u32 3, %v755_v8 }
  0x83   :  { %v29112_v14 = vand.u32 4294901760, %v29107_v11 }
  0x84   :  { %v332_v7 = vxor.u32 2147483648, %v331_v19  ;;  %vm758_vm15 = vcmp.eq.s32.totalorder %v756_v63, 0  ;;  %vm761_vm13 = vcmp.eq.s32.totalorder %v756_v63, 2  ;;  %vm757_vm0 = vcmp.lt.s32.totalorder %v756_v63, 2 }
  0x85   :  { %877 = vmatpush1.msra.mxu0 %v29112_v14  ;;  %v959_v29 = vsub.f32 %v29107_v11, %v29112_v14 }
  0x86   :  { %946 = vmatmul.mubr.f32.vlgmr.msra.gmra.mrb[0].mxu0 %v29109_v28  ;;  %957 = vmatprep.subr.mxu0 %v956_v16  ;;  %v333_v24 = vsel %vm250_vm5, %v332_v7, %v331_v19 }
  0x87   :  { %v960_v1 = vand.u32 4294901760, %v959_v29  ;;  %1026 = vmatprep.mubr.f32.mxu0 %v28695_v0  ;;  %v336_v26 = vsel %vm249_vm6, %v28751_v6, %v333_v24  ;;  %v2269_v24 = vand.u32 4294901760, %v29069_v31 }
  0x88   :  { %28458 = vcosq.f32 %v336_v26 }
  0x89   :  { %v961_v5 = vsub.f32 %v959_v29, %v960_v1  ;;  %28460 = vsinq.f32 %v336_v26  ;;  %v2348_v6 = vsub.f32 %v29069_v31, %v2269_v24 }
  0x8b   :  { %v962_v35 = vand.u32 4294901760, %v961_v5  ;;  %v2349_v5 = vand.u32 4294901760, %v2348_v6 }
  0x8d   :  { %963 = vmatpush1.msra.mxu0 %v962_v35  ;;  %v2350_v35 = vsub.f32 %v2348_v6, %v2349_v5 }
  0x8e   :  { %1028 = vmatmul.mubr.f32.vlgmr.msra.gmra.mrb[0].mxu0 %v29065_v33  ;;  %1036 = vmatprep.subr.mxu0 %v29081_v27  ;;  %v29163_v27 = vand.u32 4294901760, %v29047_v12 }
  0x8f   :  { %1039 = vmatpush1.msra.mxu0 %v959_v29  ;;  %1102 = vmatprep.mubr.f32.mxu0 %v28695_v0  ;;  %v2351_v20 = vand.u32 4294901760, %v2350_v35 }
  0x90   :  { %1112 = vmatprep.subr.mxu0 %v29024_v25  ;;  %v29178_v61 = vsub.f32 %v29047_v12, %v29163_v27 }
  0x92   :  { %v29134_v2 = vpop.eup %28458 }
  0x93   :  { %v28461_v44 = vpop.eup %28460  ;;  %v347_v43 = vxor.u32 2147483648, %v29134_v2 }
  0x94   :  { %v344_v57 = vxor.u32 2147483648, %v28461_v44 }
  0x95   :  { %v348_v17 = vsel %vm346_vm7, %v347_v43, %v28461_v44  ;;  %v763_v29 = vsel %vm761_vm13, %v347_v43, %v28461_v44 }
  0x96   :  { %1105 = vmatmul.mubr.f32.vlgmr.msra.gmra.mrb[0].mxu0 %v29077_v13  ;;  %v345_v45 = vsel %vm343_vm8, %v29134_v2, %v344_v57  ;;  %v760_v19 = vsel %vm758_vm15, %v29134_v2, %v344_v57 }
  0x97   :  { %1114 = vmatpush1.msra.mxu0 %v29112_v14  ;;  %1177 = vmatprep.mubr.f32.mxu0 %v28695_v0  ;;  %v349_v49 = vsel %vm342_vm11, %v345_v45, %v348_v17 }
  0x98   :  { %1190 = vmatprep.subr.mxu0 %v954_v62  ;;  %v29153_v51 = vsel %vm340_vm12, nan, %v349_v49  ;;  %v29167_v62 = vsel %vm134_vm4, nan, %v556_v60 }
  0x99   :  { %v29156_v58 = vand.u32 4294901760, %v29153_v51  ;;  %v29174_v21 = vand.u32 4294901760, %v29167_v62 }
  0x9b   :  { %1342 = vmatpush1.msra.mxu1 %v29156_v58  ;;  %v1424_v53 = vsub.f32 %v29153_v51, %v29156_v58  ;;  %v29182_v4 = vsub.f32 %v29167_v62, %v29174_v21 }
  0x9c   :  { %1411 = vmatmul.mubr.f32.vlgmr.msra.gmra.mrb[0].mxu1 %v29109_v28  ;;  %1422 = vmatprep.subr.mxu1 %v1421_v52 }
  0x9d   :  { %v1425_v50 = vand.u32 4294901760, %v1424_v53  ;;  %1491 = vmatprep.mubr.f32.mxu1 %v28695_v0  ;;  %v1890_v56 = vand.u32 4294901760, %v29182_v4 }
  0x9e   :  { %1181 = vmatmul.mubr.f32.vlgmr.msra.gmra.mrb[0].mxu0 %v29086_v59 }
  0x9f   :  { %1194 = vmatpush1.msra.mxu0 %v960_v1  ;;  %1257 = vmatprep.mubr.f32.mxu0 %v28695_v0  ;;  %v1426_v10 = vsub.f32 %v1424_v53, %v1425_v50  ;;  %v1891_v16 = vsub.f32 %v29182_v4, %v1890_v56 }
  0xa0   :  { %1266 = vmatprep.subr.mxu0 %v29024_v25  ;;  %v1884_v25 = vand.u32 4294901760, %v29178_v61 }
  0xa1   :  { %v1427_v3 = vand.u32 4294901760, %v1426_v10  ;;  %v1892_v22 = vand.u32 4294901760, %v1891_v16 }
  0xa2   :  { %v1885_v9 = vsub.f32 %v29178_v61, %v1884_v25 }
  0xa3   :  { %1428 = vmatpush1.msra.mxu1 %v1427_v3 }
  0xa4   :  { %1493 = vmatmul.mubr.f32.vlgmr.msra.gmra.mrb[0].mxu1 %v29065_v33  ;;  %1501 = vmatprep.subr.mxu1 %v29127_v41  ;;  %v1886_v7 = vand.u32 4294901760, %v1885_v9 }
  0xa5   :  { %1504 = vmatpush1.msra.mxu1 %v1424_v53  ;;  %1567 = vmatprep.mubr.f32.mxu1 %v28695_v0 }
  0xa6   :  { %1577 = vmatprep.subr.mxu1 %v29042_v42  ;;  %1259 = vmatmul.mubr.f32.vlgmr.msra.gmra.mrb[0].mxu0 %v29065_v33 }
  0xa7   :  { %1268 = vmatpush1.msra.mxu0 %v29112_v14  ;;  %1331 = vmatprep.mubr.f32.mxu0 %v28695_v0  ;;  %v764_v14 = vsel %vm757_vm0, %v760_v19, %v763_v29 }
  0xa8   :  { %1805 = vmatprep.subr.mxu0 %v29163_v27  ;;  %v29208_v1 = vsel %vm340_vm12, nan, %v764_v14 }
  0xa9   :  { %v2271_v26 = vand.u32 4294901760, %v29208_v1 }
  0xab   :  { %v2354_v23 = vsub.f32 %v29208_v1, %v2271_v26 }
  0xac   :  { %1570 = vmatmul.mubr.f32.vlgmr.msra.gmra.mrb[0].mxu1 %v29077_v13 }
  0xad   :  { %1579 = vmatpush1.msra.mxu1 %v29156_v58  ;;  %1642 = vmatprep.mubr.f32.mxu1 %v28695_v0 }
  0xae   :  { %1655 = vmatprep.subr.mxu1 %v1419_v39  ;;  %1333 = vmatmul.mubr.f32.vlgmr.msra.gmra.mrb[0].mxu0 %v29065_v33 }
  0xaf   :  { %1807 = vmatpush1.msra.mxu0 %v29174_v21  ;;  %1870 = vmatprep.mubr.f32.mxu0 %v28695_v0 }
  0xb0   :  { %1887 = vmatprep.subr.mxu0 %v1886_v7 }
  0xb2   :  { %1876 = vmatmul.mubr.f32.vlgmr.msra.gmra.mrb[2].mxu0 %v29109_v28 }
  0xb3   :  { %1893 = vmatpush1.msra.mxu0 %v1892_v22  ;;  %1956 = vmatprep.mubr.f32.mxu0 %v28695_v0 }
  0xb4   :  { %1646 = vmatmul.mubr.f32.vlgmr.msra.gmra.mrb[0].mxu1 %v29086_v59  ;;  %1966 = vmatprep.subr.mxu0 %v29178_v61 }
  0xb5   :  { %1659 = vmatpush1.msra.mxu1 %v1425_v50  ;;  %1722 = vmatprep.mubr.f32.mxu1 %v28695_v0 }
  0xb6   :  { %1731 = vmatprep.subr.mxu1 %v29042_v42  ;;  %v2355_v42 = vand.u32 4294901760, %v2354_v23 }
  0xb8   :  { %v2356_v30 = vsub.f32 %v2354_v23, %v2355_v42 }
  0xba   :  { %1958 = vmatmul.mubr.f32.vlgmr.msra.gmra.mrb[2].mxu0 %v29065_v33  ;;  %v2357_v41 = vand.u32 4294901760, %v2356_v30 }
  0xbb   :  { %1969 = vmatpush1.msra.mxu0 %v29182_v4  ;;  %2032 = vmatprep.mubr.f32.mxu0 %v28695_v0 }
  0xbc   :  { %1724 = vmatmul.mubr.f32.vlgmr.msra.gmra.mrb[0].mxu1 %v29065_v33  ;;  %2042 = vmatprep.subr.mxu0 %v29163_v27 }
  0xbd   :  { %1733 = vmatpush1.msra.mxu1 %v29156_v58  ;;  %1796 = vmatprep.mubr.f32.mxu1 %v28695_v0 }
  0xbe   :  { %2270 = vmatprep.subr.mxu1 %v2269_v24 }
  0xc2   :  { %2035 = vmatmul.mubr.f32.vlgmr.msra.gmra.mrb[2].mxu0 %v29077_v13 }
  0xc3   :  { %2044 = vmatpush1.msra.mxu0 %v29174_v21  ;;  %2107 = vmatprep.mubr.f32.mxu0 %v28695_v0 }
  0xc4   :  { %1798 = vmatmul.mubr.f32.vlgmr.msra.gmra.mrb[0].mxu1 %v29065_v33  ;;  %2120 = vmatprep.subr.mxu0 %v1884_v25 }
  0xc5   :  { %2272 = vmatpush1.msra.mxu1 %v2271_v26  ;;  %2335 = vmatprep.mubr.f32.mxu1 %v28695_v0 }
  0xc6   :  { %2352 = vmatprep.subr.mxu1 %v2351_v20 }
  0xc8   :  { %2341 = vmatmul.mubr.f32.vlgmr.msra.gmra.mrb[2].mxu1 %v29109_v28 }
  0xc9   :  { %2358 = vmatpush1.msra.mxu1 %v2357_v41  ;;  %2421 = vmatprep.mubr.f32.mxu1 %v28695_v0 }
  0xca   :  { %2431 = vmatprep.subr.mxu1 %v2348_v6  ;;  %2111 = vmatmul.mubr.f32.vlgmr.msra.gmra.mrb[2].mxu0 %v29086_v59 }
  0xcb   :  { %2124 = vmatpush1.msra.mxu0 %v1890_v56  ;;  %2187 = vmatprep.mubr.f32.mxu0 %v28695_v0 }
  0xcc   :  { %2196 = vmatprep.subr.mxu0 %v29163_v27 }
  0xd0   :  { %2423 = vmatmul.mubr.f32.vlgmr.msra.gmra.mrb[2].mxu1 %v29065_v33 }
  0xd1   :  { %2434 = vmatpush1.msra.mxu1 %v2354_v23  ;;  %2497 = vmatprep.mubr.f32.mxu1 %v28695_v0 }
  0xd2   :  { %2507 = vmatprep.subr.mxu1 %v2269_v24  ;;  %2189 = vmatmul.mubr.f32.vlgmr.msra.gmra.mrb[2].mxu0 %v29065_v33 }
  0xd3   :  { %2198 = vmatpush1.msra.mxu0 %v29174_v21  ;;  %2261 = vmatprep.mubr.f32.mxu0 %v28695_v0 }
  0xd8   :  { %2500 = vmatmul.mubr.f32.vlgmr.msra.gmra.mrb[2].mxu1 %v29077_v13 }
  0xd9   :  { %2509 = vmatpush1.msra.mxu1 %v2271_v26  ;;  %2572 = vmatprep.mubr.f32.mxu1 %v28695_v0 }
  0xda   :  { %2585 = vmatprep.subr.mxu1 %v2349_v5  ;;  %2263 = vmatmul.mubr.f32.vlgmr.msra.gmra.mrb[2].mxu0 %v29065_v33 }
  0xdb   :  { %3689 = vmatprep.mubr.f32.mxu0 %v28695_v0 }
  0xe0   :  { %2576 = vmatmul.mubr.f32.vlgmr.msra.gmra.mrb[2].mxu1 %v29086_v59 }
  0xe1   :  { %2589 = vmatpush1.msra.mxu1 %v2355_v42  ;;  %2652 = vmatprep.mubr.f32.mxu1 %v28695_v0 }
  0xe2   :  { %2661 = vmatprep.subr.mxu1 %v2269_v24 }
  0xe8   :  { %2654 = vmatmul.mubr.f32.vlgmr.msra.gmra.mrb[2].mxu1 %v29065_v33 }
  0xe9   :  { %2663 = vmatpush1.msra.mxu1 %v2271_v26  ;;  %2726 = vmatprep.mubr.f32.mxu1 %v28695_v0 }
  0xf0   :  { %2728 = vmatmul.mubr.f32.vlgmr.msra.gmra.mrb[2].mxu1 %v29065_v33 }
  0xf1   :  { %4154 = vmatprep.mubr.f32.mxu1 %v28695_v0 }
  0xf3   :  { %v29255_v49 = vpop.permute.xlu0 %35 }
 0x181   :  { %v1334_v54 = vpop.f32.mrb[0].mxu0 }
 0x182   :  { %v1336_v37 = vpop.f32.mrb[1].mxu0  ;;  %v2734_v43 = vmul.f32 %v1334_v54, %v29167_v62  ;;  %v28606_v62 = vld [vmem:[#allocation5] sm:$0xff] }
 0x183   :  { %v2735_v17 = vmul.f32 %v1336_v37, %v29047_v12 }
 0x197   :  { %v1799_v39 = vpop.f32.mrb[0].mxu1 }
 0x198   :  { %v1801_v2 = vpop.f32.mrb[1].mxu1  ;;  %v2736_v14 = vmul.f32 %v1799_v39, %v29208_v1 }
 0x199   :  { %v2737_v23 = vmul.f32 %v1801_v2, %v29069_v31 }
 0x1ad   :  { %v2264_v44 = vpop.f32.mrb[2].mxu0 }
 0x1ae   :  { %v2738_v57 = vmul.f32 %v2264_v44, %v29107_v11  ;;  %v2266_v18 = vpop.f32.mrb[3].mxu0  ;;  %v28607_v11 = vld [vmem:[#allocation5 + $0x8] sm:$0xff] }
 0x1af   :  { %v2739_v45 = vmul.f32 %v2266_v18, %v29019_v15 }
 0x1b0   :  { %v2742_v46 = vsub.f32 %v2734_v43, %v2738_v57 }
 0x1b1   :  { %v2743_v47 = vsub.f32 %v2735_v17, %v2739_v45 }
 0x1b2   :  { %v2746_v52 = vmul.f32 0.125, %v2742_v46 }
 0x1b3   :  { %v2747_v58 = vmul.f32 0.125, %v2743_v47 }
 0x1b4   :  { %v2750_v60 = vadd.f32 %v2746_v52, %v29255_v49 }
 0x1b5   :  { %v2751_v53 = vadd.f32 %v2747_v58, %v29255_v49 }
 0x1b6   :  { %v2754_v27 = vmul.f32 0.01, %v2750_v60  ;;  %v28608_v60 = vld [vmem:[#allocation5 + $0x18] sm:$0xff] }
 0x1b7   :  { %v2755_v50 = vmul.f32 0.01, %v2751_v53 }
 0x1b8   :  { %v2758_v10 = vadd.f32 %v28606_v62, %v2754_v27 }
 0x1b9   :  { %v2759_v21 = vadd.f32 %v28607_v11, %v2755_v50 }
 0x1ba   :  { %v2762_v61 = vmul.f32 0.15915494, %v2758_v10 }
 0x1bb   :  { %v2763_v12 = vmul.f32 0.15915494, %v2759_v21 }
 0x1bc   :  { %vm2766_vm1 = vcmp.lt.f32.partialorder %v2762_v61, 0.0  ;;  %v2770_v15 = vceil.f32 %v2762_v61  ;;  %v2774_v3 = vfloor.f32 %v2762_v61 }
 0x1bd   :  { %vm2767_vm2 = vcmp.lt.f32.partialorder %v2763_v12, 0.0  ;;  %v2771_v8 = vceil.f32 %v2763_v12  ;;  %v2775_v4 = vfloor.f32 %v2763_v12 }
 0x1be   :  { %v2778_v25 = vsel %vm2766_vm1, %v2770_v15, %v2774_v3 }
 0x1bf   :  { %v2779_v63 = vsel %vm2767_vm2, %v2771_v8, %v2775_v4  ;;  %v2782_v56 = vmul.f32 6.2831855, %v2778_v25 }
 0x1c0   :  { %v2783_v9 = vmul.f32 6.2831855, %v2779_v63 }
 0x1c1   :  { %v29259_v16 = vsub.f32 %v2758_v10, %v2782_v56 }
 0x1c2   :  { %v29261_v19 = vsub.f32 %v2759_v21, %v2783_v9 }
 0x1c3   :  { %v2729_v29 = vpop.f32.mrb[2].mxu1  ;;  %2791 = vst [vmem:[#allocation5 + $0x20] sm:$0xff] %v29259_v16  ;;  %v2798_v7 = vand.u32 2139095040, %v29259_v16  ;;  %v2795_v57 = vand.u32 2147483647, %v29259_v16 }
 0x1c4   :  { %v2740_v22 = vmul.f32 %v2729_v29, %v29153_v51  ;;  %v2731_v24 = vpop.f32.mrb[3].mxu1  ;;  %2792 = vst [vmem:[#allocation5 + $0x28] sm:$0xff] %v29261_v19  ;;  %v2898_v26 = vand.u32 2147483647, %v29261_v19  ;;  %v2901_v6 = vand.u32 2139095040, %v29261_v19 }
 0x1c5   :  { %v2741_v5 = vmul.f32 %v2731_v24, %v29035_v55  ;;  %v2799_v42 = vshrl.u32 %v2798_v7, 23  ;;  %v29282_v52 = vand.u32 8388607, %v2795_v57 }
 0x1c6   :  { %v2744_v35 = vsub.f32 %v2736_v14, %v2740_v22  ;;  %v2902_v30 = vshrl.u32 %v2901_v6, 23  ;;  %v2905_v1 = vand.u32 8388607, %v2898_v26 }
 0x1c7   :  { %v2745_v20 = vsub.f32 %v2737_v23, %v2741_v5  ;;  %v27585_v41 = vadd.s32 4294967169, %v2799_v42 }
 0x1c8   :  { %v27589_v51 = vadd.s32 4294967169, %v2902_v30  ;;  %v2906_v44 = vor.u32 8388608, %v2905_v1  ;;  %v2748_v31 = vmul.f32 0.125, %v2744_v35 }
 0x1c9   :  { %v2749_v54 = vmul.f32 0.125, %v2745_v20  ;;  %v2805_v37 = vadd.s32 1, %v27585_v41 }
 0x1ca   :  { %v2908_v39 = vadd.s32 1, %v27589_v51  ;;  %v29278_v47 = vshll.u32 %v2906_v44, 8  ;;  %v29288_v50 = vadd.f32 %v2748_v31, %v29255_v49 }
 0x1cb   :  { %v2753_v43 = vadd.f32 %v2749_v54, %v29255_v49  ;;  %vm2806_vm3 = vcmp.gt.s32.totalorder %v2805_v37, 0 }
 0x1cc   :  { %vm2909_vm4 = vcmp.gt.s32.totalorder %v2908_v39, 0  ;;  %v2807_v55 = vsel %vm2806_vm3, %v2805_v37, 0 }
 0x1cd   :  { %v2910_v2 = vsel %vm2909_vm4, %v2908_v39, 0  ;;  %v2757_v18 = vmul.f32 0.01, %v2753_v43  ;;  %v29276_v17 = vand.u32 31, %v2807_v55 }
 0x1ce   :  { %v2912_v45 = vand.u32 31, %v2910_v2  ;;  %v2911_v46 = vshrl.u32 %v2910_v2, 5 }
 0x1cf   :  { %v2761_v53 = vadd.f32 %v28608_v60, %v2757_v18  ;;  %v29285_v27 = vsub.s32 32, %v29276_v17  ;;  %v2808_v18 = vshrl.u32 %v2807_v55, 5  ;;  %v2812_v60 = vshll.u32 %v28696_v32, %v29276_v17 }
 0x1d0   :  { %v2913_v58 = vsub.s32 32, %v2912_v45  ;;  %v2915_v62 = vshll.u32 %v28696_v32, %v2912_v45  ;;  %v2918_v10 = vshll.u32 %v28697_v34, %v2912_v45  ;;  %v2921_v11 = vshll.u32 %v28698_v36, %v2912_v45 }
 0x1d1   :  { %v2924_v21 = vshll.u32 %v28699_v38, %v2912_v45  ;;  %v2927_v3 = vshll.u32 %v28700_v40, %v2912_v45  ;;  %vm2930_vm5 = vcmp.lt.s32.totalorder %v2911_v46, 1  ;;  %v2765_v29 = vmul.f32 0.15915494, %v2761_v53 }
 0x1d2   :  { %v2916_v61 = vshrl.u32 %v28697_v34, %v2913_v58  ;;  %v2919_v12 = vshrl.u32 %v28698_v36, %v2913_v58  ;;  %v2922_v15 = vshrl.u32 %v28699_v38, %v2913_v58  ;;  %v2914_v8 = vshrl.u32 %v28696_v32, %v2913_v58 }
 0x1d3   :  { %v2925_v4 = vshrl.u32 %v28700_v40, %v2913_v58  ;;  %v2928_v25 = vshrl.u32 %v28701_v48, %v2913_v58  ;;  %vm2932_vm6 = vcmp.lt.s32.totalorder %v2911_v46, 3  ;;  %vm2933_vm7 = vcmp.lt.s32.totalorder %v2911_v46, 4 }
 0x1d4   :  { %v2917_v63 = vor.u32 %v2916_v61, %v2915_v62  ;;  %v2920_v56 = vor.u32 %v2919_v12, %v2918_v10  ;;  %v2923_v9 = vor.u32 %v2922_v15, %v2921_v11  ;;  %vm2931_vm8 = vcmp.lt.s32.totalorder %v2911_v46, 2 }
 0x1d5   :  { %v2926_v7 = vor.u32 %v2925_v4, %v2924_v21  ;;  %v2929_v14 = vor.u32 %v2928_v25, %v2927_v3  ;;  %vm2769_vm9 = vcmp.lt.f32.partialorder %v2765_v29, 0.0  ;;  %v2773_v1 = vceil.f32 %v2765_v29 }
 0x1d6   :  { %v2934_v22 = vsel %vm2930_vm5, %v2914_v8, %v2917_v63  ;;  %v2935_v24 = vsel %vm2933_vm7, %v2923_v9, 2102212464  ;;  %v2938_v6 = vsel %vm2930_vm5, %v2917_v63, %v2920_v56  ;;  %v2942_v23 = vsel %vm2930_vm5, %v2920_v56, %v2923_v9 }
 0x1d7   :  { %v2936_v5 = vsel %vm2932_vm6, %v2920_v56, %v2935_v24  ;;  %v2939_v42 = vsel %vm2933_vm7, %v2926_v7, 920167782  ;;  %v2943_v35 = vsel %vm2933_vm7, %v2929_v14, 1326507024  ;;  %v2777_v37 = vfloor.f32 %v2765_v29 }
 0x1d8   :  { %v2940_v30 = vsel %vm2932_vm6, %v2923_v9, %v2939_v42  ;;  %v2944_v20 = vsel %vm2932_vm6, %v2926_v7, %v2943_v35  ;;  %v2937_v41 = vsel %vm2931_vm8, %v2934_v22, %v2936_v5  ;;  %v2813_v45 = vshrl.u32 %v28697_v34, %v29285_v27 }
 0x1d9   :  { %v2941_v51 = vsel %vm2931_vm8, %v2938_v6, %v2940_v30  ;;  %v2945_v54 = vsel %vm2931_vm8, %v2942_v23, %v2944_v20  ;;  %v2781_v2 = vsel %vm2769_vm9, %v2773_v1, %v2777_v37  ;;  %v2816_v46 = vshrl.u32 %v28698_v36, %v29285_v27 }
 0x1da   :  { %v29302_v39 = vmul.u32.u64.low %v29278_v47, %v2945_v54  ;;  %v29303_v44 = vmul.u32.u64.high %v29278_v47, %v2945_v54, %v29302_v39  ;;  %v29306_v43 = vmul.u32.u64.low %v29278_v47, %v2941_v51  ;;  %v29307_v31 = vmul.u32.u64.high %v29278_v47, %v2941_v51, %v29306_v43 }
 0x1db   :  { %v2785_v58 = vmul.f32 6.2831855, %v2781_v2  ;;  %v2819_v62 = vshrl.u32 %v28699_v38, %v29285_v27  ;;  %v2822_v10 = vshrl.u32 %v28700_v40, %v29285_v27  ;;  %v2953_v11 = vmul.u32 %v29278_v47, %v2937_v41  ;;  %v28609_v2 = vld [vmem:[#allocation5 + $0x10] sm:$0xff] }
 0x1dc   :  { %v2815_v55 = vshll.u32 %v28697_v34, %v29276_v17  ;;  %v2818_v21 = vshll.u32 %v28698_v36, %v29276_v17  ;;  %v2821_v61 = vshll.u32 %v28699_v38, %v29276_v17  ;;  %vm2955_vm10 = vc.u32 %v29303_v44, %v29306_v43 }
 0x1dd   :  { %v2956_v12 = vadd.s32 1, %v29307_v31  ;;  %v29330_v15 = vsub.f32 %v2761_v53, %v2785_v58  ;;  %v2825_v3 = vshrl.u32 %v28701_v48, %v29285_v27  ;;  %v2814_v47 = vor.u32 %v2813_v45, %v2812_v60 }
 0x1de   :  { %v2817_v8 = vor.u32 %v2816_v46, %v2815_v55  ;;  %v2820_v4 = vor.u32 %v2819_v62, %v2818_v21  ;;  %v2823_v25 = vor.u32 %v2822_v10, %v2821_v61  ;;  %v2824_v29 = vshll.u32 %v28700_v40, %v29276_v17 }
 0x1df   :  { %v2957_v63 = vsel %vm2955_vm10, %v2956_v12, %v29307_v31  ;;  %2794 = vst [vmem:[#allocation5 + $0x38] sm:$0xff] %v29330_v15  ;;  %v3104_v56 = vand.u32 2147483647, %v29330_v15  ;;  %v3107_v9 = vand.u32 2139095040, %v29330_v15  ;;  %v2811_v7 = vshrl.u32 %v28696_v32, %v29285_v27 }
 0x1e0   :  { %v2958_v53 = vadd.s32 %v2957_v63, %v2953_v11  ;;  %vm2827_vm11 = vcmp.lt.s32.totalorder %v2808_v18, 1  ;;  %v2756_v14 = vmul.f32 0.01, %v29288_v50  ;;  %v2826_v6 = vor.u32 %v2825_v3, %v2824_v29 }
 0x1e1   :  { %v3108_v22 = vshrl.u32 %v3107_v9, 23  ;;  %v3111_v24 = vand.u32 8388607, %v3104_v56  ;;  %vm2830_vm12 = vcmp.lt.s32.totalorder %v2808_v18, 4  ;;  %vm2829_vm14 = vcmp.lt.s32.totalorder %v2808_v18, 3 }
 0x1e2   :  { %v2959_v23 = vadd.s32 536870912, %v2958_v53  ;;  %v2832_v5 = vsel %vm2830_vm12, %v2820_v4, 2102212464  ;;  %v2836_v42 = vsel %vm2830_vm12, %v2823_v25, 920167782  ;;  %v2803_v35 = vor.u32 8388608, %v29282_v52 }
 0x1e3   :  { %v27597_v17 = vadd.s32 4294967169, %v3108_v22  ;;  %v2831_v27 = vsel %vm2827_vm11, %v2811_v7, %v2814_v47  ;;  %v2833_v30 = vsel %vm2829_vm14, %v2817_v8, %v2832_v5  ;;  %vm2828_vm15 = vcmp.lt.s32.totalorder %v2808_v18, 2 }
 0x1e4   :  { %v29350_v50 = vshrl.u32 %v2959_v23, 30  ;;  %v2835_v20 = vsel %vm2827_vm11, %v2814_v47, %v2817_v8  ;;  %v2837_v1 = vsel %vm2829_vm14, %v2820_v4, %v2836_v42  ;;  %v3112_v41 = vor.u32 8388608, %v3111_v24 }
 0x1e5   :  { %v3114_v51 = vadd.s32 1, %v27597_v17  ;;  %v2839_v54 = vsel %vm2827_vm11, %v2817_v8, %v2820_v4  ;;  %v2840_v37 = vsel %vm2830_vm12, %v2826_v6, 1326507024  ;;  %v29358_v52 = vsel %vm2828_vm15, %v2831_v27, %v2833_v30 }
 0x1e6   :  { %v2961_v39 = vshll.u32 %v29350_v50, 30  ;;  %v2841_v31 = vsel %vm2829_vm14, %v2823_v25, %v2840_v37  ;;  %v29361_v45 = vadd.f32 %v28609_v2, %v2756_v14  ;;  %v2838_v46 = vsel %vm2828_vm15, %v2835_v20, %v2837_v1 }
 0x1e7   :  { %vm3115_vm13 = vcmp.gt.s32.totalorder %v3114_v51, 0  ;;  %v29364_v58 = vshll.u32 %v2803_v35, 8  ;;  %v2842_v10 = vsel %vm2828_vm15, %v2839_v54, %v2841_v31  ;;  %v2954_v11 = vadd.s32 %v29306_v43, %v29303_v44 }
 0x1e8   :  { %v29366_v60 = vsub.s32 %v2958_v53, %v2961_v39  ;;  %v3116_v62 = vsel %vm3115_vm13, %v3114_v51, 0  ;;  %v29371_v21 = vshll.u32 %v3112_v41, 8  ;;  %v29382_v8 = vmul.f32 0.15915494, %v29361_v45 }
 0x1e9   :  { %v3118_v55 = vand.u32 31, %v3116_v62  ;;  %v2850_v61 = vmul.u32 %v29364_v58, %v29358_v52  ;;  %v29377_v3 = vmul.u32.u64.low %v29364_v58, %v2838_v46  ;;  %v29378_v47 = vmul.u32.u64.high %v29364_v58, %v2838_v46, %v29377_v3 }
 0x1ea   :  { %v2964_v12 = vsub.s32 0, %v29366_v60  ;;  %v3117_v18 = vshrl.u32 %v3116_v62, 5  ;;  %v29385_v44 = vmul.u32.u64.low %v29364_v58, %v2842_v10  ;;  %v29386_v43 = vmul.u32.u64.high %v29364_v58, %v2842_v10, %v29385_v44 }
 0x1eb   :  { %v3119_v4 = vsub.s32 32, %v3118_v55  ;;  %v3121_v63 = vshll.u32 %v28696_v32, %v3118_v55  ;;  %v3124_v9 = vshll.u32 %v28697_v34, %v3118_v55  ;;  %v3127_v29 = vshll.u32 %v28698_v36, %v3118_v55 }
 0x1ec   :  { %v27590_v25 = vmin.u32 %v2964_v12, %v29366_v60  ;;  %v3130_v6 = vshll.u32 %v28699_v38, %v3118_v55  ;;  %v3133_v5 = vshll.u32 %v28700_v40, %v3118_v55  ;;  %vm3136_vm0 = vcmp.lt.s32.totalorder %v3117_v18, 1 }
 0x1ed   :  { %v3120_v53 = vshrl.u32 %v28696_v32, %v3119_v4  ;;  %v3122_v7 = vshrl.u32 %v28697_v34, %v3119_v4  ;;  %v3125_v14 = vshrl.u32 %v28698_v36, %v3119_v4  ;;  %v3128_v22 = vshrl.u32 %v28699_v38, %v3119_v4 }
 0x1ee   :  { %v2966_v24 = vclz %v27590_v25  ;;  %v3131_v23 = vshrl.u32 %v28700_v40, %v3119_v4  ;;  %v3134_v27 = vshrl.u32 %v28701_v48, %v3119_v4  ;;  %vm2768_vm1 = vcmp.lt.f32.partialorder %v29382_v8, 0.0 }
 0x1ef   :  { %v3123_v42 = vor.u32 %v3122_v7, %v3121_v63  ;;  %v3126_v17 = vor.u32 %v3125_v14, %v3124_v9  ;;  %v3129_v35 = vor.u32 %v3128_v22, %v3127_v29  ;;  %vm3138_vm2 = vcmp.lt.s32.totalorder %v3117_v18, 3 }
 0x1f0   :  { %v27591_v30 = vadd.s32 4294967294, %v2966_v24  ;;  %v3132_v20 = vor.u32 %v3131_v23, %v3130_v6  ;;  %v3135_v1 = vor.u32 %v3134_v27, %v3133_v5  ;;  %vm3139_vm3 = vcmp.lt.s32.totalorder %v3117_v18, 4 }
 0x1f1   :  { %v3140_v41 = vsel %vm3136_vm0, %v3120_v53, %v3123_v42  ;;  %v3141_v51 = vsel %vm3139_vm3, %v3129_v35, 2102212464  ;;  %v3144_v54 = vsel %vm3136_vm0, %v3123_v42, %v3126_v17  ;;  %v2772_v46 = vceil.f32 %v29382_v8 }
 0x1f2   :  { %vm27592_vm4 = vcmp.lt.s32.totalorder %v27591_v30, 0  ;;  %v3145_v37 = vsel %vm3139_vm3, %v3132_v20, 920167782  ;;  %v3142_v31 = vsel %vm3138_vm2, %v3126_v17, %v3141_v51  ;;  %vm3137_vm5 = vcmp.lt.s32.totalorder %v3117_v18, 2 }
 0x1f3   :  { %v2969_v39 = vsel %vm27592_vm4, 0, %v27591_v30  ;;  %v3146_v2 = vsel %vm3138_vm2, %v3129_v35, %v3145_v37  ;;  %v3148_v55 = vsel %vm3136_vm0, %v3126_v17, %v3129_v35  ;;  %v3143_v4 = vsel %vm3137_vm5, %v3140_v41, %v3142_v31 }
 0x1f4   :  { %v2970_v62 = vsub.s32 32, %v2969_v39  ;;  %v2974_v10 = vsub.s32 4294967266, %v2969_v39  ;;  %v2971_v12 = vshll.u32 %v29366_v60, %v2969_v39  ;;  %v3147_v44 = vsel %vm3137_vm5, %v3144_v54, %v3146_v2 }
 0x1f5   :  { %v3149_v25 = vsel %vm3139_vm3, %v3135_v1, 1326507024  ;;  %vm2852_vm6 = vc.u32 %v29386_v43, %v29377_v3  ;;  %v29415_v7 = vmul.u32.u64.low %v29371_v21, %v3147_v44  ;;  %v29416_v14 = vmul.u32.u64.high %v29371_v21, %v3147_v44, %v29415_v7 }
 0x1f6   :  { %v2972_v63 = vshrl.u32 %v2954_v11, %v2970_v62  ;;  %v2975_v9 = vadd.s32 127, %v2974_v10  ;;  %v3150_v29 = vsel %vm3138_vm2, %v3132_v20, %v3149_v25  ;;  %v2853_v22 = vadd.s32 1, %v29378_v47 }
 0x1f7   :  { %v3151_v53 = vsel %vm3137_vm5, %v3148_v55, %v3150_v29  ;;  %v2776_v18 = vfloor.f32 %v29382_v8  ;;  %v2984_v17 = vsub.s32 4, %v29350_v50  ;;  %v3159_v35 = vmul.u32 %v29371_v21, %v3143_v4 }
 0x1f8   :  { %v2973_v60 = vor.u32 %v2972_v63, %v2971_v12  ;;  %v2976_v24 = vshll.u32 %v2975_v9, 23  ;;  %v29421_v6 = vmul.u32.u64.low %v29371_v21, %v3151_v53  ;;  %v29422_v23 = vmul.u32.u64.high %v29371_v21, %v3151_v53, %v29421_v6 }
 0x1f9   :  { %v2854_v11 = vsel %vm2852_vm6, %v2853_v22, %v29378_v47  ;;  %v3162_v27 = vadd.s32 1, %v29416_v14  ;;  %v2780_v30 = vsel %vm2768_vm1, %v2772_v46, %v2776_v18  ;;  %vm2900_vm8 = vcmp.lt.s32.totalorder %v29261_v19, 0 }
 0x1fa   :  { %v2977_v5 = vor.u32 4788187, %v2976_v24  ;;  %v2855_v42 = vadd.s32 %v2854_v11, %v2850_v61  ;;  %v2980_v1 = vcvt.s32.f32 %v2973_v60  ;;  %vm3161_vm7 = vc.u32 %v29422_v23, %v29415_v7 }
 0x1fb   :  { %v3163_v41 = vsel %vm3161_vm7, %v3162_v27, %v29416_v14  ;;  %v2784_v51 = vmul.f32 6.2831855, %v2780_v30  ;;  %v2985_v8 = vsel %vm2900_vm8, %v2984_v17, %v29350_v50  ;;  %vm2899_vm9 = vcmp.le.f32.partialorder %v2898_v26, 0.7853982 }
 0x1fc   :  { %v2978_v20 = vand.u32 2147483647, %v2977_v5  ;;  %v2856_v47 = vadd.s32 536870912, %v2855_v42  ;;  %v3164_v58 = vadd.s32 %v3163_v41, %v3159_v35  ;;  %v2987_v55 = vsel %vm2899_vm9, 0, %v2985_v8 }
 0x1fd   :  { %v29439_v21 = vsub.f32 %v29361_v45, %v2784_v51  ;;  %v2991_v25 = vand.u32 3, %v2987_v55  ;;  %vm3106_vm10 = vcmp.lt.s32.totalorder %v29330_v15, 0  ;;  %vm2797_vm11 = vcmp.lt.s32.totalorder %v29259_v16, 0 }
 0x1fe   :  { %v2981_v52 = vmul.f32 %v2980_v1, %v2978_v20  ;;  %v2857_v61 = vshrl.u32 %v2856_v47, 30  ;;  %v3165_v37 = vadd.s32 536870912, %v3164_v58  ;;  %v3404_v22 = vadd.s32 3, %v2987_v55 }
 0x1ff   :  { %2793 = vst [vmem:[#allocation5 + $0x30] sm:$0xff] %v29439_v21  ;;  %v3004_v31 = vand.u32 2139095040, %v29439_v21  ;;  %v3001_v45 = vand.u32 2147483647, %v29439_v21  ;;  %vm2992_vm12 = vcmp.lt.s32.totalorder %v2991_v25, 2  ;;  %vm2990_vm14 = vweird.f32 %v29261_v19 }
 0x200   :  { %v2982_v54 = vxor.u32 2147483648, %v2981_v52  ;;  %v2858_v39 = vshll.u32 %v2857_v61, 30  ;;  %v3166_v46 = vshrl.u32 %v3165_v37, 30  ;;  %v2881_v6 = vsub.s32 4, %v2857_v61 }
 0x201   :  { %v3005_v12 = vshrl.u32 %v3004_v31, 23  ;;  %v3008_v26 = vand.u32 8388607, %v3001_v45  ;;  %vm2993_vm15 = vcmp.eq.s32.totalorder %v2991_v25, 0  ;;  %vm2996_vm0 = vcmp.eq.s32.totalorder %v2991_v25, 2 }
 0x202   :  { %v2983_v2 = vsel %vm2900_vm8, %v2982_v54, %v2981_v52  ;;  %v2859_v62 = vsub.s32 %v2855_v42, %v2858_v39  ;;  %v3167_v50 = vshll.u32 %v3166_v46, 30  ;;  %v3190_v24 = vsub.s32 4, %v3166_v46 }
 0x203   :  { %v2986_v10 = vsel %vm2899_vm9, %v29261_v19, %v2983_v2  ;;  %v27593_v44 = vadd.s32 4294967169, %v3005_v12  ;;  %v3009_v18 = vor.u32 8388608, %v3008_v26  ;;  %v2851_v42 = vadd.s32 %v29377_v3, %v29386_v43 }
 0x204   :  { %28462 = vcosq.f32 %v2986_v10  ;;  %v2861_v4 = vsub.s32 0, %v2859_v62  ;;  %v3168_v63 = vsub.s32 %v3164_v58, %v3167_v50  ;;  %v3160_v35 = vadd.s32 %v29415_v7, %v29422_v23 }
 0x205   :  { %28464 = vsinq.f32 %v2986_v10  ;;  %v3011_v14 = vadd.s32 1, %v27593_v44  ;;  %v29457_v30 = vand.u32 3, %v3404_v22  ;;  %v29463_v47 = vsel %vm3106_vm10, %v3190_v24, %v3166_v46 }
 0x206   :  { %v27586_v9 = vmin.u32 %v2861_v4, %v2859_v62  ;;  %v3170_v29 = vsub.s32 0, %v3168_v63  ;;  %v29467_v51 = vsel %vm2797_vm11, %v2881_v6, %v2857_v61  ;;  %v29472_v52 = vshll.u32 %v3009_v18, 8 }
 0x207   :  { %vm3012_vm13 = vcmp.gt.s32.totalorder %v3011_v14, 0  ;;  %vm29496_vm3 = vcmp.le.f32.partialorder %v2795_v57, 0.7853982  ;;  %vm29506_vm4 = vcmp.le.f32.partialorder %v3104_v56, 0.7853982  ;;  %vm3407_vm5 = vcmp.eq.s32.totalorder %v29457_v30, 0 }
 0x208   :  { %v2863_v53 = vclz %v27586_v9  ;;  %v27598_v60 = vmin.u32 %v3170_v29, %v3168_v63  ;;  %v3013_v17 = vsel %vm3012_vm13, %v3011_v14, 0  ;;  %vm3410_vm6 = vcmp.eq.s32.totalorder %v29457_v30, 2 }
 0x209   :  { %v3015_v27 = vand.u32 31, %v3013_v17  ;;  %v29483_v55 = vshrl.u32 %v3013_v17, 5  ;;  %vm3406_vm9 = vcmp.lt.s32.totalorder %v29457_v30, 2 }
 0x20a   :  { %v27587_v11 = vadd.s32 4294967294, %v2863_v53  ;;  %v3172_v5 = vclz %v27598_v60 }
 0x20b   :  { %v3016_v8 = vsub.s32 32, %v3015_v27  ;;  %v3018_v22 = vshll.u32 %v28696_v32, %v3015_v27  ;;  %v3021_v6 = vshll.u32 %v28697_v34, %v3015_v27  ;;  %vm3033_vm7 = vcmp.lt.s32.totalorder %v29483_v55, 1 }
 0x20c   :  { %vm27588_vm1 = vcmp.lt.s32.totalorder %v27587_v11, 0  ;;  %v27599_v1 = vadd.s32 4294967294, %v3172_v5  ;;  %vm3036_vm8 = vcmp.lt.s32.totalorder %v29483_v55, 4 }
 0x20d   :  { %v2866_v41 = vsel %vm27588_vm1, 0, %v27587_v11  ;;  %v3019_v29 = vshrl.u32 %v28697_v34, %v3016_v8  ;;  %v3022_v11 = vshrl.u32 %v28698_v36, %v3016_v8  ;;  %v3025_v17 = vshrl.u32 %v28699_v38, %v3016_v8 }
 0x20e   :  { %v29459_v20 = vpop.eup %28462  ;;  %v2867_v7 = vsub.s32 32, %v2866_v41  ;;  %v2871_v23 = vsub.s32 4294967266, %v2866_v41  ;;  %vm27600_vm2 = vcmp.lt.s32.totalorder %v27599_v1, 0  ;;  %v2868_v54 = vshll.u32 %v2859_v62, %v2866_v41 }
 0x20f   :  { %v29469_v3 = vpop.eup %28464  ;;  %v2997_v43 = vxor.u32 2147483648, %v29459_v20  ;;  %v3175_v61 = vsel %vm27600_vm2, 0, %v27599_v1  ;;  %v3020_v5 = vor.u32 %v3019_v29, %v3018_v22  ;;  %v3023_v1 = vor.u32 %v3022_v11, %v3021_v6 }
 0x210   :  { %v2994_v58 = vxor.u32 2147483648, %v29469_v3  ;;  %v2869_v39 = vshrl.u32 %v2851_v42, %v2867_v7  ;;  %v2872_v31 = vadd.s32 127, %v2871_v23  ;;  %v3176_v46 = vsub.s32 32, %v3175_v61 }
 0x211   :  { %v2998_v37 = vsel %vm2996_vm0, %v2997_v43, %v29469_v3  ;;  %v3180_v10 = vsub.s32 4294967266, %v3175_v61  ;;  %v3177_v12 = vshll.u32 %v3168_v63, %v3175_v61  ;;  %v3024_v42 = vshll.u32 %v28698_v36, %v3015_v27 }
 0x212   :  { %v2995_v2 = vsel %vm2993_vm15, %v29459_v20, %v2994_v58  ;;  %v2870_v50 = vor.u32 %v2869_v39, %v2868_v54  ;;  %v2873_v4 = vshll.u32 %v2872_v31, 23  ;;  %v3178_v9 = vshrl.u32 %v3160_v35, %v3176_v46 }
 0x213   :  { %v2999_v62 = vsel %vm2992_vm12, %v2995_v2, %v2998_v37  ;;  %v3181_v26 = vadd.s32 127, %v3180_v10  ;;  %v3027_v41 = vshll.u32 %v28699_v38, %v3015_v27  ;;  %v3028_v7 = vshrl.u32 %v28700_v40, %v3016_v8 }
 0x214   :  { %v29488_v44 = vsel %vm2990_vm14, nan, %v2999_v62  ;;  %v2874_v25 = vor.u32 4788187, %v2873_v4  ;;  %v2877_v63 = vcvt.s32.f32 %v2870_v50  ;;  %v3179_v60 = vor.u32 %v3178_v9, %v3177_v12 }
 0x215   :  { %v29492_v53 = vand.u32 4294901760, %v29488_v44  ;;  %v3182_v24 = vshll.u32 %v3181_v26, 23  ;;  %v3026_v54 = vor.u32 %v3025_v17, %v3024_v42  ;;  %v3030_v37 = vshll.u32 %v28700_v40, %v3015_v27 }
 0x216   :  { %v2875_v57 = vand.u32 2147483647, %v2874_v25  ;;  %v3031_v56 = vshrl.u32 %v28701_v48, %v3016_v8  ;;  %v3186_v39 = vcvt.s32.f32 %v3179_v60  ;;  %v3017_v31 = vshrl.u32 %v28696_v32, %v3016_v8 }
 0x217   :  { %3624 = vmatprep.subr.mxu0 %v29492_v53  ;;  %v3183_v35 = vor.u32 4788187, %v3182_v24  ;;  %v3029_v2 = vor.u32 %v3028_v7, %v3027_v41  ;;  %vm3034_vm12 = vcmp.lt.s32.totalorder %v29483_v55, 2  ;;  %v3038_v62 = vsel %vm3036_vm8, %v3026_v54, 2102212464 }
 0x218   :  { %v2878_v23 = vmul.f32 %v2877_v63, %v2875_v57  ;;  %v3032_v10 = vor.u32 %v3031_v56, %v3030_v37  ;;  %v3041_v8 = vsel %vm3033_vm7, %v3020_v5, %v3023_v1  ;;  %vm3035_vm15 = vcmp.lt.s32.totalorder %v29483_v55, 3 }
 0x219   :  { %v3184_v61 = vand.u32 2147483647, %v3183_v35  ;;  %v3037_v50 = vsel %vm3033_vm7, %v3017_v31, %v3020_v5  ;;  %v3042_v4 = vsel %vm3036_vm8, %v3029_v2, 920167782  ;;  %v3045_v25 = vsel %vm3033_vm7, %v3023_v1, %v3026_v54 }
 0x21a   :  { %v2879_v46 = vxor.u32 2147483648, %v2878_v23  ;;  %v3043_v29 = vsel %vm3035_vm15, %v3026_v54, %v3042_v4  ;;  %v3039_v63 = vsel %vm3035_vm15, %v3023_v1, %v3038_v62  ;;  %v3046_v60 = vsel %vm3036_vm8, %v3032_v10, 1326507024 }
 0x21b   :  { %v3187_v27 = vmul.f32 %v3186_v39, %v3184_v61  ;;  %v3044_v22 = vsel %vm3034_vm12, %v3041_v8, %v3043_v29  ;;  %v3193_v6 = vsel %vm29506_vm4, 0, %v29463_v47  ;;  %v3047_v11 = vsel %vm3035_vm15, %v3029_v2, %v3046_v60 }
 0x21c   :  { %v2880_v12 = vsel %vm2797_vm11, %v2879_v46, %v2878_v23  ;;  %v3048_v5 = vsel %vm3034_vm12, %v3045_v25, %v3047_v11  ;;  %v29548_v42 = vmul.u32.u64.low %v29472_v52, %v3044_v22  ;;  %v29549_v17 = vmul.u32.u64.high %v29472_v52, %v3044_v22, %v29548_v42 }
 0x21d   :  { %v3188_v9 = vxor.u32 2147483648, %v3187_v27  ;;  %v2883_v26 = vsel %vm29496_vm3, %v29259_v16, %v2880_v12  ;;  %v3040_v35 = vsel %vm3034_vm12, %v3037_v50, %v3039_v63  ;;  %v29560_v18 = vsub.f32 %v29488_v44, %v29492_v53 }
 0x21e   :  { %28466 = vcosq.f32 %v2883_v26  ;;  %v29555_v47 = vmul.u32.u64.low %v29472_v52, %v3048_v5  ;;  %v29556_v1 = vmul.u32.u64.high %v29472_v52, %v3048_v5, %v29555_v47  ;;  %v3409_v41 = vsel %vm3407_vm5, %v29459_v20, %v2994_v58 }
 0x21f   :  { %v3189_v24 = vsel %vm3106_vm10, %v3188_v9, %v3187_v27  ;;  %28468 = vsinq.f32 %v2883_v26  ;;  %v3412_v55 = vsel %vm3410_vm6, %v2997_v43, %v29469_v3  ;;  %v29575_v7 = vsel %vm29496_vm3, 0, %v29467_v51 }
 0x220   :  { %v3192_v57 = vsel %vm29506_vm4, %v29330_v15, %v3189_v24  ;;  %v29579_v23 = vsel %vm3406_vm9, %v3409_v41, %v3412_v55  ;;  %v3059_v54 = vadd.s32 1, %v29549_v17  ;;  %v3056_v37 = vmul.u32 %v29472_v52, %v3040_v35 }
 0x221   :  { %28470 = vcosq.f32 %v3192_v57  ;;  %vm3058_vm10 = vc.u32 %v29556_v1, %v29548_v42  ;;  %v3612_v20 = vadd.s32 3, %v3193_v6  ;;  %v2888_v58 = vand.u32 3, %v29575_v7 }
 0x222   :  { %28472 = vsinq.f32 %v3192_v57  ;;  %v3060_v3 = vsel %vm3058_vm10, %v3059_v54, %v29549_v17  ;;  %v3703_v43 = vand.u32 4294901760, %v29560_v18  ;;  %v3197_v51 = vand.u32 3, %v3193_v6 }
 0x223   :  { %v3061_v14 = vadd.s32 %v3060_v3, %v3056_v37  ;;  %vm2887_vm11 = vweird.f32 %v29259_v16  ;;  %v3613_v39 = vand.u32 3, %v3612_v20  ;;  %vm2889_vm13 = vcmp.lt.s32.totalorder %v2888_v58, 2 }
 0x224   :  { %vm2893_vm0 = vcmp.eq.s32.totalorder %v2888_v58, 2  ;;  %v3704_v2 = vsub.f32 %v29560_v18, %v3703_v43  ;;  %vm3198_vm1 = vcmp.lt.s32.totalorder %v3197_v51, 2  ;;  %vm2890_vm2 = vcmp.eq.s32.totalorder %v2888_v58, 0 }
 0x225   :  { %v3062_v61 = vadd.s32 536870912, %v3061_v14  ;;  %vm3199_vm3 = vcmp.eq.s32.totalorder %v3197_v51, 0  ;;  %vm3202_vm4 = vcmp.eq.s32.totalorder %v3197_v51, 2  ;;  %vm3618_vm5 = vcmp.eq.s32.totalorder %v3613_v39, 2 }
 0x226   :  { %v3705_v25 = vand.u32 4294901760, %v3704_v2  ;;  %vm3615_vm6 = vcmp.eq.s32.totalorder %v3613_v39, 0  ;;  %vm3196_vm7 = vweird.f32 %v29330_v15  ;;  %vm3614_vm8 = vcmp.lt.s32.totalorder %v3613_v39, 2 }
 0x227   :  { %v29601_v27 = vshrl.u32 %v3062_v61, 30  ;;  %vm3003_vm10 = vcmp.lt.s32.totalorder %v29439_v21, 0 }
 0x228   :  { %v29588_v56 = vpop.eup %28466 }
 0x229   :  { %v29590_v30 = vpop.eup %28468  ;;  %v2894_v52 = vxor.u32 2147483648, %v29588_v56  ;;  %v3064_v9 = vshll.u32 %v29601_v27, 30 }
 0x22a   :  { %v2891_v31 = vxor.u32 2147483648, %v29590_v30 }
 0x22b   :  { %v28471_v46 = vpop.eup %28470  ;;  %v2895_v10 = vsel %vm2893_vm0, %v2894_v52, %v29590_v30  ;;  %v3065_v24 = vsub.s32 %v3061_v14, %v3064_v9  ;;  %v3057_v14 = vadd.s32 %v29548_v42, %v29556_v1  ;;  %vm29659_vm0 = vcmp.le.f32.partialorder %v3001_v45, 0.7853982 }
 0x22c   :  { %v28473_v62 = vpop.eup %28472  ;;  %v3203_v8 = vxor.u32 2147483648, %v28471_v46  ;;  %v2892_v12 = vsel %vm2890_vm2, %v29588_v56, %v2891_v31  ;;  %vm3093_vm2 = vweird.f32 %v29439_v21 }
 0x22d   :  { %v3200_v50 = vxor.u32 2147483648, %v28473_v62  ;;  %v2896_v4 = vsel %vm2889_vm13, %v2892_v12, %v2895_v10  ;;  %v3067_v17 = vsub.s32 0, %v3065_v24  ;;  %v3300_v10 = vadd.s32 3, %v29575_v7 }
 0x22e   :  { %v3204_v26 = vsel %vm3202_vm4, %v3203_v8, %v28473_v62  ;;  %v29609_v29 = vsel %vm2887_vm11, nan, %v2896_v4  ;;  %v3620_v63 = vsel %vm3618_vm5, %v3203_v8, %v28473_v62 }
 0x22f   :  { %v3201_v22 = vsel %vm3199_vm3, %v28471_v46, %v3200_v50  ;;  %v29612_v60 = vand.u32 4294901760, %v29609_v29  ;;  %v3617_v11 = vsel %vm3615_vm6, %v28471_v46, %v3200_v50  ;;  %v27594_v41 = vmin.u32 %v3067_v17, %v3065_v24 }
 0x230   :  { %v3205_v6 = vsel %vm3198_vm1, %v3201_v22, %v3204_v26  ;;  %v3621_v47 = vsel %vm3614_vm8, %v3617_v11, %v3620_v63  ;;  %v3301_v42 = vand.u32 3, %v3300_v10 }
 0x231   :  { %v29618_v57 = vsel %vm3196_vm7, nan, %v3205_v6  ;;  %3626 = vmatpush1.msra.mxu0 %v29612_v60  ;;  %v3708_v5 = vsub.f32 %v29609_v29, %v29612_v60  ;;  %v29631_v54 = vsel %vm3196_vm7, nan, %v3621_v47  ;;  %v3069_v37 = vclz %v27594_v41 }
 0x232   :  { %v29624_v35 = vand.u32 4294901760, %v29618_v57  ;;  %3695 = vmatmul.mubr.f32.vlgmr.msra.gmra.mrb[4].mxu0 %v29109_v28  ;;  %3706 = vmatprep.subr.mxu0 %v3705_v25  ;;  %vm3303_vm12 = vcmp.eq.s32.totalorder %v3301_v42, 0  ;;  %vm3306_vm15 = vcmp.eq.s32.totalorder %v3301_v42, 2  ;;  %v29654_v25 = vsel %vm2990_vm14, nan, %v29579_v23 }
 0x233   :  { %3775 = vmatprep.mubr.f32.mxu0 %v28695_v0  ;;  %v3709_v55 = vand.u32 4294901760, %v3708_v5  ;;  %v27595_v58 = vadd.s32 4294967294, %v3069_v37  ;;  %v3305_v7 = vsel %vm3303_vm12, %v29588_v56, %v2891_v31  ;;  %v3308_v9 = vsel %vm3306_vm15, %v2894_v52, %v29590_v30 }
 0x234   :  { %4089 = vmatprep.subr.mxu1 %v29624_v35  ;;  %vm3302_vm13 = vcmp.lt.s32.totalorder %v3301_v42, 2  ;;  %v3087_v31 = vsub.s32 4, %v29601_v27  ;;  %v29668_v19 = vand.u32 4294901760, %v29654_v25  ;;  %v29684_v63 = vsub.f32 %v29618_v57, %v29624_v35 }
 0x235   :  { %v3710_v20 = vsub.f32 %v3708_v5, %v3709_v55  ;;  %vm27596_vm9 = vcmp.lt.s32.totalorder %v27595_v58, 0  ;;  %v3309_v56 = vsel %vm3302_vm13, %v3305_v7, %v3308_v9 }
 0x236   :  { %v3072_v51 = vsel %vm27596_vm9, 0, %v27595_v58  ;;  %v29674_v45 = vsel %vm2887_vm11, nan, %v3309_v56  ;;  %v3088_v23 = vsel %vm3003_vm10, %v3087_v31, %v29601_v27  ;;  %v29680_v52 = vsub.f32 %v29654_v25, %v29668_v19 }
 0x237   :  { %v3711_v3 = vand.u32 4294901760, %v3710_v20  ;;  %v3073_v61 = vsub.s32 32, %v3072_v51  ;;  %v3077_v39 = vsub.s32 4294967266, %v3072_v51  ;;  %v3074_v15 = vshll.u32 %v3065_v24, %v3072_v51 }
 0x238   :  { %v29687_v22 = vand.u32 4294901760, %v29674_v45  ;;  %v3090_v16 = vsel %vm29659_vm0, 0, %v3088_v23  ;;  %v4633_v24 = vand.u32 4294901760, %v29680_v52  ;;  %v4168_v27 = vand.u32 4294901760, %v29684_v63 }
 0x239   :  { %3712 = vmatpush1.msra.mxu0 %v3711_v3  ;;  %v3075_v2 = vshrl.u32 %v3057_v14, %v3073_v61  ;;  %v3078_v46 = vadd.s32 127, %v3077_v39  ;;  %v3094_v6 = vand.u32 3, %v3090_v16 }
 0x23a   :  { %3777 = vmatmul.mubr.f32.vlgmr.msra.gmra.mrb[4].mxu0 %v29065_v33  ;;  %3785 = vmatprep.subr.mxu0 %v29560_v18  ;;  %v4634_v47 = vsub.f32 %v29680_v52, %v4633_v24 }
 0x23b   :  { %3788 = vmatpush1.msra.mxu0 %v3708_v5  ;;  %3851 = vmatprep.mubr.f32.mxu0 %v28695_v0  ;;  %v3076_v62 = vor.u32 %v3075_v2, %v3074_v15  ;;  %v3079_v8 = vshll.u32 %v3078_v46, 23  ;;  %vm3099_vm14 = vcmp.eq.s32.totalorder %v3094_v6, 2  ;;  %vm3096_vm11 = vcmp.eq.s32.totalorder %v3094_v6, 0 }
 0x23c   :  { %3861 = vmatprep.subr.mxu0 %v29492_v53  ;;  %vm3095_vm1 = vcmp.lt.s32.totalorder %v3094_v6, 2  ;;  %v4635_v14 = vand.u32 4294901760, %v4634_v47 }
 0x23d   :  { %v3080_v12 = vor.u32 4788187, %v3079_v8  ;;  %v3083_v50 = vcvt.s32.f32 %v3076_v62  ;;  %v3508_v8 = vadd.s32 3, %v3090_v16 }
 0x23f   :  { %v3081_v1 = vand.u32 2147483647, %v3080_v12  ;;  %v3509_v12 = vand.u32 3, %v3508_v8 }
 0x241   :  { %v3084_v4 = vmul.f32 %v3083_v50, %v3081_v1  ;;  %vm3511_vm3 = vcmp.eq.s32.totalorder %v3509_v12, 0  ;;  %vm3514_vm4 = vcmp.eq.s32.totalorder %v3509_v12, 2  ;;  %vm3510_vm5 = vcmp.lt.s32.totalorder %v3509_v12, 2 }
 0x242   :  { %3854 = vmatmul.mubr.f32.vlgmr.msra.gmra.mrb[4].mxu0 %v29077_v13 }
 0x243   :  { %3863 = vmatpush1.msra.mxu0 %v29612_v60  ;;  %3926 = vmatprep.mubr.f32.mxu0 %v28695_v0  ;;  %v3085_v26 = vxor.u32 2147483648, %v3084_v4 }
 0x244   :  { %3939 = vmatprep.subr.mxu0 %v3703_v43 }
 0x245   :  { %v3086_v43 = vsel %vm3003_vm10, %v3085_v26, %v3084_v4  ;;  %v5018_v4 = vand.u32 4294901760, %v29631_v54 }
 0x246   :  { %v3089_v30 = vsel %vm29659_vm0, %v29439_v21, %v3086_v43 }
 0x247   :  { %28474 = vcosq.f32 %v3089_v30  ;;  %v5097_v26 = vsub.f32 %v29631_v54, %v5018_v4 }
 0x248   :  { %28476 = vsinq.f32 %v3089_v30 }
 0x249   :  { %v5098_v18 = vand.u32 4294901760, %v5097_v26 }
 0x24a   :  { %3930 = vmatmul.mubr.f32.vlgmr.msra.gmra.mrb[4].mxu0 %v29086_v59 }
 0x24b   :  { %3943 = vmatpush1.msra.mxu0 %v3709_v55  ;;  %4006 = vmatprep.mubr.f32.mxu0 %v28695_v0  ;;  %v4169_v55 = vsub.f32 %v29684_v63, %v4168_v27  ;;  %v5099_v43 = vsub.f32 %v5097_v26, %v5098_v18 }
 0x24c   :  { %4015 = vmatprep.subr.mxu0 %v29492_v53  ;;  %v29696_v53 = vsub.f32 %v29674_v45, %v29687_v22 }
 0x24d   :  { %v4170_v51 = vand.u32 4294901760, %v4169_v55  ;;  %v5100_v56 = vand.u32 4294901760, %v5099_v43 }
 0x24e   :  { %v4639_v37 = vand.u32 4294901760, %v29696_v53 }
 0x250   :  { %v4640_v61 = vsub.f32 %v29696_v53, %v4639_v37 }
 0x251   :  { %v28475_v11 = vpop.eup %28474 }
 0x252   :  { %4008 = vmatmul.mubr.f32.vlgmr.msra.gmra.mrb[4].mxu0 %v29065_v33  ;;  %v28477_v5 = vpop.eup %28476  ;;  %v3100_v17 = vxor.u32 2147483648, %v28475_v11  ;;  %v4641_v2 = vand.u32 4294901760, %v4640_v61 }
 0x253   :  { %4017 = vmatpush1.msra.mxu0 %v29612_v60  ;;  %4080 = vmatprep.mubr.f32.mxu0 %v28695_v0  ;;  %v3097_v41 = vxor.u32 2147483648, %v28477_v5 }
 0x254   :  { %4554 = vmatprep.subr.mxu0 %v29668_v19  ;;  %v3101_v20 = vsel %vm3099_vm14, %v3100_v17, %v28477_v5  ;;  %v3516_v1 = vsel %vm3514_vm4, %v3100_v17, %v28477_v5 }
 0x255   :  { %v3098_v60 = vsel %vm3096_vm11, %v28475_v11, %v3097_v41  ;;  %v3513_v42 = vsel %vm3511_vm3, %v28475_v11, %v3097_v41 }
 0x256   :  { %v3102_v58 = vsel %vm3095_vm1, %v3098_v60, %v3101_v20  ;;  %v3517_v50 = vsel %vm3510_vm5, %v3513_v42, %v3516_v1  ;;  %v28610_v60 = vld [vmem:[#allocation5 + $0x20] sm:$0xff] }
 0x257   :  { %v29709_v3 = vsel %vm3093_vm2, nan, %v3102_v58  ;;  %v29741_v7 = vsel %vm3093_vm2, nan, %v3517_v50 }
 0x258   :  { %v4090_v39 = vand.u32 4294901760, %v29709_v3  ;;  %v5020_v9 = vand.u32 4294901760, %v29741_v7 }
 0x25a   :  { %4082 = vmatmul.mubr.f32.vlgmr.msra.gmra.mrb[4].mxu0 %v29065_v33  ;;  %4091 = vmatpush1.msra.mxu1 %v4090_v39  ;;  %v4173_v15 = vsub.f32 %v29709_v3, %v4090_v39  ;;  %v5103_v21 = vsub.f32 %v29741_v7, %v5020_v9 }
 0x25b   :  { %4556 = vmatpush1.msra.mxu0 %v29687_v22  ;;  %4619 = vmatprep.mubr.f32.mxu0 %v28695_v0 }
 0x25c   :  { %4636 = vmatprep.subr.mxu0 %v4635_v14  ;;  %4160 = vmatmul.mubr.f32.vlgmr.msra.gmra.mrb[4].mxu1 %v29109_v28  ;;  %v4174_v46 = vand.u32 4294901760, %v4173_v15 }
 0x25d   :  { %4171 = vmatprep.subr.mxu1 %v4170_v51  ;;  %4240 = vmatprep.mubr.f32.mxu1 %v28695_v0 }
 0x25e   :  { %4625 = vmatmul.mubr.f32.vlgmr.msra.gmra.mrb[6].mxu0 %v29109_v28  ;;  %v4175_v10 = vsub.f32 %v4173_v15, %v4174_v46 }
 0x25f   :  { %4642 = vmatpush1.msra.mxu0 %v4641_v2  ;;  %4705 = vmatprep.mubr.f32.mxu0 %v28695_v0 }
 0x260   :  { %4715 = vmatprep.subr.mxu0 %v29680_v52  ;;  %v4176_v62 = vand.u32 4294901760, %v4175_v10 }
 0x262   :  { %4177 = vmatpush1.msra.mxu1 %v4176_v62 }
 0x263   :  { %4250 = vmatprep.subr.mxu1 %v29684_v63 }
 0x264   :  { %4242 = vmatmul.mubr.f32.vlgmr.msra.gmra.mrb[4].mxu1 %v29065_v33 }
 0x265   :  { %4253 = vmatpush1.msra.mxu1 %v4173_v15  ;;  %4316 = vmatprep.mubr.f32.mxu1 %v28695_v0 }
 0x266   :  { %4326 = vmatprep.subr.mxu1 %v29624_v35  ;;  %4707 = vmatmul.mubr.f32.vlgmr.msra.gmra.mrb[6].mxu0 %v29065_v33 }
 0x267   :  { %4718 = vmatpush1.msra.mxu0 %v29696_v53  ;;  %4781 = vmatprep.mubr.f32.mxu0 %v28695_v0 }
 0x268   :  { %4791 = vmatprep.subr.mxu0 %v29668_v19 }
 0x26c   :  { %4319 = vmatmul.mubr.f32.vlgmr.msra.gmra.mrb[4].mxu1 %v29077_v13 }
 0x26d   :  { %4328 = vmatpush1.msra.mxu1 %v4090_v39  ;;  %4391 = vmatprep.mubr.f32.mxu1 %v28695_v0 }
 0x26e   :  { %4404 = vmatprep.subr.mxu1 %v4168_v27  ;;  %4784 = vmatmul.mubr.f32.vlgmr.msra.gmra.mrb[6].mxu0 %v29077_v13 }
 0x26f   :  { %4793 = vmatpush1.msra.mxu0 %v29687_v22  ;;  %4856 = vmatprep.mubr.f32.mxu0 %v28695_v0 }
 0x270   :  { %4869 = vmatprep.subr.mxu0 %v4633_v24 }
 0x274   :  { %4395 = vmatmul.mubr.f32.vlgmr.msra.gmra.mrb[4].mxu1 %v29086_v59 }
 0x275   :  { %4408 = vmatpush1.msra.mxu1 %v4174_v46  ;;  %4471 = vmatprep.mubr.f32.mxu1 %v28695_v0 }
 0x276   :  { %4480 = vmatprep.subr.mxu1 %v29624_v35  ;;  %4860 = vmatmul.mubr.f32.vlgmr.msra.gmra.mrb[6].mxu0 %v29086_v59  ;;  %v5104_v35 = vand.u32 4294901760, %v5103_v21 }
 0x277   :  { %4873 = vmatpush1.msra.mxu0 %v4639_v37  ;;  %4936 = vmatprep.mubr.f32.mxu0 %v28695_v0 }
 0x278   :  { %4945 = vmatprep.subr.mxu0 %v29668_v19  ;;  %v5105_v31 = vsub.f32 %v5103_v21, %v5104_v35 }
 0x27a   :  { %v5106_v30 = vand.u32 4294901760, %v5105_v31 }
 0x27c   :  { %4473 = vmatmul.mubr.f32.vlgmr.msra.gmra.mrb[4].mxu1 %v29065_v33 }
 0x27d   :  { %4482 = vmatpush1.msra.mxu1 %v4090_v39  ;;  %4545 = vmatprep.mubr.f32.mxu1 %v28695_v0 }
 0x27e   :  { %5019 = vmatprep.subr.mxu1 %v5018_v4  ;;  %4938 = vmatmul.mubr.f32.vlgmr.msra.gmra.mrb[6].mxu0 %v29065_v33 }
 0x27f   :  { %4947 = vmatpush1.msra.mxu0 %v29687_v22  ;;  %5010 = vmatprep.mubr.f32.mxu0 %v28695_v0 }
 0x284   :  { %4547 = vmatmul.mubr.f32.vlgmr.msra.gmra.mrb[4].mxu1 %v29065_v33 }
 0x285   :  { %5021 = vmatpush1.msra.mxu1 %v5020_v9  ;;  %5084 = vmatprep.mubr.f32.mxu1 %v28695_v0 }
 0x286   :  { %5101 = vmatprep.subr.mxu1 %v5100_v56  ;;  %5012 = vmatmul.mubr.f32.vlgmr.msra.gmra.mrb[6].mxu0 %v29065_v33 }
 0x287   :  { %6438 = vmatprep.mubr.f32.mxu0 %v28695_v0 }
 0x288   :  { %5090 = vmatmul.mubr.f32.vlgmr.msra.gmra.mrb[6].mxu1 %v29109_v28 }
 0x289   :  { %5107 = vmatpush1.msra.mxu1 %v5106_v30  ;;  %5170 = vmatprep.mubr.f32.mxu1 %v28695_v0 }
 0x28a   :  { %5180 = vmatprep.subr.mxu1 %v5097_v26 }
 0x290   :  { %5172 = vmatmul.mubr.f32.vlgmr.msra.gmra.mrb[6].mxu1 %v29065_v33 }
 0x291   :  { %5183 = vmatpush1.msra.mxu1 %v5103_v21  ;;  %5246 = vmatprep.mubr.f32.mxu1 %v28695_v0 }
 0x292   :  { %5256 = vmatprep.subr.mxu1 %v5018_v4 }
 0x298   :  { %5249 = vmatmul.mubr.f32.vlgmr.msra.gmra.mrb[6].mxu1 %v29077_v13 }
 0x299   :  { %5258 = vmatpush1.msra.mxu1 %v5020_v9  ;;  %5321 = vmatprep.mubr.f32.mxu1 %v28695_v0 }
 0x29a   :  { %5334 = vmatprep.subr.mxu1 %v5098_v18 }
 0x2a0   :  { %5325 = vmatmul.mubr.f32.vlgmr.msra.gmra.mrb[6].mxu1 %v29086_v59 }
 0x2a1   :  { %5338 = vmatpush1.msra.mxu1 %v5104_v35  ;;  %5401 = vmatprep.mubr.f32.mxu1 %v28695_v0 }
 0x2a2   :  { %5410 = vmatprep.subr.mxu1 %v5018_v4 }
 0x2a8   :  { %5403 = vmatmul.mubr.f32.vlgmr.msra.gmra.mrb[6].mxu1 %v29065_v33 }
 0x2a9   :  { %5412 = vmatpush1.msra.mxu1 %v5020_v9  ;;  %5475 = vmatprep.mubr.f32.mxu1 %v28695_v0 }
 0x2b0   :  { %5477 = vmatmul.mubr.f32.vlgmr.msra.gmra.mrb[6].mxu1 %v29065_v33 }
 0x2b1   :  { %6903 = vmatprep.mubr.f32.mxu1 %v28695_v0 }
 0x32d   :  { %v4083_v19 = vpop.f32.mrb[4].mxu0 }
 0x32e   :  { %v4085_v23 = vpop.f32.mrb[5].mxu0  ;;  %v5483_v16 = vmul.f32 %v4083_v19, %v29674_v45  ;;  %v28611_v45 = vld [vmem:[#allocation5 + $0x28] sm:$0xff] }
 0x32f   :  { %v5484_v27 = vmul.f32 %v4085_v23, %v29654_v25 }
 0x357   :  { %v4548_v52 = vpop.f32.mrb[4].mxu1 }
 0x358   :  { %v4550_v63 = vpop.f32.mrb[5].mxu1 }
 0x359   :  { %v5013_v22 = vpop.f32.mrb[6].mxu0 }
 0x35a   :  { %v5487_v24 = vmul.f32 %v5013_v22, %v29609_v29  ;;  %v5015_v6 = vpop.f32.mrb[7].mxu0 }
 0x35b   :  { %v5488_v53 = vmul.f32 %v5015_v6, %v29488_v44 }
 0x35c   :  { %v5491_v11 = vsub.f32 %v5483_v16, %v5487_v24  ;;  %v5485_v16 = vmul.f32 %v4548_v52, %v29741_v7  ;;  %v5486_v24 = vmul.f32 %v4550_v63, %v29631_v54 }
 0x35d   :  { %v5492_v5 = vsub.f32 %v5484_v27, %v5488_v53 }
 0x35e   :  { %v5495_v17 = vmul.f32 0.125, %v5491_v11 }
 0x35f   :  { %v5496_v47 = vmul.f32 0.125, %v5492_v5 }
 0x360   :  { %v5499_v41 = vadd.f32 %v5495_v17, %v29255_v49 }
 0x361   :  { %v5500_v55 = vadd.f32 %v5496_v47, %v29255_v49 }
 0x362   :  { %v5503_v37 = vmul.f32 0.01, %v5499_v41 }
 0x363   :  { %v5504_v20 = vmul.f32 0.01, %v5500_v55 }
 0x364   :  { %v5507_v58 = vadd.f32 %v28610_v60, %v5503_v37 }
 0x365   :  { %v5508_v51 = vadd.f32 %v28611_v45, %v5504_v20 }
 0x366   :  { %v5511_v29 = vmul.f32 0.15915494, %v5507_v58 }
 0x367   :  { %v5512_v14 = vmul.f32 0.15915494, %v5508_v51 }
 0x368   :  { %vm5515_vm6 = vcmp.lt.f32.partialorder %v5511_v29, 0.0  ;;  %v5519_v25 = vceil.f32 %v5511_v29  ;;  %v5523_v61 = vfloor.f32 %v5511_v29 }
 0x369   :  { %vm5516_vm7 = vcmp.lt.f32.partialorder %v5512_v14, 0.0  ;;  %v5520_v44 = vceil.f32 %v5512_v14  ;;  %v5524_v39 = vfloor.f32 %v5512_v14 }
 0x36a   :  { %v5527_v15 = vsel %vm5515_vm6, %v5519_v25, %v5523_v61 }
 0x36b   :  { %v5531_v2 = vmul.f32 6.2831855, %v5527_v15  ;;  %v5528_v46 = vsel %vm5516_vm7, %v5520_v44, %v5524_v39 }
 0x36c   :  { %v5532_v10 = vmul.f32 6.2831855, %v5528_v46 }
 0x36d   :  { %v29778_v62 = vsub.f32 %v5507_v58, %v5531_v2 }
 0x36e   :  { %v29780_v8 = vsub.f32 %v5508_v51, %v5532_v10 }
 0x36f   :  { %5540 = vst [vmem:[#allocation5 + $0x40] sm:$0xff] %v29778_v62  ;;  %v5547_v12 = vand.u32 2139095040, %v29778_v62  ;;  %v5544_v42 = vand.u32 2147483647, %v29778_v62 }
 0x370   :  { %5541 = vst [vmem:[#allocation5 + $0x48] sm:$0xff] %v29780_v8  ;;  %v5650_v1 = vand.u32 2139095040, %v29780_v8  ;;  %v5647_v50 = vand.u32 2147483647, %v29780_v8  ;;  %vm5649_vm6 = vcmp.lt.s32.totalorder %v29780_v8, 0 }
 0x371   :  { %v5548_v4 = vshrl.u32 %v5547_v12, 23  ;;  %v5551_v18 = vand.u32 8388607, %v5544_v42 }
 0x372   :  { %v5651_v9 = vshrl.u32 %v5650_v1, 23  ;;  %v5654_v21 = vand.u32 8388607, %v5647_v50 }
 0x373   :  { %v27617_v26 = vadd.s32 4294967169, %v5548_v4  ;;  %v5552_v30 = vor.u32 8388608, %v5551_v18 }
 0x374   :  { %v27621_v35 = vadd.s32 4294967169, %v5651_v9  ;;  %v5655_v56 = vor.u32 8388608, %v5654_v21 }
 0x375   :  { %v5554_v43 = vadd.s32 1, %v27617_v26  ;;  %v29800_v5 = vshll.u32 %v5552_v30, 8 }
 0x376   :  { %v5657_v31 = vadd.s32 1, %v27621_v35  ;;  %v29798_v11 = vshll.u32 %v5655_v56, 8 }
 0x377   :  { %vm5555_vm8 = vcmp.gt.s32.totalorder %v5554_v43, 0 }
 0x378   :  { %v5556_v19 = vsel %vm5555_vm8, %v5554_v43, 0  ;;  %vm5658_vm9 = vcmp.gt.s32.totalorder %v5657_v31, 0  ;;  %vm29909_vm8 = vcmp.le.f32.partialorder %v5647_v50, 0.7853982 }
 0x379   :  { %v29792_v23 = vand.u32 31, %v5556_v19  ;;  %v5659_v22 = vsel %vm5658_vm9, %v5657_v31, 0  ;;  %v29796_v27 = vshrl.u32 %v5556_v19, 5 }
 0x37a   :  { %v5661_v6 = vand.u32 31, %v5659_v22  ;;  %v5660_v53 = vshrl.u32 %v5659_v22, 5 }
 0x37b   :  { %v5559_v47 = vsub.s32 32, %v29792_v23  ;;  %v5561_v41 = vshll.u32 %v28696_v32, %v29792_v23  ;;  %v5564_v55 = vshll.u32 %v28697_v34, %v29792_v23  ;;  %v5567_v63 = vshll.u32 %v28698_v36, %v29792_v23 }
 0x37c   :  { %v5662_v17 = vsub.s32 32, %v5661_v6  ;;  %v5664_v7 = vshll.u32 %v28696_v32, %v5661_v6  ;;  %v5667_v54 = vshll.u32 %v28697_v34, %v5661_v6  ;;  %v5670_v52 = vshll.u32 %v28698_v36, %v5661_v6 }
 0x37d   :  { %v5673_v58 = vshll.u32 %v28699_v38, %v5661_v6  ;;  %v5676_v51 = vshll.u32 %v28700_v40, %v5661_v6  ;;  %vm5679_vm12 = vcmp.lt.s32.totalorder %v5660_v53, 1  ;;  %vm5680_vm15 = vcmp.lt.s32.totalorder %v5660_v53, 2 }
 0x37e   :  { %v5665_v37 = vshrl.u32 %v28697_v34, %v5662_v17  ;;  %v5668_v20 = vshrl.u32 %v28698_v36, %v5662_v17  ;;  %v5671_v60 = vshrl.u32 %v28699_v38, %v5662_v17  ;;  %v5674_v45 = vshrl.u32 %v28700_v40, %v5662_v17 }
 0x37f   :  { %v5677_v29 = vshrl.u32 %v28701_v48, %v5662_v17  ;;  %v5663_v44 = vshrl.u32 %v28696_v32, %v5662_v17  ;;  %vm5682_vm10 = vcmp.lt.s32.totalorder %v5660_v53, 4  ;;  %vm5681_vm13 = vcmp.lt.s32.totalorder %v5660_v53, 3 }
 0x380   :  { %v5666_v14 = vor.u32 %v5665_v37, %v5664_v7  ;;  %v5669_v25 = vor.u32 %v5668_v20, %v5667_v54  ;;  %v5672_v61 = vor.u32 %v5671_v60, %v5670_v52  ;;  %v5675_v39 = vor.u32 %v5674_v45, %v5673_v58 }
 0x381   :  { %v5678_v15 = vor.u32 %v5677_v29, %v5676_v51  ;;  %v5562_v9 = vshrl.u32 %v28697_v34, %v5559_v47  ;;  %v5565_v26 = vshrl.u32 %v28698_v36, %v5559_v47  ;;  %v5560_v54 = vshrl.u32 %v28696_v32, %v5559_v47 }
 0x382   :  { %v5684_v2 = vsel %vm5682_vm10, %v5672_v61, 2102212464  ;;  %v5687_v46 = vsel %vm5679_vm12, %v5666_v14, %v5669_v25  ;;  %v5691_v10 = vsel %vm5679_vm12, %v5669_v25, %v5672_v61  ;;  %v5688_v1 = vsel %vm5682_vm10, %v5675_v39, 920167782 }
 0x383   :  { %v5478_v12 = vpop.f32.mrb[6].mxu1  ;;  %v5692_v4 = vsel %vm5682_vm10, %v5678_v15, 1326507024  ;;  %v5683_v35 = vsel %vm5679_vm12, %v5663_v44, %v5666_v14  ;;  %v5689_v43 = vsel %vm5681_vm13, %v5672_v61, %v5688_v1  ;;  %v5685_v30 = vsel %vm5681_vm13, %v5669_v25, %v5684_v2 }
 0x384   :  { %v5489_v21 = vmul.f32 %v5478_v12, %v29709_v3  ;;  %v5480_v18 = vpop.f32.mrb[7].mxu1  ;;  %v5693_v31 = vsel %vm5681_vm13, %v5675_v39, %v5692_v4  ;;  %v5690_v19 = vsel %vm5680_vm15, %v5687_v46, %v5689_v43  ;;  %v5686_v60 = vsel %vm5680_vm15, %v5683_v35, %v5685_v30  ;;  %v28612_v46 = vld [vmem:[#allocation5 + $0x30] sm:$0xff]  ;;  %v28613_v12 = vld [vmem:[#allocation5 + $0x38] sm:$0xff] }
 0x385   :  { %v5490_v56 = vmul.f32 %v5480_v18, %v29618_v57  ;;  %v5694_v22 = vsel %vm5680_vm15, %v5691_v10, %v5693_v31  ;;  %v29835_v52 = vmul.u32.u64.low %v29798_v11, %v5690_v19  ;;  %v29836_v37 = vmul.u32.u64.high %v29798_v11, %v5690_v19, %v29835_v52 }
 0x386   :  { %v5493_v6 = vsub.f32 %v5485_v16, %v5489_v21  ;;  %v29830_v17 = vmul.u32.u64.low %v29798_v11, %v5694_v22  ;;  %v29831_v7 = vmul.u32.u64.high %v29798_v11, %v5694_v22, %v29830_v17  ;;  %v5568_v57 = vshrl.u32 %v28699_v38, %v5559_v47 }
 0x387   :  { %v5494_v3 = vsub.f32 %v5486_v24, %v5490_v56  ;;  %v5570_v16 = vshll.u32 %v28699_v38, %v29792_v23  ;;  %v5571_v58 = vshrl.u32 %v28700_v40, %v5559_v47  ;;  %v5563_v51 = vor.u32 %v5562_v9, %v5561_v41 }
 0x388   :  { %v5497_v20 = vmul.f32 0.125, %v5493_v6  ;;  %v5566_v29 = vor.u32 %v5565_v26, %v5564_v55  ;;  %v5574_v24 = vshrl.u32 %v28701_v48, %v5559_v47  ;;  %vm5704_vm0 = vc.u32 %v29831_v7, %v29835_v52 }
 0x389   :  { %v5498_v45 = vmul.f32 0.125, %v5494_v3  ;;  %v5572_v25 = vor.u32 %v5571_v58, %v5570_v16  ;;  %v5573_v53 = vshll.u32 %v28700_v40, %v29792_v23  ;;  %v5702_v44 = vmul.u32 %v29798_v11, %v5686_v60 }
 0x38a   :  { %v5501_v14 = vadd.f32 %v5497_v20, %v29255_v49  ;;  %v5705_v39 = vadd.s32 1, %v29836_v37  ;;  %v5569_v15 = vor.u32 %v5568_v57, %v5567_v63  ;;  %vm5576_vm14 = vcmp.lt.s32.totalorder %v29796_v27, 1 }
 0x38b   :  { %v5502_v61 = vadd.f32 %v5498_v45, %v29255_v49  ;;  %v5575_v55 = vor.u32 %v5574_v24, %v5573_v53  ;;  %vm5577_vm11 = vcmp.lt.s32.totalorder %v29796_v27, 2  ;;  %vm5579_vm1 = vcmp.lt.s32.totalorder %v29796_v27, 4 }
 0x38c   :  { %v5505_v41 = vmul.f32 0.01, %v5501_v14  ;;  %v5706_v2 = vsel %vm5704_vm0, %v5705_v39, %v29836_v37  ;;  %v5584_v23 = vsel %vm5576_vm14, %v5563_v51, %v5566_v29  ;;  %vm5578_vm2 = vcmp.lt.s32.totalorder %v29796_v27, 3 }
 0x38d   :  { %v5506_v47 = vmul.f32 0.01, %v5502_v61  ;;  %v5707_v11 = vadd.s32 %v5706_v2, %v5702_v44  ;;  %v5585_v63 = vsel %vm5579_vm1, %v5572_v25, 920167782  ;;  %v5581_v4 = vsel %vm5579_vm1, %v5569_v15, 2102212464 }
 0x38e   :  { %v5509_v10 = vadd.f32 %v28612_v46, %v5505_v41  ;;  %v5586_v9 = vsel %vm5578_vm2, %v5569_v15, %v5585_v63  ;;  %v5588_v26 = vsel %vm5576_vm14, %v5566_v29, %v5569_v15  ;;  %v5589_v43 = vsel %vm5579_vm1, %v5575_v55, 1326507024 }
 0x38f   :  { %v5510_v1 = vadd.f32 %v28613_v12, %v5506_v47  ;;  %v5708_v18 = vadd.s32 536870912, %v5707_v11  ;;  %v5587_v35 = vsel %vm5577_vm11, %v5584_v23, %v5586_v9  ;;  %v5590_v56 = vsel %vm5578_vm2, %v5572_v25, %v5589_v43 }
 0x390   :  { %v5513_v21 = vmul.f32 0.15915494, %v5509_v10  ;;  %v29869_v30 = vmul.u32.u64.low %v29800_v5, %v5587_v35  ;;  %v29870_v19 = vmul.u32.u64.high %v29800_v5, %v5587_v35, %v29869_v30  ;;  %v5591_v57 = vsel %vm5577_vm11, %v5588_v26, %v5590_v56 }
 0x391   :  { %v5514_v31 = vmul.f32 0.15915494, %v5510_v1  ;;  %v5709_v17 = vshrl.u32 %v5708_v18, 30  ;;  %v5580_v16 = vsel %vm5576_vm14, %v5560_v54, %v5563_v51  ;;  %v5582_v58 = vsel %vm5578_vm2, %v5566_v29, %v5581_v4 }
 0x392   :  { %vm5517_vm3 = vcmp.lt.f32.partialorder %v5513_v21, 0.0  ;;  %v5521_v22 = vceil.f32 %v5513_v21  ;;  %v5525_v6 = vfloor.f32 %v5513_v21  ;;  %v5583_v41 = vsel %vm5577_vm11, %v5580_v16, %v5582_v58 }
 0x393   :  { %vm5518_vm4 = vcmp.lt.f32.partialorder %v5514_v31, 0.0  ;;  %v5522_v3 = vceil.f32 %v5514_v31  ;;  %v5526_v37 = vfloor.f32 %v5514_v31  ;;  %v5710_v60 = vshll.u32 %v5709_v17, 30 }
 0x394   :  { %v5529_v20 = vsel %vm5517_vm3, %v5521_v22, %v5525_v6  ;;  %v29880_v14 = vmul.u32.u64.low %v29800_v5, %v5591_v57  ;;  %v29881_v25 = vmul.u32.u64.high %v29800_v5, %v5591_v57, %v29880_v14  ;;  %v5602_v54 = vadd.s32 1, %v29870_v19 }
 0x395   :  { %v5533_v45 = vmul.f32 6.2831855, %v5529_v20  ;;  %v5530_v24 = vsel %vm5518_vm4, %v5522_v3, %v5526_v37  ;;  %v5711_v61 = vsub.s32 %v5707_v11, %v5710_v60  ;;  %v5599_v27 = vmul.u32 %v29800_v5, %v5583_v41 }
 0x396   :  { %v5534_v53 = vmul.f32 6.2831855, %v5530_v24  ;;  %vm5601_vm5 = vc.u32 %v29881_v25, %v29869_v30  ;;  %v5703_v43 = vadd.s32 %v29835_v52, %v29831_v7  ;;  %vm5739_vm4 = vweird.f32 %v29780_v8 }
 0x397   :  { %v29883_v44 = vsub.f32 %v5509_v10, %v5533_v45  ;;  %v5713_v15 = vsub.s32 0, %v5711_v61  ;;  %v5733_v10 = vsub.s32 4, %v5709_v17  ;;  %v5603_v11 = vsel %vm5601_vm5, %v5602_v54, %v29870_v19 }
 0x398   :  { %v29885_v39 = vsub.f32 %v5510_v1, %v5534_v53  ;;  %v29901_v1 = vadd.s32 %v5603_v11, %v5599_v27  ;;  %vm5546_vm5 = vcmp.lt.s32.totalorder %v29778_v62, 0 }
 0x399   :  { %5542 = vst [vmem:[#allocation5 + $0x50] sm:$0xff] %v29883_v44  ;;  %v5753_v51 = vand.u32 2139095040, %v29883_v44  ;;  %v27622_v55 = vmin.u32 %v5713_v15, %v5711_v61  ;;  %v5734_v5 = vsel %vm5649_vm6, %v5733_v10, %v5709_v17  ;;  %v5750_v20 = vand.u32 2147483647, %v29883_v44 }
 0x39a   :  { %5543 = vst [vmem:[#allocation5 + $0x58] sm:$0xff] %v29885_v39  ;;  %v5856_v29 = vand.u32 2139095040, %v29885_v39  ;;  %v5853_v2 = vand.u32 2147483647, %v29885_v39  ;;  %v5605_v21 = vadd.s32 536870912, %v29901_v1  ;;  %v29919_v17 = vsel %vm29909_vm8, 0, %v5734_v5 }
 0x39b   :  { %v5754_v47 = vshrl.u32 %v5753_v51, 23  ;;  %v5715_v46 = vclz %v27622_v55 }
 0x39c   :  { %v5857_v23 = vshrl.u32 %v5856_v29, 23  ;;  %v5860_v12 = vand.u32 8388607, %v5853_v2  ;;  %v29915_v22 = vshrl.u32 %v5605_v21, 30 }
 0x39d   :  { %v27625_v63 = vadd.s32 4294967169, %v5754_v47  ;;  %v27623_v9 = vadd.s32 4294967294, %v5715_v46 }
 0x39e   :  { %v27629_v4 = vadd.s32 4294967169, %v5857_v23  ;;  %v5861_v56 = vor.u32 8388608, %v5860_v12  ;;  %v5607_v14 = vshll.u32 %v29915_v22, 30 }
 0x39f   :  { %v5760_v26 = vadd.s32 1, %v27625_v63  ;;  %vm27624_vm7 = vcmp.lt.s32.totalorder %v27623_v9, 0 }
 0x3a0   :  { %v5863_v18 = vadd.s32 1, %v27629_v4  ;;  %v5718_v31 = vsel %vm27624_vm7, 0, %v27623_v9  ;;  %v29924_v16 = vshll.u32 %v5861_v56, 8 }
 0x3a1   :  { %vm5761_vm9 = vcmp.gt.s32.totalorder %v5760_v26, 0  ;;  %v5719_v19 = vsub.s32 32, %v5718_v31  ;;  %v5723_v3 = vsub.s32 4294967266, %v5718_v31  ;;  %v5720_v37 = vshll.u32 %v5711_v61, %v5718_v31 }
 0x3a2   :  { %vm5864_vm12 = vcmp.gt.s32.totalorder %v5863_v18, 0  ;;  %v29922_v60 = vsel %vm5761_vm9, %v5760_v26, 0 }
 0x3a3   :  { %v5865_v6 = vsel %vm5864_vm12, %v5863_v18, 0  ;;  %v5721_v57 = vshrl.u32 %v5703_v43, %v5719_v19  ;;  %v5724_v52 = vadd.s32 127, %v5723_v3  ;;  %v29939_v3 = vsub.s32 %v29901_v1, %v5607_v14 }
 0x3a4   :  { %v5867_v50 = vand.u32 31, %v5865_v6  ;;  %v5866_v7 = vshrl.u32 %v5865_v6, 5 }
 0x3a5   :  { %v5722_v58 = vor.u32 %v5721_v57, %v5720_v37  ;;  %v5725_v53 = vshll.u32 %v5724_v52, 23 }
 0x3a6   :  { %v5868_v45 = vsub.s32 32, %v5867_v50  ;;  %v5870_v24 = vshll.u32 %v28696_v32, %v5867_v50  ;;  %v5873_v15 = vshll.u32 %v28697_v34, %v5867_v50  ;;  %v5876_v61 = vshll.u32 %v28698_v36, %v5867_v50 }
 0x3a7   :  { %v5879_v41 = vshll.u32 %v28699_v38, %v5867_v50  ;;  %v5729_v54 = vcvt.s32.f32 %v5722_v58  ;;  %v5882_v55 = vshll.u32 %v28700_v40, %v5867_v50  ;;  %v5726_v47 = vor.u32 4788187, %v5725_v53 }
 0x3a8   :  { %v5871_v51 = vshrl.u32 %v28697_v34, %v5868_v45  ;;  %v5874_v29 = vshrl.u32 %v28698_v36, %v5868_v45  ;;  %v5877_v27 = vshrl.u32 %v28699_v38, %v5868_v45  ;;  %v5880_v23 = vshrl.u32 %v28700_v40, %v5868_v45 }
 0x3a9   :  { %v5883_v46 = vshrl.u32 %v28701_v48, %v5868_v45  ;;  %v5869_v10 = vshrl.u32 %v28696_v32, %v5868_v45  ;;  %vm5885_vm15 = vcmp.lt.s32.totalorder %v5866_v7, 1  ;;  %v5727_v12 = vand.u32 2147483647, %v5726_v47 }
 0x3aa   :  { %v5872_v11 = vor.u32 %v5871_v51, %v5870_v24  ;;  %v5875_v63 = vor.u32 %v5874_v29, %v5873_v15  ;;  %v5878_v4 = vor.u32 %v5877_v27, %v5876_v61  ;;  %v5881_v9 = vor.u32 %v5880_v23, %v5879_v41 }
 0x3ab   :  { %v5884_v26 = vor.u32 %v5883_v46, %v5882_v55  ;;  %vm5886_vm10 = vcmp.lt.s32.totalorder %v5866_v7, 2  ;;  %vm5887_vm13 = vcmp.lt.s32.totalorder %v5866_v7, 3  ;;  %vm5888_vm0 = vcmp.lt.s32.totalorder %v5866_v7, 4 }
 0x3ac   :  { %v5893_v21 = vsel %vm5885_vm15, %v5872_v11, %v5875_v63  ;;  %v5730_v18 = vmul.f32 %v5729_v54, %v5727_v12  ;;  %v5890_v5 = vsel %vm5888_vm0, %v5878_v4, 2102212464  ;;  %v5894_v43 = vsel %vm5888_vm0, %v5881_v9, 920167782 }
 0x3ad   :  { %v5897_v31 = vsel %vm5885_vm15, %v5875_v63, %v5878_v4  ;;  %v5889_v56 = vsel %vm5885_vm15, %v5869_v10, %v5872_v11  ;;  %v5895_v19 = vsel %vm5887_vm13, %v5878_v4, %v5894_v43  ;;  %v5898_v6 = vsel %vm5888_vm0, %v5884_v26, 1326507024 }
 0x3ae   :  { %v5731_v50 = vxor.u32 2147483648, %v5730_v18  ;;  %v5891_v37 = vsel %vm5887_vm13, %v5875_v63, %v5890_v5  ;;  %v5896_v57 = vsel %vm5886_vm10, %v5893_v21, %v5895_v19  ;;  %v5899_v52 = vsel %vm5887_vm13, %v5881_v9, %v5898_v6 }
 0x3af   :  { %v5764_v58 = vand.u32 31, %v29922_v60  ;;  %v5900_v45 = vsel %vm5886_vm10, %v5897_v31, %v5899_v52  ;;  %v29945_v24 = vmul.u32.u64.low %v29924_v16, %v5896_v57  ;;  %v29946_v53 = vmul.u32.u64.high %v29924_v16, %v5896_v57, %v29945_v24 }
 0x3b0   :  { %v5732_v15 = vsel %vm5649_vm6, %v5731_v50, %v5730_v18  ;;  %v29952_v1 = vmul.u32.u64.low %v29924_v16, %v5900_v45  ;;  %v29953_v14 = vmul.u32.u64.high %v29924_v16, %v5900_v45, %v29952_v1  ;;  %v5610_v61 = vsub.s32 0, %v29939_v3 }
 0x3b1   :  { %v5735_v41 = vsel %vm29909_vm8, %v29780_v8, %v5732_v15  ;;  %v5892_v54 = vsel %vm5886_vm10, %v5889_v56, %v5891_v37  ;;  %v29961_v51 = vand.u32 3, %v29919_v17  ;;  %v5911_v55 = vadd.s32 1, %v29946_v53 }
 0x3b2   :  { %28478 = vcosq.f32 %v5735_v41  ;;  %v27618_v29 = vmin.u32 %v5610_v61, %v29939_v3  ;;  %v5765_v47 = vsub.s32 32, %v5764_v58  ;;  %v6153_v27 = vadd.s32 3, %v29919_v17 }
 0x3b3   :  { %28480 = vsinq.f32 %v5735_v41  ;;  %v5908_v23 = vmul.u32 %v29924_v16, %v5892_v54  ;;  %vm5910_vm14 = vc.u32 %v29953_v14, %v29945_v24  ;;  %v29971_v7 = vand.u32 8388607, %v5750_v20 }
 0x3b4   :  { %v5612_v35 = vclz %v27618_v29  ;;  %v5912_v46 = vsel %vm5910_vm14, %v5911_v55, %v29946_v53  ;;  %vm5745_vm11 = vcmp.eq.s32.totalorder %v29961_v51, 2  ;;  %v5600_v11 = vadd.s32 %v29869_v30, %v29881_v25 }
 0x3b5   :  { %v5913_v10 = vadd.s32 %v5912_v46, %v5908_v23  ;;  %v29978_v17 = vshrl.u32 %v29922_v60, 5  ;;  %vm5742_vm1 = vcmp.eq.s32.totalorder %v29961_v51, 0  ;;  %v5630_v16 = vsub.s32 4, %v29915_v22 }
 0x3b6   :  { %v27619_v63 = vadd.s32 4294967294, %v5612_v35  ;;  %v5768_v12 = vshrl.u32 %v28697_v34, %v5765_v47  ;;  %v29983_v4 = vand.u32 3, %v6153_v27  ;;  %vm5741_vm2 = vcmp.lt.s32.totalorder %v29961_v51, 2 }
 0x3b7   :  { %v5914_v9 = vadd.s32 536870912, %v5913_v10  ;;  %v5758_v26 = vor.u32 8388608, %v29971_v7  ;;  %v5766_v30 = vshrl.u32 %v28696_v32, %v5765_v47  ;;  %v5767_v60 = vshll.u32 %v28696_v32, %v5764_v58 }
 0x3b8   :  { %vm27620_vm3 = vcmp.lt.s32.totalorder %v27619_v63, 0  ;;  %v5771_v21 = vshrl.u32 %v28698_v36, %v5765_v47  ;;  %v5777_v18 = vshrl.u32 %v28700_v40, %v5765_v47  ;;  %v5774_v56 = vshrl.u32 %v28699_v38, %v5765_v47 }
 0x3b9   :  { %v5615_v25 = vsel %vm27620_vm3, 0, %v27619_v63  ;;  %v29992_v5 = vshrl.u32 %v5914_v9, 30  ;;  %v5769_v19 = vor.u32 %v5768_v12, %v5767_v60  ;;  %v5770_v6 = vshll.u32 %v28697_v34, %v5764_v58 }
 0x3ba   :  { %v5616_v43 = vsub.s32 32, %v5615_v25  ;;  %v5620_v31 = vsub.s32 4294967266, %v5615_v25  ;;  %v5773_v50 = vshll.u32 %v28698_v36, %v5764_v58  ;;  %v5776_v37 = vshll.u32 %v28699_v38, %v5764_v58 }
 0x3bb   :  { %v5916_v52 = vshll.u32 %v29992_v5, 30  ;;  %v5780_v15 = vshrl.u32 %v28701_v48, %v5765_v47  ;;  %v5617_v41 = vshll.u32 %v29939_v3, %v5615_v25  ;;  %v5779_v29 = vshll.u32 %v28700_v40, %v5764_v58 }
 0x3bc   :  { %v29998_v57 = vpop.eup %28478  ;;  %v5618_v45 = vshrl.u32 %v5600_v11, %v5616_v43  ;;  %v5621_v53 = vadd.s32 127, %v5620_v31  ;;  %v5778_v54 = vor.u32 %v5777_v18, %v5776_v37  ;;  %v5772_v23 = vor.u32 %v5771_v21, %v5770_v6 }
 0x3bd   :  { %v30002_v1 = vpop.eup %28480  ;;  %v5746_v61 = vxor.u32 2147483648, %v29998_v57  ;;  %v30008_v27 = vsub.s32 %v5913_v10, %v5916_v52  ;;  %v5775_v35 = vor.u32 %v5774_v56, %v5773_v50  ;;  %vm5782_vm6 = vcmp.lt.s32.totalorder %v29978_v17, 1 }
 0x3be   :  { %v5743_v55 = vxor.u32 2147483648, %v30002_v1  ;;  %v5619_v7 = vor.u32 %v5618_v45, %v5617_v41  ;;  %v5622_v46 = vshll.u32 %v5621_v53, 23  ;;  %v5781_v10 = vor.u32 %v5780_v15, %v5779_v29 }
 0x3bf   :  { %v5747_v47 = vsel %vm5745_vm11, %v5746_v61, %v30002_v1  ;;  %v5919_v58 = vsub.s32 0, %v30008_v27  ;;  %vm5785_vm7 = vcmp.lt.s32.totalorder %v29978_v17, 4  ;;  %vm30026_vm8 = vcmp.le.f32.partialorder %v5544_v42, 0.7853982 }
 0x3c0   :  { %v5744_v3 = vsel %vm5742_vm1, %v29998_v57, %v5743_v55  ;;  %v5623_v12 = vor.u32 4788187, %v5622_v46  ;;  %vm5784_vm9 = vcmp.lt.s32.totalorder %v29978_v17, 3  ;;  %v5791_v9 = vsel %vm5785_vm7, %v5778_v54, 920167782 }
 0x3c1   :  { %v5748_v11 = vsel %vm5741_vm2, %v5744_v3, %v5747_v47  ;;  %v27630_v60 = vmin.u32 %v5919_v58, %v30008_v27  ;;  %v5787_v51 = vsel %vm5785_vm7, %v5775_v35, 2102212464  ;;  %v5790_v42 = vsel %vm5782_vm6, %v5769_v19, %v5772_v23 }
 0x3c2   :  { %v30035_v25 = vsel %vm5739_vm4, nan, %v5748_v11  ;;  %v5624_v18 = vand.u32 2147483647, %v5623_v12  ;;  %v5626_v43 = vcvt.s32.f32 %v5619_v7  ;;  %v5792_v31 = vsel %vm5784_vm9, %v5775_v35, %v5791_v9 }
 0x3c3   :  { %v30043_v21 = vand.u32 4294901760, %v30035_v25  ;;  %v5921_v56 = vclz %v27630_v60  ;;  %vm5783_vm12 = vcmp.lt.s32.totalorder %v29978_v17, 2  ;;  %v5794_v6 = vsel %vm5782_vm6, %v5772_v23, %v5775_v35 }
 0x3c4   :  { %v5795_v50 = vsel %vm5785_vm7, %v5781_v10, 1326507024  ;;  %v5627_v37 = vmul.f32 %v5626_v43, %v5624_v18  ;;  %v5793_v52 = vsel %vm5783_vm12, %v5790_v42, %v5792_v31  ;;  %v5798_v53 = vshll.u32 %v5758_v26, 8 }
 0x3c5   :  { %6373 = vmatprep.subr.mxu0 %v30043_v21  ;;  %v5796_v45 = vsel %vm5784_vm9, %v5778_v54, %v5795_v50  ;;  %v27631_v15 = vadd.s32 4294967294, %v5921_v56  ;;  %v5786_v41 = vsel %vm5782_vm6, %v5766_v30, %v5769_v19  ;;  %v5788_v29 = vsel %vm5784_vm9, %v5772_v23, %v5787_v51 }
 0x3c6   :  { %v5797_v35 = vsel %vm5783_vm12, %v5794_v6, %v5796_v45  ;;  %v5628_v47 = vxor.u32 2147483648, %v5627_v37  ;;  %v5631_v7 = vsel %vm5546_vm5, %v5630_v16, %v29915_v22  ;;  %v5909_v26 = vadd.s32 %v29945_v24, %v29953_v14 }
 0x3c7   :  { %v30068_v46 = vmul.u32.u64.low %v5798_v53, %v5797_v35  ;;  %v30069_v54 = vmul.u32.u64.high %v5798_v53, %v5797_v35, %v30068_v46  ;;  %vm27632_vm15 = vcmp.lt.s32.totalorder %v27631_v15, 0  ;;  %v5789_v58 = vsel %vm5783_vm12, %v5786_v41, %v5788_v29 }
 0x3c8   :  { %v30073_v30 = vmul.u32.u64.low %v5798_v53, %v5793_v52  ;;  %v30074_v19 = vmul.u32.u64.high %v5798_v53, %v5793_v52, %v30073_v30  ;;  %v5924_v23 = vsel %vm27632_vm15, 0, %v27631_v15  ;;  %v5629_v3 = vsel %vm5546_vm5, %v5628_v47, %v5627_v37 }
 0x3c9   :  { %vm6156_vm10 = vcmp.eq.s32.totalorder %v29983_v4, 0  ;;  %v5925_v22 = vsub.s32 32, %v5924_v23  ;;  %v5929_v16 = vsub.s32 4294967266, %v5924_v23  ;;  %v5632_v24 = vsel %vm30026_vm8, %v29778_v62, %v5629_v3 }
 0x3ca   :  { %v6158_v14 = vsel %vm6156_vm10, %v29998_v57, %v5743_v55  ;;  %v5926_v10 = vshll.u32 %v30008_v27, %v5924_v23  ;;  %28482 = vcosq.f32 %v5632_v24  ;;  %vm5807_vm13 = vc.u32 %v30069_v54, %v30073_v30 }
 0x3cb   :  { %vm6159_vm0 = vcmp.eq.s32.totalorder %v29983_v4, 2  ;;  %v5927_v17 = vshrl.u32 %v5909_v26, %v5925_v22  ;;  %v5930_v11 = vadd.s32 127, %v5929_v16  ;;  %28484 = vsinq.f32 %v5632_v24 }
 0x3cc   :  { %v5808_v12 = vadd.s32 1, %v30074_v19  ;;  %v5805_v9 = vmul.u32 %v5798_v53, %v5789_v58  ;;  %vm6155_vm14 = vcmp.lt.s32.totalorder %v29983_v4, 2  ;;  %v6161_v55 = vsel %vm6159_vm0, %v5746_v61, %v30002_v1 }
 0x3cd   :  { %v5928_v60 = vor.u32 %v5927_v17, %v5926_v10  ;;  %v5931_v27 = vshll.u32 %v5930_v11, 23  ;;  %v30096_v42 = vsel %vm6155_vm14, %v6158_v14, %v6161_v55  ;;  %v30100_v18 = vsel %vm30026_vm8, 0, %v5631_v7 }
 0x3ce   :  { %v5809_v51 = vsel %vm5807_vm13, %v5808_v12, %v30074_v19  ;;  %v30104_v31 = vsub.f32 %v30035_v25, %v30043_v21  ;;  %v5637_v1 = vand.u32 3, %v30100_v18  ;;  %v5939_v61 = vsub.s32 4, %v29992_v5 }
 0x3cf   :  { %v5810_v43 = vadd.s32 %v5809_v51, %v5805_v9  ;;  %v5932_v4 = vor.u32 4788187, %v5931_v27  ;;  %v5935_v57 = vcvt.s32.f32 %v5928_v60  ;;  %vm5855_vm11 = vcmp.lt.s32.totalorder %v29885_v39, 0 }
 0x3d0   :  { %v6452_v37 = vand.u32 4294901760, %v30104_v31  ;;  %vm5642_vm1 = vcmp.eq.s32.totalorder %v5637_v1, 2  ;;  %v5940_v29 = vsel %vm5855_vm11, %v5939_v61, %v29992_v5  ;;  %vm5854_vm2 = vcmp.le.f32.partialorder %v5853_v2, 0.7853982 }
 0x3d1   :  { %v5811_v56 = vadd.s32 536870912, %v5810_v43  ;;  %v5933_v6 = vand.u32 2147483647, %v5932_v4  ;;  %vm5639_vm3 = vcmp.eq.s32.totalorder %v5637_v1, 0  ;;  %vm5638_vm5 = vcmp.lt.s32.totalorder %v5637_v1, 2 }
 0x3d2   :  { %v6453_v7 = vsub.f32 %v30104_v31, %v6452_v37  ;;  %v5942_v3 = vsel %vm5854_vm2, 0, %v5940_v29  ;;  %vm5636_vm6 = vweird.f32 %v29778_v62  ;;  %v5806_v51 = vadd.s32 %v30073_v30, %v30069_v54 }
 0x3d3   :  { %v30108_v50 = vshrl.u32 %v5811_v56, 30  ;;  %v5936_v63 = vmul.f32 %v5935_v57, %v5933_v6  ;;  %v6361_v17 = vadd.s32 3, %v5942_v3  ;;  %v5946_v12 = vand.u32 3, %v5942_v3 }
 0x3d4   :  { %v30111_v52 = vpop.eup %28482  ;;  %v6454_v16 = vand.u32 4294901760, %v6453_v7  ;;  %vm5945_vm8 = vweird.f32 %v29885_v39  ;;  %vm30174_vm14 = vcmp.le.f32.partialorder %v5750_v20, 0.7853982 }
 0x3d5   :  { %v5813_v45 = vshll.u32 %v30108_v50, 30  ;;  %v30114_v53 = vpop.eup %28484  ;;  %v5937_v15 = vxor.u32 2147483648, %v5936_v63  ;;  %v5643_v41 = vxor.u32 2147483648, %v30111_v52  ;;  %v6362_v27 = vand.u32 3, %v6361_v17 }
 0x3d6   :  { %v5640_v35 = vxor.u32 2147483648, %v30114_v53  ;;  %vm5948_vm9 = vcmp.eq.s32.totalorder %v5946_v12, 0  ;;  %vm5951_vm12 = vcmp.eq.s32.totalorder %v5946_v12, 2  ;;  %vm5947_vm13 = vcmp.lt.s32.totalorder %v5946_v12, 2 }
 0x3d7   :  { %v5814_v47 = vsub.s32 %v5810_v43, %v5813_v45  ;;  %v5938_v46 = vsel %vm5855_vm11, %v5937_v15, %v5936_v63  ;;  %v5644_v26 = vsel %vm5642_vm1, %v5643_v41, %v30114_v53  ;;  %vm6364_vm15 = vcmp.eq.s32.totalorder %v6362_v27, 0 }
 0x3d8   :  { %v5941_v19 = vsel %vm5854_vm2, %v29885_v39, %v5938_v46  ;;  %v5641_v5 = vsel %vm5639_vm3, %v30111_v52, %v5640_v35  ;;  %vm6367_vm10 = vcmp.eq.s32.totalorder %v6362_v27, 2  ;;  %vm6363_vm0 = vcmp.lt.s32.totalorder %v6362_v27, 2 }
 0x3d9   :  { %v5816_v23 = vsub.s32 0, %v5814_v47  ;;  %28486 = vcosq.f32 %v5941_v19  ;;  %v5645_v58 = vsel %vm5638_vm5, %v5641_v5, %v5644_v26  ;;  %vm5752_vm11 = vcmp.lt.s32.totalorder %v29883_v44, 0 }
 0x3da   :  { %28488 = vsinq.f32 %v5941_v19  ;;  %v30135_v2 = vsel %vm5636_vm6, nan, %v5645_v58 }
 0x3db   :  { %v27626_v22 = vmin.u32 %v5816_v23, %v5814_v47  ;;  %v30138_v24 = vand.u32 4294901760, %v30135_v2  ;;  %v6049_v23 = vadd.s32 3, %v30100_v18 }
 0x3dd   :  { %v5818_v14 = vclz %v27626_v22  ;;  %6375 = vmatpush1.msra.mxu0 %v30138_v24  ;;  %v30143_v10 = vsub.f32 %v30135_v2, %v30138_v24  ;;  %v6050_v17 = vand.u32 3, %v6049_v23 }
 0x3de   :  { %6444 = vmatmul.mubr.f32.vlgmr.msra.gmra.mrb[8].mxu0 %v29109_v28  ;;  %6455 = vmatprep.subr.mxu0 %v6454_v16 }
 0x3df   :  { %v27627_v11 = vadd.s32 4294967294, %v5818_v14  ;;  %v6458_v9 = vand.u32 4294901760, %v30143_v10  ;;  %6524 = vmatprep.mubr.f32.mxu0 %v28695_v0  ;;  %vm6052_vm1 = vcmp.eq.s32.totalorder %v6050_v17, 0  ;;  %vm6055_vm2 = vcmp.eq.s32.totalorder %v6050_v17, 2 }
 0x3e0   :  { %v6057_v27 = vsel %vm6055_vm2, %v5643_v41, %v30114_v53  ;;  %vm6051_vm3 = vcmp.lt.s32.totalorder %v6050_v17, 2 }
 0x3e1   :  { %vm27628_vm7 = vcmp.lt.s32.totalorder %v27627_v11, 0  ;;  %v6459_v60 = vsub.f32 %v30143_v10, %v6458_v9 }
 0x3e2   :  { %v5821_v55 = vsel %vm27628_vm7, 0, %v27627_v11  ;;  %vm5842_vm7 = vweird.f32 %v29883_v44 }
 0x3e3   :  { %v5822_v43 = vsub.s32 32, %v5821_v55  ;;  %v5826_v4 = vsub.s32 4294967266, %v5821_v55  ;;  %v28487_v56 = vpop.eup %28486  ;;  %v6460_v6 = vand.u32 4294901760, %v6459_v60  ;;  %v5823_v61 = vshll.u32 %v5814_v47, %v5821_v55 }
 0x3e4   :  { %v28489_v57 = vpop.eup %28488  ;;  %v5952_v1 = vxor.u32 2147483648, %v28487_v56  ;;  %v5836_v55 = vsub.s32 4, %v30108_v50  ;;  %v6054_v60 = vsel %vm6052_vm1, %v30111_v52, %v5640_v35 }
 0x3e5   :  { %v5824_v63 = vshrl.u32 %v5806_v51, %v5822_v43  ;;  %v5827_v45 = vadd.s32 127, %v5826_v4  ;;  %v5949_v15 = vxor.u32 2147483648, %v28489_v57  ;;  %6461 = vmatpush1.msra.mxu0 %v6460_v6  ;;  %v6058_v51 = vsel %vm6051_vm3, %v6054_v60, %v6057_v27 }
 0x3e6   :  { %v5953_v29 = vsel %vm5951_vm12, %v5952_v1, %v28489_v57  ;;  %6526 = vmatmul.mubr.f32.vlgmr.msra.gmra.mrb[8].mxu0 %v29065_v33  ;;  %6534 = vmatprep.subr.mxu0 %v30104_v31  ;;  %v6369_v30 = vsel %vm6367_vm10, %v5952_v1, %v28489_v57  ;;  %v5837_v31 = vsel %vm5752_vm11, %v5836_v55, %v30108_v50  ;;  %v30214_v8 = vsel %vm5636_vm6, nan, %v6058_v51 }
 0x3e7   :  { %v5825_v7 = vor.u32 %v5824_v63, %v5823_v61  ;;  %v5828_v54 = vshll.u32 %v5827_v45, 23  ;;  %v5950_v46 = vsel %vm5948_vm9, %v28487_v56, %v5949_v15  ;;  %6537 = vmatpush1.msra.mxu0 %v30143_v10  ;;  %6600 = vmatprep.mubr.f32.mxu0 %v28695_v0  ;;  %v6366_v47 = vsel %vm6364_vm15, %v28487_v56, %v5949_v15 }
 0x3e8   :  { %v5954_v26 = vsel %vm5947_vm13, %v5950_v46, %v5953_v29  ;;  %6610 = vmatprep.subr.mxu0 %v30043_v21  ;;  %v30160_v5 = vsel %vm6363_vm0, %v6366_v47, %v6369_v30  ;;  %v5839_v52 = vsel %vm30174_vm14, 0, %v5837_v31  ;;  %v30219_v41 = vand.u32 4294901760, %v30214_v8 }
 0x3e9   :  { %v5829_v19 = vor.u32 4788187, %v5828_v54  ;;  %v30165_v3 = vsel %vm5945_vm8, nan, %v5954_v26  ;;  %v5832_v16 = vcvt.s32.f32 %v5825_v7  ;;  %v6257_v23 = vadd.s32 3, %v5839_v52 }
 0x3ea   :  { %v30168_v58 = vand.u32 4294901760, %v30165_v3  ;;  %v30271_v17 = vsel %vm5945_vm8, nan, %v30160_v5 }
 0x3eb   :  { %v5830_v22 = vand.u32 2147483647, %v5829_v19  ;;  %v7767_v18 = vand.u32 4294901760, %v30271_v17 }
 0x3ec   :  { %6838 = vmatprep.subr.mxu1 %v30168_v58  ;;  %v30201_v43 = vsub.f32 %v30165_v3, %v30168_v58 }
 0x3ed   :  { %v5833_v14 = vmul.f32 %v5832_v16, %v5830_v22  ;;  %v6258_v22 = vand.u32 3, %v6257_v23  ;;  %v7846_v5 = vsub.f32 %v30271_v17, %v7767_v18 }
 0x3ee   :  { %6603 = vmatmul.mubr.f32.vlgmr.msra.gmra.mrb[8].mxu0 %v29077_v13  ;;  %v6917_v53 = vand.u32 4294901760, %v30201_v43 }
 0x3ef   :  { %v5834_v11 = vxor.u32 2147483648, %v5833_v14  ;;  %6612 = vmatpush1.msra.mxu0 %v30138_v24  ;;  %6675 = vmatprep.mubr.f32.mxu0 %v28695_v0  ;;  %vm6260_vm9 = vcmp.eq.s32.totalorder %v6258_v22, 0  ;;  %vm6263_vm12 = vcmp.eq.s32.totalorder %v6258_v22, 2  ;;  %vm6259_vm15 = vcmp.lt.s32.totalorder %v6258_v22, 2 }
 0x3f0   :  { %6688 = vmatprep.subr.mxu0 %v6452_v37  ;;  %v30197_v37 = vsel %vm5739_vm4, nan, %v30096_v42  ;;  %v5843_v42 = vand.u32 3, %v5839_v52  ;;  %v6918_v56 = vsub.f32 %v30201_v43, %v6917_v53 }
 0x3f1   :  { %v5835_v12 = vsel %vm5752_vm11, %v5834_v11, %v5833_v14  ;;  %v30210_v50 = vand.u32 4294901760, %v30197_v37 }
 0x3f2   :  { %v5838_v20 = vsel %vm30174_vm14, %v29883_v44, %v5835_v12  ;;  %vm5848_vm4 = vcmp.eq.s32.totalorder %v5843_v42, 2  ;;  %vm5845_vm5 = vcmp.eq.s32.totalorder %v5843_v42, 0  ;;  %vm5844_vm6 = vcmp.lt.s32.totalorder %v5843_v42, 2 }
 0x3f3   :  { %28490 = vcosq.f32 %v5838_v20  ;;  %v30223_v35 = vsub.f32 %v30197_v37, %v30210_v50  ;;  %v6919_v45 = vand.u32 4294901760, %v6918_v56  ;;  %v7847_v44 = vand.u32 4294901760, %v7846_v5 }
 0x3f4   :  { %28492 = vsinq.f32 %v5838_v20 }
 0x3f5   :  { %v7382_v57 = vand.u32 4294901760, %v30223_v35  ;;  %v7848_v20 = vsub.f32 %v7846_v5, %v7847_v44 }
 0x3f6   :  { %6679 = vmatmul.mubr.f32.vlgmr.msra.gmra.mrb[8].mxu0 %v29086_v59 }
 0x3f7   :  { %6692 = vmatpush1.msra.mxu0 %v6458_v9  ;;  %6755 = vmatprep.mubr.f32.mxu0 %v28695_v0  ;;  %v7383_v29 = vsub.f32 %v30223_v35, %v7382_v57  ;;  %v7849_v27 = vand.u32 4294901760, %v7848_v20 }
 0x3f8   :  { %6764 = vmatprep.subr.mxu0 %v30043_v21  ;;  %v30232_v21 = vsub.f32 %v30214_v8, %v30219_v41 }
 0x3f9   :  { %v7384_v46 = vand.u32 4294901760, %v7383_v29 }
 0x3fa   :  { %v7388_v15 = vand.u32 4294901760, %v30232_v21 }
 0x3fc   :  { %v7389_v54 = vsub.f32 %v30232_v21, %v7388_v15 }
 0x3fd   :  { %v30225_v10 = vpop.eup %28490 }
 0x3fe   :  { %v28493_v9 = vpop.eup %28492  ;;  %v5849_v4 = vxor.u32 2147483648, %v30225_v10  ;;  %6757 = vmatmul.mubr.f32.vlgmr.msra.gmra.mrb[8].mxu0 %v29065_v33  ;;  %v7390_v26 = vand.u32 4294901760, %v7389_v54 }
 0x3ff   :  { %v5846_v62 = vxor.u32 2147483648, %v28493_v9  ;;  %6766 = vmatpush1.msra.mxu0 %v30138_v24  ;;  %6829 = vmatprep.mubr.f32.mxu0 %v28695_v0 }
 0x400   :  { %v5850_v6 = vsel %vm5848_vm4, %v5849_v4, %v28493_v9  ;;  %7303 = vmatprep.subr.mxu0 %v30210_v50  ;;  %v6265_v14 = vsel %vm6263_vm12, %v5849_v4, %v28493_v9 }
 0x401   :  { %v5847_v1 = vsel %vm5845_vm5, %v30225_v10, %v5846_v62  ;;  %v6262_v16 = vsel %vm6260_vm9, %v30225_v10, %v5846_v62 }
 0x402   :  { %v5851_v61 = vsel %vm5844_vm6, %v5847_v1, %v5850_v6  ;;  %v6266_v11 = vsel %vm6259_vm15, %v6262_v16, %v6265_v14 }
 0x403   :  { %v30242_v63 = vsel %vm5842_vm7, nan, %v5851_v61  ;;  %v30280_v12 = vsel %vm5842_vm7, nan, %v6266_v11 }
 0x404   :  { %v6839_v24 = vand.u32 4294901760, %v30242_v63  ;;  %v7769_v39 = vand.u32 4294901760, %v30280_v12 }
 0x406   :  { %6840 = vmatpush1.msra.mxu1 %v6839_v24  ;;  %v6922_v7 = vsub.f32 %v30242_v63, %v6839_v24  ;;  %6831 = vmatmul.mubr.f32.vlgmr.msra.gmra.mrb[8].mxu0 %v29065_v33  ;;  %v7852_v55 = vsub.f32 %v30280_v12, %v7769_v39 }
 0x407   :  { %6909 = vmatmul.mubr.f32.vlgmr.msra.gmra.mrb[8].mxu1 %v29109_v28  ;;  %6920 = vmatprep.subr.mxu1 %v6919_v45  ;;  %v28614_v45 = vld [vmem:[#allocation5 + $0x40] sm:$0xff] }
 0x408   :  { %v6923_v30 = vand.u32 4294901760, %v6922_v7  ;;  %6989 = vmatprep.mubr.f32.mxu1 %v28695_v0  ;;  %7305 = vmatpush1.msra.mxu0 %v30219_v41 }
 0x409   :  { %7368 = vmatprep.mubr.f32.mxu0 %v28695_v0  ;;  %7385 = vmatprep.subr.mxu0 %v7384_v46 }
 0x40a   :  { %v6924_v47 = vsub.f32 %v6922_v7, %v6923_v30  ;;  %7374 = vmatmul.mubr.f32.vlgmr.msra.gmra.mrb[10].mxu0 %v29109_v28 }
 0x40b   :  { %7391 = vmatpush1.msra.mxu0 %v7390_v26  ;;  %7454 = vmatprep.mubr.f32.mxu0 %v28695_v0 }
 0x40c   :  { %v6925_v19 = vand.u32 4294901760, %v6924_v47  ;;  %7464 = vmatprep.subr.mxu0 %v30223_v35 }
 0x40e   :  { %6926 = vmatpush1.msra.mxu1 %v6925_v19 }
 0x40f   :  { %6991 = vmatmul.mubr.f32.vlgmr.msra.gmra.mrb[8].mxu1 %v29065_v33  ;;  %6999 = vmatprep.subr.mxu1 %v30201_v43 }
 0x410   :  { %7002 = vmatpush1.msra.mxu1 %v6922_v7  ;;  %7065 = vmatprep.mubr.f32.mxu1 %v28695_v0 }
 0x411   :  { %7075 = vmatprep.subr.mxu1 %v30168_v58 }
 0x412   :  { %7456 = vmatmul.mubr.f32.vlgmr.msra.gmra.mrb[10].mxu0 %v29065_v33 }
 0x413   :  { %7467 = vmatpush1.msra.mxu0 %v30232_v21  ;;  %7530 = vmatprep.mubr.f32.mxu0 %v28695_v0 }
 0x414   :  { %7540 = vmatprep.subr.mxu0 %v30210_v50 }
 0x417   :  { %7068 = vmatmul.mubr.f32.vlgmr.msra.gmra.mrb[8].mxu1 %v29077_v13 }
 0x418   :  { %7077 = vmatpush1.msra.mxu1 %v6839_v24  ;;  %7140 = vmatprep.mubr.f32.mxu1 %v28695_v0 }
 0x419   :  { %7153 = vmatprep.subr.mxu1 %v6917_v53 }
 0x41a   :  { %7533 = vmatmul.mubr.f32.vlgmr.msra.gmra.mrb[10].mxu0 %v29077_v13 }
 0x41b   :  { %7542 = vmatpush1.msra.mxu0 %v30219_v41  ;;  %7605 = vmatprep.mubr.f32.mxu0 %v28695_v0 }
 0x41c   :  { %7618 = vmatprep.subr.mxu0 %v7382_v57 }
 0x41f   :  { %7144 = vmatmul.mubr.f32.vlgmr.msra.gmra.mrb[8].mxu1 %v29086_v59 }
 0x420   :  { %7157 = vmatpush1.msra.mxu1 %v6923_v30  ;;  %7220 = vmatprep.mubr.f32.mxu1 %v28695_v0 }
 0x421   :  { %7229 = vmatprep.subr.mxu1 %v30168_v58  ;;  %v7853_v58 = vand.u32 4294901760, %v7852_v55 }
 0x422   :  { %7609 = vmatmul.mubr.f32.vlgmr.msra.gmra.mrb[10].mxu0 %v29086_v59 }
 0x423   :  { %7622 = vmatpush1.msra.mxu0 %v7388_v15  ;;  %7685 = vmatprep.mubr.f32.mxu0 %v28695_v0  ;;  %v7854_v60 = vsub.f32 %v7852_v55, %v7853_v58 }
 0x424   :  { %7694 = vmatprep.subr.mxu0 %v30210_v50 }
 0x425   :  { %v7855_v31 = vand.u32 4294901760, %v7854_v60 }
 0x427   :  { %7222 = vmatmul.mubr.f32.vlgmr.msra.gmra.mrb[8].mxu1 %v29065_v33 }
 0x428   :  { %7231 = vmatpush1.msra.mxu1 %v6839_v24  ;;  %7294 = vmatprep.mubr.f32.mxu1 %v28695_v0 }
 0x429   :  { %7768 = vmatprep.subr.mxu1 %v7767_v18 }
 0x42a   :  { %7687 = vmatmul.mubr.f32.vlgmr.msra.gmra.mrb[10].mxu0 %v29065_v33 }
 0x42b   :  { %7696 = vmatpush1.msra.mxu0 %v30219_v41  ;;  %7759 = vmatprep.mubr.f32.mxu0 %v28695_v0 }
 0x42f   :  { %7296 = vmatmul.mubr.f32.vlgmr.msra.gmra.mrb[8].mxu1 %v29065_v33 }
 0x430   :  { %7770 = vmatpush1.msra.mxu1 %v7769_v39  ;;  %7833 = vmatprep.mubr.f32.mxu1 %v28695_v0 }
 0x431   :  { %7850 = vmatprep.subr.mxu1 %v7849_v27 }
 0x432   :  { %7761 = vmatmul.mubr.f32.vlgmr.msra.gmra.mrb[10].mxu0 %v29065_v33 }
 0x433   :  { %7839 = vmatmul.mubr.f32.vlgmr.msra.gmra.mrb[10].mxu1 %v29109_v28  ;;  %9187 = vmatprep.mubr.f32.mxu0 %v28695_v0 }
 0x434   :  { %7856 = vmatpush1.msra.mxu1 %v7855_v31  ;;  %7919 = vmatprep.mubr.f32.mxu1 %v28695_v0 }
 0x435   :  { %7929 = vmatprep.subr.mxu1 %v7846_v5 }
 0x43b   :  { %7921 = vmatmul.mubr.f32.vlgmr.msra.gmra.mrb[10].mxu1 %v29065_v33 }
 0x43c   :  { %7932 = vmatpush1.msra.mxu1 %v7852_v55  ;;  %7995 = vmatprep.mubr.f32.mxu1 %v28695_v0 }
 0x43d   :  { %8005 = vmatprep.subr.mxu1 %v7767_v18 }
 0x443   :  { %7998 = vmatmul.mubr.f32.vlgmr.msra.gmra.mrb[10].mxu1 %v29077_v13 }
 0x444   :  { %8007 = vmatpush1.msra.mxu1 %v7769_v39  ;;  %8070 = vmatprep.mubr.f32.mxu1 %v28695_v0 }
 0x445   :  { %8083 = vmatprep.subr.mxu1 %v7847_v44 }
 0x44b   :  { %8074 = vmatmul.mubr.f32.vlgmr.msra.gmra.mrb[10].mxu1 %v29086_v59 }
 0x44c   :  { %8087 = vmatpush1.msra.mxu1 %v7853_v58  ;;  %8150 = vmatprep.mubr.f32.mxu1 %v28695_v0 }
 0x44d   :  { %8159 = vmatprep.subr.mxu1 %v7767_v18 }
 0x453   :  { %8152 = vmatmul.mubr.f32.vlgmr.msra.gmra.mrb[10].mxu1 %v29065_v33 }
 0x454   :  { %8161 = vmatpush1.msra.mxu1 %v7769_v39  ;;  %8224 = vmatprep.mubr.f32.mxu1 %v28695_v0 }
 0x45b   :  { %8226 = vmatmul.mubr.f32.vlgmr.msra.gmra.mrb[10].mxu1 %v29065_v33 }
 0x45c   :  { %9652 = vmatprep.mubr.f32.mxu1 %v28695_v0 }
 0x4d9   :  { %v6832_v51 = vpop.f32.mrb[8].mxu0 }
 0x4da   :  { %v6834_v43 = vpop.f32.mrb[9].mxu0  ;;  %v8232_v53 = vmul.f32 %v6832_v51, %v30214_v8  ;;  %v28615_v8 = vld [vmem:[#allocation5 + $0x48] sm:$0xff] }
 0x4db   :  { %v8233_v10 = vmul.f32 %v6834_v43, %v30197_v37 }
 0x502   :  { %v7297_v52 = vpop.f32.mrb[8].mxu1 }
 0x503   :  { %v7299_v50 = vpop.f32.mrb[9].mxu1  ;;  %v8234_v51 = vmul.f32 %v7297_v52, %v30280_v12 }
 0x504   :  { %v8235_v43 = vmul.f32 %v7299_v50, %v30271_v17 }
 0x505   :  { %v7762_v42 = vpop.f32.mrb[10].mxu0 }
 0x506   :  { %v8236_v41 = vmul.f32 %v7762_v42, %v30135_v2  ;;  %v7764_v35 = vpop.f32.mrb[11].mxu0 }
 0x507   :  { %v8237_v9 = vmul.f32 %v7764_v35, %v30035_v25 }
 0x508   :  { %v8240_v4 = vsub.f32 %v8232_v53, %v8236_v41 }
 0x509   :  { %v8241_v62 = vsub.f32 %v8233_v10, %v8237_v9 }
 0x50a   :  { %v8244_v56 = vmul.f32 0.125, %v8240_v4 }
 0x50b   :  { %v8245_v21 = vmul.f32 0.125, %v8241_v62 }
 0x50c   :  { %v8248_v6 = vadd.f32 %v8244_v56, %v29255_v49 }
 0x50d   :  { %v8249_v57 = vadd.f32 %v8245_v21, %v29255_v49 }
 0x50e   :  { %v8252_v1 = vmul.f32 0.01, %v8248_v6 }
 0x50f   :  { %v8253_v61 = vmul.f32 0.01, %v8249_v57 }
 0x510   :  { %v8256_v15 = vadd.f32 %v28614_v45, %v8252_v1 }
 0x511   :  { %v8257_v24 = vadd.f32 %v28615_v8, %v8253_v61 }
 0x512   :  { %v8260_v2 = vmul.f32 0.15915494, %v8256_v15 }
 0x513   :  { %v8261_v29 = vmul.f32 0.15915494, %v8257_v24 }
 0x514   :  { %vm8264_vm8 = vcmp.lt.f32.partialorder %v8260_v2, 0.0  ;;  %v8268_v37 = vceil.f32 %v8260_v2  ;;  %v8272_v7 = vfloor.f32 %v8260_v2 }
 0x515   :  { %vm8265_vm10 = vcmp.lt.f32.partialorder %v8261_v29, 0.0  ;;  %v8269_v25 = vceil.f32 %v8261_v29  ;;  %v8273_v54 = vfloor.f32 %v8261_v29 }
 0x516   :  { %v8276_v30 = vsel %vm8264_vm8, %v8268_v37, %v8272_v7 }
 0x517   :  { %v8280_v46 = vmul.f32 6.2831855, %v8276_v30  ;;  %v8277_v47 = vsel %vm8265_vm10, %v8269_v25, %v8273_v54 }
 0x518   :  { %v8281_v26 = vmul.f32 6.2831855, %v8277_v47 }
 0x519   :  { %v30317_v19 = vsub.f32 %v8256_v15, %v8280_v46 }
 0x51a   :  { %v30319_v23 = vsub.f32 %v8257_v24, %v8281_v26 }
 0x51b   :  { %8289 = vst [vmem:[#allocation5 + $0x60] sm:$0xff] %v30317_v19  ;;  %v8296_v22 = vand.u32 2139095040, %v30317_v19  ;;  %v8293_v10 = vand.u32 2147483647, %v30317_v19 }
 0x51c   :  { %8290 = vst [vmem:[#allocation5 + $0x68] sm:$0xff] %v30319_v23  ;;  %v8399_v16 = vand.u32 2139095040, %v30319_v23  ;;  %v8396_v14 = vand.u32 2147483647, %v30319_v23  ;;  %vm8398_vm6 = vcmp.lt.s32.totalorder %v30319_v23, 0 }
 0x51d   :  { %v8297_v11 = vshrl.u32 %v8296_v22, 23 }
 0x51e   :  { %v8400_v18 = vshrl.u32 %v8399_v16, 23  ;;  %v8403_v55 = vand.u32 8388607, %v8396_v14  ;;  %vm30409_vm12 = vcmp.le.f32.partialorder %v8396_v14, 0.7853982 }
 0x51f   :  { %v27649_v39 = vadd.s32 4294967169, %v8297_v11 }
 0x520   :  { %v27653_v5 = vadd.s32 4294967169, %v8400_v18  ;;  %v8404_v20 = vor.u32 8388608, %v8403_v55 }
 0x521   :  { %v8303_v44 = vadd.s32 1, %v27649_v39 }
 0x522   :  { %v8406_v58 = vadd.s32 1, %v27653_v5  ;;  %v30332_v35 = vshll.u32 %v8404_v20, 8 }
 0x523   :  { %vm8304_vm13 = vcmp.gt.s32.totalorder %v8303_v44, 0 }
 0x524   :  { %vm8407_vm0 = vcmp.gt.s32.totalorder %v8406_v58, 0  ;;  %v8305_v60 = vsel %vm8304_vm13, %v8303_v44, 0 }
 0x525   :  { %v8408_v27 = vsel %vm8407_vm0, %v8406_v58, 0  ;;  %v30330_v53 = vand.u32 31, %v8305_v60 }
 0x526   :  { %v8410_v31 = vand.u32 31, %v8408_v27  ;;  %v8409_v42 = vshrl.u32 %v8408_v27, 5 }
 0x528   :  { %v8411_v41 = vsub.s32 32, %v8410_v31  ;;  %v8413_v9 = vshll.u32 %v28696_v32, %v8410_v31  ;;  %v8416_v4 = vshll.u32 %v28697_v34, %v8410_v31  ;;  %v8419_v62 = vshll.u32 %v28698_v36, %v8410_v31 }
 0x529   :  { %v8422_v56 = vshll.u32 %v28699_v38, %v8410_v31  ;;  %v8425_v50 = vshll.u32 %v28700_v40, %v8410_v31  ;;  %vm8428_vm14 = vcmp.lt.s32.totalorder %v8409_v42, 1  ;;  %vm8429_vm11 = vcmp.lt.s32.totalorder %v8409_v42, 2 }
 0x52a   :  { %v8414_v12 = vshrl.u32 %v28697_v34, %v8411_v41  ;;  %v8417_v17 = vshrl.u32 %v28698_v36, %v8411_v41  ;;  %v8420_v52 = vshrl.u32 %v28699_v38, %v8411_v41  ;;  %v8423_v6 = vshrl.u32 %v28700_v40, %v8411_v41 }
 0x52b   :  { %v8426_v57 = vshrl.u32 %v28701_v48, %v8411_v41  ;;  %vm8431_vm1 = vcmp.lt.s32.totalorder %v8409_v42, 4  ;;  %v8412_v7 = vshrl.u32 %v28696_v32, %v8411_v41  ;;  %vm8430_vm2 = vcmp.lt.s32.totalorder %v8409_v42, 3 }
 0x52c   :  { %v8415_v45 = vor.u32 %v8414_v12, %v8413_v9  ;;  %v8418_v15 = vor.u32 %v8417_v17, %v8416_v4  ;;  %v8421_v8 = vor.u32 %v8420_v52, %v8419_v62  ;;  %v8424_v2 = vor.u32 %v8423_v6, %v8422_v56  ;;  %v28616_v62 = vld [vmem:[#allocation5 + $0x50] sm:$0xff]  ;;  %v28617_v52 = vld [vmem:[#allocation5 + $0x58] sm:$0xff] }
 0x52d   :  { %v8427_v29 = vor.u32 %v8426_v57, %v8425_v50  ;;  %v8308_v41 = vsub.s32 32, %v30330_v53  ;;  %v30366_v4 = vshrl.u32 %v8305_v60, 5  ;;  %v30371_v17 = vand.u32 8388607, %v8293_v10 }
 0x52e   :  { %v8227_v21 = vpop.f32.mrb[10].mxu1  ;;  %v8433_v25 = vsel %vm8431_vm1, %v8421_v8, 2102212464  ;;  %v8436_v54 = vsel %vm8428_vm14, %v8415_v45, %v8418_v15  ;;  %v8437_v46 = vsel %vm8431_vm1, %v8424_v2, 920167782  ;;  %v8432_v26 = vsel %vm8428_vm14, %v8412_v7, %v8415_v45 }
 0x52f   :  { %v8238_v1 = vmul.f32 %v8227_v21, %v30242_v63  ;;  %v8229_v61 = vpop.f32.mrb[11].mxu1  ;;  %v8440_v63 = vsel %vm8428_vm14, %v8418_v15, %v8421_v8  ;;  %v8438_v22 = vsel %vm8430_vm2, %v8421_v8, %v8437_v46  ;;  %v8441_v16 = vsel %vm8431_vm1, %v8427_v29, 1326507024 }
 0x530   :  { %v8239_v24 = vmul.f32 %v8229_v61, %v30165_v3  ;;  %v8434_v11 = vsel %vm8430_vm2, %v8418_v15, %v8433_v25  ;;  %v8439_v18 = vsel %vm8429_vm11, %v8436_v54, %v8438_v22  ;;  %v8442_v39 = vsel %vm8430_vm2, %v8424_v2, %v8441_v16 }
 0x531   :  { %v8242_v37 = vsub.f32 %v8234_v51, %v8238_v1  ;;  %v8443_v55 = vsel %vm8429_vm11, %v8440_v63, %v8442_v39  ;;  %v30355_v44 = vmul.u32.u64.low %v30332_v35, %v8439_v18  ;;  %v30356_v58 = vmul.u32.u64.high %v30332_v35, %v8439_v18, %v30355_v44 }
 0x532   :  { %v8243_v30 = vsub.f32 %v8235_v43, %v8239_v24  ;;  %v30361_v27 = vmul.u32.u64.low %v30332_v35, %v8443_v55  ;;  %v30362_v31 = vmul.u32.u64.high %v30332_v35, %v8443_v55, %v30361_v27  ;;  %v8435_v43 = vsel %vm8429_vm11, %v8432_v26, %v8434_v11 }
 0x533   :  { %v8246_v47 = vmul.f32 0.125, %v8242_v37  ;;  %v8454_v12 = vadd.s32 1, %v30356_v58  ;;  %v8451_v21 = vmul.u32 %v30332_v35, %v8435_v43  ;;  %v8313_v42 = vshll.u32 %v28697_v34, %v30330_v53 }
 0x534   :  { %v8247_v3 = vmul.f32 0.125, %v8243_v30  ;;  %vm8453_vm3 = vc.u32 %v30362_v31, %v30355_v44  ;;  %v8314_v57 = vshrl.u32 %v28698_v36, %v8308_v41  ;;  %v8317_v1 = vshrl.u32 %v28699_v38, %v8308_v41 }
 0x535   :  { %v8250_v5 = vadd.f32 %v8246_v47, %v29255_v49  ;;  %v8455_v6 = vsel %vm8453_vm3, %v8454_v12, %v30356_v58  ;;  %v8320_v15 = vshrl.u32 %v28700_v40, %v8308_v41  ;;  %v8323_v8 = vshrl.u32 %v28701_v48, %v8308_v41 }
 0x536   :  { %v8251_v20 = vadd.f32 %v8247_v3, %v29255_v49  ;;  %v8456_v45 = vadd.s32 %v8455_v6, %v8451_v21  ;;  %v8322_v2 = vshll.u32 %v28700_v40, %v30330_v53  ;;  %v8311_v54 = vshrl.u32 %v28697_v34, %v8308_v41 }
 0x537   :  { %v8254_v51 = vmul.f32 0.01, %v8250_v5  ;;  %v8316_v30 = vshll.u32 %v28698_v36, %v30330_v53  ;;  %v8319_v46 = vshll.u32 %v28699_v38, %v30330_v53  ;;  %v8301_v3 = vor.u32 8388608, %v30371_v17 }
 0x538   :  { %v8255_v9 = vmul.f32 0.01, %v8251_v20  ;;  %v8457_v7 = vadd.s32 536870912, %v8456_v45  ;;  %v8324_v22 = vor.u32 %v8323_v8, %v8322_v2  ;;  %v8310_v11 = vshll.u32 %v28696_v32, %v30330_v53 }
 0x539   :  { %v8258_v56 = vadd.f32 %v28616_v62, %v8254_v51  ;;  %v8318_v18 = vor.u32 %v8317_v1, %v8316_v30  ;;  %v8315_v55 = vor.u32 %v8314_v57, %v8313_v42  ;;  %v8321_v58 = vor.u32 %v8320_v15, %v8319_v46 }
 0x53a   :  { %v8259_v50 = vadd.f32 %v28617_v52, %v8255_v9  ;;  %v8458_v26 = vshrl.u32 %v8457_v7, 30  ;;  %v8309_v27 = vshrl.u32 %v28696_v32, %v8308_v41  ;;  %v8312_v51 = vor.u32 %v8311_v54, %v8310_v11 }
 0x53b   :  { %v8262_v60 = vmul.f32 0.15915494, %v8258_v56  ;;  %vm8328_vm7 = vcmp.lt.s32.totalorder %v30366_v4, 4  ;;  %vm8325_vm9 = vcmp.lt.s32.totalorder %v30366_v4, 1  ;;  %vm8327_vm15 = vcmp.lt.s32.totalorder %v30366_v4, 3 }
 0x53c   :  { %v8263_v61 = vmul.f32 0.15915494, %v8259_v50  ;;  %v8459_v5 = vshll.u32 %v8458_v26, 30  ;;  %v8338_v9 = vsel %vm8328_vm7, %v8324_v22, 1326507024  ;;  %v8337_v21 = vsel %vm8325_vm9, %v8315_v55, %v8318_v18 }
 0x53d   :  { %vm8266_vm4 = vcmp.lt.f32.partialorder %v8262_v60, 0.0  ;;  %v8270_v35 = vceil.f32 %v8262_v60  ;;  %v8274_v24 = vfloor.f32 %v8262_v60  ;;  %v8330_v12 = vsel %vm8328_vm7, %v8318_v18, 2102212464 }
 0x53e   :  { %vm8267_vm5 = vcmp.lt.f32.partialorder %v8263_v61, 0.0  ;;  %v8271_v29 = vceil.f32 %v8263_v61  ;;  %v8275_v37 = vfloor.f32 %v8263_v61  ;;  %v30402_v53 = vsub.s32 %v8456_v45, %v8459_v5 }
 0x53f   :  { %v8278_v25 = vsel %vm8266_vm4, %v8270_v35, %v8274_v24  ;;  %v8482_v60 = vsub.s32 4, %v8458_v26  ;;  %v8339_v6 = vsel %vm8327_vm15, %v8321_v58, %v8338_v9  ;;  %vm8326_vm8 = vcmp.lt.s32.totalorder %v30366_v4, 2 }
 0x540   :  { %v8282_v63 = vmul.f32 6.2831855, %v8278_v25  ;;  %v8279_v47 = vsel %vm8267_vm5, %v8271_v29, %v8275_v37  ;;  %v8462_v52 = vsub.s32 0, %v30402_v53  ;;  %v8329_v61 = vsel %vm8325_vm9, %v8309_v27, %v8312_v51 }
 0x541   :  { %v8283_v16 = vmul.f32 6.2831855, %v8279_v47  ;;  %v8331_v15 = vsel %vm8327_vm15, %v8315_v55, %v8330_v12  ;;  %v8333_v8 = vsel %vm8325_vm9, %v8312_v51, %v8315_v55  ;;  %v8340_v37 = vsel %vm8326_vm8, %v8337_v21, %v8339_v6 }
 0x542   :  { %v30393_v39 = vsub.f32 %v8258_v56, %v8282_v63  ;;  %v27654_v1 = vmin.u32 %v8462_v52, %v30402_v53  ;;  %v8452_v25 = vadd.s32 %v30355_v44, %v30362_v31  ;;  %v8483_v54 = vsel %vm8398_vm6, %v8482_v60, %v8458_v26 }
 0x543   :  { %v30396_v20 = vsub.f32 %v8259_v50, %v8283_v16  ;;  %v8334_v50 = vsel %vm8328_vm7, %v8321_v58, 920167782  ;;  %v30438_v30 = vshll.u32 %v8301_v3, 8  ;;  %v30442_v63 = vsel %vm8326_vm8, %v8329_v61, %v8331_v15 }
 0x544   :  { %8291 = vst [vmem:[#allocation5 + $0x70] sm:$0xff] %v30393_v39  ;;  %v8502_v43 = vand.u32 2139095040, %v30393_v39  ;;  %v8335_v35 = vsel %vm8327_vm15, %v8318_v18, %v8334_v50  ;;  %v8464_v2 = vclz %v27654_v1  ;;  %v30454_v26 = vsel %vm30409_vm12, 0, %v8483_v54 }
 0x545   :  { %8292 = vst [vmem:[#allocation5 + $0x78] sm:$0xff] %v30396_v20  ;;  %v8605_v62 = vand.u32 2139095040, %v30396_v20  ;;  %v8602_v56 = vand.u32 2147483647, %v30396_v20  ;;  %v8336_v47 = vsel %vm8326_vm8, %v8333_v8, %v8335_v35  ;;  %v8499_v41 = vand.u32 2147483647, %v30393_v39 }
 0x546   :  { %v8503_v17 = vshrl.u32 %v8502_v43, 23  ;;  %v27655_v46 = vadd.s32 4294967294, %v8464_v2  ;;  %v30449_v16 = vmul.u32.u64.low %v30438_v30, %v8340_v37  ;;  %v30450_v44 = vmul.u32.u64.high %v30438_v30, %v8340_v37, %v30449_v16 }
 0x547   :  { %v8606_v42 = vshrl.u32 %v8605_v62, 23  ;;  %v8609_v14 = vand.u32 8388607, %v8602_v56  ;;  %v30459_v4 = vmul.u32.u64.low %v30438_v30, %v8336_v47  ;;  %v30460_v5 = vmul.u32.u64.high %v30438_v30, %v8336_v47, %v30459_v4 }
 0x548   :  { %v27657_v57 = vadd.s32 4294967169, %v8503_v17  ;;  %vm27656_vm0 = vcmp.lt.s32.totalorder %v27655_v46, 0  ;;  %vm8488_vm9 = vweird.f32 %v30319_v23 }
 0x549   :  { %v27661_v45 = vadd.s32 4294967169, %v8606_v42  ;;  %v8610_v29 = vor.u32 8388608, %v8609_v14  ;;  %v8467_v18 = vsel %vm27656_vm0, 0, %v27655_v46  ;;  %vm8350_vm3 = vc.u32 %v30450_v44, %v30459_v4 }
 0x54a   :  { %v8509_v24 = vadd.s32 1, %v27657_v57  ;;  %v8468_v27 = vsub.s32 32, %v8467_v18  ;;  %v8472_v51 = vsub.s32 4294967266, %v8467_v18  ;;  %v8469_v43 = vshll.u32 %v30402_v53, %v8467_v18 }
 0x54b   :  { %v8612_v7 = vadd.s32 1, %v27661_v45  ;;  %v30456_v3 = vshll.u32 %v8610_v29, 8 }
 0x54c   :  { %vm8510_vm10 = vcmp.gt.s32.totalorder %v8509_v24, 0  ;;  %v8470_v17 = vshrl.u32 %v8452_v25, %v8468_v27  ;;  %v8473_v52 = vadd.s32 127, %v8472_v51 }
 0x54d   :  { %v30446_v22 = vsel %vm8510_vm10, %v8509_v24, 0  ;;  %vm8613_vm13 = vcmp.gt.s32.totalorder %v8612_v7, 0 }
 0x54e   :  { %v8614_v31 = vsel %vm8613_vm13, %v8612_v7, 0  ;;  %v30464_v55 = vand.u32 31, %v30446_v22  ;;  %v8471_v53 = vor.u32 %v8470_v17, %v8469_v43  ;;  %v8474_v57 = vshll.u32 %v8473_v52, 23 }
 0x54f   :  { %v8616_v11 = vand.u32 31, %v8614_v31  ;;  %v8615_v58 = vshrl.u32 %v8614_v31, 5 }
 0x550   :  { %v8475_v24 = vor.u32 4788187, %v8474_v57  ;;  %v8478_v37 = vcvt.s32.f32 %v8471_v53  ;;  %v8489_v57 = vand.u32 3, %v30454_v26 }
 0x551   :  { %v8617_v9 = vsub.s32 32, %v8616_v11  ;;  %v8619_v62 = vshll.u32 %v28696_v32, %v8616_v11  ;;  %v8622_v12 = vshll.u32 %v28697_v34, %v8616_v11  ;;  %v8625_v50 = vshll.u32 %v28698_v36, %v8616_v11 }
 0x552   :  { %v8628_v21 = vshll.u32 %v28699_v38, %v8616_v11  ;;  %v8631_v6 = vshll.u32 %v28700_v40, %v8616_v11  ;;  %vm8634_vm14 = vcmp.lt.s32.totalorder %v8615_v58, 1  ;;  %vm8635_vm11 = vcmp.lt.s32.totalorder %v8615_v58, 2 }
 0x553   :  { %v8620_v42 = vshrl.u32 %v28697_v34, %v8617_v9  ;;  %v8623_v60 = vshrl.u32 %v28698_v36, %v8617_v9  ;;  %v8626_v14 = vshrl.u32 %v28699_v38, %v8617_v9  ;;  %v8629_v1 = vshrl.u32 %v28700_v40, %v8617_v9 }
 0x554   :  { %v8632_v61 = vshrl.u32 %v28701_v48, %v8617_v9  ;;  %v8618_v45 = vshrl.u32 %v28696_v32, %v8617_v9  ;;  %vm8636_vm1 = vcmp.lt.s32.totalorder %v8615_v58, 3  ;;  %vm8637_vm2 = vcmp.lt.s32.totalorder %v8615_v58, 4 }
 0x555   :  { %v8621_v15 = vor.u32 %v8620_v42, %v8619_v62  ;;  %v8624_v8 = vor.u32 %v8623_v60, %v8622_v12  ;;  %v8627_v35 = vor.u32 %v8626_v14, %v8625_v50  ;;  %v8630_v2 = vor.u32 %v8629_v1, %v8628_v21 }
 0x556   :  { %v8633_v29 = vor.u32 %v8632_v61, %v8631_v6  ;;  %v8476_v7 = vand.u32 2147483647, %v8475_v24  ;;  %v8351_v21 = vadd.s32 1, %v30460_v5  ;;  %v8348_v60 = vmul.u32 %v30438_v30, %v30442_v63 }
 0x557   :  { %v8639_v25 = vsel %vm8637_vm2, %v8627_v35, 2102212464  ;;  %v8642_v54 = vsel %vm8634_vm14, %v8621_v15, %v8624_v8  ;;  %v8643_v46 = vsel %vm8637_vm2, %v8630_v2, 920167782  ;;  %v8638_v47 = vsel %vm8634_vm14, %v8618_v45, %v8621_v15 }
 0x558   :  { %v8644_v16 = vsel %vm8636_vm1, %v8627_v35, %v8643_v46  ;;  %v8646_v31 = vsel %vm8634_vm14, %v8624_v8, %v8627_v35  ;;  %v8647_v11 = vsel %vm8637_vm2, %v8633_v29, 1326507024  ;;  %v8479_v18 = vmul.f32 %v8478_v37, %v8476_v7 }
 0x559   :  { %v8640_v27 = vsel %vm8636_vm1, %v8624_v8, %v8639_v25  ;;  %v8645_v51 = vsel %vm8635_vm11, %v8642_v54, %v8644_v16  ;;  %v8648_v43 = vsel %vm8636_vm1, %v8630_v2, %v8647_v11  ;;  %v8352_v6 = vsel %vm8350_vm3, %v8351_v21, %v30460_v5 }
 0x55a   :  { %v8649_v9 = vsel %vm8635_vm11, %v8646_v31, %v8648_v43  ;;  %v30481_v62 = vmul.u32.u64.low %v30456_v3, %v8645_v51  ;;  %v30482_v12 = vmul.u32.u64.high %v30456_v3, %v8645_v51, %v30481_v62  ;;  %v8480_v17 = vxor.u32 2147483648, %v8479_v18 }
 0x55b   :  { %v30488_v52 = vmul.u32.u64.low %v30456_v3, %v8649_v9  ;;  %v30489_v50 = vmul.u32.u64.high %v30456_v3, %v8649_v9, %v30488_v52  ;;  %v8641_v42 = vsel %vm8635_vm11, %v8638_v47, %v8640_v27  ;;  %v8353_v61 = vadd.s32 %v8352_v6, %v8348_v60 }
 0x55c   :  { %v8481_v14 = vsel %vm8398_vm6, %v8480_v17, %v8479_v18  ;;  %v8660_v1 = vadd.s32 1, %v30482_v12  ;;  %v8657_v58 = vmul.u32 %v30456_v3, %v8641_v42  ;;  %v8514_v30 = vsub.s32 32, %v30464_v55 }
 0x55d   :  { %v8484_v53 = vsel %vm30409_vm12, %v30319_v23, %v8481_v14  ;;  %vm8659_vm4 = vc.u32 %v30489_v50, %v30481_v62  ;;  %v8354_v5 = vadd.s32 536870912, %v8353_v61  ;;  %vm8491_vm5 = vcmp.eq.s32.totalorder %v8489_v57, 0 }
 0x55e   :  { %28494 = vcosq.f32 %v8484_v53  ;;  %v8661_v63 = vsel %vm8659_vm4, %v8660_v1, %v30482_v12  ;;  %v8526_v35 = vshrl.u32 %v28700_v40, %v8514_v30  ;;  %vm8494_vm6 = vcmp.eq.s32.totalorder %v8489_v57, 2 }
 0x55f   :  { %28496 = vsinq.f32 %v8484_v53  ;;  %v8662_v45 = vadd.s32 %v8661_v63, %v8657_v58  ;;  %v30509_v15 = vshrl.u32 %v8354_v5, 30  ;;  %v8506_v24 = vand.u32 8388607, %v8499_v41 }
 0x560   :  { %v30516_v2 = vadd.s32 3, %v30454_v26  ;;  %vm8490_vm7 = vcmp.lt.s32.totalorder %v8489_v57, 2  ;;  %v8517_v37 = vshrl.u32 %v28697_v34, %v8514_v30  ;;  %v8520_v7 = vshrl.u32 %v28698_v36, %v8514_v30 }
 0x561   :  { %v8663_v8 = vadd.s32 536870912, %v8662_v45  ;;  %v8356_v3 = vshll.u32 %v30509_v15, 30  ;;  %v8525_v25 = vshll.u32 %v28699_v38, %v30464_v55  ;;  %v30525_v54 = vshrl.u32 %v30446_v22, 5 }
 0x562   :  { %v8516_v26 = vshll.u32 %v28696_v32, %v30464_v55  ;;  %v8523_v47 = vshrl.u32 %v28699_v38, %v8514_v30  ;;  %v8519_v31 = vshll.u32 %v28697_v34, %v30464_v55  ;;  %v8529_v18 = vshrl.u32 %v28701_v48, %v8514_v30 }
 0x563   :  { %v30518_v29 = vshrl.u32 %v8663_v8, 30  ;;  %v30528_v46 = vsub.s32 %v8353_v61, %v8356_v3  ;;  %v8527_v11 = vor.u32 %v8526_v35, %v8525_v25  ;;  %v8349_v22 = vadd.s32 %v30459_v4, %v30450_v44 }
 0x564   :  { %v8507_v51 = vor.u32 8388608, %v8506_v24  ;;  %v8522_v43 = vshll.u32 %v28698_v36, %v30464_v55  ;;  %v8518_v17 = vor.u32 %v8517_v37, %v8516_v26  ;;  %v8521_v52 = vor.u32 %v8520_v7, %v8519_v31 }
 0x565   :  { %v8665_v16 = vshll.u32 %v30518_v29, 30  ;;  %v8359_v27 = vsub.s32 0, %v30528_v46  ;;  %v8528_v21 = vshll.u32 %v28700_v40, %v30464_v55  ;;  %vm8534_vm12 = vcmp.lt.s32.totalorder %v30525_v54, 4 }
 0x566   :  { %v8524_v4 = vor.u32 %v8523_v47, %v8522_v43  ;;  %v8540_v1 = vsel %vm8534_vm12, %v8527_v11, 920167782  ;;  %v8658_v61 = vadd.s32 %v30481_v62, %v30489_v50  ;;  %v8515_v63 = vshrl.u32 %v28696_v32, %v8514_v30 }
 0x567   :  { %v30544_v12 = vsub.s32 %v8662_v45, %v8665_v16  ;;  %v27650_v44 = vmin.u32 %v8359_v27, %v30528_v46  ;;  %v8530_v53 = vor.u32 %v8529_v18, %v8528_v21  ;;  %vm8531_vm15 = vcmp.lt.s32.totalorder %v30525_v54, 1 }
 0x568   :  { %v30542_v9 = vpop.eup %28494  ;;  %vm8533_vm8 = vcmp.lt.s32.totalorder %v30525_v54, 3  ;;  %v8539_v3 = vsel %vm8531_vm15, %v8518_v17, %v8521_v52  ;;  %v8543_v24 = vsel %vm8531_vm15, %v8521_v52, %v8524_v4  ;;  %vm8532_vm13 = vcmp.lt.s32.totalorder %v30525_v54, 2 }
 0x569   :  { %v30548_v42 = vpop.eup %28496  ;;  %v8495_v60 = vxor.u32 2147483648, %v30542_v9  ;;  %v8668_v6 = vsub.s32 0, %v30544_v12  ;;  %v8361_v58 = vclz %v27650_v44  ;;  %v8541_v62 = vsel %vm8533_vm8, %v8524_v4, %v8540_v1 }
 0x56a   :  { %v8492_v14 = vxor.u32 2147483648, %v30548_v42  ;;  %v8544_v37 = vsel %vm8534_vm12, %v8530_v53, 1326507024  ;;  %v8547_v16 = vshll.u32 %v8507_v51, 8  ;;  %v8536_v27 = vsel %vm8534_vm12, %v8524_v4, 2102212464 }
 0x56b   :  { %v8496_v55 = vsel %vm8494_vm6, %v8495_v60, %v30548_v42  ;;  %v27662_v45 = vmin.u32 %v8668_v6, %v30544_v12  ;;  %v27651_v35 = vadd.s32 4294967294, %v8361_v58  ;;  %v8545_v7 = vsel %vm8533_vm8, %v8527_v11, %v8544_v37 }
 0x56c   :  { %v8493_v5 = vsel %vm8491_vm5, %v30542_v9, %v8492_v14  ;;  %v8546_v47 = vsel %vm8532_vm13, %v8543_v24, %v8545_v7  ;;  %v8542_v43 = vsel %vm8532_vm13, %v8539_v3, %v8541_v62  ;;  %v8903_v11 = vand.u32 3, %v30516_v2 }
 0x56d   :  { %v8497_v8 = vsel %vm8490_vm7, %v8493_v5, %v8496_v55  ;;  %v8670_v30 = vclz %v27662_v45  ;;  %vm27652_vm10 = vcmp.lt.s32.totalorder %v27651_v35, 0  ;;  %v8535_v5 = vsel %vm8531_vm15, %v8515_v63, %v8518_v17 }
 0x56e   :  { %v30576_v50 = vsel %vm8488_vm9, nan, %v8497_v8  ;;  %v8364_v26 = vsel %vm27652_vm10, 0, %v27651_v35  ;;  %v30595_v21 = vmul.u32.u64.low %v8547_v16, %v8546_v47  ;;  %v30596_v44 = vmul.u32.u64.high %v8547_v16, %v8546_v47, %v30595_v21 }
 0x56f   :  { %v30583_v57 = vand.u32 4294901760, %v30576_v50  ;;  %v27663_v25 = vadd.s32 4294967294, %v8670_v30  ;;  %v8365_v31 = vsub.s32 32, %v8364_v26  ;;  %v8369_v18 = vsub.s32 4294967266, %v8364_v26 }
 0x570   :  { %v8366_v53 = vshll.u32 %v30528_v46, %v8364_v26  ;;  %v8537_v4 = vsel %vm8533_vm8, %v8521_v52, %v8536_v27  ;;  %v30604_v35 = vmul.u32.u64.low %v8547_v16, %v8542_v43  ;;  %v30605_v3 = vmul.u32.u64.high %v8547_v16, %v8542_v43, %v30604_v35 }
 0x571   :  { %9122 = vmatprep.subr.mxu0 %v30583_v57  ;;  %vm27664_vm0 = vcmp.lt.s32.totalorder %v27663_v25, 0  ;;  %v8367_v51 = vshrl.u32 %v8349_v22, %v8365_v31  ;;  %v8370_v1 = vadd.s32 127, %v8369_v18  ;;  %v8538_v30 = vsel %vm8532_vm13, %v8535_v5, %v8537_v4 }
 0x572   :  { %v8673_v6 = vsel %vm27664_vm0, 0, %v27663_v25  ;;  %vm8905_vm14 = vcmp.eq.s32.totalorder %v8903_v11, 0  ;;  %vm8556_vm11 = vc.u32 %v30596_v44, %v30604_v35  ;;  %v8557_v7 = vadd.s32 1, %v30605_v3 }
 0x573   :  { %v8674_v55 = vsub.s32 32, %v8673_v6  ;;  %v8678_v58 = vsub.s32 4294967266, %v8673_v6  ;;  %v8368_v45 = vor.u32 %v8367_v51, %v8366_v53  ;;  %v8371_v8 = vshll.u32 %v8370_v1, 23 }
 0x574   :  { %v8675_v2 = vshll.u32 %v30544_v12, %v8673_v6  ;;  %v8907_v52 = vsel %vm8905_vm14, %v30542_v9, %v8492_v14  ;;  %vm8908_vm1 = vcmp.eq.s32.totalorder %v8903_v11, 2  ;;  %vm8904_vm2 = vcmp.lt.s32.totalorder %v8903_v11, 2 }
 0x575   :  { %v8676_v62 = vshrl.u32 %v8658_v61, %v8674_v55  ;;  %v8679_v46 = vadd.s32 127, %v8678_v58  ;;  %v8372_v22 = vor.u32 4788187, %v8371_v8  ;;  %v8375_v37 = vcvt.s32.f32 %v8368_v45 }
 0x576   :  { %v8554_v61 = vmul.u32 %v8547_v16, %v8538_v30  ;;  %v8910_v54 = vsel %vm8908_vm1, %v8495_v60, %v30548_v42  ;;  %v8688_v25 = vsub.s32 4, %v30518_v29  ;;  %v8558_v47 = vsel %vm8556_vm11, %v8557_v7, %v30605_v3 }
 0x577   :  { %v8677_v24 = vor.u32 %v8676_v62, %v8675_v2  ;;  %v8680_v17 = vshll.u32 %v8679_v46, 23  ;;  %v8373_v63 = vand.u32 2147483647, %v8372_v22  ;;  %v8911_v31 = vsel %vm8904_vm2, %v8907_v52, %v8910_v54 }
 0x578   :  { %v8559_v27 = vadd.s32 %v8558_v47, %v8554_v61  ;;  %v30622_v43 = vsel %vm8488_vm9, nan, %v8911_v31  ;;  %v8379_v16 = vsub.s32 4, %v30509_v15  ;;  %vm8295_vm3 = vcmp.lt.s32.totalorder %v30317_v19, 0 }
 0x579   :  { %v8681_v12 = vor.u32 4788187, %v8680_v17  ;;  %v8376_v26 = vmul.f32 %v8375_v37, %v8373_v63  ;;  %v8684_v14 = vcvt.s32.f32 %v8677_v24  ;;  %vm8604_vm4 = vcmp.lt.s32.totalorder %v30396_v20, 0 }
 0x57a   :  { %v8560_v9 = vadd.s32 536870912, %v8559_v27  ;;  %vm30629_vm5 = vcmp.le.f32.partialorder %v8293_v10, 0.7853982  ;;  %v8689_v23 = vsel %vm8604_vm4, %v8688_v25, %v30518_v29  ;;  %vm8603_vm6 = vcmp.le.f32.partialorder %v8602_v56, 0.7853982 }
 0x57b   :  { %v8682_v18 = vand.u32 2147483647, %v8681_v12  ;;  %v8377_v21 = vxor.u32 2147483648, %v8376_v26  ;;  %v8380_v1 = vsel %vm8295_vm3, %v8379_v16, %v30509_v15  ;;  %v30645_v58 = vsub.f32 %v30576_v50, %v30583_v57 }
 0x57c   :  { %v30637_v51 = vshrl.u32 %v8560_v9, 30  ;;  %v8691_v5 = vsel %vm8603_vm6, 0, %v8689_v23  ;;  %v30650_v4 = vsel %vm30629_vm5, 0, %v8380_v1  ;;  %vm8694_vm7 = vweird.f32 %v30396_v20 }
 0x57d   :  { %v8685_v11 = vmul.f32 %v8684_v14, %v8682_v18  ;;  %v8378_v60 = vsel %vm8295_vm3, %v8377_v21, %v8376_v26  ;;  %v9201_v45 = vand.u32 4294901760, %v30645_v58  ;;  %v9110_v8 = vadd.s32 3, %v8691_v5 }
 0x57e   :  { %v8381_v53 = vsel %vm30629_vm5, %v30317_v19, %v8378_v60  ;;  %v8562_v55 = vshll.u32 %v30637_v51, 30  ;;  %v8386_v3 = vand.u32 3, %v30650_v4  ;;  %v8695_v2 = vand.u32 3, %v8691_v5 }
 0x57f   :  { %v8686_v6 = vxor.u32 2147483648, %v8685_v11  ;;  %28498 = vcosq.f32 %v8381_v53  ;;  %v9202_v22 = vsub.f32 %v30645_v58, %v9201_v45  ;;  %v9111_v30 = vand.u32 3, %v9110_v8 }
 0x580   :  { %28500 = vsinq.f32 %v8381_v53  ;;  %v8563_v56 = vsub.s32 %v8559_v27, %v8562_v55  ;;  %vm8385_vm9 = vweird.f32 %v30317_v19  ;;  %vm8387_vm12 = vcmp.lt.s32.totalorder %v8386_v3, 2 }
 0x581   :  { %v8687_v10 = vsel %vm8604_vm4, %v8686_v6, %v8685_v11  ;;  %vm8388_vm15 = vcmp.eq.s32.totalorder %v8386_v3, 0  ;;  %vm8696_vm8 = vcmp.lt.s32.totalorder %v8695_v2, 2  ;;  %vm8391_vm10 = vcmp.eq.s32.totalorder %v8386_v3, 2 }
 0x582   :  { %v8690_v29 = vsel %vm8603_vm6, %v30396_v20, %v8687_v10  ;;  %v8565_v15 = vsub.s32 0, %v8563_v56  ;;  %vm8697_vm13 = vcmp.eq.s32.totalorder %v8695_v2, 0  ;;  %vm8700_vm0 = vcmp.eq.s32.totalorder %v8695_v2, 2 }
 0x583   :  { %28502 = vcosq.f32 %v8690_v29  ;;  %v8555_v7 = vadd.s32 %v30604_v35, %v30596_v44  ;;  %v9203_v54 = vand.u32 4294901760, %v9202_v22  ;;  %vm9112_vm11 = vcmp.lt.s32.totalorder %v9111_v30, 2 }
 0x584   :  { %28504 = vsinq.f32 %v8690_v29  ;;  %v27658_v62 = vmin.u32 %v8565_v15, %v8563_v56  ;;  %vm9113_vm1 = vcmp.eq.s32.totalorder %v9111_v30, 0  ;;  %vm9116_vm2 = vcmp.eq.s32.totalorder %v9111_v30, 2 }
 0x585   :  { %vm8501_vm3 = vcmp.lt.s32.totalorder %v30393_v39, 0  ;;  %vm8500_vm4 = vcmp.le.f32.partialorder %v8499_v41, 0.7853982 }
 0x586   :  { %v8567_v46 = vclz %v27658_v62 }
 0x588   :  { %v27659_v63 = vadd.s32 4294967294, %v8567_v46 }
 0x589   :  { %v30657_v24 = vpop.eup %28498 }
 0x58a   :  { %v30661_v17 = vpop.eup %28500  ;;  %v8392_v52 = vxor.u32 2147483648, %v30657_v24  ;;  %vm27660_vm14 = vcmp.lt.s32.totalorder %v27659_v63, 0 }
 0x58b   :  { %v8389_v37 = vxor.u32 2147483648, %v30661_v17  ;;  %v8570_v31 = vsel %vm27660_vm14, 0, %v27659_v63 }
 0x58c   :  { %v8393_v61 = vsel %vm8391_vm10, %v8392_v52, %v30661_v17  ;;  %v8571_v35 = vsub.s32 32, %v8570_v31  ;;  %v8575_v21 = vsub.s32 4294967266, %v8570_v31  ;;  %v8572_v23 = vshll.u32 %v8563_v56, %v8570_v31 }
 0x58d   :  { %v28503_v12 = vpop.eup %28502  ;;  %v8390_v47 = vsel %vm8388_vm15, %v30657_v24, %v8389_v37  ;;  %vm8591_vm10 = vweird.f32 %v30393_v39 }
 0x58e   :  { %v28505_v25 = vpop.eup %28504  ;;  %v8701_v26 = vxor.u32 2147483648, %v28503_v12  ;;  %v8394_v44 = vsel %vm8387_vm12, %v8390_v47, %v8393_v61  ;;  %v8573_v42 = vshrl.u32 %v8555_v7, %v8571_v35  ;;  %v8576_v53 = vadd.s32 127, %v8575_v21 }
 0x58f   :  { %v8698_v18 = vxor.u32 2147483648, %v28505_v25  ;;  %v30678_v27 = vsel %vm8385_vm9, nan, %v8394_v44  ;;  %v8585_v7 = vsub.s32 4, %v30637_v51  ;;  %v8798_v61 = vadd.s32 3, %v30650_v4 }
 0x590   :  { %v8702_v14 = vsel %vm8700_vm0, %v8701_v26, %v28505_v25  ;;  %v9118_v16 = vsel %vm9116_vm2, %v8701_v26, %v28505_v25  ;;  %v30682_v9 = vand.u32 4294901760, %v30678_v27  ;;  %v8574_v56 = vor.u32 %v8573_v42, %v8572_v23 }
 0x591   :  { %v8699_v11 = vsel %vm8697_vm13, %v28503_v12, %v8698_v18  ;;  %v9115_v60 = vsel %vm9113_vm1, %v28503_v12, %v8698_v18  ;;  %v8577_v15 = vshll.u32 %v8576_v53, 23  ;;  %v8799_v25 = vand.u32 3, %v8798_v61 }
 0x592   :  { %v8703_v6 = vsel %vm8696_vm8, %v8699_v11, %v8702_v14  ;;  %v9119_v1 = vsel %vm9112_vm11, %v9115_v60, %v9118_v16  ;;  %9124 = vmatpush1.msra.mxu0 %v30682_v9  ;;  %v9206_v55 = vsub.f32 %v30678_v27, %v30682_v9  ;;  %v8581_v46 = vcvt.s32.f32 %v8574_v56 }
 0x593   :  { %v30688_v10 = vsel %vm8694_vm7, nan, %v8703_v6  ;;  %v30695_v29 = vsel %vm8694_vm7, nan, %v9119_v1  ;;  %9193 = vmatmul.mubr.f32.vlgmr.msra.gmra.mrb[12].mxu0 %v29109_v28  ;;  %9204 = vmatprep.subr.mxu0 %v9203_v54  ;;  %v8578_v3 = vor.u32 4788187, %v8577_v15  ;;  %v8586_v54 = vsel %vm8501_vm3, %v8585_v7, %v30637_v51 }
 0x594   :  { %v30698_v5 = vand.u32 4294901760, %v30688_v10  ;;  %v9207_v8 = vand.u32 4294901760, %v9206_v55  ;;  %9273 = vmatprep.mubr.f32.mxu0 %v28695_v0  ;;  %v8588_v41 = vsel %vm8500_vm4, 0, %v8586_v54  ;;  %vm8801_vm5 = vcmp.eq.s32.totalorder %v8799_v25, 0 }
 0x595   :  { %v8579_v62 = vand.u32 2147483647, %v8578_v3  ;;  %vm8804_vm6 = vcmp.eq.s32.totalorder %v8799_v25, 2  ;;  %v8592_v4 = vand.u32 3, %v8588_v41  ;;  %v8803_v47 = vsel %vm8801_vm5, %v30657_v24, %v8389_v37 }
 0x596   :  { %9587 = vmatprep.subr.mxu1 %v30698_v5  ;;  %v9208_v2 = vsub.f32 %v9206_v55, %v9207_v8  ;;  %v30716_v26 = vsub.f32 %v30688_v10, %v30698_v5  ;;  %v8806_v31 = vsel %vm8804_vm6, %v8392_v52, %v30661_v17  ;;  %vm8800_vm7 = vcmp.lt.s32.totalorder %v8799_v25, 2 }
 0x597   :  { %v8582_v22 = vmul.f32 %v8581_v46, %v8579_v62  ;;  %vm8597_vm12 = vcmp.eq.s32.totalorder %v8592_v4, 2  ;;  %vm8594_vm15 = vcmp.eq.s32.totalorder %v8592_v4, 0  ;;  %vm8593_vm8 = vcmp.lt.s32.totalorder %v8592_v4, 2 }
 0x598   :  { %v9209_v20 = vand.u32 4294901760, %v9208_v2  ;;  %v9666_v51 = vand.u32 4294901760, %v30716_v26  ;;  %v30747_v52 = vand.u32 4294901760, %v30622_v43 }
 0x599   :  { %v8583_v30 = vxor.u32 2147483648, %v8582_v22 }
 0x59a   :  { %9210 = vmatpush1.msra.mxu0 %v9209_v20  ;;  %v9667_v14 = vsub.f32 %v30716_v26, %v9666_v51  ;;  %v30766_v60 = vsub.f32 %v30622_v43, %v30747_v52 }
 0x59b   :  { %9275 = vmatmul.mubr.f32.vlgmr.msra.gmra.mrb[12].mxu0 %v29065_v33  ;;  %9283 = vmatprep.subr.mxu0 %v30645_v58  ;;  %v8584_v63 = vsel %vm8501_vm3, %v8583_v30, %v8582_v22  ;;  %v10516_v30 = vand.u32 4294901760, %v30695_v29 }
 0x59c   :  { %9286 = vmatpush1.msra.mxu0 %v9206_v55  ;;  %9349 = vmatprep.mubr.f32.mxu0 %v28695_v0  ;;  %v8587_v12 = vsel %vm8500_vm4, %v30393_v39, %v8584_v63  ;;  %v9668_v11 = vand.u32 4294901760, %v9667_v14  ;;  %v10131_v53 = vand.u32 4294901760, %v30766_v60 }
 0x59d   :  { %9359 = vmatprep.subr.mxu0 %v30583_v57  ;;  %28506 = vcosq.f32 %v8587_v12 }
 0x59e   :  { %28508 = vsinq.f32 %v8587_v12  ;;  %v10132_v15 = vsub.f32 %v30766_v60, %v10131_v53  ;;  %v10595_v12 = vsub.f32 %v30695_v29, %v10516_v30 }
 0x5a0   :  { %v10133_v3 = vand.u32 4294901760, %v10132_v15  ;;  %v10596_v39 = vand.u32 4294901760, %v10595_v12 }
 0x5a2   :  { %v10597_v54 = vsub.f32 %v10595_v12, %v10596_v39 }
 0x5a3   :  { %9352 = vmatmul.mubr.f32.vlgmr.msra.gmra.mrb[12].mxu0 %v29077_v13 }
 0x5a4   :  { %9361 = vmatpush1.msra.mxu0 %v30682_v9  ;;  %9424 = vmatprep.mubr.f32.mxu0 %v28695_v0 }
 0x5a5   :  { %9437 = vmatprep.subr.mxu0 %v9201_v45  ;;  %v8807_v45 = vsel %vm8800_vm7, %v8803_v47, %v8806_v31 }
 0x5a6   :  { %v30751_v37 = vsel %vm8385_vm9, nan, %v8807_v45 }
 0x5a7   :  { %v30730_v18 = vpop.eup %28506 }
 0x5a8   :  { %v30732_v44 = vpop.eup %28508  ;;  %v8598_v58 = vxor.u32 2147483648, %v30730_v18 }
 0x5a9   :  { %v8595_v35 = vxor.u32 2147483648, %v30732_v44 }
 0x5aa   :  { %v8599_v24 = vsel %vm8597_vm12, %v8598_v58, %v30732_v44 }
 0x5ab   :  { %9428 = vmatmul.mubr.f32.vlgmr.msra.gmra.mrb[12].mxu0 %v29086_v59  ;;  %v8596_v17 = vsel %vm8594_vm15, %v30730_v18, %v8595_v35 }
 0x5ac   :  { %9441 = vmatpush1.msra.mxu0 %v9207_v8  ;;  %9504 = vmatprep.mubr.f32.mxu0 %v28695_v0  ;;  %v8600_v21 = vsel %vm8593_vm8, %v8596_v17, %v8599_v24 }
 0x5ad   :  { %9513 = vmatprep.subr.mxu0 %v30583_v57  ;;  %v30756_v16 = vsel %vm8591_vm10, nan, %v8600_v21  ;;  %v30762_v57 = vand.u32 4294901760, %v30751_v37 }
 0x5ae   :  { %v30759_v42 = vand.u32 4294901760, %v30756_v16 }
 0x5af   :  { %v30776_v23 = vsub.f32 %v30751_v37, %v30762_v57 }
 0x5b0   :  { %9589 = vmatpush1.msra.mxu1 %v30759_v42  ;;  %v9671_v19 = vsub.f32 %v30756_v16, %v30759_v42 }
 0x5b1   :  { %9658 = vmatmul.mubr.f32.vlgmr.msra.gmra.mrb[12].mxu1 %v29109_v28  ;;  %9669 = vmatprep.subr.mxu1 %v9668_v11  ;;  %v10137_v56 = vand.u32 4294901760, %v30776_v23 }
 0x5b2   :  { %v9672_v6 = vand.u32 4294901760, %v9671_v19  ;;  %9738 = vmatprep.mubr.f32.mxu1 %v28695_v0 }
 0x5b3   :  { %9506 = vmatmul.mubr.f32.vlgmr.msra.gmra.mrb[12].mxu0 %v29065_v33  ;;  %v10138_v8 = vsub.f32 %v30776_v23, %v10137_v56 }
 0x5b4   :  { %9515 = vmatpush1.msra.mxu0 %v30682_v9  ;;  %9578 = vmatprep.mubr.f32.mxu0 %v28695_v0  ;;  %v9673_v1 = vsub.f32 %v9671_v19, %v9672_v6  ;;  %v9006_v9 = vadd.s32 3, %v8588_v41 }
 0x5b5   :  { %10052 = vmatprep.subr.mxu0 %v30747_v52  ;;  %v10139_v62 = vand.u32 4294901760, %v10138_v8 }
 0x5b6   :  { %v9674_v55 = vand.u32 4294901760, %v9673_v1  ;;  %v9007_v2 = vand.u32 3, %v9006_v9 }
 0x5b8   :  { %9675 = vmatpush1.msra.mxu1 %v9674_v55  ;;  %vm9009_vm9 = vcmp.eq.s32.totalorder %v9007_v2, 0  ;;  %vm9012_vm13 = vcmp.eq.s32.totalorder %v9007_v2, 2  ;;  %vm9008_vm0 = vcmp.lt.s32.totalorder %v9007_v2, 2 }
 0x5b9   :  { %9740 = vmatmul.mubr.f32.vlgmr.msra.gmra.mrb[12].mxu1 %v29065_v33  ;;  %9748 = vmatprep.subr.mxu1 %v30716_v26  ;;  %v9011_v46 = vsel %vm9009_vm9, %v30730_v18, %v8595_v35  ;;  %v9014_v20 = vsel %vm9012_vm13, %v8598_v58, %v30732_v44  ;;  %v10598_v26 = vand.u32 4294901760, %v10597_v54 }
 0x5ba   :  { %9751 = vmatpush1.msra.mxu1 %v9671_v19  ;;  %9814 = vmatprep.mubr.f32.mxu1 %v28695_v0  ;;  %v9015_v22 = vsel %vm9008_vm0, %v9011_v46, %v9014_v20  ;;  %v28618_v19 = vld [vmem:[#allocation5 + $0x60] sm:$0xff] }
 0x5bb   :  { %9824 = vmatprep.subr.mxu1 %v30698_v5  ;;  %9580 = vmatmul.mubr.f32.vlgmr.msra.gmra.mrb[12].mxu0 %v29065_v33  ;;  %v30811_v63 = vsel %vm8591_vm10, nan, %v9015_v22 }
 0x5bc   :  { %10054 = vmatpush1.msra.mxu0 %v30762_v57  ;;  %10117 = vmatprep.mubr.f32.mxu0 %v28695_v0  ;;  %v10518_v7 = vand.u32 4294901760, %v30811_v63 }
 0x5bd   :  { %10134 = vmatprep.subr.mxu0 %v10133_v3 }
 0x5be   :  { %v10601_v61 = vsub.f32 %v30811_v63, %v10518_v7 }
 0x5bf   :  { %10123 = vmatmul.mubr.f32.vlgmr.msra.gmra.mrb[14].mxu0 %v29109_v28 }
 0x5c0   :  { %10140 = vmatpush1.msra.mxu0 %v10139_v62  ;;  %10203 = vmatprep.mubr.f32.mxu0 %v28695_v0 }
 0x5c1   :  { %9817 = vmatmul.mubr.f32.vlgmr.msra.gmra.mrb[12].mxu1 %v29077_v13  ;;  %10213 = vmatprep.subr.mxu0 %v30766_v60 }
 0x5c2   :  { %9826 = vmatpush1.msra.mxu1 %v30759_v42  ;;  %9889 = vmatprep.mubr.f32.mxu1 %v28695_v0 }
 0x5c3   :  { %9902 = vmatprep.subr.mxu1 %v9666_v51 }
 0x5c7   :  { %10205 = vmatmul.mubr.f32.vlgmr.msra.gmra.mrb[14].mxu0 %v29065_v33 }
 0x5c8   :  { %10216 = vmatpush1.msra.mxu0 %v30776_v23  ;;  %10279 = vmatprep.mubr.f32.mxu0 %v28695_v0 }
 0x5c9   :  { %9893 = vmatmul.mubr.f32.vlgmr.msra.gmra.mrb[12].mxu1 %v29086_v59  ;;  %10289 = vmatprep.subr.mxu0 %v30747_v52 }
 0x5ca   :  { %9906 = vmatpush1.msra.mxu1 %v9672_v6  ;;  %9969 = vmatprep.mubr.f32.mxu1 %v28695_v0 }
 0x5cb   :  { %9978 = vmatprep.subr.mxu1 %v30698_v5  ;;  %v10602_v5 = vand.u32 4294901760, %v10601_v61 }
 0x5cd   :  { %v10603_v25 = vsub.f32 %v10601_v61, %v10602_v5 }
 0x5cf   :  { %10282 = vmatmul.mubr.f32.vlgmr.msra.gmra.mrb[14].mxu0 %v29077_v13  ;;  %v10604_v41 = vand.u32 4294901760, %v10603_v25 }
 0x5d0   :  { %10291 = vmatpush1.msra.mxu0 %v30762_v57  ;;  %10354 = vmatprep.mubr.f32.mxu0 %v28695_v0 }
 0x5d1   :  { %9971 = vmatmul.mubr.f32.vlgmr.msra.gmra.mrb[12].mxu1 %v29065_v33  ;;  %10367 = vmatprep.subr.mxu0 %v10131_v53 }
 0x5d2   :  { %9980 = vmatpush1.msra.mxu1 %v30759_v42  ;;  %10043 = vmatprep.mubr.f32.mxu1 %v28695_v0 }
 0x5d3   :  { %10517 = vmatprep.subr.mxu1 %v10516_v30 }
 0x5d7   :  { %10358 = vmatmul.mubr.f32.vlgmr.msra.gmra.mrb[14].mxu0 %v29086_v59 }
 0x5d8   :  { %10371 = vmatpush1.msra.mxu0 %v10137_v56  ;;  %10434 = vmatprep.mubr.f32.mxu0 %v28695_v0 }
 0x5d9   :  { %10045 = vmatmul.mubr.f32.vlgmr.msra.gmra.mrb[12].mxu1 %v29065_v33  ;;  %10443 = vmatprep.subr.mxu0 %v30747_v52 }
 0x5da   :  { %10519 = vmatpush1.msra.mxu1 %v10518_v7  ;;  %10582 = vmatprep.mubr.f32.mxu1 %v28695_v0 }
 0x5db   :  { %10599 = vmatprep.subr.mxu1 %v10598_v26 }
 0x5dd   :  { %10588 = vmatmul.mubr.f32.vlgmr.msra.gmra.mrb[14].mxu1 %v29109_v28 }
 0x5de   :  { %10605 = vmatpush1.msra.mxu1 %v10604_v41  ;;  %10668 = vmatprep.mubr.f32.mxu1 %v28695_v0 }
 0x5df   :  { %10678 = vmatprep.subr.mxu1 %v10595_v12  ;;  %10436 = vmatmul.mubr.f32.vlgmr.msra.gmra.mrb[14].mxu0 %v29065_v33 }
 0x5e0   :  { %10445 = vmatpush1.msra.mxu0 %v30762_v57  ;;  %10508 = vmatprep.mubr.f32.mxu0 %v28695_v0 }
 0x5e5   :  { %10670 = vmatmul.mubr.f32.vlgmr.msra.gmra.mrb[14].mxu1 %v29065_v33 }
 0x5e6   :  { %10681 = vmatpush1.msra.mxu1 %v10601_v61  ;;  %10744 = vmatprep.mubr.f32.mxu1 %v28695_v0 }
 0x5e7   :  { %10754 = vmatprep.subr.mxu1 %v10516_v30  ;;  %10510 = vmatmul.mubr.f32.vlgmr.msra.gmra.mrb[14].mxu0 %v29065_v33 }
 0x5e8   :  { %11936 = vmatprep.mubr.f32.mxu0 %v28695_v0 }
 0x5ed   :  { %10747 = vmatmul.mubr.f32.vlgmr.msra.gmra.mrb[14].mxu1 %v29077_v13 }
 0x5ee   :  { %10756 = vmatpush1.msra.mxu1 %v10518_v7  ;;  %10819 = vmatprep.mubr.f32.mxu1 %v28695_v0 }
 0x5ef   :  { %10832 = vmatprep.subr.mxu1 %v10596_v39 }
 0x5f5   :  { %10823 = vmatmul.mubr.f32.vlgmr.msra.gmra.mrb[14].mxu1 %v29086_v59 }
 0x5f6   :  { %10836 = vmatpush1.msra.mxu1 %v10602_v5  ;;  %10899 = vmatprep.mubr.f32.mxu1 %v28695_v0 }
 0x5f7   :  { %10908 = vmatprep.subr.mxu1 %v10516_v30 }
 0x5fd   :  { %10901 = vmatmul.mubr.f32.vlgmr.msra.gmra.mrb[14].mxu1 %v29065_v33 }
 0x5fe   :  { %10910 = vmatpush1.msra.mxu1 %v10518_v7  ;;  %10973 = vmatprep.mubr.f32.mxu1 %v28695_v0 }
 0x605   :  { %10975 = vmatmul.mubr.f32.vlgmr.msra.gmra.mrb[14].mxu1 %v29065_v33 }
 0x606   :  { %12401 = vmatprep.mubr.f32.mxu1 %v28695_v0 }
 0x68e   :  { %v9581_v4 = vpop.f32.mrb[12].mxu0 }
 0x68f   :  { %v9583_v51 = vpop.f32.mrb[13].mxu0  ;;  %v10981_v44 = vmul.f32 %v9581_v4, %v30751_v37  ;;  %v28619_v37 = vld [vmem:[#allocation5 + $0x68] sm:$0xff] }
 0x690   :  { %v10982_v35 = vmul.f32 %v9583_v51, %v30622_v43 }
 0x6ac   :  { %v10046_v47 = vpop.f32.mrb[12].mxu1 }
 0x6ad   :  { %v10048_v31 = vpop.f32.mrb[13].mxu1  ;;  %v10983_v41 = vmul.f32 %v10046_v47, %v30811_v63 }
 0x6ba   :  { %v10511_v18 = vpop.f32.mrb[14].mxu0 }
 0x6bb   :  { %v10985_v58 = vmul.f32 %v10511_v18, %v30678_v27  ;;  %v10513_v45 = vpop.f32.mrb[15].mxu0 }
 0x6bc   :  { %v10986_v14 = vmul.f32 %v10513_v45, %v30576_v50 }
 0x6bd   :  { %v10989_v24 = vsub.f32 %v10981_v44, %v10985_v58  ;;  %v10984_v44 = vmul.f32 %v10048_v31, %v30695_v29 }
 0x6be   :  { %v10990_v17 = vsub.f32 %v10982_v35, %v10986_v14 }
 0x6bf   :  { %v10993_v52 = vmul.f32 0.125, %v10989_v24 }
 0x6c0   :  { %v10994_v21 = vmul.f32 0.125, %v10990_v17 }
 0x6c1   :  { %v10997_v11 = vadd.f32 %v10993_v52, %v29255_v49 }
 0x6c2   :  { %v10998_v42 = vadd.f32 %v10994_v21, %v29255_v49 }
 0x6c3   :  { %v11001_v57 = vmul.f32 0.01, %v10997_v11 }
 0x6c4   :  { %v11002_v60 = vmul.f32 0.01, %v10998_v42 }
 0x6c5   :  { %v11005_v6 = vadd.f32 %v28618_v19, %v11001_v57 }
 0x6c6   :  { %v11006_v23 = vadd.f32 %v28619_v37, %v11002_v60 }
 0x6c7   :  { %v11009_v27 = vmul.f32 0.15915494, %v11005_v6 }
 0x6c8   :  { %v11010_v53 = vmul.f32 0.15915494, %v11006_v23 }
 0x6c9   :  { %vm11013_vm14 = vcmp.lt.f32.partialorder %v11009_v27, 0.0  ;;  %v11017_v43 = vceil.f32 %v11009_v27  ;;  %v11021_v1 = vfloor.f32 %v11009_v27 }
 0x6ca   :  { %vm11014_vm11 = vcmp.lt.f32.partialorder %v11010_v53, 0.0  ;;  %v11018_v50 = vceil.f32 %v11010_v53  ;;  %v11022_v55 = vfloor.f32 %v11010_v53 }
 0x6cb   :  { %v11025_v56 = vsel %vm11013_vm14, %v11017_v43, %v11021_v1 }
 0x6cc   :  { %v11029_v15 = vmul.f32 6.2831855, %v11025_v56  ;;  %v11026_v9 = vsel %vm11014_vm11, %v11018_v50, %v11022_v55 }
 0x6cd   :  { %v11030_v8 = vmul.f32 6.2831855, %v11026_v9 }
 0x6ce   :  { %v30853_v3 = vsub.f32 %v11005_v6, %v11029_v15 }
 0x6cf   :  { %v30855_v2 = vsub.f32 %v11006_v23, %v11030_v8 }
 0x6d0   :  { %11038 = vst [vmem:[#allocation5 + $0x80] sm:$0xff] %v30853_v3  ;;  %v11045_v62 = vand.u32 2139095040, %v30853_v3  ;;  %v11042_v26 = vand.u32 2147483647, %v30853_v3 }
 0x6d1   :  { %11039 = vst [vmem:[#allocation5 + $0x88] sm:$0xff] %v30855_v2  ;;  %v11148_v46 = vand.u32 2139095040, %v30855_v2  ;;  %v11145_v20 = vand.u32 2147483647, %v30855_v2 }
 0x6d2   :  { %v11046_v22 = vshrl.u32 %v11045_v62, 23  ;;  %v30878_v63 = vand.u32 8388607, %v11042_v26  ;;  %v28620_v62 = vld [vmem:[#allocation5 + $0x70] sm:$0xff] }
 0x6d3   :  { %v11149_v30 = vshrl.u32 %v11148_v46, 23  ;;  %v11152_v12 = vand.u32 8388607, %v11145_v20 }
 0x6d4   :  { %v27681_v7 = vadd.s32 4294967169, %v11046_v22  ;;  %v28621_v22 = vld [vmem:[#allocation5 + $0x78] sm:$0xff] }
 0x6d5   :  { %v27685_v61 = vadd.s32 4294967169, %v11149_v30  ;;  %v11153_v25 = vor.u32 8388608, %v11152_v12 }
 0x6d6   :  { %v11052_v39 = vadd.s32 1, %v27681_v7 }
 0x6d7   :  { %v11155_v5 = vadd.s32 1, %v27685_v61  ;;  %v30874_v52 = vshll.u32 %v11153_v25, 8 }
 0x6d8   :  { %vm11053_vm1 = vcmp.gt.s32.totalorder %v11052_v39, 0  ;;  %v10976_v54 = vpop.f32.mrb[14].mxu1 }
 0x6d9   :  { %v30866_v4 = vsel %vm11053_vm1, %v11052_v39, 0  ;;  %v10987_v51 = vmul.f32 %v10976_v54, %v30756_v16  ;;  %vm11156_vm2 = vcmp.gt.s32.totalorder %v11155_v5, 0  ;;  %v10978_v18 = vpop.f32.mrb[15].mxu1 }
 0x6da   :  { %v11157_v58 = vsel %vm11156_vm2, %v11155_v5, 0  ;;  %v10988_v45 = vmul.f32 %v10978_v18, %v30688_v10  ;;  %v30872_v24 = vand.u32 31, %v30866_v4 }
 0x6db   :  { %v10991_v35 = vsub.f32 %v10983_v41, %v10987_v51  ;;  %v11159_v14 = vand.u32 31, %v11157_v58  ;;  %v11158_v47 = vshrl.u32 %v11157_v58, 5 }
 0x6dc   :  { %v10992_v17 = vsub.f32 %v10984_v44, %v10988_v45 }
 0x6dd   :  { %v10995_v16 = vmul.f32 0.125, %v10991_v35  ;;  %v11160_v21 = vsub.s32 32, %v11159_v14  ;;  %v11162_v29 = vshll.u32 %v28696_v32, %v11159_v14  ;;  %v11165_v10 = vshll.u32 %v28697_v34, %v11159_v14 }
 0x6de   :  { %v10996_v31 = vmul.f32 0.125, %v10992_v17  ;;  %v11168_v11 = vshll.u32 %v28698_v36, %v11159_v14  ;;  %v11171_v42 = vshll.u32 %v28699_v38, %v11159_v14  ;;  %v11174_v6 = vshll.u32 %v28700_v40, %v11159_v14 }
 0x6df   :  { %v10999_v57 = vadd.f32 %v10995_v16, %v29255_v49  ;;  %v11163_v60 = vshrl.u32 %v28697_v34, %v11160_v21  ;;  %v11166_v19 = vshrl.u32 %v28698_v36, %v11160_v21  ;;  %v11169_v23 = vshrl.u32 %v28699_v38, %v11160_v21 }
 0x6e0   :  { %v11000_v37 = vadd.f32 %v10996_v31, %v29255_v49  ;;  %v11172_v27 = vshrl.u32 %v28700_v40, %v11160_v21  ;;  %v11175_v53 = vshrl.u32 %v28701_v48, %v11160_v21  ;;  %v11161_v1 = vshrl.u32 %v28696_v32, %v11160_v21 }
 0x6e1   :  { %v11003_v43 = vmul.f32 0.01, %v10999_v57  ;;  %v11164_v50 = vor.u32 %v11163_v60, %v11162_v29  ;;  %v11167_v55 = vor.u32 %v11166_v19, %v11165_v10  ;;  %v11170_v15 = vor.u32 %v11169_v23, %v11168_v11 }
 0x6e2   :  { %v11004_v56 = vmul.f32 0.01, %v11000_v37  ;;  %v11173_v9 = vor.u32 %v11172_v27, %v11171_v42  ;;  %v11176_v8 = vor.u32 %v11175_v53, %v11174_v6  ;;  %vm11177_vm3 = vcmp.lt.s32.totalorder %v11158_v47, 1 }
 0x6e3   :  { %v11007_v46 = vadd.f32 %v28620_v62, %v11003_v43  ;;  %vm11178_vm4 = vcmp.lt.s32.totalorder %v11158_v47, 2  ;;  %vm11180_vm5 = vcmp.lt.s32.totalorder %v11158_v47, 4  ;;  %vm11179_vm6 = vcmp.lt.s32.totalorder %v11158_v47, 3 }
 0x6e4   :  { %v11008_v30 = vadd.f32 %v28621_v22, %v11004_v56  ;;  %v11182_v7 = vsel %vm11180_vm5, %v11170_v15, 2102212464  ;;  %v11185_v12 = vsel %vm11177_vm3, %v11164_v50, %v11167_v55  ;;  %v11181_v39 = vsel %vm11177_vm3, %v11161_v1, %v11164_v50 }
 0x6e5   :  { %v11011_v61 = vmul.f32 0.15915494, %v11007_v46  ;;  %v11183_v5 = vsel %vm11179_vm6, %v11167_v55, %v11182_v7  ;;  %v11186_v54 = vsel %vm11180_vm5, %v11173_v9, 920167782  ;;  %v11189_v51 = vsel %vm11177_vm3, %v11167_v55, %v11170_v15 }
 0x6e6   :  { %v11012_v25 = vmul.f32 0.15915494, %v11008_v30  ;;  %v11187_v41 = vsel %vm11179_vm6, %v11170_v15, %v11186_v54  ;;  %v11190_v18 = vsel %vm11180_vm5, %v11176_v8, 1326507024  ;;  %v11184_v19 = vsel %vm11178_vm4, %v11181_v39, %v11183_v5 }
 0x6e7   :  { %vm11015_vm7 = vcmp.lt.f32.partialorder %v11011_v61, 0.0  ;;  %v11019_v44 = vceil.f32 %v11011_v61  ;;  %v11023_v58 = vfloor.f32 %v11011_v61  ;;  %v11188_v45 = vsel %vm11178_vm4, %v11185_v12, %v11187_v41 }
 0x6e8   :  { %vm11016_vm12 = vcmp.lt.f32.partialorder %v11012_v25, 0.0  ;;  %v11020_v35 = vceil.f32 %v11012_v25  ;;  %v11024_v14 = vfloor.f32 %v11012_v25  ;;  %v11191_v17 = vsel %vm11179_vm6, %v11173_v9, %v11190_v18 }
 0x6e9   :  { %v11027_v16 = vsel %vm11015_vm7, %v11019_v44, %v11023_v58  ;;  %v11192_v21 = vsel %vm11178_vm4, %v11189_v51, %v11191_v17  ;;  %v30899_v29 = vmul.u32.u64.low %v30874_v52, %v11188_v45  ;;  %v30900_v31 = vmul.u32.u64.high %v30874_v52, %v11188_v45, %v30899_v29 }
 0x6ea   :  { %v11031_v10 = vmul.f32 6.2831855, %v11027_v16  ;;  %v11028_v11 = vsel %vm11016_vm12, %v11020_v35, %v11024_v14  ;;  %v30903_v42 = vmul.u32.u64.low %v30874_v52, %v11192_v21  ;;  %v30904_v57 = vmul.u32.u64.high %v30874_v52, %v11192_v21, %v30903_v42 }
 0x6eb   :  { %v11032_v60 = vmul.f32 6.2831855, %v11028_v11  ;;  %v11203_v23 = vadd.s32 1, %v30900_v31  ;;  %v11050_v27 = vor.u32 8388608, %v30878_v63  ;;  %v11200_v43 = vmul.u32 %v30874_v52, %v11184_v19 }
 0x6ec   :  { %v30907_v6 = vsub.f32 %v11007_v46, %v11031_v10  ;;  %vm11202_vm15 = vc.u32 %v30904_v57, %v30899_v29  ;;  %v11057_v1 = vsub.s32 32, %v30872_v24  ;;  %v30923_v15 = vshrl.u32 %v30866_v4, 5 }
 0x6ed   :  { %v30909_v37 = vsub.f32 %v11008_v30, %v11032_v60  ;;  %v11204_v50 = vsel %vm11202_vm15, %v11203_v23, %v30900_v31  ;;  %v30925_v8 = vshll.u32 %v11050_v27, 8  ;;  %v11059_v7 = vshll.u32 %v28696_v32, %v30872_v24 }
 0x6ee   :  { %11040 = vst [vmem:[#allocation5 + $0x90] sm:$0xff] %v30907_v6  ;;  %v11251_v53 = vand.u32 2139095040, %v30907_v6  ;;  %v11205_v63 = vadd.s32 %v11204_v50, %v11200_v43  ;;  %v11060_v22 = vshrl.u32 %v28697_v34, %v11057_v1  ;;  %v11063_v12 = vshrl.u32 %v28698_v36, %v11057_v1 }
 0x6ef   :  { %11041 = vst [vmem:[#allocation5 + $0x98] sm:$0xff] %v30909_v37  ;;  %v11354_v47 = vand.u32 2139095040, %v30909_v37  ;;  %v11351_v55 = vand.u32 2147483647, %v30909_v37  ;;  %v11066_v61 = vshrl.u32 %v28699_v38, %v11057_v1  ;;  %v11062_v5 = vshll.u32 %v28697_v34, %v30872_v24 }
 0x6f0   :  { %v11252_v56 = vshrl.u32 %v11251_v53, 23  ;;  %v11206_v62 = vadd.s32 536870912, %v11205_v63  ;;  %v11069_v54 = vshrl.u32 %v28700_v40, %v11057_v1  ;;  %v30940_v41 = vshrl.u32 %v28696_v32, %v11057_v1 }
 0x6f1   :  { %v11355_v9 = vshrl.u32 %v11354_v47, 23  ;;  %v11358_v46 = vand.u32 8388607, %v11351_v55  ;;  %v11065_v51 = vshll.u32 %v28698_v36, %v30872_v24  ;;  %v30945_v18 = vshrl.u32 %v28701_v48, %v11057_v1 }
 0x6f2   :  { %v27689_v52 = vadd.s32 4294967169, %v11252_v56  ;;  %v30934_v39 = vshrl.u32 %v11206_v62, 30  ;;  %v30948_v45 = vor.u32 %v11060_v22, %v11059_v7  ;;  %v11068_v35 = vshll.u32 %v28699_v38, %v30872_v24 }
 0x6f3   :  { %v27693_v30 = vadd.s32 4294967169, %v11355_v9  ;;  %v11359_v58 = vor.u32 8388608, %v11358_v46  ;;  %v30952_v14 = vor.u32 %v11063_v12, %v11062_v5  ;;  %v30954_v17 = vor.u32 %v11066_v61, %v11065_v51 }
 0x6f4   :  { %v11258_v4 = vadd.s32 1, %v27689_v52  ;;  %v11208_v44 = vshll.u32 %v30934_v39, 30  ;;  %v30958_v16 = vshll.u32 %v28700_v40, %v30872_v24  ;;  %v30962_v10 = vor.u32 %v11069_v54, %v11068_v35 }
 0x6f5   :  { %v11361_v25 = vadd.s32 1, %v27693_v30  ;;  %v11201_v42 = vadd.s32 %v30899_v29, %v30904_v57  ;;  %vm11074_vm9 = vcmp.lt.s32.totalorder %v30923_v15, 1  ;;  %v11231_v23 = vsub.s32 4, %v30934_v39 }
 0x6f6   :  { %vm11259_vm10 = vcmp.gt.s32.totalorder %v11258_v4, 0  ;;  %v30960_v31 = vsub.s32 %v11205_v63, %v11208_v44  ;;  %v11073_v60 = vor.u32 %v30945_v18, %v30958_v16  ;;  %v30970_v24 = vshll.u32 %v11359_v58, 8 }
 0x6f7   :  { %vm11362_vm8 = vcmp.gt.s32.totalorder %v11361_v25, 0  ;;  %vm11077_vm13 = vcmp.lt.s32.totalorder %v30923_v15, 4  ;;  %v30973_v27 = vsel %vm11259_vm10, %v11258_v4, 0  ;;  %vm11076_vm0 = vcmp.lt.s32.totalorder %v30923_v15, 3 }
 0x6f8   :  { %v11363_v21 = vsel %vm11362_vm8, %v11361_v25, 0  ;;  %v11211_v19 = vsub.s32 0, %v30960_v31  ;;  %v30978_v29 = vsel %vm11077_vm13, %v30954_v17, 2102212464  ;;  %v11082_v47 = vsel %vm11074_vm9, %v30948_v45, %v30952_v14 }
 0x6f9   :  { %v11365_v11 = vand.u32 31, %v11363_v21  ;;  %v11364_v53 = vshrl.u32 %v11363_v21, 5  ;;  %v11083_v50 = vsel %vm11077_vm13, %v30962_v10, 920167782  ;;  %vm11075_vm14 = vcmp.lt.s32.totalorder %v30923_v15, 2 }
 0x6fa   :  { %v27686_v57 = vmin.u32 %v11211_v19, %v30960_v31  ;;  %vm11147_vm5 = vcmp.lt.s32.totalorder %v30855_v2, 0  ;;  %vm11146_vm7 = vcmp.le.f32.partialorder %v11145_v20, 0.7853982  ;;  %vm11237_vm8 = vweird.f32 %v30855_v2 }
 0x6fb   :  { %v11366_v43 = vsub.s32 32, %v11365_v11  ;;  %v11368_v1 = vshll.u32 %v28696_v32, %v11365_v11  ;;  %v11371_v56 = vshll.u32 %v28697_v34, %v11365_v11  ;;  %v11374_v63 = vshll.u32 %v28698_v36, %v11365_v11 }
 0x6fc   :  { %v11377_v9 = vshll.u32 %v28699_v38, %v11365_v11  ;;  %v11380_v52 = vshll.u32 %v28700_v40, %v11365_v11  ;;  %v11213_v62 = vclz %v27686_v57  ;;  %vm11383_vm11 = vcmp.lt.s32.totalorder %v11364_v53, 1 }
 0x6fd   :  { %v11369_v46 = vshrl.u32 %v28697_v34, %v11366_v43  ;;  %v11372_v22 = vshrl.u32 %v28698_v36, %v11366_v43  ;;  %v11375_v30 = vshrl.u32 %v28699_v38, %v11366_v43  ;;  %v11367_v7 = vshrl.u32 %v28696_v32, %v11366_v43 }
 0x6fe   :  { %v11378_v12 = vshrl.u32 %v28700_v40, %v11366_v43  ;;  %v11381_v61 = vshrl.u32 %v28701_v48, %v11366_v43  ;;  %v27687_v4 = vadd.s32 4294967294, %v11213_v62  ;;  %vm11384_vm1 = vcmp.lt.s32.totalorder %v11364_v53, 2 }
 0x6ff   :  { %v11370_v5 = vor.u32 %v11369_v46, %v11368_v1  ;;  %v11373_v54 = vor.u32 %v11372_v22, %v11371_v56  ;;  %v11376_v25 = vor.u32 %v11375_v30, %v11374_v63  ;;  %vm11386_vm2 = vcmp.lt.s32.totalorder %v11364_v53, 4 }
 0x700   :  { %v11379_v51 = vor.u32 %v11378_v12, %v11377_v9  ;;  %v11382_v44 = vor.u32 %v11381_v61, %v11380_v52  ;;  %vm27688_vm3 = vcmp.lt.s32.totalorder %v27687_v4, 0  ;;  %vm11385_vm4 = vcmp.lt.s32.totalorder %v11364_v53, 3 }
 0x701   :  { %v11387_v58 = vsel %vm11383_vm11, %v11367_v7, %v11370_v5  ;;  %v11388_v35 = vsel %vm11386_vm2, %v11376_v25, 2102212464  ;;  %v11216_v21 = vsel %vm27688_vm3, 0, %v27687_v4  ;;  %v11391_v19 = vsel %vm11383_vm11, %v11370_v5, %v11373_v54 }
 0x702   :  { %v11389_v11 = vsel %vm11385_vm4, %v11373_v54, %v11388_v35  ;;  %v11392_v43 = vsel %vm11386_vm2, %v11379_v51, 920167782  ;;  %v11217_v57 = vsub.s32 32, %v11216_v21  ;;  %v11218_v1 = vshll.u32 %v30960_v31, %v11216_v21 }
 0x703   :  { %v11221_v56 = vsub.s32 4294967266, %v11216_v21  ;;  %v11395_v63 = vsel %vm11383_vm11, %v11373_v54, %v11376_v25  ;;  %v11390_v9 = vsel %vm11384_vm1, %v11387_v58, %v11389_v11  ;;  %v11393_v52 = vsel %vm11385_vm4, %v11376_v25, %v11392_v43 }
 0x704   :  { %v11396_v62 = vsel %vm11386_vm2, %v11382_v44, 1326507024  ;;  %v11084_v46 = vsel %vm11076_vm0, %v30954_v17, %v11083_v50  ;;  %v11219_v22 = vshrl.u32 %v11201_v42, %v11217_v57  ;;  %v11394_v7 = vsel %vm11384_vm1, %v11391_v19, %v11393_v52 }
 0x705   :  { %v11222_v30 = vadd.s32 127, %v11221_v56  ;;  %v11397_v12 = vsel %vm11385_vm4, %v11379_v51, %v11396_v62  ;;  %v31015_v61 = vmul.u32.u64.low %v30970_v24, %v11394_v7  ;;  %v31016_v4 = vmul.u32.u64.high %v30970_v24, %v11394_v7, %v31015_v61 }
 0x706   :  { %v11398_v31 = vsel %vm11384_vm1, %v11395_v63, %v11397_v12  ;;  %v11085_v5 = vsel %vm11075_vm14, %v11082_v47, %v11084_v46  ;;  %v11220_v54 = vor.u32 %v11219_v22, %v11218_v1  ;;  %v11086_v53 = vsel %vm11074_vm9, %v30952_v14, %v30954_v17 }
 0x707   :  { %v11223_v25 = vshll.u32 %v11222_v30, 23  ;;  %v31022_v50 = vmul.u32.u64.low %v30970_v24, %v11398_v31  ;;  %v31023_v42 = vmul.u32.u64.high %v30970_v24, %v11398_v31, %v31022_v50  ;;  %v11087_v51 = vsel %vm11077_vm13, %v11073_v60, 1326507024 }
 0x708   :  { %v31035_v44 = vmul.u32.u64.low %v30925_v8, %v11085_v5  ;;  %v31036_v47 = vmul.u32.u64.high %v30925_v8, %v11085_v5, %v31035_v44  ;;  %v11078_v35 = vsel %vm11074_vm9, %v30940_v41, %v30948_v45  ;;  %v11088_v18 = vsel %vm11076_vm0, %v30962_v10, %v11087_v51 }
 0x709   :  { %v11224_v58 = vor.u32 4788187, %v11223_v25  ;;  %v11262_v17 = vand.u32 31, %v30973_v27  ;;  %v11409_v16 = vadd.s32 1, %v31016_v4  ;;  %v11080_v60 = vsel %vm11076_vm0, %v30952_v14, %v30978_v29 }
 0x70a   :  { %v11089_v21 = vsel %vm11075_vm14, %v11086_v53, %v11088_v18  ;;  %v11227_v19 = vcvt.s32.f32 %v11220_v54  ;;  %v11406_v41 = vmul.u32 %v30970_v24, %v11390_v9  ;;  %vm11408_vm6 = vc.u32 %v31023_v42, %v31015_v61 }
 0x70b   :  { %v11225_v11 = vand.u32 2147483647, %v11224_v58  ;;  %v11232_v45 = vsel %vm11147_vm5, %v11231_v23, %v30934_v39  ;;  %v11410_v10 = vsel %vm11408_vm6, %v11409_v16, %v31016_v4  ;;  %v11081_v24 = vsel %vm11075_vm14, %v11078_v35, %v11080_v60 }
 0x70c   :  { %v31065_v14 = vmul.u32.u64.low %v30925_v8, %v11089_v21  ;;  %v31066_v29 = vmul.u32.u64.high %v30925_v8, %v11089_v21, %v31065_v14  ;;  %v11411_v57 = vadd.s32 %v11410_v10, %v11406_v41  ;;  %v11100_v1 = vadd.s32 1, %v31036_v47 }
 0x70d   :  { %v11228_v43 = vmul.f32 %v11227_v19, %v11225_v11  ;;  %v31073_v63 = vsel %vm11146_vm7, 0, %v11232_v45  ;;  %v11263_v23 = vsub.s32 32, %v11262_v17  ;;  %v11097_v9 = vmul.u32 %v30925_v8, %v11081_v24 }
 0x70e   :  { %v11412_v39 = vadd.s32 536870912, %v11411_v57  ;;  %vm11099_vm12 = vc.u32 %v31066_v29, %v31035_v44  ;;  %v31085_v20 = vand.u32 3, %v31073_v63  ;;  %v11248_v8 = vand.u32 2147483647, %v30907_v6 }
 0x70f   :  { %v11229_v56 = vxor.u32 2147483648, %v11228_v43  ;;  %v11101_v62 = vsel %vm11099_vm12, %v11100_v1, %v31036_v47  ;;  %v11275_v7 = vshrl.u32 %v28700_v40, %v11263_v23  ;;  %v11266_v31 = vshrl.u32 %v28697_v34, %v11263_v23 }
 0x710   :  { %v31080_v15 = vshrl.u32 %v11412_v39, 30  ;;  %v11102_v22 = vadd.s32 %v11101_v62, %v11097_v9  ;;  %v11269_v4 = vshrl.u32 %v28698_v36, %v11263_v23  ;;  %v11272_v54 = vshrl.u32 %v28699_v38, %v11263_v23 }
 0x711   :  { %v11230_v52 = vsel %vm11147_vm5, %v11229_v56, %v11228_v43  ;;  %v11274_v25 = vshll.u32 %v28699_v38, %v11262_v17  ;;  %v11278_v50 = vshrl.u32 %v28701_v48, %v11263_v23  ;;  %v31098_v53 = vshrl.u32 %v30973_v27, 5 }
 0x712   :  { %v11233_v46 = vsel %vm11146_vm7, %v30855_v2, %v11230_v52  ;;  %v11414_v30 = vshll.u32 %v31080_v15, 30  ;;  %v11103_v12 = vadd.s32 536870912, %v11102_v22  ;;  %v11265_v47 = vshll.u32 %v28696_v32, %v11262_v17 }
 0x713   :  { %28510 = vcosq.f32 %v11233_v46  ;;  %v11268_v58 = vshll.u32 %v28697_v34, %v11262_v17  ;;  %v11271_v18 = vshll.u32 %v28698_v36, %v11262_v17  ;;  %v11276_v16 = vor.u32 %v11275_v7, %v11274_v25 }
 0x714   :  { %28512 = vsinq.f32 %v11233_v46  ;;  %v31092_v5 = vsub.s32 %v11411_v57, %v11414_v30  ;;  %v31100_v51 = vshrl.u32 %v11103_v12, 30  ;;  %v11277_v60 = vshll.u32 %v28700_v40, %v11262_v17 }
 0x715   :  { %v11255_v11 = vand.u32 8388607, %v11248_v8  ;;  %v11267_v27 = vor.u32 %v11266_v31, %v11265_v47  ;;  %vm11239_vm15 = vcmp.lt.s32.totalorder %v31085_v20, 2  ;;  %v11270_v41 = vor.u32 %v11269_v4, %v11268_v58 }
 0x716   :  { %v11417_v35 = vsub.s32 0, %v31092_v5  ;;  %v11105_v21 = vshll.u32 %v31100_v51, 30  ;;  %v11273_v45 = vor.u32 %v11272_v54, %v11271_v18  ;;  %v11279_v10 = vor.u32 %v11278_v50, %v11277_v60 }
 0x717   :  { %vm11240_vm10 = vcmp.eq.s32.totalorder %v31085_v20, 0  ;;  %vm11243_vm9 = vcmp.eq.s32.totalorder %v31085_v20, 2  ;;  %vm11283_vm13 = vcmp.lt.s32.totalorder %v31098_v53, 4  ;;  %v11407_v14 = vadd.s32 %v31015_v61, %v31023_v42 }
 0x718   :  { %v27694_v19 = vmin.u32 %v11417_v35, %v31092_v5  ;;  %v31115_v17 = vsub.s32 %v11102_v22, %v11105_v21  ;;  %v11264_v57 = vshrl.u32 %v28696_v32, %v11263_v23  ;;  %v11289_v24 = vsel %vm11283_vm13, %v11276_v16, 920167782 }
 0x719   :  { %v11256_v56 = vor.u32 8388608, %v11255_v11  ;;  %vm11280_vm0 = vcmp.lt.s32.totalorder %v31098_v53, 1  ;;  %vm11282_vm14 = vcmp.lt.s32.totalorder %v31098_v53, 3  ;;  %v11293_v42 = vsel %vm11283_vm13, %v11279_v10, 1326507024 }
 0x71a   :  { %v11419_v43 = vclz %v27694_v19  ;;  %v11108_v1 = vsub.s32 0, %v31115_v17  ;;  %v11288_v52 = vsel %vm11280_vm0, %v11267_v27, %v11270_v41  ;;  %v11290_v61 = vsel %vm11282_vm14, %v11273_v45, %v11289_v24 }
 0x71b   :  { %vm11281_vm11 = vcmp.lt.s32.totalorder %v31098_v53, 2  ;;  %v11292_v22 = vsel %vm11280_vm0, %v11270_v41, %v11273_v45  ;;  %v11285_v7 = vsel %vm11283_vm13, %v11273_v45, 2102212464  ;;  %v11294_v12 = vsel %vm11282_vm14, %v11276_v16, %v11293_v42 }
 0x71c   :  { %v27695_v9 = vadd.s32 4294967294, %v11419_v43  ;;  %v27682_v46 = vmin.u32 %v11108_v1, %v31115_v17  ;;  %v11291_v25 = vsel %vm11281_vm11, %v11288_v52, %v11290_v61  ;;  %v11295_v35 = vsel %vm11281_vm11, %v11292_v22, %v11294_v12 }
 0x71d   :  { %v31126_v39 = vpop.eup %28510  ;;  %v11296_v21 = vshll.u32 %v11256_v56, 8  ;;  %v11651_v10 = vadd.s32 3, %v31073_v63  ;;  %v11284_v63 = vsel %vm11280_vm0, %v11264_v57, %v11267_v27  ;;  %v11286_v61 = vsel %vm11282_vm14, %v11270_v41, %v11285_v7 }
 0x71e   :  { %v31134_v23 = vpop.eup %28512  ;;  %v11244_v62 = vxor.u32 2147483648, %v31126_v39  ;;  %vm27696_vm1 = vcmp.lt.s32.totalorder %v27695_v9, 0  ;;  %v11110_v54 = vclz %v27682_v46  ;;  %vm11353_vm3 = vcmp.lt.s32.totalorder %v30909_v37, 0 }
 0x71f   :  { %v11241_v30 = vxor.u32 2147483648, %v31134_v23  ;;  %v11422_v4 = vsel %vm27696_vm1, 0, %v27695_v9  ;;  %v31169_v24 = vmul.u32.u64.low %v11296_v21, %v11295_v35  ;;  %v31170_v1 = vmul.u32.u64.high %v11296_v21, %v11295_v35, %v31169_v24 }
 0x720   :  { %v11245_v31 = vsel %vm11243_vm9, %v11244_v62, %v31134_v23  ;;  %v11423_v47 = vsub.s32 32, %v11422_v4  ;;  %v11427_v58 = vsub.s32 4294967266, %v11422_v4  ;;  %v11424_v16 = vshll.u32 %v31092_v5, %v11422_v4 }
 0x721   :  { %v11242_v50 = vsel %vm11240_vm10, %v31126_v39, %v11241_v30  ;;  %v27683_v60 = vadd.s32 4294967294, %v11110_v54  ;;  %v11098_v5 = vadd.s32 %v31035_v44, %v31066_v29  ;;  %v11652_v29 = vand.u32 3, %v11651_v10 }
 0x722   :  { %v11246_v18 = vsel %vm11239_vm15, %v11242_v50, %v11245_v31  ;;  %v11425_v19 = vshrl.u32 %v11407_v14, %v11423_v47  ;;  %v11428_v45 = vadd.s32 127, %v11427_v58  ;;  %v11287_v50 = vsel %vm11281_vm11, %v11284_v63, %v11286_v61 }
 0x723   :  { %v31163_v11 = vsel %vm11237_vm8, nan, %v11246_v18  ;;  %vm27684_vm2 = vcmp.lt.s32.totalorder %v27683_v60, 0  ;;  %v31179_v46 = vmul.u32.u64.low %v11296_v21, %v11291_v25  ;;  %v31180_v22 = vmul.u32.u64.high %v11296_v21, %v11291_v25, %v31179_v46 }
 0x724   :  { %v31167_v43 = vand.u32 4294901760, %v31163_v11  ;;  %v11426_v20 = vor.u32 %v11425_v19, %v11424_v16  ;;  %v11429_v9 = vshll.u32 %v11428_v45, 23  ;;  %v11113_v56 = vsel %vm27684_vm2, 0, %v27683_v60 }
 0x725   :  { %v11114_v52 = vsub.s32 32, %v11113_v56  ;;  %v11118_v14 = vsub.s32 4294967266, %v11113_v56  ;;  %v11115_v12 = vshll.u32 %v31115_v17, %v11113_v56  ;;  %vm11305_vm4 = vc.u32 %v31170_v1, %v31179_v46 }
 0x726   :  { %11871 = vmatprep.subr.mxu0 %v31167_v43  ;;  %v11430_v42 = vor.u32 4788187, %v11429_v9  ;;  %v11433_v54 = vcvt.s32.f32 %v11426_v20  ;;  %v11437_v7 = vsub.s32 4, %v31080_v15  ;;  %v11306_v17 = vadd.s32 1, %v31180_v22 }
 0x727   :  { %v11116_v31 = vshrl.u32 %v11098_v5, %v11114_v52  ;;  %v11119_v44 = vadd.s32 127, %v11118_v14  ;;  %vm11654_vm5 = vcmp.eq.s32.totalorder %v11652_v29, 0  ;;  %v11303_v47 = vmul.u32 %v11296_v21, %v11287_v50 }
 0x728   :  { %v11431_v4 = vand.u32 2147483647, %v11430_v42  ;;  %v11656_v58 = vsel %vm11654_vm5, %v31126_v39, %v11241_v30  ;;  %vm11657_vm6 = vcmp.eq.s32.totalorder %v11652_v29, 2  ;;  %v11307_v35 = vsel %vm11305_vm4, %v11306_v17, %v31180_v22 }
 0x729   :  { %v11117_v27 = vor.u32 %v11116_v31, %v11115_v12  ;;  %v11120_v57 = vshll.u32 %v11119_v44, 23  ;;  %vm11653_vm7 = vcmp.lt.s32.totalorder %v11652_v29, 2  ;;  %v11659_v18 = vsel %vm11657_vm6, %v11244_v62, %v31134_v23 }
 0x72a   :  { %v11434_v41 = vmul.f32 %v11433_v54, %v11431_v4  ;;  %v11308_v19 = vadd.s32 %v11307_v35, %v11303_v47  ;;  %v11660_v45 = vsel %vm11653_vm7, %v11656_v58, %v11659_v18  ;;  %vm11352_vm12 = vcmp.le.f32.partialorder %v11351_v55, 0.7853982 }
 0x72b   :  { %v11121_v25 = vor.u32 4788187, %v11120_v57  ;;  %v11124_v60 = vcvt.s32.f32 %v11117_v27  ;;  %v11438_v30 = vsel %vm11353_vm3, %v11437_v7, %v31080_v15  ;;  %v31205_v10 = vsel %vm11237_vm8, nan, %v11660_v45 }
 0x72c   :  { %v11435_v53 = vxor.u32 2147483648, %v11434_v41  ;;  %v11309_v62 = vadd.s32 536870912, %v11308_v19  ;;  %v11128_v24 = vsub.s32 4, %v31100_v51  ;;  %v11440_v20 = vsel %vm11352_vm12, 0, %v11438_v30 }
 0x72d   :  { %v11122_v16 = vand.u32 2147483647, %v11121_v25  ;;  %vm11044_vm15 = vcmp.lt.s32.totalorder %v30853_v3, 0  ;;  %vm11043_vm10 = vcmp.le.f32.partialorder %v11042_v26, 0.7853982  ;;  %v11859_v52 = vadd.s32 3, %v11440_v20 }
 0x72e   :  { %v11436_v21 = vsel %vm11353_vm3, %v11435_v53, %v11434_v41  ;;  %v31209_v9 = vshrl.u32 %v11309_v62, 30  ;;  %v11129_v5 = vsel %vm11044_vm15, %v11128_v24, %v31100_v51  ;;  %v11444_v63 = vand.u32 3, %v11440_v20 }
 0x72f   :  { %v11439_v39 = vsel %vm11352_vm12, %v30909_v37, %v11436_v21  ;;  %v11125_v23 = vmul.f32 %v11124_v60, %v11122_v16  ;;  %v31217_v61 = vsel %vm11043_vm10, 0, %v11129_v5  ;;  %v31221_v22 = vsub.f32 %v31163_v11, %v31167_v43 }
 0x730   :  { %28514 = vcosq.f32 %v11439_v39  ;;  %v11311_v15 = vshll.u32 %v31209_v9, 30  ;;  %v11860_v26 = vand.u32 3, %v11859_v52  ;;  %vm11443_vm8 = vweird.f32 %v30909_v37 }
 0x731   :  { %28516 = vsinq.f32 %v11439_v39  ;;  %v11126_v55 = vxor.u32 2147483648, %v11125_v23  ;;  %v11135_v51 = vand.u32 3, %v31217_v61  ;;  %vm11445_vm9 = vcmp.lt.s32.totalorder %v11444_v63, 2 }
 0x732   :  { %v11312_v14 = vsub.s32 %v11308_v19, %v11311_v15  ;;  %vm11446_vm13 = vcmp.eq.s32.totalorder %v11444_v63, 0  ;;  %vm11449_vm0 = vcmp.eq.s32.totalorder %v11444_v63, 2  ;;  %v11950_v50 = vand.u32 4294901760, %v31221_v22 }
 0x733   :  { %v11127_v2 = vsel %vm11044_vm15, %v11126_v55, %v11125_v23  ;;  %vm11865_vm14 = vcmp.eq.s32.totalorder %v11860_v26, 2  ;;  %vm11862_vm11 = vcmp.eq.s32.totalorder %v11860_v26, 0  ;;  %vm11140_vm1 = vcmp.eq.s32.totalorder %v11135_v51, 2 }
 0x734   :  { %v11130_v56 = vsel %vm11043_vm10, %v30853_v3, %v11127_v2  ;;  %v11314_v42 = vsub.s32 0, %v11312_v14  ;;  %vm11861_vm2 = vcmp.lt.s32.totalorder %v11860_v26, 2  ;;  %v11304_v58 = vadd.s32 %v31179_v46, %v31170_v1 }
 0x735   :  { %28518 = vcosq.f32 %v11130_v56  ;;  %v11951_v21 = vsub.f32 %v31221_v22, %v11950_v50  ;;  %vm11137_vm4 = vcmp.eq.s32.totalorder %v11135_v51, 0  ;;  %vm11136_vm5 = vcmp.lt.s32.totalorder %v11135_v51, 2 }
 0x736   :  { %28520 = vsinq.f32 %v11130_v56  ;;  %v27690_v12 = vmin.u32 %v11314_v42, %v11312_v14  ;;  %vm11134_vm6 = vweird.f32 %v30853_v3  ;;  %vm11250_vm7 = vcmp.lt.s32.totalorder %v30907_v6, 0 }
 0x737   :  { %v11952_v2 = vand.u32 4294901760, %v11951_v21  ;;  %vm31271_vm12 = vcmp.le.f32.partialorder %v11248_v8, 0.7853982  ;;  %v11547_v8 = vadd.s32 3, %v31217_v61 }
 0x738   :  { %v11316_v4 = vclz %v27690_v12 }
 0x73a   :  { %v28515_v31 = vpop.eup %28514  ;;  %v27691_v57 = vadd.s32 4294967294, %v11316_v4 }
 0x73b   :  { %v28517_v44 = vpop.eup %28516  ;;  %v11450_v29 = vxor.u32 2147483648, %v28515_v31 }
 0x73c   :  { %v11447_v54 = vxor.u32 2147483648, %v28517_v44  ;;  %vm27692_vm3 = vcmp.lt.s32.totalorder %v27691_v57, 0 }
 0x73d   :  { %v11451_v27 = vsel %vm11449_vm0, %v11450_v29, %v28517_v44  ;;  %v11867_v41 = vsel %vm11865_vm14, %v11450_v29, %v28517_v44  ;;  %v11319_v60 = vsel %vm27692_vm3, 0, %v27691_v57  ;;  %vm11340_vm14 = vweird.f32 %v30907_v6 }
 0x73e   :  { %v11448_v7 = vsel %vm11446_vm13, %v28515_v31, %v11447_v54  ;;  %v11864_v17 = vsel %vm11862_vm11, %v28515_v31, %v11447_v54  ;;  %v11320_v46 = vsub.s32 32, %v11319_v60  ;;  %v11324_v39 = vsub.s32 4294967266, %v11319_v60 }
 0x73f   :  { %v31226_v25 = vpop.eup %28518  ;;  %v11452_v47 = vsel %vm11445_vm9, %v11448_v7, %v11451_v27  ;;  %v11868_v53 = vsel %vm11861_vm2, %v11864_v17, %v11867_v41  ;;  %v11321_v24 = vshll.u32 %v11312_v14, %v11319_v60  ;;  %v11334_v54 = vsub.s32 4, %v31209_v9 }
 0x740   :  { %v31231_v35 = vpop.eup %28520  ;;  %v31235_v18 = vsel %vm11443_vm8, nan, %v11452_v47  ;;  %v11141_v16 = vxor.u32 2147483648, %v31226_v25  ;;  %v31240_v19 = vsel %vm11443_vm8, nan, %v11868_v53  ;;  %v11322_v23 = vshrl.u32 %v11304_v58, %v11320_v46 }
 0x741   :  { %v31243_v45 = vand.u32 4294901760, %v31235_v18  ;;  %v11138_v1 = vxor.u32 2147483648, %v31231_v35  ;;  %v11325_v20 = vadd.s32 127, %v11324_v39  ;;  %v11335_v57 = vsel %vm11250_vm7, %v11334_v54, %v31209_v9 }
 0x742   :  { %v11142_v30 = vsel %vm11140_vm1, %v11141_v16, %v31231_v35  ;;  %v11323_v5 = vor.u32 %v11322_v23, %v11321_v24  ;;  %v11548_v7 = vand.u32 3, %v11547_v8  ;;  %v11337_v17 = vsel %vm31271_vm12, 0, %v11335_v57 }
 0x743   :  { %12336 = vmatprep.subr.mxu1 %v31243_v45  ;;  %v11139_v37 = vsel %vm11137_vm4, %v31226_v25, %v11138_v1  ;;  %v11326_v56 = vshll.u32 %v11325_v20, 23  ;;  %v31287_v41 = vsub.f32 %v31235_v18, %v31243_v45  ;;  %v11341_v47 = vand.u32 3, %v11337_v17 }
 0x744   :  { %v11143_v62 = vsel %vm11136_vm5, %v11139_v37, %v11142_v30  ;;  %v11330_v42 = vcvt.s32.f32 %v11323_v5  ;;  %vm11550_vm15 = vcmp.eq.s32.totalorder %v11548_v7, 0  ;;  %vm11553_vm10 = vcmp.eq.s32.totalorder %v11548_v7, 2 }
 0x745   :  { %v31258_v55 = vsel %vm11134_vm6, nan, %v11143_v62  ;;  %v11327_v63 = vor.u32 4788187, %v11326_v56  ;;  %v12415_v58 = vand.u32 4294901760, %v31287_v41  ;;  %v11552_v9 = vsel %vm11550_vm15, %v31226_v25, %v11138_v1 }
 0x746   :  { %v31261_v15 = vand.u32 4294901760, %v31258_v55  ;;  %v11555_v61 = vsel %vm11553_vm10, %v11141_v16, %v31231_v35  ;;  %vm11549_vm8 = vcmp.lt.s32.totalorder %v11548_v7, 2  ;;  %vm11346_vm9 = vcmp.eq.s32.totalorder %v11341_v47, 2 }
 0x747   :  { %v11328_v14 = vand.u32 2147483647, %v11327_v63  ;;  %vm11343_vm13 = vcmp.eq.s32.totalorder %v11341_v47, 0  ;;  %vm11342_vm0 = vcmp.lt.s32.totalorder %v11341_v47, 2  ;;  %v31317_v1 = vand.u32 4294901760, %v31205_v10 }
 0x748   :  { %11873 = vmatpush1.msra.mxu0 %v31261_v15  ;;  %v11955_v52 = vsub.f32 %v31258_v55, %v31261_v15  ;;  %v13265_v29 = vand.u32 4294901760, %v31240_v19 }
 0x749   :  { %11942 = vmatmul.mubr.f32.vlgmr.msra.gmra.mrb[16].mxu0 %v29109_v28  ;;  %11953 = vmatprep.subr.mxu0 %v11952_v2  ;;  %v11331_v12 = vmul.f32 %v11330_v42, %v11328_v14  ;;  %v31340_v24 = vsub.f32 %v31205_v10, %v31317_v1  ;;  %v11755_v14 = vadd.s32 3, %v11337_v17 }
 0x74a   :  { %v11956_v26 = vand.u32 4294901760, %v11955_v52  ;;  %12022 = vmatprep.mubr.f32.mxu0 %v28695_v0 }
 0x74b   :  { %v11332_v51 = vxor.u32 2147483648, %v11331_v12  ;;  %v12880_v5 = vand.u32 4294901760, %v31340_v24 }
 0x74c   :  { %v11957_v31 = vsub.f32 %v11955_v52, %v11956_v26 }
 0x74d   :  { %v11333_v4 = vsel %vm11250_vm7, %v11332_v51, %v11331_v12  ;;  %v12881_v63 = vsub.f32 %v31340_v24, %v12880_v5 }
 0x74e   :  { %v11958_v44 = vand.u32 4294901760, %v11957_v31  ;;  %v11336_v27 = vsel %vm31271_vm12, %v30907_v6, %v11333_v4 }
 0x74f   :  { %28522 = vcosq.f32 %v11336_v27  ;;  %v12882_v42 = vand.u32 4294901760, %v12881_v63 }
 0x750   :  { %11959 = vmatpush1.msra.mxu0 %v11958_v44  ;;  %28524 = vsinq.f32 %v11336_v27  ;;  %v13344_v27 = vsub.f32 %v31240_v19, %v13265_v29 }
 0x751   :  { %12024 = vmatmul.mubr.f32.vlgmr.msra.gmra.mrb[16].mxu0 %v29065_v33  ;;  %12032 = vmatprep.subr.mxu0 %v31221_v22  ;;  %v12416_v22 = vsub.f32 %v31287_v41, %v12415_v58 }
 0x752   :  { %12035 = vmatpush1.msra.mxu0 %v11955_v52  ;;  %12098 = vmatprep.mubr.f32.mxu0 %v28695_v0  ;;  %v13345_v6 = vand.u32 4294901760, %v13344_v27 }
 0x753   :  { %12108 = vmatprep.subr.mxu0 %v31167_v43  ;;  %v12417_v37 = vand.u32 4294901760, %v12416_v22 }
 0x754   :  { %v13346_v57 = vsub.f32 %v13344_v27, %v13345_v6 }
 0x756   :  { %v13347_v7 = vand.u32 4294901760, %v13346_v57 }
 0x759   :  { %12101 = vmatmul.mubr.f32.vlgmr.msra.gmra.mrb[16].mxu0 %v29077_v13  ;;  %v31301_v53 = vpop.eup %28522 }
 0x75a   :  { %12110 = vmatpush1.msra.mxu0 %v31261_v15  ;;  %12173 = vmatprep.mubr.f32.mxu0 %v28695_v0  ;;  %v31303_v60 = vpop.eup %28524  ;;  %v11347_v46 = vxor.u32 2147483648, %v31301_v53 }
 0x75b   :  { %12186 = vmatprep.subr.mxu0 %v11950_v50  ;;  %v11344_v21 = vxor.u32 2147483648, %v31303_v60  ;;  %v11556_v50 = vsel %vm11549_vm8, %v11552_v9, %v11555_v61 }
 0x75c   :  { %v11348_v25 = vsel %vm11346_vm9, %v11347_v46, %v31303_v60  ;;  %v31321_v30 = vsel %vm11134_vm6, nan, %v11556_v50 }
 0x75d   :  { %v11345_v35 = vsel %vm11343_vm13, %v31301_v53, %v11344_v21  ;;  %v31333_v62 = vand.u32 4294901760, %v31321_v30 }
 0x75e   :  { %v11349_v16 = vsel %vm11342_vm0, %v11345_v35, %v11348_v25 }
 0x75f   :  { %v31325_v39 = vsel %vm11340_vm14, nan, %v11349_v16 }
 0x760   :  { %v31329_v23 = vand.u32 4294901760, %v31325_v39 }
 0x761   :  { %12177 = vmatmul.mubr.f32.vlgmr.msra.gmra.mrb[16].mxu0 %v29086_v59 }
 0x762   :  { %12190 = vmatpush1.msra.mxu0 %v11956_v26  ;;  %12253 = vmatprep.mubr.f32.mxu0 %v28695_v0  ;;  %v12420_v3 = vsub.f32 %v31325_v39, %v31329_v23  ;;  %v11756_v26 = vand.u32 3, %v11755_v14 }
 0x763   :  { %12262 = vmatprep.subr.mxu0 %v31167_v43  ;;  %12338 = vmatpush1.msra.mxu1 %v31329_v23  ;;  %v31346_v43 = vsub.f32 %v31321_v30, %v31333_v62 }
 0x764   :  { %12407 = vmatmul.mubr.f32.vlgmr.msra.gmra.mrb[16].mxu1 %v29109_v28  ;;  %12418 = vmatprep.subr.mxu1 %v12417_v37  ;;  %v12421_v20 = vand.u32 4294901760, %v12420_v3  ;;  %vm11758_vm11 = vcmp.eq.s32.totalorder %v11756_v26, 0  ;;  %vm11761_vm1 = vcmp.eq.s32.totalorder %v11756_v26, 2  ;;  %vm11757_vm2 = vcmp.lt.s32.totalorder %v11756_v26, 2 }
 0x765   :  { %12487 = vmatprep.mubr.f32.mxu1 %v28695_v0  ;;  %v12886_v52 = vand.u32 4294901760, %v31346_v43  ;;  %v11760_v31 = vsel %vm11758_vm11, %v31301_v53, %v11344_v21  ;;  %v11763_v51 = vsel %vm11761_vm1, %v11347_v46, %v31303_v60 }
 0x766   :  { %v12422_v2 = vsub.f32 %v12420_v3, %v12421_v20  ;;  %v11764_v44 = vsel %vm11757_vm2, %v11760_v31, %v11763_v51 }
 0x767   :  { %v31380_v4 = vsel %vm11340_vm14, nan, %v11764_v44 }
 0x768   :  { %v12423_v56 = vand.u32 4294901760, %v12422_v2  ;;  %v13267_v54 = vand.u32 4294901760, %v31380_v4 }
 0x769   :  { %12255 = vmatmul.mubr.f32.vlgmr.msra.gmra.mrb[16].mxu0 %v29065_v33 }
 0x76a   :  { %12264 = vmatpush1.msra.mxu0 %v31261_v15  ;;  %12327 = vmatprep.mubr.f32.mxu0 %v28695_v0  ;;  %v12887_v15 = vsub.f32 %v31346_v43, %v12886_v52  ;;  %v13350_v8 = vsub.f32 %v31380_v4, %v13267_v54 }
 0x76b   :  { %12801 = vmatprep.subr.mxu0 %v31317_v1  ;;  %12424 = vmatpush1.msra.mxu1 %v12423_v56 }
 0x76c   :  { %12489 = vmatmul.mubr.f32.vlgmr.msra.gmra.mrb[16].mxu1 %v29065_v33  ;;  %12497 = vmatprep.subr.mxu1 %v31287_v41  ;;  %v12888_v12 = vand.u32 4294901760, %v12887_v15 }
 0x76d   :  { %12500 = vmatpush1.msra.mxu1 %v12420_v3  ;;  %12563 = vmatprep.mubr.f32.mxu1 %v28695_v0 }
 0x76e   :  { %12573 = vmatprep.subr.mxu1 %v31243_v45 }
 0x771   :  { %12329 = vmatmul.mubr.f32.vlgmr.msra.gmra.mrb[16].mxu0 %v29065_v33 }
 0x772   :  { %12803 = vmatpush1.msra.mxu0 %v31333_v62  ;;  %12866 = vmatprep.mubr.f32.mxu0 %v28695_v0 }
 0x773   :  { %12883 = vmatprep.subr.mxu0 %v12882_v42 }
 0x774   :  { %12566 = vmatmul.mubr.f32.vlgmr.msra.gmra.mrb[16].mxu1 %v29077_v13 }
 0x775   :  { %12872 = vmatmul.mubr.f32.vlgmr.msra.gmra.mrb[18].mxu0 %v29109_v28  ;;  %12575 = vmatpush1.msra.mxu1 %v31329_v23 }
 0x776   :  { %12889 = vmatpush1.msra.mxu0 %v12888_v12  ;;  %12638 = vmatprep.mubr.f32.mxu1 %v28695_v0 }
 0x777   :  { %12651 = vmatprep.subr.mxu1 %v12415_v58  ;;  %12962 = vmatprep.subr.mxu0 %v31340_v24  ;;  %v28622_v24 = vld [vmem:[#allocation5 + $0x80] sm:$0xff] }
 0x778   :  { %12952 = vmatprep.mubr.f32.mxu0 %v28695_v0 }
 0x77c   :  { %12642 = vmatmul.mubr.f32.vlgmr.msra.gmra.mrb[16].mxu1 %v29086_v59 }
 0x77d   :  { %12954 = vmatmul.mubr.f32.vlgmr.msra.gmra.mrb[18].mxu0 %v29065_v33  ;;  %12655 = vmatpush1.msra.mxu1 %v12421_v20 }
 0x77e   :  { %12965 = vmatpush1.msra.mxu0 %v31346_v43  ;;  %12718 = vmatprep.mubr.f32.mxu1 %v28695_v0 }
 0x77f   :  { %12727 = vmatprep.subr.mxu1 %v31243_v45  ;;  %13038 = vmatprep.subr.mxu0 %v31317_v1  ;;  %v13351_v45 = vand.u32 4294901760, %v13350_v8 }
 0x780   :  { %13028 = vmatprep.mubr.f32.mxu0 %v28695_v0 }
 0x781   :  { %v13352_v41 = vsub.f32 %v13350_v8, %v13351_v45 }
 0x783   :  { %v13353_v17 = vand.u32 4294901760, %v13352_v41 }
 0x784   :  { %12720 = vmatmul.mubr.f32.vlgmr.msra.gmra.mrb[16].mxu1 %v29065_v33 }
 0x785   :  { %13031 = vmatmul.mubr.f32.vlgmr.msra.gmra.mrb[18].mxu0 %v29077_v13  ;;  %12729 = vmatpush1.msra.mxu1 %v31329_v23 }
 0x786   :  { %13040 = vmatpush1.msra.mxu0 %v31333_v62  ;;  %12792 = vmatprep.mubr.f32.mxu1 %v28695_v0 }
 0x787   :  { %13266 = vmatprep.subr.mxu1 %v13265_v29  ;;  %13116 = vmatprep.subr.mxu0 %v12880_v5 }
 0x788   :  { %13103 = vmatprep.mubr.f32.mxu0 %v28695_v0 }
 0x78c   :  { %12794 = vmatmul.mubr.f32.vlgmr.msra.gmra.mrb[16].mxu1 %v29065_v33 }
 0x78d   :  { %13107 = vmatmul.mubr.f32.vlgmr.msra.gmra.mrb[18].mxu0 %v29086_v59  ;;  %13268 = vmatpush1.msra.mxu1 %v13267_v54 }
 0x78e   :  { %13120 = vmatpush1.msra.mxu0 %v12886_v52  ;;  %13331 = vmatprep.mubr.f32.mxu1 %v28695_v0 }
 0x78f   :  { %13348 = vmatprep.subr.mxu1 %v13347_v7  ;;  %13192 = vmatprep.subr.mxu0 %v31317_v1 }
 0x790   :  { %13183 = vmatprep.mubr.f32.mxu0 %v28695_v0  ;;  %13337 = vmatmul.mubr.f32.vlgmr.msra.gmra.mrb[18].mxu1 %v29109_v28 }
 0x791   :  { %13354 = vmatpush1.msra.mxu1 %v13353_v17  ;;  %13417 = vmatprep.mubr.f32.mxu1 %v28695_v0 }
 0x792   :  { %13427 = vmatprep.subr.mxu1 %v13344_v27 }
 0x795   :  { %13185 = vmatmul.mubr.f32.vlgmr.msra.gmra.mrb[18].mxu0 %v29065_v33 }
 0x796   :  { %13194 = vmatpush1.msra.mxu0 %v31333_v62  ;;  %13257 = vmatprep.mubr.f32.mxu0 %v28695_v0 }
 0x798   :  { %13419 = vmatmul.mubr.f32.vlgmr.msra.gmra.mrb[18].mxu1 %v29065_v33 }
 0x799   :  { %13430 = vmatpush1.msra.mxu1 %v13350_v8  ;;  %13493 = vmatprep.mubr.f32.mxu1 %v28695_v0 }
 0x79a   :  { %13503 = vmatprep.subr.mxu1 %v13265_v29 }
 0x79d   :  { %13259 = vmatmul.mubr.f32.vlgmr.msra.gmra.mrb[18].mxu0 %v29065_v33 }
 0x79e   :  { %14685 = vmatprep.mubr.f32.mxu0 %v28695_v0 }
 0x7a0   :  { %13496 = vmatmul.mubr.f32.vlgmr.msra.gmra.mrb[18].mxu1 %v29077_v13 }
 0x7a1   :  { %13505 = vmatpush1.msra.mxu1 %v13267_v54  ;;  %13568 = vmatprep.mubr.f32.mxu1 %v28695_v0 }
 0x7a2   :  { %13581 = vmatprep.subr.mxu1 %v13345_v6 }
 0x7a8   :  { %13572 = vmatmul.mubr.f32.vlgmr.msra.gmra.mrb[18].mxu1 %v29086_v59 }
 0x7a9   :  { %13585 = vmatpush1.msra.mxu1 %v13351_v45  ;;  %13648 = vmatprep.mubr.f32.mxu1 %v28695_v0 }
 0x7aa   :  { %13657 = vmatprep.subr.mxu1 %v13265_v29 }
 0x7b0   :  { %13650 = vmatmul.mubr.f32.vlgmr.msra.gmra.mrb[18].mxu1 %v29065_v33 }
 0x7b1   :  { %13659 = vmatpush1.msra.mxu1 %v13267_v54  ;;  %13722 = vmatprep.mubr.f32.mxu1 %v28695_v0 }
 0x7b8   :  { %13724 = vmatmul.mubr.f32.vlgmr.msra.gmra.mrb[18].mxu1 %v29065_v33 }
 0x7b9   :  { %15150 = vmatprep.mubr.f32.mxu1 %v28695_v0 }
 0x844   :  { %v12330_v47 = vpop.f32.mrb[16].mxu0 }
 0x845   :  { %v12332_v58 = vpop.f32.mrb[17].mxu0  ;;  %v13730_v60 = vmul.f32 %v12330_v47, %v31321_v30  ;;  %v28623_v30 = vld [vmem:[#allocation5 + $0x88] sm:$0xff] }
 0x846   :  { %v13731_v22 = vmul.f32 %v12332_v58, %v31205_v10 }
 0x85f   :  { %v12795_v9 = vpop.f32.mrb[16].mxu1 }
 0x860   :  { %v12797_v61 = vpop.f32.mrb[17].mxu1  ;;  %v13732_v41 = vmul.f32 %v12795_v9, %v31380_v4 }
 0x870   :  { %v13260_v53 = vpop.f32.mrb[18].mxu0 }
 0x871   :  { %v13734_v46 = vmul.f32 %v13260_v53, %v31258_v55  ;;  %v13262_v21 = vpop.f32.mrb[19].mxu0  ;;  %v13733_v53 = vmul.f32 %v12797_v61, %v31240_v19 }
 0x872   :  { %v13735_v50 = vmul.f32 %v13262_v21, %v31163_v11 }
 0x873   :  { %v13738_v25 = vsub.f32 %v13730_v60, %v13734_v46 }
 0x874   :  { %v13739_v35 = vsub.f32 %v13731_v22, %v13735_v50 }
 0x875   :  { %v13742_v16 = vmul.f32 0.125, %v13738_v25 }
 0x876   :  { %v13743_v1 = vmul.f32 0.125, %v13739_v35 }
 0x877   :  { %v13746_v37 = vadd.f32 %v13742_v16, %v29255_v49 }
 0x878   :  { %v13747_v23 = vadd.f32 %v13743_v1, %v29255_v49 }
 0x879   :  { %v13750_v62 = vmul.f32 0.01, %v13746_v37 }
 0x87a   :  { %v13751_v3 = vmul.f32 0.01, %v13747_v23 }
 0x87b   :  { %v13754_v20 = vadd.f32 %v28622_v24, %v13750_v62 }
 0x87c   :  { %v13755_v43 = vadd.f32 %v28623_v30, %v13751_v3 }
 0x87d   :  { %v13758_v55 = vmul.f32 0.15915494, %v13754_v20 }
 0x87e   :  { %v13759_v2 = vmul.f32 0.15915494, %v13755_v43 }
 0x87f   :  { %vm13762_vm3 = vcmp.lt.f32.partialorder %v13758_v55, 0.0  ;;  %v13766_v10 = vceil.f32 %v13758_v55  ;;  %v13770_v5 = vfloor.f32 %v13758_v55 }
 0x880   :  { %vm13763_vm4 = vcmp.lt.f32.partialorder %v13759_v2, 0.0  ;;  %v13767_v11 = vceil.f32 %v13759_v2  ;;  %v13771_v56 = vfloor.f32 %v13759_v2 }
 0x881   :  { %v13774_v52 = vsel %vm13762_vm3, %v13766_v10, %v13770_v5 }
 0x882   :  { %v13778_v63 = vmul.f32 6.2831855, %v13774_v52  ;;  %v13775_v14 = vsel %vm13763_vm4, %v13767_v11, %v13771_v56  ;;  %v28624_v52 = vld [vmem:[#allocation5 + $0x90] sm:$0xff] }
 0x883   :  { %v13779_v15 = vmul.f32 6.2831855, %v13775_v14 }
 0x884   :  { %v31424_v42 = vsub.f32 %v13754_v20, %v13778_v63 }
 0x885   :  { %v31426_v26 = vsub.f32 %v13755_v43, %v13779_v15 }
 0x886   :  { %13787 = vst [vmem:[#allocation5 + $0xa0] sm:$0xff] %v31424_v42  ;;  %v13794_v12 = vand.u32 2139095040, %v31424_v42  ;;  %v13791_v58 = vand.u32 2147483647, %v31424_v42 }
 0x887   :  { %13788 = vst [vmem:[#allocation5 + $0xa8] sm:$0xff] %v31426_v26  ;;  %v13897_v31 = vand.u32 2139095040, %v31426_v26  ;;  %v13894_v51 = vand.u32 2147483647, %v31426_v26 }
 0x888   :  { %v13795_v44 = vshrl.u32 %v13794_v12, 23  ;;  %v28625_v12 = vld [vmem:[#allocation5 + $0x98] sm:$0xff] }
 0x889   :  { %v13898_v29 = vshrl.u32 %v13897_v31, 23  ;;  %v13901_v27 = vand.u32 8388607, %v13894_v51 }
 0x88a   :  { %v27713_v54 = vadd.s32 4294967169, %v13795_v44 }
 0x88b   :  { %v27717_v8 = vadd.s32 4294967169, %v13898_v29  ;;  %v13725_v45 = vpop.f32.mrb[18].mxu1  ;;  %v13902_v47 = vor.u32 8388608, %v13901_v27 }
 0x88c   :  { %v13801_v6 = vadd.s32 1, %v27713_v54  ;;  %v13736_v7 = vmul.f32 %v13725_v45, %v31325_v39  ;;  %v13727_v17 = vpop.f32.mrb[19].mxu1  ;;  %v31444_v39 = vand.u32 8388607, %v13791_v58 }
 0x88d   :  { %v13904_v57 = vadd.s32 1, %v27717_v8  ;;  %v13737_v60 = vmul.f32 %v13727_v17, %v31235_v18  ;;  %v31440_v35 = vshll.u32 %v13902_v47, 8 }
 0x88e   :  { %vm13802_vm6 = vcmp.gt.s32.totalorder %v13801_v6, 0  ;;  %v13740_v46 = vsub.f32 %v13732_v41, %v13736_v7 }
 0x88f   :  { %vm13905_vm5 = vcmp.gt.s32.totalorder %v13904_v57, 0  ;;  %v13741_v50 = vsub.f32 %v13733_v53, %v13737_v60  ;;  %v31446_v4 = vsel %vm13802_vm6, %v13801_v6, 0 }
 0x890   :  { %v13906_v21 = vsel %vm13905_vm5, %v13904_v57, 0  ;;  %v13744_v25 = vmul.f32 0.125, %v13740_v46  ;;  %v31461_v56 = vand.u32 31, %v31446_v4 }
 0x891   :  { %v13908_v22 = vand.u32 31, %v13906_v21  ;;  %v13907_v9 = vshrl.u32 %v13906_v21, 5  ;;  %v13745_v16 = vmul.f32 0.125, %v13741_v50 }
 0x892   :  { %v13748_v61 = vadd.f32 %v13744_v25, %v29255_v49 }
 0x893   :  { %v13909_v19 = vsub.s32 32, %v13908_v22  ;;  %v13911_v18 = vshll.u32 %v28696_v32, %v13908_v22  ;;  %v13914_v1 = vshll.u32 %v28697_v34, %v13908_v22  ;;  %v13917_v37 = vshll.u32 %v28698_v36, %v13908_v22 }
 0x894   :  { %v13749_v23 = vadd.f32 %v13745_v16, %v29255_v49  ;;  %v13920_v24 = vshll.u32 %v28699_v38, %v13908_v22  ;;  %v13752_v20 = vmul.f32 0.01, %v13748_v61  ;;  %v13923_v11 = vshll.u32 %v28700_v40, %v13908_v22 }
 0x895   :  { %v13912_v62 = vshrl.u32 %v28697_v34, %v13909_v19  ;;  %v13915_v3 = vshrl.u32 %v28698_v36, %v13909_v19  ;;  %v13918_v30 = vshrl.u32 %v28699_v38, %v13909_v19  ;;  %v13921_v43 = vshrl.u32 %v28700_v40, %v13909_v19 }
 0x896   :  { %v13924_v55 = vshrl.u32 %v28701_v48, %v13909_v19  ;;  %v13753_v2 = vmul.f32 0.01, %v13749_v23  ;;  %v13756_v63 = vadd.f32 %v28624_v52, %v13752_v20  ;;  %v13910_v44 = vshrl.u32 %v28696_v32, %v13909_v19 }
 0x897   :  { %v13913_v10 = vor.u32 %v13912_v62, %v13911_v18  ;;  %v13916_v5 = vor.u32 %v13915_v3, %v13914_v1  ;;  %v13919_v14 = vor.u32 %v13918_v30, %v13917_v37  ;;  %v13922_v15 = vor.u32 %v13921_v43, %v13920_v24 }
 0x898   :  { %v13757_v31 = vadd.f32 %v28625_v12, %v13753_v2  ;;  %v13925_v29 = vor.u32 %v13924_v55, %v13923_v11  ;;  %vm13926_vm7 = vcmp.lt.s32.totalorder %v13907_v9, 1  ;;  %v13760_v54 = vmul.f32 0.15915494, %v13756_v63 }
 0x899   :  { %vm13927_vm12 = vcmp.lt.s32.totalorder %v13907_v9, 2  ;;  %vm13928_vm15 = vcmp.lt.s32.totalorder %v13907_v9, 3  ;;  %vm13929_vm10 = vcmp.lt.s32.totalorder %v13907_v9, 4  ;;  %v13934_v6 = vsel %vm13926_vm7, %v13913_v10, %v13916_v5 }
 0x89a   :  { %v13761_v27 = vmul.f32 0.15915494, %v13757_v31  ;;  %v13931_v8 = vsel %vm13929_vm10, %v13919_v14, 2102212464  ;;  %v13935_v45 = vsel %vm13929_vm10, %v13922_v15, 920167782  ;;  %v13768_v57 = vceil.f32 %v13760_v54 }
 0x89b   :  { %vm13764_vm8 = vcmp.lt.f32.partialorder %v13760_v54, 0.0  ;;  %v13772_v41 = vfloor.f32 %v13760_v54  ;;  %v13938_v7 = vsel %vm13926_vm7, %v13916_v5, %v13919_v14  ;;  %v13936_v53 = vsel %vm13928_vm15, %v13919_v14, %v13935_v45 }
 0x89c   :  { %vm13765_vm9 = vcmp.lt.f32.partialorder %v13761_v27, 0.0  ;;  %v13769_v17 = vceil.f32 %v13761_v27  ;;  %v13773_v47 = vfloor.f32 %v13761_v27  ;;  %v13930_v46 = vsel %vm13926_vm7, %v13910_v44, %v13913_v10 }
 0x89d   :  { %v13776_v60 = vsel %vm13764_vm8, %v13768_v57, %v13772_v41  ;;  %v13937_v21 = vsel %vm13927_vm12, %v13934_v6, %v13936_v53  ;;  %v13939_v22 = vsel %vm13929_vm10, %v13925_v29, 1326507024  ;;  %v13932_v16 = vsel %vm13928_vm15, %v13916_v5, %v13931_v8 }
 0x89e   :  { %v13780_v50 = vmul.f32 6.2831855, %v13776_v60  ;;  %v13777_v25 = vsel %vm13765_vm9, %v13769_v17, %v13773_v47  ;;  %v13940_v19 = vsel %vm13928_vm15, %v13922_v15, %v13939_v22  ;;  %v13933_v20 = vsel %vm13927_vm12, %v13930_v46, %v13932_v16 }
 0x89f   :  { %v13781_v61 = vmul.f32 6.2831855, %v13777_v25  ;;  %v13941_v18 = vsel %vm13927_vm12, %v13938_v7, %v13940_v19  ;;  %v31476_v1 = vmul.u32.u64.low %v31440_v35, %v13937_v21  ;;  %v31477_v37 = vmul.u32.u64.high %v31440_v35, %v13937_v21, %v31476_v1 }
 0x8a0   :  { %v31479_v23 = vsub.f32 %v13756_v63, %v13780_v50  ;;  %v31482_v62 = vmul.u32.u64.low %v31440_v35, %v13941_v18  ;;  %v31483_v3 = vmul.u32.u64.high %v31440_v35, %v13941_v18, %v31482_v62  ;;  %v13799_v43 = vor.u32 8388608, %v31444_v39 }
 0x8a1   :  { %v31485_v24 = vsub.f32 %v13757_v31, %v13781_v61  ;;  %v13952_v2 = vadd.s32 1, %v31477_v37  ;;  %v13806_v5 = vsub.s32 32, %v31461_v56  ;;  %v13949_v9 = vmul.u32 %v31440_v35, %v13933_v20 }
 0x8a2   :  { %13789 = vst [vmem:[#allocation5 + $0xb0] sm:$0xff] %v31479_v23  ;;  %v14000_v30 = vand.u32 2139095040, %v31479_v23  ;;  %vm13951_vm13 = vc.u32 %v31483_v3, %v31476_v1  ;;  %v31501_v12 = vshll.u32 %v13799_v43, 8  ;;  %v31504_v31 = vshrl.u32 %v31446_v4, 5 }
 0x8a3   :  { %13790 = vst [vmem:[#allocation5 + $0xb8] sm:$0xff] %v31485_v24  ;;  %v14103_v55 = vand.u32 2139095040, %v31485_v24  ;;  %v14100_v10 = vand.u32 2147483647, %v31485_v24  ;;  %v13953_v63 = vsel %vm13951_vm13, %v13952_v2, %v31477_v37  ;;  %v13809_v29 = vshrl.u32 %v28697_v34, %v13806_v5 }
 0x8a4   :  { %v14001_v11 = vshrl.u32 %v14000_v30, 23  ;;  %v13954_v39 = vadd.s32 %v13953_v63, %v13949_v9  ;;  %v13815_v35 = vshrl.u32 %v28699_v38, %v13806_v5  ;;  %v13808_v8 = vshll.u32 %v28696_v32, %v31461_v56 }
 0x8a5   :  { %v14104_v52 = vshrl.u32 %v14103_v55, 23  ;;  %v14107_v15 = vand.u32 8388607, %v14100_v10  ;;  %v13811_v6 = vshll.u32 %v28697_v34, %v31461_v56  ;;  %v13812_v57 = vshrl.u32 %v28698_v36, %v13806_v5 }
 0x8a6   :  { %v27721_v14 = vadd.s32 4294967169, %v14001_v11  ;;  %v13955_v27 = vadd.s32 536870912, %v13954_v39  ;;  %v13814_v4 = vshll.u32 %v28698_v36, %v31461_v56  ;;  %v13818_v41 = vshrl.u32 %v28700_v40, %v13806_v5 }
 0x8a7   :  { %v27725_v44 = vadd.s32 4294967169, %v14104_v52  ;;  %v14108_v17 = vor.u32 8388608, %v14107_v15  ;;  %v13807_v47 = vshrl.u32 %v28696_v32, %v13806_v5  ;;  %v31520_v53 = vshrl.u32 %v28701_v48, %v13806_v5 }
 0x8a8   :  { %v14007_v54 = vadd.s32 1, %v27721_v14  ;;  %v31516_v7 = vshrl.u32 %v13955_v27, 30  ;;  %v13810_v60 = vor.u32 %v13809_v29, %v13808_v8  ;;  %v31522_v46 = vor.u32 %v13815_v35, %v13814_v4 }
 0x8a9   :  { %v14110_v45 = vadd.s32 1, %v27725_v44  ;;  %v13817_v21 = vshll.u32 %v28699_v38, %v31461_v56  ;;  %v31529_v25 = vshll.u32 %v28700_v40, %v31461_v56  ;;  %v13950_v19 = vadd.s32 %v31476_v1, %v31483_v3 }
 0x8aa   :  { %vm14008_vm14 = vcmp.gt.s32.totalorder %v14007_v54, 0  ;;  %v13957_v50 = vshll.u32 %v31516_v7, 30  ;;  %v31532_v61 = vor.u32 %v13812_v57, %v13811_v6  ;;  %v31538_v62 = vshll.u32 %v14108_v17, 8 }
 0x8ab   :  { %vm14111_vm0 = vcmp.gt.s32.totalorder %v14110_v45, 0  ;;  %v31534_v18 = vor.u32 %v13818_v41, %v13817_v21  ;;  %v13822_v20 = vor.u32 %v31520_v53, %v31529_v25  ;;  %vm13823_vm11 = vcmp.lt.s32.totalorder %v31504_v31, 1 }
 0x8ac   :  { %v14112_v22 = vsel %vm14111_vm0, %v14110_v45, 0  ;;  %v31536_v37 = vsub.s32 %v13954_v39, %v13957_v50  ;;  %v31543_v30 = vsel %vm14008_vm14, %v14007_v54, 0  ;;  %vm13826_vm1 = vcmp.lt.s32.totalorder %v31504_v31, 4 }
 0x8ad   :  { %v14114_v16 = vand.u32 31, %v14112_v22  ;;  %v31548_v1 = vsel %vm13823_vm11, %v13807_v47, %v13810_v60  ;;  %v14113_v3 = vshrl.u32 %v14112_v22, 5  ;;  %v13828_v2 = vsel %vm13826_vm1, %v31522_v46, 2102212464 }
 0x8ae   :  { %v13960_v43 = vsub.s32 0, %v31536_v37  ;;  %vm13825_vm2 = vcmp.lt.s32.totalorder %v31504_v31, 3  ;;  %v13980_v44 = vsub.s32 4, %v31516_v7  ;;  %v13831_v35 = vsel %vm13823_vm11, %v13810_v60, %v31532_v61 }
 0x8af   :  { %v14115_v56 = vsub.s32 32, %v14114_v16  ;;  %v14117_v55 = vshll.u32 %v28696_v32, %v14114_v16  ;;  %v14120_v11 = vshll.u32 %v28697_v34, %v14114_v16  ;;  %v14123_v52 = vshll.u32 %v28698_v36, %v14114_v16 }
 0x8b0   :  { %v27718_v63 = vmin.u32 %v13960_v43, %v31536_v37  ;;  %v14126_v39 = vshll.u32 %v28699_v38, %v14114_v16  ;;  %v13832_v54 = vsel %vm13826_vm1, %v31534_v18, 920167782  ;;  %vm13824_vm3 = vcmp.lt.s32.totalorder %v31504_v31, 2 }
 0x8b1   :  { %v14118_v5 = vshrl.u32 %v28697_v34, %v14115_v56  ;;  %v14121_v9 = vshrl.u32 %v28698_v36, %v14115_v56  ;;  %v14124_v14 = vshrl.u32 %v28699_v38, %v14115_v56  ;;  %v14127_v15 = vshrl.u32 %v28700_v40, %v14115_v56 }
 0x8b2   :  { %v13962_v27 = vclz %v27718_v63  ;;  %v14116_v57 = vshrl.u32 %v28696_v32, %v14115_v56  ;;  %v14129_v4 = vshll.u32 %v28700_v40, %v14114_v16  ;;  %v14130_v41 = vshrl.u32 %v28701_v48, %v14115_v56 }
 0x8b3   :  { %v14119_v29 = vor.u32 %v14118_v5, %v14117_v55  ;;  %v14122_v8 = vor.u32 %v14121_v9, %v14120_v11  ;;  %v14125_v6 = vor.u32 %v14124_v14, %v14123_v52  ;;  %v14128_v45 = vor.u32 %v14127_v15, %v14126_v39 }
 0x8b4   :  { %vm14132_vm4 = vcmp.lt.s32.totalorder %v14113_v3, 1  ;;  %v27719_v17 = vadd.s32 4294967294, %v13962_v27  ;;  %vm14133_vm5 = vcmp.lt.s32.totalorder %v14113_v3, 2  ;;  %vm14135_vm6 = vcmp.lt.s32.totalorder %v14113_v3, 4 }
 0x8b5   :  { %v14140_v47 = vsel %vm14132_vm4, %v14119_v29, %v14122_v8  ;;  %v14131_v60 = vor.u32 %v14130_v41, %v14129_v4  ;;  %vm14134_vm7 = vcmp.lt.s32.totalorder %v14113_v3, 3  ;;  %v14137_v21 = vsel %vm14135_vm6, %v14125_v6, 2102212464 }
 0x8b6   :  { %v14141_v22 = vsel %vm14135_vm6, %v14128_v45, 920167782  ;;  %vm27720_vm12 = vcmp.lt.s32.totalorder %v27719_v17, 0  ;;  %v14136_v50 = vsel %vm14132_vm4, %v14116_v57, %v14119_v29  ;;  %v14144_v55 = vsel %vm14132_vm4, %v14122_v8, %v14125_v6 }
 0x8b7   :  { %v14142_v43 = vsel %vm14134_vm7, %v14125_v6, %v14141_v22  ;;  %vm13896_vm15 = vcmp.lt.s32.totalorder %v31426_v26, 0  ;;  %v13965_v5 = vsel %vm27720_vm12, 0, %v27719_v17  ;;  %v14138_v11 = vsel %vm14134_vm7, %v14122_v8, %v14137_v21 }
 0x8b8   :  { %v14143_v16 = vsel %vm14133_vm5, %v14140_v47, %v14142_v43  ;;  %v14145_v56 = vsel %vm14135_vm6, %v14131_v60, 1326507024  ;;  %v13966_v9 = vsub.s32 32, %v13965_v5  ;;  %v13970_v52 = vsub.s32 4294967266, %v13965_v5 }
 0x8b9   :  { %v14146_v63 = vsel %vm14134_vm7, %v14128_v45, %v14145_v56  ;;  %v13833_v14 = vsel %vm13825_vm2, %v31522_v46, %v13832_v54  ;;  %v13967_v39 = vshll.u32 %v31536_v37, %v13965_v5  ;;  %v14139_v45 = vsel %vm14133_vm5, %v14136_v50, %v14138_v11 }
 0x8ba   :  { %v14147_v15 = vsel %vm14133_vm5, %v14144_v55, %v14146_v63  ;;  %v31583_v29 = vmul.u32.u64.low %v31538_v62, %v14143_v16  ;;  %v31584_v27 = vmul.u32.u64.high %v31538_v62, %v14143_v16, %v31583_v29  ;;  %v13968_v8 = vshrl.u32 %v13950_v19, %v13966_v9 }
 0x8bb   :  { %v13971_v6 = vadd.s32 127, %v13970_v52  ;;  %v31588_v57 = vmul.u32.u64.low %v31538_v62, %v14147_v15  ;;  %v31589_v4 = vmul.u32.u64.high %v31538_v62, %v14147_v15, %v31588_v57  ;;  %v13834_v54 = vsel %vm13824_vm3, %v13831_v35, %v13833_v14 }
 0x8bc   :  { %v13835_v37 = vsel %vm13823_vm11, %v31532_v61, %v31522_v46  ;;  %v13836_v19 = vsel %vm13826_vm1, %v13822_v20, 1326507024  ;;  %v13969_v41 = vor.u32 %v13968_v8, %v13967_v39  ;;  %v13829_v3 = vsel %vm13825_vm2, %v31532_v61, %v13828_v2 }
 0x8bd   :  { %v13972_v17 = vshll.u32 %v13971_v6, 23  ;;  %v13837_v35 = vsel %vm13825_vm2, %v31534_v18, %v13836_v19  ;;  %v14158_v47 = vadd.s32 1, %v31584_v27  ;;  %v14011_v20 = vand.u32 31, %v31543_v30 }
 0x8be   :  { %v13838_v46 = vsel %vm13824_vm3, %v13835_v37, %v13837_v35  ;;  %v31613_v53 = vmul.u32.u64.low %v31501_v12, %v13834_v54  ;;  %v31614_v25 = vmul.u32.u64.high %v31501_v12, %v13834_v54, %v31613_v53  ;;  %v14155_v21 = vmul.u32 %v31538_v62, %v14139_v45 }
 0x8bf   :  { %v13973_v60 = vor.u32 4788187, %v13972_v17  ;;  %vm14157_vm10 = vc.u32 %v31589_v4, %v31583_v29  ;;  %v13830_v18 = vsel %vm13824_vm3, %v31548_v1, %v13829_v3  ;;  %v13976_v43 = vcvt.s32.f32 %v13969_v41 }
 0x8c0   :  { %v14159_v61 = vsel %vm14157_vm10, %v14158_v47, %v31584_v27  ;;  %v31625_v2 = vmul.u32.u64.low %v31501_v12, %v13838_v46  ;;  %v31626_v22 = vmul.u32.u64.high %v31501_v12, %v13838_v46, %v31625_v2  ;;  %v13981_v62 = vsel %vm13896_vm15, %v13980_v44, %v31516_v7 }
 0x8c1   :  { %v13974_v50 = vand.u32 2147483647, %v13973_v60  ;;  %v14160_v55 = vadd.s32 %v14159_v61, %v14155_v21  ;;  %v13849_v5 = vadd.s32 1, %v31614_v25  ;;  %vm13895_vm8 = vcmp.le.f32.partialorder %v13894_v51, 0.7853982 }
 0x8c2   :  { %v31636_v11 = vsel %vm13895_vm8, 0, %v13981_v62  ;;  %v13846_v16 = vmul.u32 %v31501_v12, %v13830_v18  ;;  %vm13848_vm9 = vc.u32 %v31626_v22, %v31613_v53  ;;  %v14012_v7 = vsub.s32 32, %v14011_v20 }
 0x8c3   :  { %v13977_v31 = vmul.f32 %v13976_v43, %v13974_v50  ;;  %v14161_v1 = vadd.s32 536870912, %v14160_v55  ;;  %v13850_v52 = vsel %vm13848_vm9, %v13849_v5, %v31614_v25  ;;  %v13997_v14 = vand.u32 2147483647, %v31479_v23 }
 0x8c4   :  { %v13851_v44 = vadd.s32 %v13850_v52, %v13846_v16  ;;  %v31648_v39 = vshrl.u32 %v31543_v30, 5  ;;  %v31652_v15 = vand.u32 3, %v31636_v11  ;;  %v14015_v6 = vshrl.u32 %v28697_v34, %v14012_v7 }
 0x8c5   :  { %v13978_v56 = vxor.u32 2147483648, %v13977_v31  ;;  %v31640_v9 = vshrl.u32 %v14161_v1, 30  ;;  %v14024_v57 = vshrl.u32 %v28700_v40, %v14012_v7  ;;  %v14018_v54 = vshrl.u32 %v28698_v36, %v14012_v7 }
 0x8c6   :  { %v13852_v27 = vadd.s32 536870912, %v13851_v44  ;;  %v14021_v30 = vshrl.u32 %v28699_v38, %v14012_v7  ;;  %v14004_v19 = vand.u32 8388607, %v13997_v14  ;;  %v14023_v41 = vshll.u32 %v28699_v38, %v14011_v20 }
 0x8c7   :  { %v13979_v63 = vsel %vm13896_vm15, %v13978_v56, %v13977_v31  ;;  %v14163_v51 = vshll.u32 %v31640_v9, 30  ;;  %v14027_v17 = vshrl.u32 %v28701_v48, %v14012_v7  ;;  %v14014_v35 = vshll.u32 %v28696_v32, %v14011_v20 }
 0x8c8   :  { %v13982_v12 = vsel %vm13895_vm8, %v31426_v26, %v13979_v63  ;;  %v31658_v45 = vshrl.u32 %v13852_v27, 30  ;;  %v14017_v47 = vshll.u32 %v28697_v34, %v14011_v20  ;;  %v14020_v46 = vshll.u32 %v28698_v36, %v14011_v20 }
 0x8c9   :  { %28526 = vcosq.f32 %v13982_v12  ;;  %v31654_v8 = vsub.s32 %v14160_v55, %v14163_v51  ;;  %vm13992_vm13 = vcmp.eq.s32.totalorder %v31652_v15, 2  ;;  %v14156_v25 = vadd.s32 %v31583_v29, %v31589_v4 }
 0x8ca   :  { %28528 = vsinq.f32 %v13982_v12  ;;  %v13854_v3 = vshll.u32 %v31658_v45, 30  ;;  %v14025_v21 = vor.u32 %v14024_v57, %v14023_v41  ;;  %v14026_v61 = vshll.u32 %v28700_v40, %v14011_v20 }
 0x8cb   :  { %v14166_v37 = vsub.s32 0, %v31654_v8  ;;  %vm13989_vm0 = vcmp.eq.s32.totalorder %v31652_v15, 0  ;;  %v14016_v2 = vor.u32 %v14015_v6, %v14014_v35  ;;  %v14019_v50 = vor.u32 %v14018_v54, %v14017_v47 }
 0x8cc   :  { %v31677_v18 = vsub.s32 %v13851_v44, %v13854_v3  ;;  %v14022_v43 = vor.u32 %v14021_v30, %v14020_v46  ;;  %vm13988_vm14 = vcmp.lt.s32.totalorder %v31652_v15, 2  ;;  %v13847_v55 = vadd.s32 %v31613_v53, %v31626_v22 }
 0x8cd   :  { %v27726_v60 = vmin.u32 %v14166_v37, %v31654_v8  ;;  %v14005_v5 = vor.u32 8388608, %v14004_v19  ;;  %v14028_v31 = vor.u32 %v14027_v17, %v14026_v61  ;;  %vm13986_vm11 = vweird.f32 %v31426_v26 }
 0x8ce   :  { %v13857_v29 = vsub.s32 0, %v31677_v18  ;;  %v14013_v4 = vshrl.u32 %v28696_v32, %v14012_v7  ;;  %vm14029_vm1 = vcmp.lt.s32.totalorder %v31648_v39, 1  ;;  %vm14032_vm2 = vcmp.lt.s32.totalorder %v31648_v39, 4 }
 0x8cf   :  { %v14168_v62 = vclz %v27726_v60  ;;  %vm14030_vm3 = vcmp.lt.s32.totalorder %v31648_v39, 2  ;;  %vm14031_vm4 = vcmp.lt.s32.totalorder %v31648_v39, 3  ;;  %v14038_v1 = vsel %vm14032_vm2, %v14025_v21, 920167782 }
 0x8d0   :  { %v27714_v53 = vmin.u32 %v13857_v29, %v31677_v18  ;;  %v14033_v22 = vsel %vm14029_vm1, %v14013_v4, %v14016_v2  ;;  %v14034_v16 = vsel %vm14032_vm2, %v14022_v43, 2102212464  ;;  %v14037_v56 = vsel %vm14029_vm1, %v14016_v2, %v14019_v50 }
 0x8d1   :  { %v27727_v20 = vadd.s32 4294967294, %v14168_v62  ;;  %v14039_v7 = vsel %vm14031_vm4, %v14022_v43, %v14038_v1  ;;  %v14041_v44 = vsel %vm14029_vm1, %v14019_v50, %v14022_v43  ;;  %v14042_v63 = vsel %vm14032_vm2, %v14028_v31, 1326507024 }
 0x8d2   :  { %v13859_v6 = vclz %v27714_v53  ;;  %v14045_v57 = vshll.u32 %v14005_v5, 8  ;;  %v14040_v19 = vsel %vm14030_vm3, %v14037_v56, %v14039_v7  ;;  %v14043_v35 = vsel %vm14031_vm4, %v14025_v21, %v14042_v63 }
 0x8d3   :  { %v31689_v52 = vpop.eup %28526  ;;  %vm27728_vm5 = vcmp.lt.s32.totalorder %v27727_v20, 0  ;;  %v14044_v61 = vsel %vm14030_vm3, %v14041_v44, %v14043_v35  ;;  %v14035_v15 = vsel %vm14031_vm4, %v14019_v50, %v14034_v16  ;;  %v14186_v56 = vsub.s32 4, %v31640_v9 }
 0x8d4   :  { %v31693_v51 = vpop.eup %28528  ;;  %v13993_v12 = vxor.u32 2147483648, %v31689_v52  ;;  %v14171_v27 = vsel %vm27728_vm5, 0, %v27727_v20  ;;  %v27715_v3 = vadd.s32 4294967294, %v13859_v6  ;;  %v14400_v50 = vadd.s32 3, %v31636_v11 }
 0x8d5   :  { %v13990_v54 = vxor.u32 2147483648, %v31693_v51  ;;  %v14172_v30 = vsub.s32 32, %v14171_v27  ;;  %v14176_v37 = vsub.s32 4294967266, %v14171_v27  ;;  %v14173_v17 = vshll.u32 %v31654_v8, %v14171_v27 }
 0x8d6   :  { %v13994_v41 = vsel %vm13992_vm13, %v13993_v12, %v31693_v51  ;;  %vm27716_vm6 = vcmp.lt.s32.totalorder %v27715_v3, 0  ;;  %v31714_v43 = vmul.u32.u64.low %v14045_v57, %v14044_v61  ;;  %v31715_v62 = vmul.u32.u64.high %v14045_v57, %v14044_v61, %v31714_v43 }
 0x8d7   :  { %v13991_v47 = vsel %vm13989_vm0, %v31689_v52, %v13990_v54  ;;  %v14174_v46 = vshrl.u32 %v14156_v25, %v14172_v30  ;;  %v14177_v60 = vadd.s32 127, %v14176_v37  ;;  %v13862_v31 = vsel %vm27716_vm6, 0, %v27715_v3 }
 0x8d8   :  { %v13995_v2 = vsel %vm13988_vm14, %v13991_v47, %v13994_v41  ;;  %v13863_v29 = vsub.s32 32, %v13862_v31  ;;  %v13867_v4 = vsub.s32 4294967266, %v13862_v31  ;;  %v13864_v7 = vshll.u32 %v31677_v18, %v13862_v31 }
 0x8d9   :  { %v31719_v8 = vsel %vm13986_vm11, nan, %v13995_v2  ;;  %v14175_v21 = vor.u32 %v14174_v46, %v14173_v17  ;;  %v14178_v5 = vshll.u32 %v14177_v60, 23  ;;  %v14036_v30 = vsel %vm14030_vm3, %v14033_v22, %v14035_v15 }
 0x8da   :  { %v31722_v25 = vand.u32 4294901760, %v31719_v8  ;;  %v31726_v1 = vmul.u32.u64.low %v14045_v57, %v14040_v19  ;;  %v31727_v53 = vmul.u32.u64.high %v14045_v57, %v14040_v19, %v31726_v1  ;;  %v13865_v44 = vshrl.u32 %v13847_v55, %v13863_v29 }
 0x8db   :  { %v14179_v20 = vor.u32 4788187, %v14178_v5  ;;  %v13868_v63 = vadd.s32 127, %v13867_v4  ;;  %v14182_v6 = vcvt.s32.f32 %v14175_v21  ;;  %v14401_v17 = vand.u32 3, %v14400_v50 }
 0x8dc   :  { %14620 = vmatprep.subr.mxu0 %v31722_v25  ;;  %v13866_v16 = vor.u32 %v13865_v44, %v13864_v7  ;;  %vm14054_vm7 = vc.u32 %v31715_v62, %v31726_v1  ;;  %v14055_v41 = vadd.s32 1, %v31727_v53  ;;  %vm14102_vm12 = vcmp.lt.s32.totalorder %v31485_v24, 0 }
 0x8dd   :  { %v14180_v27 = vand.u32 2147483647, %v14179_v20  ;;  %v13869_v37 = vshll.u32 %v13868_v63, 23  ;;  %v14052_v55 = vmul.u32 %v14045_v57, %v14036_v30  ;;  %v14187_v35 = vsel %vm14102_vm12, %v14186_v56, %v31640_v9 }
 0x8de   :  { %v14056_v39 = vsel %vm14054_vm7, %v14055_v41, %v31727_v53  ;;  %vm14403_vm15 = vcmp.eq.s32.totalorder %v14401_v17, 0  ;;  %v13873_v22 = vcvt.s32.f32 %v13866_v16  ;;  %vm14101_vm10 = vcmp.le.f32.partialorder %v14100_v10, 0.7853982 }
 0x8df   :  { %v14183_v19 = vmul.f32 %v14182_v6, %v14180_v27  ;;  %v13870_v18 = vor.u32 4788187, %v13869_v37  ;;  %v14057_v47 = vadd.s32 %v14056_v39, %v14052_v55  ;;  %v14405_v46 = vsel %vm14403_vm15, %v31689_v52, %v13990_v54 }
 0x8e0   :  { %vm14402_vm8 = vcmp.lt.s32.totalorder %v14401_v17, 2  ;;  %vm14406_vm9 = vcmp.eq.s32.totalorder %v14401_v17, 2  ;;  %v14189_v43 = vsel %vm14101_vm10, 0, %v14187_v35  ;;  %v13877_v21 = vsub.s32 4, %v31658_v45 }
 0x8e1   :  { %v14184_v3 = vxor.u32 2147483648, %v14183_v19  ;;  %v13871_v11 = vand.u32 2147483647, %v13870_v18  ;;  %v14058_v2 = vadd.s32 536870912, %v14057_v47  ;;  %v14408_v9 = vsel %vm14406_vm9, %v13993_v12, %v31693_v51 }
 0x8e2   :  { %v14409_v5 = vsel %vm14402_vm8, %v14405_v46, %v14408_v9  ;;  %vm13793_vm13 = vcmp.lt.s32.totalorder %v31424_v42, 0  ;;  %vm13792_vm0 = vcmp.le.f32.partialorder %v13791_v58, 0.7853982  ;;  %v14608_v4 = vadd.s32 3, %v14189_v43 }
 0x8e3   :  { %v14185_v60 = vsel %vm14102_vm12, %v14184_v3, %v14183_v19  ;;  %v13874_v57 = vmul.f32 %v13873_v22, %v13871_v11  ;;  %v31750_v31 = vshrl.u32 %v14058_v2, 30  ;;  %v31754_v10 = vsel %vm13986_vm11, nan, %v14409_v5 }
 0x8e4   :  { %v14188_v61 = vsel %vm14101_vm10, %v31485_v24, %v14185_v60  ;;  %v13878_v12 = vsel %vm13793_vm13, %v13877_v21, %v31658_v45  ;;  %v14193_v20 = vand.u32 3, %v14189_v43  ;;  %v31766_v56 = vsub.f32 %v31719_v8, %v31722_v25 }
 0x8e5   :  { %28530 = vcosq.f32 %v14188_v61  ;;  %v13875_v54 = vxor.u32 2147483648, %v13874_v57  ;;  %v14060_v51 = vshll.u32 %v31750_v31, 30  ;;  %v31762_v26 = vsel %vm13792_vm0, 0, %v13878_v12 }
 0x8e6   :  { %28532 = vsinq.f32 %v14188_v61  ;;  %v14609_v58 = vand.u32 3, %v14608_v4  ;;  %vm14192_vm14 = vweird.f32 %v31485_v24  ;;  %v13884_v45 = vand.u32 3, %v31762_v26 }
 0x8e7   :  { %v13876_v52 = vsel %vm13793_vm13, %v13875_v54, %v13874_v57  ;;  %v14061_v15 = vsub.s32 %v14057_v47, %v14060_v51  ;;  %vm14194_vm11 = vcmp.lt.s32.totalorder %v14193_v20, 2  ;;  %vm14195_vm1 = vcmp.eq.s32.totalorder %v14193_v20, 0 }
 0x8e8   :  { %v13879_v29 = vsel %vm13792_vm0, %v31424_v42, %v13876_v52  ;;  %vm14198_vm2 = vcmp.eq.s32.totalorder %v14193_v20, 2  ;;  %v14699_v50 = vand.u32 4294901760, %v31766_v56  ;;  %vm14614_vm3 = vcmp.eq.s32.totalorder %v14609_v58, 2 }
 0x8e9   :  { %28534 = vcosq.f32 %v13879_v29  ;;  %v14063_v53 = vsub.s32 0, %v14061_v15  ;;  %vm14611_vm4 = vcmp.eq.s32.totalorder %v14609_v58, 0  ;;  %vm13889_vm5 = vcmp.eq.s32.totalorder %v13884_v45, 2 }
 0x8ea   :  { %28536 = vsinq.f32 %v13879_v29  ;;  %vm14610_vm6 = vcmp.lt.s32.totalorder %v14609_v58, 2  ;;  %v14053_v3 = vadd.s32 %v31726_v1, %v31715_v62  ;;  %v14700_v61 = vsub.f32 %v31766_v56, %v14699_v50 }
 0x8eb   :  { %v27722_v7 = vmin.u32 %v14063_v53, %v14061_v15  ;;  %vm13886_vm12 = vcmp.eq.s32.totalorder %v13884_v45, 0  ;;  %vm13885_vm15 = vcmp.lt.s32.totalorder %v13884_v45, 2  ;;  %vm13883_vm10 = vweird.f32 %v31424_v42 }
 0x8ec   :  { %v14701_v52 = vand.u32 4294901760, %v14700_v61  ;;  %vm13999_vm8 = vcmp.lt.s32.totalorder %v31479_v23, 0  ;;  %vm31816_vm9 = vcmp.le.f32.partialorder %v13997_v14, 0.7853982  ;;  %v14296_v14 = vadd.s32 3, %v31762_v26 }
 0x8ed   :  { %v14065_v6 = vclz %v27722_v7 }
 0x8ef   :  { %v28531_v44 = vpop.eup %28530  ;;  %v27723_v37 = vadd.s32 4294967294, %v14065_v6 }
 0x8f0   :  { %v28533_v63 = vpop.eup %28532  ;;  %v14199_v27 = vxor.u32 2147483648, %v28531_v44 }
 0x8f1   :  { %v14196_v30 = vxor.u32 2147483648, %v28533_v63  ;;  %vm27724_vm7 = vcmp.lt.s32.totalorder %v27723_v37, 0 }
 0x8f2   :  { %v14200_v16 = vsel %vm14198_vm2, %v14199_v27, %v28533_v63  ;;  %v14616_v19 = vsel %vm14614_vm3, %v14199_v27, %v28533_v63  ;;  %v14068_v47 = vsel %vm27724_vm7, 0, %v27723_v37  ;;  %vm14089_vm3 = vweird.f32 %v31479_v23 }
 0x8f3   :  { %v14197_v41 = vsel %vm14195_vm1, %v28531_v44, %v14196_v30  ;;  %v14613_v17 = vsel %vm14611_vm4, %v28531_v44, %v14196_v30  ;;  %v31771_v18 = vpop.eup %28534  ;;  %v14069_v1 = vsub.s32 32, %v14068_v47  ;;  %v14073_v2 = vsub.s32 4294967266, %v14068_v47 }
 0x8f4   :  { %v14201_v55 = vsel %vm14194_vm11, %v14197_v41, %v14200_v16  ;;  %v14617_v35 = vsel %vm14610_vm6, %v14613_v17, %v14616_v19  ;;  %v31776_v39 = vpop.eup %28536  ;;  %v13890_v22 = vxor.u32 2147483648, %v31771_v18  ;;  %v14070_v21 = vshll.u32 %v14061_v15, %v14068_v47 }
 0x8f5   :  { %v31780_v11 = vsel %vm14192_vm14, nan, %v14201_v55  ;;  %v31785_v46 = vsel %vm14192_vm14, nan, %v14617_v35  ;;  %v13887_v62 = vxor.u32 2147483648, %v31776_v39  ;;  %v14071_v9 = vshrl.u32 %v14053_v3, %v14069_v1 }
 0x8f6   :  { %v31788_v60 = vand.u32 4294901760, %v31780_v11  ;;  %v13891_v57 = vsel %vm13889_vm5, %v13890_v22, %v31776_v39  ;;  %v14074_v5 = vadd.s32 127, %v14073_v2  ;;  %v14083_v30 = vsub.s32 4, %v31750_v31 }
 0x8f7   :  { %v13888_v24 = vsel %vm13886_vm12, %v31771_v18, %v13887_v62  ;;  %v14072_v12 = vor.u32 %v14071_v9, %v14070_v21  ;;  %v14297_v41 = vand.u32 3, %v14296_v14  ;;  %v16014_v27 = vand.u32 4294901760, %v31785_v46 }
 0x8f8   :  { %15085 = vmatprep.subr.mxu1 %v31788_v60  ;;  %v13892_v43 = vsel %vm13885_vm15, %v13888_v24, %v13891_v57  ;;  %v14075_v29 = vshll.u32 %v14074_v5, 23  ;;  %v14084_v37 = vsel %vm13999_vm8, %v14083_v30, %v31750_v31  ;;  %v31832_v19 = vsub.f32 %v31780_v11, %v31788_v60 }
 0x8f9   :  { %v31803_v54 = vsel %vm13883_vm10, nan, %v13892_v43  ;;  %v14079_v53 = vcvt.s32.f32 %v14072_v12  ;;  %v14086_v17 = vsel %vm31816_vm9, 0, %v14084_v37  ;;  %vm14299_vm13 = vcmp.eq.s32.totalorder %v14297_v41, 0 }
 0x8fa   :  { %v31806_v51 = vand.u32 4294901760, %v31803_v54  ;;  %v14076_v20 = vor.u32 4788187, %v14075_v29  ;;  %v14090_v55 = vand.u32 3, %v14086_v17  ;;  %v15164_v3 = vand.u32 4294901760, %v31832_v19 }
 0x8fb   :  { %vm14302_vm0 = vcmp.eq.s32.totalorder %v14297_v41, 2  ;;  %v14301_v31 = vsel %vm14299_vm13, %v31771_v18, %v13887_v62  ;;  %vm14298_vm14 = vcmp.lt.s32.totalorder %v14297_v41, 2  ;;  %v31862_v62 = vand.u32 4294901760, %v31754_v10 }
 0x8fc   :  { %14622 = vmatpush1.msra.mxu0 %v31806_v51  ;;  %v14704_v4 = vsub.f32 %v31803_v54, %v31806_v51  ;;  %v14077_v15 = vand.u32 2147483647, %v14076_v20  ;;  %v14304_v26 = vsel %vm14302_vm0, %v13890_v22, %v31776_v39  ;;  %vm14095_vm11 = vcmp.eq.s32.totalorder %v14090_v55, 2 }
 0x8fd   :  { %14691 = vmatmul.mubr.f32.vlgmr.msra.gmra.mrb[20].mxu0 %v29109_v28  ;;  %14702 = vmatprep.subr.mxu0 %v14701_v52  ;;  %vm14092_vm1 = vcmp.eq.s32.totalorder %v14090_v55, 0  ;;  %vm14091_vm2 = vcmp.lt.s32.totalorder %v14090_v55, 2  ;;  %v31885_v21 = vsub.f32 %v31754_v10, %v31862_v62 }
 0x8fe   :  { %v14705_v58 = vand.u32 4294901760, %v14704_v4  ;;  %14771 = vmatprep.mubr.f32.mxu0 %v28695_v0  ;;  %v14080_v7 = vmul.f32 %v14079_v53, %v14077_v15  ;;  %v14504_v15 = vadd.s32 3, %v14086_v17 }
 0x8ff   :  { %v15629_v12 = vand.u32 4294901760, %v31885_v21 }
 0x900   :  { %v14706_v44 = vsub.f32 %v14704_v4, %v14705_v58  ;;  %v14081_v45 = vxor.u32 2147483648, %v14080_v7 }
 0x901   :  { %v15630_v20 = vsub.f32 %v31885_v21, %v15629_v12 }
 0x902   :  { %v14707_v63 = vand.u32 4294901760, %v14706_v44  ;;  %v14082_v6 = vsel %vm13999_vm8, %v14081_v45, %v14080_v7 }
 0x903   :  { %v14085_v16 = vsel %vm31816_vm9, %v31479_v23, %v14082_v6  ;;  %v15631_v53 = vand.u32 4294901760, %v15630_v20 }
 0x904   :  { %14708 = vmatpush1.msra.mxu0 %v14707_v63  ;;  %28538 = vcosq.f32 %v14085_v16 }
 0x905   :  { %14773 = vmatmul.mubr.f32.vlgmr.msra.gmra.mrb[20].mxu0 %v29065_v33  ;;  %14781 = vmatprep.subr.mxu0 %v31766_v56  ;;  %28540 = vsinq.f32 %v14085_v16  ;;  %v15165_v56 = vsub.f32 %v31832_v19, %v15164_v3  ;;  %v16093_v16 = vsub.f32 %v31785_v46, %v16014_v27 }
 0x906   :  { %14784 = vmatpush1.msra.mxu0 %v14704_v4  ;;  %14847 = vmatprep.mubr.f32.mxu0 %v28695_v0 }
 0x907   :  { %14857 = vmatprep.subr.mxu0 %v31722_v25  ;;  %v15166_v24 = vand.u32 4294901760, %v15165_v56  ;;  %v16094_v23 = vand.u32 4294901760, %v16093_v16 }
 0x909   :  { %v16095_v37 = vsub.f32 %v16093_v16, %v16094_v23 }
 0x90b   :  { %v16096_v41 = vand.u32 4294901760, %v16095_v37 }
 0x90d   :  { %14850 = vmatmul.mubr.f32.vlgmr.msra.gmra.mrb[20].mxu0 %v29077_v13 }
 0x90e   :  { %14859 = vmatpush1.msra.mxu0 %v31806_v51  ;;  %14922 = vmatprep.mubr.f32.mxu0 %v28695_v0  ;;  %v31846_v35 = vpop.eup %28538 }
 0x90f   :  { %14935 = vmatprep.subr.mxu0 %v14699_v50  ;;  %v31848_v47 = vpop.eup %28540  ;;  %v14096_v1 = vxor.u32 2147483648, %v31846_v35  ;;  %v14305_v50 = vsel %vm14298_vm14, %v14301_v31, %v14304_v26 }
 0x910   :  { %v14093_v61 = vxor.u32 2147483648, %v31848_v47  ;;  %v31866_v57 = vsel %vm13883_vm10, nan, %v14305_v50 }
 0x911   :  { %v14097_v18 = vsel %vm14095_vm11, %v14096_v1, %v31848_v47  ;;  %v31878_v43 = vand.u32 4294901760, %v31866_v57 }
 0x912   :  { %v14094_v39 = vsel %vm14092_vm1, %v31846_v35, %v14093_v61 }
 0x913   :  { %v14098_v22 = vsel %vm14091_vm2, %v14094_v39, %v14097_v18 }
 0x914   :  { %v31870_v2 = vsel %vm14089_vm3, nan, %v14098_v22 }
 0x915   :  { %14926 = vmatmul.mubr.f32.vlgmr.msra.gmra.mrb[20].mxu0 %v29086_v59  ;;  %v31874_v9 = vand.u32 4294901760, %v31870_v2 }
 0x916   :  { %14939 = vmatpush1.msra.mxu0 %v14705_v58  ;;  %15002 = vmatprep.mubr.f32.mxu0 %v28695_v0  ;;  %v14505_v58 = vand.u32 3, %v14504_v15 }
 0x917   :  { %15011 = vmatprep.subr.mxu0 %v31722_v25  ;;  %15087 = vmatpush1.msra.mxu1 %v31874_v9  ;;  %v15169_v42 = vsub.f32 %v31870_v2, %v31874_v9  ;;  %v31891_v25 = vsub.f32 %v31866_v57, %v31878_v43 }
 0x918   :  { %15156 = vmatmul.mubr.f32.vlgmr.msra.gmra.mrb[20].mxu1 %v29109_v28  ;;  %15167 = vmatprep.subr.mxu1 %v15166_v24  ;;  %vm14507_vm4 = vcmp.eq.s32.totalorder %v14505_v58, 0  ;;  %vm14510_vm5 = vcmp.eq.s32.totalorder %v14505_v58, 2  ;;  %vm14506_vm6 = vcmp.lt.s32.totalorder %v14505_v58, 2 }
 0x919   :  { %v15170_v5 = vand.u32 4294901760, %v15169_v42  ;;  %15236 = vmatprep.mubr.f32.mxu1 %v28695_v0  ;;  %v15635_v4 = vand.u32 4294901760, %v31891_v25  ;;  %v14509_v44 = vsel %vm14507_vm4, %v31846_v35, %v14093_v61  ;;  %v14512_v45 = vsel %vm14510_vm5, %v14096_v1, %v31848_v47 }
 0x91a   :  { %v14513_v63 = vsel %vm14506_vm6, %v14509_v44, %v14512_v45 }
 0x91b   :  { %v15171_v52 = vsub.f32 %v15169_v42, %v15170_v5  ;;  %v31925_v6 = vsel %vm14089_vm3, nan, %v14513_v63 }
 0x91c   :  { %v16016_v30 = vand.u32 4294901760, %v31925_v6 }
 0x91d   :  { %15004 = vmatmul.mubr.f32.vlgmr.msra.gmra.mrb[20].mxu0 %v29065_v33  ;;  %v15172_v29 = vand.u32 4294901760, %v15171_v52 }
 0x91e   :  { %15013 = vmatpush1.msra.mxu0 %v31806_v51  ;;  %15076 = vmatprep.mubr.f32.mxu0 %v28695_v0  ;;  %v15636_v51 = vsub.f32 %v31891_v25, %v15635_v4  ;;  %v16099_v14 = vsub.f32 %v31925_v6, %v16016_v30 }
 0x91f   :  { %15550 = vmatprep.subr.mxu0 %v31862_v62  ;;  %15173 = vmatpush1.msra.mxu1 %v15172_v29 }
 0x920   :  { %15238 = vmatmul.mubr.f32.vlgmr.msra.gmra.mrb[20].mxu1 %v29065_v33  ;;  %15246 = vmatprep.subr.mxu1 %v31832_v19  ;;  %v15637_v7 = vand.u32 4294901760, %v15636_v51 }
 0x921   :  { %15249 = vmatpush1.msra.mxu1 %v15169_v42  ;;  %15312 = vmatprep.mubr.f32.mxu1 %v28695_v0 }
 0x922   :  { %15322 = vmatprep.subr.mxu1 %v31788_v60 }
 0x925   :  { %15078 = vmatmul.mubr.f32.vlgmr.msra.gmra.mrb[20].mxu0 %v29065_v33 }
 0x926   :  { %15552 = vmatpush1.msra.mxu0 %v31878_v43  ;;  %15615 = vmatprep.mubr.f32.mxu0 %v28695_v0 }
 0x927   :  { %15632 = vmatprep.subr.mxu0 %v15631_v53 }
 0x928   :  { %15315 = vmatmul.mubr.f32.vlgmr.msra.gmra.mrb[20].mxu1 %v29077_v13 }
 0x929   :  { %15621 = vmatmul.mubr.f32.vlgmr.msra.gmra.mrb[22].mxu0 %v29109_v28  ;;  %15324 = vmatpush1.msra.mxu1 %v31874_v9 }
 0x92a   :  { %15638 = vmatpush1.msra.mxu0 %v15637_v7  ;;  %15387 = vmatprep.mubr.f32.mxu1 %v28695_v0 }
 0x92b   :  { %15400 = vmatprep.subr.mxu1 %v15164_v3  ;;  %15711 = vmatprep.subr.mxu0 %v31885_v21  ;;  %v28626_v21 = vld [vmem:[#allocation5 + $0xa0] sm:$0xff] }
 0x92c   :  { %15701 = vmatprep.mubr.f32.mxu0 %v28695_v0 }
 0x930   :  { %15391 = vmatmul.mubr.f32.vlgmr.msra.gmra.mrb[20].mxu1 %v29086_v59 }
 0x931   :  { %15703 = vmatmul.mubr.f32.vlgmr.msra.gmra.mrb[22].mxu0 %v29065_v33  ;;  %15404 = vmatpush1.msra.mxu1 %v15170_v5 }
 0x932   :  { %15714 = vmatpush1.msra.mxu0 %v31891_v25  ;;  %15467 = vmatprep.mubr.f32.mxu1 %v28695_v0 }
 0x933   :  { %15476 = vmatprep.subr.mxu1 %v31788_v60  ;;  %15787 = vmatprep.subr.mxu0 %v31862_v62  ;;  %v16100_v60 = vand.u32 4294901760, %v16099_v14 }
 0x934   :  { %15777 = vmatprep.mubr.f32.mxu0 %v28695_v0 }
 0x935   :  { %v16101_v19 = vsub.f32 %v16099_v14, %v16100_v60 }
 0x937   :  { %v16102_v17 = vand.u32 4294901760, %v16101_v19 }
 0x938   :  { %15469 = vmatmul.mubr.f32.vlgmr.msra.gmra.mrb[20].mxu1 %v29065_v33 }
 0x939   :  { %15780 = vmatmul.mubr.f32.vlgmr.msra.gmra.mrb[22].mxu0 %v29077_v13  ;;  %15478 = vmatpush1.msra.mxu1 %v31874_v9 }
 0x93a   :  { %15789 = vmatpush1.msra.mxu0 %v31878_v43  ;;  %15541 = vmatprep.mubr.f32.mxu1 %v28695_v0 }
 0x93b   :  { %16015 = vmatprep.subr.mxu1 %v16014_v27  ;;  %15865 = vmatprep.subr.mxu0 %v15629_v12 }
 0x93c   :  { %15852 = vmatprep.mubr.f32.mxu0 %v28695_v0 }
 0x940   :  { %15543 = vmatmul.mubr.f32.vlgmr.msra.gmra.mrb[20].mxu1 %v29065_v33 }
 0x941   :  { %15856 = vmatmul.mubr.f32.vlgmr.msra.gmra.mrb[22].mxu0 %v29086_v59  ;;  %16017 = vmatpush1.msra.mxu1 %v16016_v30 }
 0x942   :  { %15869 = vmatpush1.msra.mxu0 %v15635_v4  ;;  %16080 = vmatprep.mubr.f32.mxu1 %v28695_v0 }
 0x943   :  { %16097 = vmatprep.subr.mxu1 %v16096_v41  ;;  %15941 = vmatprep.subr.mxu0 %v31862_v62 }
 0x944   :  { %15932 = vmatprep.mubr.f32.mxu0 %v28695_v0  ;;  %16086 = vmatmul.mubr.f32.vlgmr.msra.gmra.mrb[22].mxu1 %v29109_v28 }
 0x945   :  { %16103 = vmatpush1.msra.mxu1 %v16102_v17  ;;  %16166 = vmatprep.mubr.f32.mxu1 %v28695_v0 }
 0x946   :  { %16176 = vmatprep.subr.mxu1 %v16093_v16 }
 0x949   :  { %15934 = vmatmul.mubr.f32.vlgmr.msra.gmra.mrb[22].mxu0 %v29065_v33 }
 0x94a   :  { %15943 = vmatpush1.msra.mxu0 %v31878_v43  ;;  %16006 = vmatprep.mubr.f32.mxu0 %v28695_v0 }
 0x94c   :  { %16168 = vmatmul.mubr.f32.vlgmr.msra.gmra.mrb[22].mxu1 %v29065_v33 }
 0x94d   :  { %16179 = vmatpush1.msra.mxu1 %v16099_v14  ;;  %16242 = vmatprep.mubr.f32.mxu1 %v28695_v0 }
 0x94e   :  { %16252 = vmatprep.subr.mxu1 %v16014_v27 }
 0x951   :  { %16008 = vmatmul.mubr.f32.vlgmr.msra.gmra.mrb[22].mxu0 %v29065_v33 }
 0x952   :  { %17434 = vmatprep.mubr.f32.mxu0 %v28695_v0 }
 0x954   :  { %16245 = vmatmul.mubr.f32.vlgmr.msra.gmra.mrb[22].mxu1 %v29077_v13 }
 0x955   :  { %16254 = vmatpush1.msra.mxu1 %v16016_v30  ;;  %16317 = vmatprep.mubr.f32.mxu1 %v28695_v0 }
 0x956   :  { %16330 = vmatprep.subr.mxu1 %v16094_v23 }
 0x95c   :  { %16321 = vmatmul.mubr.f32.vlgmr.msra.gmra.mrb[22].mxu1 %v29086_v59 }
 0x95d   :  { %16334 = vmatpush1.msra.mxu1 %v16100_v60  ;;  %16397 = vmatprep.mubr.f32.mxu1 %v28695_v0 }
 0x95e   :  { %16406 = vmatprep.subr.mxu1 %v16014_v27 }
 0x964   :  { %16399 = vmatmul.mubr.f32.vlgmr.msra.gmra.mrb[22].mxu1 %v29065_v33 }
 0x965   :  { %16408 = vmatpush1.msra.mxu1 %v16016_v30  ;;  %16471 = vmatprep.mubr.f32.mxu1 %v28695_v0 }
 0x96c   :  { %16473 = vmatmul.mubr.f32.vlgmr.msra.gmra.mrb[22].mxu1 %v29065_v33 }
 0x96d   :  { %17899 = vmatprep.mubr.f32.mxu1 %v28695_v0 }
 0x9f8   :  { %v15079_v55 = vpop.f32.mrb[20].mxu0 }
 0x9f9   :  { %v15081_v3 = vpop.f32.mrb[21].mxu0  ;;  %v16479_v47 = vmul.f32 %v15079_v55, %v31866_v57  ;;  %v28627_v57 = vld [vmem:[#allocation5 + $0xa8] sm:$0xff] }
 0x9fa   :  { %v16480_v56 = vmul.f32 %v15081_v3, %v31754_v10 }
 0xa13   :  { %v15544_v31 = vpop.f32.mrb[20].mxu1 }
 0xa14   :  { %v15546_v26 = vpop.f32.mrb[21].mxu1  ;;  %v16481_v19 = vmul.f32 %v15544_v31, %v31925_v6 }
 0xa24   :  { %v16009_v35 = vpop.f32.mrb[22].mxu0 }
 0xa25   :  { %v16483_v1 = vmul.f32 %v16009_v35, %v31803_v54  ;;  %v16011_v61 = vpop.f32.mrb[23].mxu0  ;;  %v16482_v35 = vmul.f32 %v15546_v26, %v31785_v46 }
 0xa26   :  { %v16484_v50 = vmul.f32 %v16011_v61, %v31719_v8 }
 0xa27   :  { %v16487_v18 = vsub.f32 %v16479_v47, %v16483_v1 }
 0xa28   :  { %v16488_v39 = vsub.f32 %v16480_v56, %v16484_v50 }
 0xa29   :  { %v16491_v22 = vmul.f32 0.125, %v16487_v18 }
 0xa2a   :  { %v16492_v62 = vmul.f32 0.125, %v16488_v39 }
 0xa2b   :  { %v16495_v24 = vadd.f32 %v16491_v22, %v29255_v49 }
 0xa2c   :  { %v16496_v9 = vadd.f32 %v16492_v62, %v29255_v49 }
 0xa2d   :  { %v16499_v43 = vmul.f32 0.01, %v16495_v24 }
 0xa2e   :  { %v16500_v42 = vmul.f32 0.01, %v16496_v9 }
 0xa2f   :  { %v16503_v5 = vadd.f32 %v28626_v21, %v16499_v43 }
 0xa30   :  { %v16504_v25 = vadd.f32 %v28627_v57, %v16500_v42 }
 0xa31   :  { %v16507_v54 = vmul.f32 0.15915494, %v16503_v5 }
 0xa32   :  { %v16508_v52 = vmul.f32 0.15915494, %v16504_v25 }
 0xa33   :  { %vm16511_vm7 = vcmp.lt.f32.partialorder %v16507_v54, 0.0  ;;  %v16515_v10 = vceil.f32 %v16507_v54  ;;  %v16519_v12 = vfloor.f32 %v16507_v54 }
 0xa34   :  { %vm16512_vm12 = vcmp.lt.f32.partialorder %v16508_v52, 0.0  ;;  %v16516_v8 = vceil.f32 %v16508_v52  ;;  %v16520_v29 = vfloor.f32 %v16508_v52 }
 0xa35   :  { %v16523_v4 = vsel %vm16511_vm7, %v16515_v10, %v16519_v12 }
 0xa36   :  { %v16527_v20 = vmul.f32 6.2831855, %v16523_v4  ;;  %v16524_v15 = vsel %vm16512_vm12, %v16516_v8, %v16520_v29  ;;  %v28628_v4 = vld [vmem:[#allocation5 + $0xb0] sm:$0xff] }
 0xa37   :  { %v16528_v51 = vmul.f32 6.2831855, %v16524_v15 }
 0xa38   :  { %v31969_v53 = vsub.f32 %v16503_v5, %v16527_v20 }
 0xa39   :  { %v31971_v58 = vsub.f32 %v16504_v25, %v16528_v51 }
 0xa3a   :  { %16536 = vst [vmem:[#allocation5 + $0xc0] sm:$0xff] %v31969_v53  ;;  %v16543_v7 = vand.u32 2139095040, %v31969_v53  ;;  %v16540_v3 = vand.u32 2147483647, %v31969_v53 }
 0xa3b   :  { %16537 = vst [vmem:[#allocation5 + $0xc8] sm:$0xff] %v31971_v58  ;;  %v16646_v44 = vand.u32 2139095040, %v31971_v58  ;;  %v16643_v45 = vand.u32 2147483647, %v31971_v58 }
 0xa3c   :  { %v16544_v63 = vshrl.u32 %v16543_v7, 23  ;;  %v28629_v7 = vld [vmem:[#allocation5 + $0xb8] sm:$0xff] }
 0xa3d   :  { %v16647_v27 = vshrl.u32 %v16646_v44, 23  ;;  %v16650_v16 = vand.u32 8388607, %v16643_v45 }
 0xa3e   :  { %v27745_v30 = vadd.s32 4294967169, %v16544_v63 }
 0xa3f   :  { %v27749_v14 = vadd.s32 4294967169, %v16647_v27  ;;  %v16474_v60 = vpop.f32.mrb[22].mxu1  ;;  %v16651_v55 = vor.u32 8388608, %v16650_v16 }
 0xa40   :  { %v16550_v23 = vadd.s32 1, %v27745_v30  ;;  %v16485_v41 = vmul.f32 %v16474_v60, %v31870_v2  ;;  %v16476_v17 = vpop.f32.mrb[23].mxu1  ;;  %v31989_v2 = vand.u32 8388607, %v16540_v3 }
 0xa41   :  { %v16653_v37 = vadd.s32 1, %v27749_v14  ;;  %v16486_v47 = vmul.f32 %v16476_v17, %v31780_v11  ;;  %v31985_v39 = vshll.u32 %v16651_v55, 8 }
 0xa42   :  { %vm16551_vm10 = vcmp.gt.s32.totalorder %v16550_v23, 0  ;;  %v16489_v1 = vsub.f32 %v16481_v19, %v16485_v41 }
 0xa43   :  { %vm16654_vm15 = vcmp.gt.s32.totalorder %v16653_v37, 0  ;;  %v16490_v50 = vsub.f32 %v16482_v35, %v16486_v47  ;;  %v31991_v6 = vsel %vm16551_vm10, %v16550_v23, 0 }
 0xa44   :  { %v16655_v61 = vsel %vm16654_vm15, %v16653_v37, 0  ;;  %v16493_v18 = vmul.f32 0.125, %v16489_v1  ;;  %v32006_v29 = vand.u32 31, %v31991_v6 }
 0xa45   :  { %v16657_v56 = vand.u32 31, %v16655_v61  ;;  %v16656_v31 = vshrl.u32 %v16655_v61, 5  ;;  %v16494_v22 = vmul.f32 0.125, %v16490_v50 }
 0xa46   :  { %v16497_v26 = vadd.f32 %v16493_v18, %v29255_v49 }
 0xa47   :  { %v16658_v46 = vsub.s32 32, %v16657_v56  ;;  %v16660_v11 = vshll.u32 %v28696_v32, %v16657_v56  ;;  %v16663_v62 = vshll.u32 %v28697_v34, %v16657_v56  ;;  %v16666_v24 = vshll.u32 %v28698_v36, %v16657_v56 }
 0xa48   :  { %v16498_v9 = vadd.f32 %v16494_v22, %v29255_v49  ;;  %v16669_v21 = vshll.u32 %v28699_v38, %v16657_v56  ;;  %v16501_v5 = vmul.f32 0.01, %v16497_v26  ;;  %v16672_v8 = vshll.u32 %v28700_v40, %v16657_v56 }
 0xa49   :  { %v16661_v43 = vshrl.u32 %v28697_v34, %v16658_v46  ;;  %v16664_v42 = vshrl.u32 %v28698_v36, %v16658_v46  ;;  %v16667_v57 = vshrl.u32 %v28699_v38, %v16658_v46  ;;  %v16670_v25 = vshrl.u32 %v28700_v40, %v16658_v46 }
 0xa4a   :  { %v16673_v54 = vshrl.u32 %v28701_v48, %v16658_v46  ;;  %v16502_v52 = vmul.f32 0.01, %v16498_v9  ;;  %v16505_v20 = vadd.f32 %v28628_v4, %v16501_v5  ;;  %v16659_v63 = vshrl.u32 %v28696_v32, %v16658_v46 }
 0xa4b   :  { %v16662_v10 = vor.u32 %v16661_v43, %v16660_v11  ;;  %v16665_v12 = vor.u32 %v16664_v42, %v16663_v62  ;;  %v16668_v15 = vor.u32 %v16667_v57, %v16666_v24  ;;  %v16671_v51 = vor.u32 %v16670_v25, %v16669_v21 }
 0xa4c   :  { %v16506_v44 = vadd.f32 %v28629_v7, %v16502_v52  ;;  %v16674_v27 = vor.u32 %v16673_v54, %v16672_v8  ;;  %vm16675_vm8 = vcmp.lt.s32.totalorder %v16656_v31, 1  ;;  %v16509_v30 = vmul.f32 0.15915494, %v16505_v20 }
 0xa4d   :  { %vm16676_vm9 = vcmp.lt.s32.totalorder %v16656_v31, 2  ;;  %vm16677_vm13 = vcmp.lt.s32.totalorder %v16656_v31, 3  ;;  %vm16678_vm0 = vcmp.lt.s32.totalorder %v16656_v31, 4  ;;  %v16683_v23 = vsel %vm16675_vm8, %v16662_v10, %v16665_v12 }
 0xa4e   :  { %v16510_v16 = vmul.f32 0.15915494, %v16506_v44  ;;  %v16680_v14 = vsel %vm16678_vm0, %v16668_v15, 2102212464  ;;  %v16684_v60 = vsel %vm16678_vm0, %v16671_v51, 920167782  ;;  %v16517_v37 = vceil.f32 %v16509_v30 }
 0xa4f   :  { %vm16513_vm14 = vcmp.lt.f32.partialorder %v16509_v30, 0.0  ;;  %v16521_v19 = vfloor.f32 %v16509_v30  ;;  %v16687_v41 = vsel %vm16675_vm8, %v16665_v12, %v16668_v15  ;;  %v16685_v35 = vsel %vm16677_vm13, %v16668_v15, %v16684_v60 }
 0xa50   :  { %vm16514_vm11 = vcmp.lt.f32.partialorder %v16510_v16, 0.0  ;;  %v16518_v17 = vceil.f32 %v16510_v16  ;;  %v16522_v55 = vfloor.f32 %v16510_v16  ;;  %v16679_v1 = vsel %vm16675_vm8, %v16659_v63, %v16662_v10 }
 0xa51   :  { %v16525_v47 = vsel %vm16513_vm14, %v16517_v37, %v16521_v19  ;;  %v16686_v61 = vsel %vm16676_vm9, %v16683_v23, %v16685_v35  ;;  %v16688_v56 = vsel %vm16678_vm0, %v16674_v27, 1326507024  ;;  %v16681_v22 = vsel %vm16677_vm13, %v16665_v12, %v16680_v14 }
 0xa52   :  { %v16529_v50 = vmul.f32 6.2831855, %v16525_v47  ;;  %v16526_v18 = vsel %vm16514_vm11, %v16518_v17, %v16522_v55  ;;  %v16689_v46 = vsel %vm16677_vm13, %v16671_v51, %v16688_v56  ;;  %v16682_v5 = vsel %vm16676_vm9, %v16679_v1, %v16681_v22 }
 0xa53   :  { %v16530_v26 = vmul.f32 6.2831855, %v16526_v18  ;;  %v16690_v11 = vsel %vm16676_vm9, %v16687_v41, %v16689_v46  ;;  %v32021_v62 = vmul.u32.u64.low %v31985_v39, %v16686_v61  ;;  %v32022_v24 = vmul.u32.u64.high %v31985_v39, %v16686_v61, %v32021_v62 }
 0xa54   :  { %v32024_v9 = vsub.f32 %v16505_v20, %v16529_v50  ;;  %v32027_v43 = vmul.u32.u64.low %v31985_v39, %v16690_v11  ;;  %v32028_v42 = vmul.u32.u64.high %v31985_v39, %v16690_v11, %v32027_v43  ;;  %v16548_v25 = vor.u32 8388608, %v31989_v2 }
 0xa55   :  { %v32030_v21 = vsub.f32 %v16506_v44, %v16530_v26  ;;  %v16701_v52 = vadd.s32 1, %v32022_v24  ;;  %v16555_v12 = vsub.s32 32, %v32006_v29  ;;  %v16698_v31 = vmul.u32 %v31985_v39, %v16682_v5 }
 0xa56   :  { %16538 = vst [vmem:[#allocation5 + $0xd0] sm:$0xff] %v32024_v9  ;;  %v16749_v57 = vand.u32 2139095040, %v32024_v9  ;;  %vm16700_vm1 = vc.u32 %v32028_v42, %v32021_v62  ;;  %v32046_v7 = vshll.u32 %v16548_v25, 8  ;;  %v32049_v44 = vshrl.u32 %v31991_v6, 5 }
 0xa57   :  { %16539 = vst [vmem:[#allocation5 + $0xd8] sm:$0xff] %v32030_v21  ;;  %v16852_v54 = vand.u32 2139095040, %v32030_v21  ;;  %v16849_v10 = vand.u32 2147483647, %v32030_v21  ;;  %v16702_v20 = vsel %vm16700_vm1, %v16701_v52, %v32022_v24  ;;  %v16558_v27 = vshrl.u32 %v28697_v34, %v16555_v12 }
 0xa58   :  { %v16750_v8 = vshrl.u32 %v16749_v57, 23  ;;  %v16703_v2 = vadd.s32 %v16702_v20, %v16698_v31  ;;  %v16564_v39 = vshrl.u32 %v28699_v38, %v16555_v12  ;;  %v16557_v14 = vshll.u32 %v28696_v32, %v32006_v29 }
 0xa59   :  { %v16853_v4 = vshrl.u32 %v16852_v54, 23  ;;  %v16856_v51 = vand.u32 8388607, %v16849_v10  ;;  %v16560_v23 = vshll.u32 %v28697_v34, %v32006_v29  ;;  %v16561_v37 = vshrl.u32 %v28698_v36, %v16555_v12 }
 0xa5a   :  { %v27753_v15 = vadd.s32 4294967169, %v16750_v8  ;;  %v16704_v16 = vadd.s32 536870912, %v16703_v2  ;;  %v16563_v6 = vshll.u32 %v28698_v36, %v32006_v29  ;;  %v16567_v19 = vshrl.u32 %v28700_v40, %v16555_v12 }
 0xa5b   :  { %v27757_v63 = vadd.s32 4294967169, %v16853_v4  ;;  %v16857_v17 = vor.u32 8388608, %v16856_v51  ;;  %v16556_v55 = vshrl.u32 %v28696_v32, %v16555_v12  ;;  %v32065_v35 = vshrl.u32 %v28701_v48, %v16555_v12 }
 0xa5c   :  { %v16756_v30 = vadd.s32 1, %v27753_v15  ;;  %v32061_v41 = vshrl.u32 %v16704_v16, 30  ;;  %v16559_v47 = vor.u32 %v16558_v27, %v16557_v14  ;;  %v32067_v1 = vor.u32 %v16564_v39, %v16563_v6 }
 0xa5d   :  { %v16859_v60 = vadd.s32 1, %v27757_v63  ;;  %v16566_v61 = vshll.u32 %v28699_v38, %v32006_v29  ;;  %v32074_v18 = vshll.u32 %v28700_v40, %v32006_v29  ;;  %v16699_v46 = vadd.s32 %v32021_v62, %v32028_v42 }
 0xa5e   :  { %vm16757_vm3 = vcmp.gt.s32.totalorder %v16756_v30, 0  ;;  %v16706_v50 = vshll.u32 %v32061_v41, 30  ;;  %v32077_v26 = vor.u32 %v16561_v37, %v16560_v23  ;;  %v32083_v43 = vshll.u32 %v16857_v17, 8 }
 0xa5f   :  { %vm16860_vm2 = vcmp.gt.s32.totalorder %v16859_v60, 0  ;;  %v32079_v11 = vor.u32 %v16567_v19, %v16566_v61  ;;  %v16571_v5 = vor.u32 %v32065_v35, %v32074_v18  ;;  %vm16572_vm4 = vcmp.lt.s32.totalorder %v32049_v44, 1 }
 0xa60   :  { %v16861_v56 = vsel %vm16860_vm2, %v16859_v60, 0  ;;  %v32081_v24 = vsub.s32 %v16703_v2, %v16706_v50  ;;  %v32088_v57 = vsel %vm16757_vm3, %v16756_v30, 0  ;;  %vm16575_vm5 = vcmp.lt.s32.totalorder %v32049_v44, 4 }
 0xa61   :  { %v16863_v22 = vand.u32 31, %v16861_v56  ;;  %v32093_v62 = vsel %vm16572_vm4, %v16556_v55, %v16559_v47  ;;  %v16862_v42 = vshrl.u32 %v16861_v56, 5  ;;  %v16577_v52 = vsel %vm16575_vm5, %v32067_v1, 2102212464 }
 0xa62   :  { %v16709_v25 = vsub.s32 0, %v32081_v24  ;;  %vm16574_vm6 = vcmp.lt.s32.totalorder %v32049_v44, 3  ;;  %v16729_v63 = vsub.s32 4, %v32061_v41  ;;  %v16580_v39 = vsel %vm16572_vm4, %v16559_v47, %v32077_v26 }
 0xa63   :  { %v16864_v29 = vsub.s32 32, %v16863_v22  ;;  %v16866_v54 = vshll.u32 %v28696_v32, %v16863_v22  ;;  %v16869_v8 = vshll.u32 %v28697_v34, %v16863_v22  ;;  %v16872_v4 = vshll.u32 %v28698_v36, %v16863_v22 }
 0xa64   :  { %v27750_v20 = vmin.u32 %v16709_v25, %v32081_v24  ;;  %v16875_v2 = vshll.u32 %v28699_v38, %v16863_v22  ;;  %v16581_v30 = vsel %vm16575_vm5, %v32079_v11, 920167782  ;;  %vm16573_vm7 = vcmp.lt.s32.totalorder %v32049_v44, 2 }
 0xa65   :  { %v16867_v12 = vshrl.u32 %v28697_v34, %v16864_v29  ;;  %v16870_v31 = vshrl.u32 %v28698_v36, %v16864_v29  ;;  %v16873_v15 = vshrl.u32 %v28699_v38, %v16864_v29  ;;  %v16876_v51 = vshrl.u32 %v28700_v40, %v16864_v29 }
 0xa66   :  { %v16711_v16 = vclz %v27750_v20  ;;  %v16865_v37 = vshrl.u32 %v28696_v32, %v16864_v29  ;;  %v16878_v6 = vshll.u32 %v28700_v40, %v16863_v22  ;;  %v16879_v19 = vshrl.u32 %v28701_v48, %v16864_v29 }
 0xa67   :  { %v16868_v27 = vor.u32 %v16867_v12, %v16866_v54  ;;  %v16871_v14 = vor.u32 %v16870_v31, %v16869_v8  ;;  %v16874_v23 = vor.u32 %v16873_v15, %v16872_v4  ;;  %v16877_v60 = vor.u32 %v16876_v51, %v16875_v2 }
 0xa68   :  { %vm16881_vm12 = vcmp.lt.s32.totalorder %v16862_v42, 1  ;;  %v27751_v17 = vadd.s32 4294967294, %v16711_v16  ;;  %vm16882_vm15 = vcmp.lt.s32.totalorder %v16862_v42, 2  ;;  %vm16884_vm10 = vcmp.lt.s32.totalorder %v16862_v42, 4 }
 0xa69   :  { %v16889_v55 = vsel %vm16881_vm12, %v16868_v27, %v16871_v14  ;;  %v16880_v47 = vor.u32 %v16879_v19, %v16878_v6  ;;  %vm16883_vm8 = vcmp.lt.s32.totalorder %v16862_v42, 3  ;;  %v16886_v61 = vsel %vm16884_vm10, %v16874_v23, 2102212464 }
 0xa6a   :  { %v16890_v56 = vsel %vm16884_vm10, %v16877_v60, 920167782  ;;  %vm27752_vm9 = vcmp.lt.s32.totalorder %v27751_v17, 0  ;;  %v16885_v50 = vsel %vm16881_vm12, %v16865_v37, %v16868_v27  ;;  %v16893_v54 = vsel %vm16881_vm12, %v16871_v14, %v16874_v23 }
 0xa6b   :  { %v16891_v25 = vsel %vm16883_vm8, %v16874_v23, %v16890_v56  ;;  %vm16645_vm13 = vcmp.lt.s32.totalorder %v31971_v58, 0  ;;  %v16714_v12 = vsel %vm27752_vm9, 0, %v27751_v17  ;;  %v16887_v8 = vsel %vm16883_vm8, %v16871_v14, %v16886_v61 }
 0xa6c   :  { %v16892_v22 = vsel %vm16882_vm15, %v16889_v55, %v16891_v25  ;;  %v16894_v29 = vsel %vm16884_vm10, %v16880_v47, 1326507024  ;;  %v16715_v31 = vsub.s32 32, %v16714_v12  ;;  %v16719_v4 = vsub.s32 4294967266, %v16714_v12 }
 0xa6d   :  { %v16895_v20 = vsel %vm16883_vm8, %v16877_v60, %v16894_v29  ;;  %v16582_v15 = vsel %vm16574_vm6, %v32067_v1, %v16581_v30  ;;  %v16716_v2 = vshll.u32 %v32081_v24, %v16714_v12  ;;  %v16888_v60 = vsel %vm16882_vm15, %v16885_v50, %v16887_v8 }
 0xa6e   :  { %v16896_v51 = vsel %vm16882_vm15, %v16893_v54, %v16895_v20  ;;  %v32128_v27 = vmul.u32.u64.low %v32083_v43, %v16892_v22  ;;  %v32129_v16 = vmul.u32.u64.high %v32083_v43, %v16892_v22, %v32128_v27  ;;  %v16717_v14 = vshrl.u32 %v16699_v46, %v16715_v31 }
 0xa6f   :  { %v16720_v23 = vadd.s32 127, %v16719_v4  ;;  %v32133_v37 = vmul.u32.u64.low %v32083_v43, %v16896_v51  ;;  %v32134_v6 = vmul.u32.u64.high %v32083_v43, %v16896_v51, %v32133_v37  ;;  %v16583_v30 = vsel %vm16573_vm7, %v16580_v39, %v16582_v15 }
 0xa70   :  { %v16584_v24 = vsel %vm16572_vm4, %v32077_v26, %v32067_v1  ;;  %v16585_v46 = vsel %vm16575_vm5, %v16571_v5, 1326507024  ;;  %v16718_v19 = vor.u32 %v16717_v14, %v16716_v2  ;;  %v16578_v42 = vsel %vm16574_vm6, %v32077_v26, %v16577_v52 }
 0xa71   :  { %v16721_v17 = vshll.u32 %v16720_v23, 23  ;;  %v16586_v39 = vsel %vm16574_vm6, %v32079_v11, %v16585_v46  ;;  %v16907_v55 = vadd.s32 1, %v32129_v16  ;;  %v16760_v5 = vand.u32 31, %v32088_v57 }
 0xa72   :  { %v16587_v1 = vsel %vm16573_vm7, %v16584_v24, %v16586_v39  ;;  %v32158_v35 = vmul.u32.u64.low %v32046_v7, %v16583_v30  ;;  %v32159_v18 = vmul.u32.u64.high %v32046_v7, %v16583_v30, %v32158_v35  ;;  %v16904_v61 = vmul.u32 %v32083_v43, %v16888_v60 }
 0xa73   :  { %v16722_v47 = vor.u32 4788187, %v16721_v17  ;;  %vm16906_vm0 = vc.u32 %v32134_v6, %v32128_v27  ;;  %v16579_v11 = vsel %vm16573_vm7, %v32093_v62, %v16578_v42  ;;  %v16725_v25 = vcvt.s32.f32 %v16718_v19 }
 0xa74   :  { %v16908_v26 = vsel %vm16906_vm0, %v16907_v55, %v32129_v16  ;;  %v32170_v52 = vmul.u32.u64.low %v32046_v7, %v16587_v1  ;;  %v32171_v56 = vmul.u32.u64.high %v32046_v7, %v16587_v1, %v32170_v52  ;;  %v16730_v43 = vsel %vm16645_vm13, %v16729_v63, %v32061_v41 }
 0xa75   :  { %v16723_v50 = vand.u32 2147483647, %v16722_v47  ;;  %v16909_v54 = vadd.s32 %v16908_v26, %v16904_v61  ;;  %v16598_v12 = vadd.s32 1, %v32159_v18  ;;  %vm16644_vm14 = vcmp.le.f32.partialorder %v16643_v45, 0.7853982 }
 0xa76   :  { %v32181_v8 = vsel %vm16644_vm14, 0, %v16730_v43  ;;  %v16595_v22 = vmul.u32 %v32046_v7, %v16579_v11  ;;  %vm16597_vm11 = vc.u32 %v32171_v56, %v32158_v35  ;;  %v16761_v41 = vsub.s32 32, %v16760_v5 }
 0xa77   :  { %v16726_v44 = vmul.f32 %v16725_v25, %v16723_v50  ;;  %v16910_v62 = vadd.s32 536870912, %v16909_v54  ;;  %v16599_v4 = vsel %vm16597_vm11, %v16598_v12, %v32159_v18  ;;  %v16746_v15 = vand.u32 2147483647, %v32024_v9 }
 0xa78   :  { %v16600_v63 = vadd.s32 %v16599_v4, %v16595_v22  ;;  %v32193_v2 = vshrl.u32 %v32088_v57, 5  ;;  %v32197_v51 = vand.u32 3, %v32181_v8  ;;  %v16764_v23 = vshrl.u32 %v28697_v34, %v16761_v41 }
 0xa79   :  { %v16727_v29 = vxor.u32 2147483648, %v16726_v44  ;;  %v32185_v31 = vshrl.u32 %v16910_v62, 30  ;;  %v16773_v37 = vshrl.u32 %v28700_v40, %v16761_v41  ;;  %v16767_v30 = vshrl.u32 %v28698_v36, %v16761_v41 }
 0xa7a   :  { %v16601_v16 = vadd.s32 536870912, %v16600_v63  ;;  %v16770_v57 = vshrl.u32 %v28699_v38, %v16761_v41  ;;  %v16753_v46 = vand.u32 8388607, %v16746_v15  ;;  %v16772_v19 = vshll.u32 %v28699_v38, %v16760_v5 }
 0xa7b   :  { %v16728_v20 = vsel %vm16645_vm13, %v16727_v29, %v16726_v44  ;;  %v16912_v45 = vshll.u32 %v32185_v31, 30  ;;  %v16776_v17 = vshrl.u32 %v28701_v48, %v16761_v41  ;;  %v16763_v39 = vshll.u32 %v28696_v32, %v16760_v5 }
 0xa7c   :  { %v16731_v7 = vsel %vm16644_vm14, %v31971_v58, %v16728_v20  ;;  %v32203_v60 = vshrl.u32 %v16601_v16, 30  ;;  %v16766_v55 = vshll.u32 %v28697_v34, %v16760_v5  ;;  %v16769_v1 = vshll.u32 %v28698_v36, %v16760_v5 }
 0xa7d   :  { %28542 = vcosq.f32 %v16731_v7  ;;  %v32199_v14 = vsub.s32 %v16909_v54, %v16912_v45  ;;  %vm16741_vm1 = vcmp.eq.s32.totalorder %v32197_v51, 2  ;;  %v16905_v18 = vadd.s32 %v32128_v27, %v32134_v6 }
 0xa7e   :  { %28544 = vsinq.f32 %v16731_v7  ;;  %v16603_v42 = vshll.u32 %v32203_v60, 30  ;;  %v16774_v61 = vor.u32 %v16773_v37, %v16772_v19  ;;  %v16775_v26 = vshll.u32 %v28700_v40, %v16760_v5 }
 0xa7f   :  { %v16915_v24 = vsub.s32 0, %v32199_v14  ;;  %vm16738_vm2 = vcmp.eq.s32.totalorder %v32197_v51, 0  ;;  %v16765_v52 = vor.u32 %v16764_v23, %v16763_v39  ;;  %v16768_v50 = vor.u32 %v16767_v30, %v16766_v55 }
 0xa80   :  { %v32222_v11 = vsub.s32 %v16600_v63, %v16603_v42  ;;  %v16771_v25 = vor.u32 %v16770_v57, %v16769_v1  ;;  %vm16737_vm3 = vcmp.lt.s32.totalorder %v32197_v51, 2  ;;  %v16596_v54 = vadd.s32 %v32158_v35, %v32171_v56 }
 0xa81   :  { %v27758_v47 = vmin.u32 %v16915_v24, %v32199_v14  ;;  %v16754_v12 = vor.u32 8388608, %v16753_v46  ;;  %v16777_v44 = vor.u32 %v16776_v17, %v16775_v26  ;;  %vm16735_vm4 = vweird.f32 %v31971_v58 }
 0xa82   :  { %v16606_v27 = vsub.s32 0, %v32222_v11  ;;  %v16762_v6 = vshrl.u32 %v28696_v32, %v16761_v41  ;;  %vm16778_vm5 = vcmp.lt.s32.totalorder %v32193_v2, 1  ;;  %vm16781_vm6 = vcmp.lt.s32.totalorder %v32193_v2, 4 }
 0xa83   :  { %v16917_v43 = vclz %v27758_v47  ;;  %vm16779_vm7 = vcmp.lt.s32.totalorder %v32193_v2, 2  ;;  %vm16780_vm12 = vcmp.lt.s32.totalorder %v32193_v2, 3  ;;  %v16787_v62 = vsel %vm16781_vm6, %v16774_v61, 920167782 }
 0xa84   :  { %v27746_v35 = vmin.u32 %v16606_v27, %v32222_v11  ;;  %v16782_v56 = vsel %vm16778_vm5, %v16762_v6, %v16765_v52  ;;  %v16783_v22 = vsel %vm16781_vm6, %v16771_v25, 2102212464  ;;  %v16786_v29 = vsel %vm16778_vm5, %v16765_v52, %v16768_v50 }
 0xa85   :  { %v27759_v5 = vadd.s32 4294967294, %v16917_v43  ;;  %v16788_v41 = vsel %vm16780_vm12, %v16771_v25, %v16787_v62  ;;  %v16790_v63 = vsel %vm16778_vm5, %v16768_v50, %v16771_v25  ;;  %v16791_v20 = vsel %vm16781_vm6, %v16777_v44, 1326507024 }
 0xa86   :  { %v16608_v23 = vclz %v27746_v35  ;;  %v16794_v37 = vshll.u32 %v16754_v12, 8  ;;  %v16789_v46 = vsel %vm16779_vm7, %v16786_v29, %v16788_v41  ;;  %v16792_v39 = vsel %vm16780_vm12, %v16774_v61, %v16791_v20 }
 0xa87   :  { %v32234_v4 = vpop.eup %28542  ;;  %vm27760_vm15 = vcmp.lt.s32.totalorder %v27759_v5, 0  ;;  %v16793_v26 = vsel %vm16779_vm7, %v16790_v63, %v16792_v39  ;;  %v16784_v51 = vsel %vm16780_vm12, %v16768_v50, %v16783_v22  ;;  %v16935_v29 = vsub.s32 4, %v32185_v31 }
 0xa88   :  { %v32238_v45 = vpop.eup %28544  ;;  %v16742_v7 = vxor.u32 2147483648, %v32234_v4  ;;  %v16920_v16 = vsel %vm27760_vm15, 0, %v27759_v5  ;;  %v27747_v42 = vadd.s32 4294967294, %v16608_v23  ;;  %v17149_v50 = vadd.s32 3, %v32181_v8 }
 0xa89   :  { %v16739_v30 = vxor.u32 2147483648, %v32238_v45  ;;  %v16921_v57 = vsub.s32 32, %v16920_v16  ;;  %v16925_v24 = vsub.s32 4294967266, %v16920_v16  ;;  %v16922_v17 = vshll.u32 %v32199_v14, %v16920_v16 }
 0xa8a   :  { %v16743_v19 = vsel %vm16741_vm1, %v16742_v7, %v32238_v45  ;;  %vm27748_vm10 = vcmp.lt.s32.totalorder %v27747_v42, 0  ;;  %v32259_v25 = vmul.u32.u64.low %v16794_v37, %v16793_v26  ;;  %v32260_v43 = vmul.u32.u64.high %v16794_v37, %v16793_v26, %v32259_v25 }
 0xa8b   :  { %v16740_v55 = vsel %vm16738_vm2, %v32234_v4, %v16739_v30  ;;  %v16923_v1 = vshrl.u32 %v16905_v18, %v16921_v57  ;;  %v16926_v47 = vadd.s32 127, %v16925_v24  ;;  %v16611_v44 = vsel %vm27748_vm10, 0, %v27747_v42 }
 0xa8c   :  { %v16744_v52 = vsel %vm16737_vm3, %v16740_v55, %v16743_v19  ;;  %v16612_v27 = vsub.s32 32, %v16611_v44  ;;  %v16616_v6 = vsub.s32 4294967266, %v16611_v44  ;;  %v16613_v41 = vshll.u32 %v32222_v11, %v16611_v44 }
 0xa8d   :  { %v32264_v14 = vsel %vm16735_vm4, nan, %v16744_v52  ;;  %v16924_v61 = vor.u32 %v16923_v1, %v16922_v17  ;;  %v16927_v12 = vshll.u32 %v16926_v47, 23  ;;  %v16785_v57 = vsel %vm16779_vm7, %v16782_v56, %v16784_v51 }
 0xa8e   :  { %v32267_v18 = vand.u32 4294901760, %v32264_v14  ;;  %v32271_v62 = vmul.u32.u64.low %v16794_v37, %v16789_v46  ;;  %v32272_v35 = vmul.u32.u64.high %v16794_v37, %v16789_v46, %v32271_v62  ;;  %v16614_v63 = vshrl.u32 %v16596_v54, %v16612_v27 }
 0xa8f   :  { %v16928_v5 = vor.u32 4788187, %v16927_v12  ;;  %v16617_v20 = vadd.s32 127, %v16616_v6  ;;  %v16931_v23 = vcvt.s32.f32 %v16924_v61  ;;  %v17150_v17 = vand.u32 3, %v17149_v50 }
 0xa90   :  { %17369 = vmatprep.subr.mxu0 %v32267_v18  ;;  %v16615_v22 = vor.u32 %v16614_v63, %v16613_v41  ;;  %vm16803_vm8 = vc.u32 %v32260_v43, %v32271_v62  ;;  %v16804_v19 = vadd.s32 1, %v32272_v35  ;;  %vm16851_vm9 = vcmp.lt.s32.totalorder %v32030_v21, 0 }
 0xa91   :  { %v16929_v16 = vand.u32 2147483647, %v16928_v5  ;;  %v16618_v24 = vshll.u32 %v16617_v20, 23  ;;  %v16801_v54 = vmul.u32 %v16794_v37, %v16785_v57  ;;  %v16936_v39 = vsel %vm16851_vm9, %v16935_v29, %v32185_v31 }
 0xa92   :  { %v16805_v2 = vsel %vm16803_vm8, %v16804_v19, %v32272_v35  ;;  %vm17152_vm13 = vcmp.eq.s32.totalorder %v17150_v17, 0  ;;  %v16622_v56 = vcvt.s32.f32 %v16615_v22  ;;  %vm16850_vm0 = vcmp.le.f32.partialorder %v16849_v10, 0.7853982 }
 0xa93   :  { %v16932_v46 = vmul.f32 %v16931_v23, %v16929_v16  ;;  %v16619_v11 = vor.u32 4788187, %v16618_v24  ;;  %v16806_v55 = vadd.s32 %v16805_v2, %v16801_v54  ;;  %v17154_v1 = vsel %vm17152_vm13, %v32234_v4, %v16739_v30 }
 0xa94   :  { %vm17151_vm14 = vcmp.lt.s32.totalorder %v17150_v17, 2  ;;  %vm17155_vm11 = vcmp.eq.s32.totalorder %v17150_v17, 2  ;;  %v16938_v25 = vsel %vm16850_vm0, 0, %v16936_v39  ;;  %v16626_v61 = vsub.s32 4, %v32203_v60 }
 0xa95   :  { %v16933_v42 = vxor.u32 2147483648, %v16932_v46  ;;  %v16620_v8 = vand.u32 2147483647, %v16619_v11  ;;  %v16807_v52 = vadd.s32 536870912, %v16806_v55  ;;  %v17157_v31 = vsel %vm17155_vm11, %v16742_v7, %v32238_v45 }
 0xa96   :  { %v17158_v12 = vsel %vm17151_vm14, %v17154_v1, %v17157_v31  ;;  %vm16542_vm1 = vcmp.lt.s32.totalorder %v31969_v53, 0  ;;  %vm16541_vm2 = vcmp.le.f32.partialorder %v16540_v3, 0.7853982  ;;  %v17357_v6 = vadd.s32 3, %v16938_v25 }
 0xa97   :  { %v16934_v47 = vsel %vm16851_vm9, %v16933_v42, %v16932_v46  ;;  %v16623_v37 = vmul.f32 %v16622_v56, %v16620_v8  ;;  %v32295_v44 = vshrl.u32 %v16807_v52, 30  ;;  %v32299_v10 = vsel %vm16735_vm4, nan, %v17158_v12 }
 0xa98   :  { %v16937_v26 = vsel %vm16850_vm0, %v32030_v21, %v16934_v47  ;;  %v16627_v7 = vsel %vm16542_vm1, %v16626_v61, %v32203_v60  ;;  %v16942_v5 = vand.u32 3, %v16938_v25  ;;  %v32311_v29 = vsub.f32 %v32264_v14, %v32267_v18 }
 0xa99   :  { %28546 = vcosq.f32 %v16937_v26  ;;  %v16624_v30 = vxor.u32 2147483648, %v16623_v37  ;;  %v16809_v45 = vshll.u32 %v32295_v44, 30  ;;  %v32307_v58 = vsel %vm16541_vm2, 0, %v16627_v7 }
 0xa9a   :  { %28548 = vsinq.f32 %v16937_v26  ;;  %v17358_v3 = vand.u32 3, %v17357_v6  ;;  %vm16941_vm3 = vweird.f32 %v32030_v21  ;;  %v16633_v60 = vand.u32 3, %v32307_v58 }
 0xa9b   :  { %v16625_v4 = vsel %vm16542_vm1, %v16624_v30, %v16623_v37  ;;  %v16810_v51 = vsub.s32 %v16806_v55, %v16809_v45  ;;  %vm16943_vm4 = vcmp.lt.s32.totalorder %v16942_v5, 2  ;;  %vm16944_vm5 = vcmp.eq.s32.totalorder %v16942_v5, 0 }
 0xa9c   :  { %v16628_v27 = vsel %vm16541_vm2, %v31969_v53, %v16625_v4  ;;  %vm16947_vm6 = vcmp.eq.s32.totalorder %v16942_v5, 2  ;;  %v17448_v50 = vand.u32 4294901760, %v32311_v29  ;;  %vm17363_vm7 = vcmp.eq.s32.totalorder %v17358_v3, 2 }
 0xa9d   :  { %28550 = vcosq.f32 %v16628_v27  ;;  %v16812_v35 = vsub.s32 0, %v16810_v51  ;;  %vm17360_vm12 = vcmp.eq.s32.totalorder %v17358_v3, 0  ;;  %vm16638_vm15 = vcmp.eq.s32.totalorder %v16633_v60, 2 }
 0xa9e   :  { %28552 = vsinq.f32 %v16628_v27  ;;  %vm17359_vm10 = vcmp.lt.s32.totalorder %v17358_v3, 2  ;;  %v16802_v42 = vadd.s32 %v32271_v62, %v32260_v43  ;;  %v17449_v26 = vsub.f32 %v32311_v29, %v17448_v50 }
 0xa9f   :  { %v27754_v41 = vmin.u32 %v16812_v35, %v16810_v51  ;;  %vm16635_vm9 = vcmp.eq.s32.totalorder %v16633_v60, 0  ;;  %vm16634_vm13 = vcmp.lt.s32.totalorder %v16633_v60, 2  ;;  %vm16632_vm0 = vweird.f32 %v31969_v53 }
 0xaa0   :  { %v17450_v4 = vand.u32 4294901760, %v17449_v26  ;;  %vm16748_vm14 = vcmp.lt.s32.totalorder %v32024_v9, 0  ;;  %vm32361_vm11 = vcmp.le.f32.partialorder %v16746_v15, 0.7853982  ;;  %v17045_v15 = vadd.s32 3, %v32307_v58 }
 0xaa1   :  { %v16814_v23 = vclz %v27754_v41 }
 0xaa3   :  { %v28547_v63 = vpop.eup %28546  ;;  %v27755_v24 = vadd.s32 4294967294, %v16814_v23 }
 0xaa4   :  { %v28549_v20 = vpop.eup %28548  ;;  %v16948_v16 = vxor.u32 2147483648, %v28547_v63 }
 0xaa5   :  { %v16945_v57 = vxor.u32 2147483648, %v28549_v20  ;;  %vm27756_vm8 = vcmp.lt.s32.totalorder %v27755_v24, 0 }
 0xaa6   :  { %v16949_v22 = vsel %vm16947_vm6, %v16948_v16, %v28549_v20  ;;  %v17365_v46 = vsel %vm17363_vm7, %v16948_v16, %v28549_v20  ;;  %v16817_v55 = vsel %vm27756_vm8, 0, %v27755_v24  ;;  %vm16838_vm7 = vweird.f32 %v32024_v9 }
 0xaa7   :  { %v16946_v19 = vsel %vm16944_vm5, %v28547_v63, %v16945_v57  ;;  %v17362_v17 = vsel %vm17360_vm12, %v28547_v63, %v16945_v57  ;;  %v32316_v11 = vpop.eup %28550  ;;  %v16818_v62 = vsub.s32 32, %v16817_v55  ;;  %v16822_v52 = vsub.s32 4294967266, %v16817_v55 }
 0xaa8   :  { %v16950_v54 = vsel %vm16943_vm4, %v16946_v19, %v16949_v22  ;;  %v17366_v39 = vsel %vm17359_vm10, %v17362_v17, %v17365_v46  ;;  %v32321_v2 = vpop.eup %28552  ;;  %v16639_v56 = vxor.u32 2147483648, %v32316_v11  ;;  %v16819_v61 = vshll.u32 %v16810_v51, %v16817_v55 }
 0xaa9   :  { %v32325_v8 = vsel %vm16941_vm3, nan, %v16950_v54  ;;  %v32330_v1 = vsel %vm16941_vm3, nan, %v17366_v39  ;;  %v16636_v43 = vxor.u32 2147483648, %v32321_v2  ;;  %v16820_v31 = vshrl.u32 %v16802_v42, %v16818_v62 }
 0xaaa   :  { %v32333_v47 = vand.u32 4294901760, %v32325_v8  ;;  %v16640_v37 = vsel %vm16638_vm15, %v16639_v56, %v32321_v2  ;;  %v16823_v12 = vadd.s32 127, %v16822_v52  ;;  %v16832_v57 = vsub.s32 4, %v32295_v44 }
 0xaab   :  { %v16637_v21 = vsel %vm16635_vm9, %v32316_v11, %v16636_v43  ;;  %v16821_v7 = vor.u32 %v16820_v31, %v16819_v61  ;;  %v17046_v19 = vand.u32 3, %v17045_v15  ;;  %v18763_v16 = vand.u32 4294901760, %v32330_v1 }
 0xaac   :  { %17834 = vmatprep.subr.mxu1 %v32333_v47  ;;  %v16641_v25 = vsel %vm16634_vm13, %v16637_v21, %v16640_v37  ;;  %v16824_v27 = vshll.u32 %v16823_v12, 23  ;;  %v16833_v24 = vsel %vm16748_vm14, %v16832_v57, %v32295_v44  ;;  %v32377_v46 = vsub.f32 %v32325_v8, %v32333_v47 }
 0xaad   :  { %v32348_v30 = vsel %vm16632_vm0, nan, %v16641_v25  ;;  %v16828_v35 = vcvt.s32.f32 %v16821_v7  ;;  %v16835_v17 = vsel %vm32361_vm11, 0, %v16833_v24  ;;  %vm17048_vm1 = vcmp.eq.s32.totalorder %v17046_v19, 0 }
 0xaae   :  { %v32351_v45 = vand.u32 4294901760, %v32348_v30  ;;  %v16825_v5 = vor.u32 4788187, %v16824_v27  ;;  %v16839_v54 = vand.u32 3, %v16835_v17  ;;  %v17913_v42 = vand.u32 4294901760, %v32377_v46 }
 0xaaf   :  { %vm17051_vm2 = vcmp.eq.s32.totalorder %v17046_v19, 2  ;;  %v17050_v44 = vsel %vm17048_vm1, %v32316_v11, %v16636_v43  ;;  %vm17047_vm3 = vcmp.lt.s32.totalorder %v17046_v19, 2  ;;  %v32407_v43 = vand.u32 4294901760, %v32299_v10 }
 0xab0   :  { %17371 = vmatpush1.msra.mxu0 %v32351_v45  ;;  %v17453_v6 = vsub.f32 %v32348_v30, %v32351_v45  ;;  %v16826_v51 = vand.u32 2147483647, %v16825_v5  ;;  %v17053_v58 = vsel %vm17051_vm2, %v16639_v56, %v32321_v2  ;;  %vm16844_vm4 = vcmp.eq.s32.totalorder %v16839_v54, 2 }
 0xab1   :  { %17440 = vmatmul.mubr.f32.vlgmr.msra.gmra.mrb[24].mxu0 %v29109_v28  ;;  %17451 = vmatprep.subr.mxu0 %v17450_v4  ;;  %vm16841_vm5 = vcmp.eq.s32.totalorder %v16839_v54, 0  ;;  %vm16840_vm6 = vcmp.lt.s32.totalorder %v16839_v54, 2  ;;  %v32430_v61 = vsub.f32 %v32299_v10, %v32407_v43 }
 0xab2   :  { %v17454_v3 = vand.u32 4294901760, %v17453_v6  ;;  %17520 = vmatprep.mubr.f32.mxu0 %v28695_v0  ;;  %v16829_v41 = vmul.f32 %v16828_v35, %v16826_v51  ;;  %v17253_v51 = vadd.s32 3, %v16835_v17 }
 0xab3   :  { %v18378_v7 = vand.u32 4294901760, %v32430_v61 }
 0xab4   :  { %v17455_v63 = vsub.f32 %v17453_v6, %v17454_v3  ;;  %v16830_v60 = vxor.u32 2147483648, %v16829_v41 }
 0xab5   :  { %v18379_v5 = vsub.f32 %v32430_v61, %v18378_v7 }
 0xab6   :  { %v17456_v20 = vand.u32 4294901760, %v17455_v63  ;;  %v16831_v23 = vsel %vm16748_vm14, %v16830_v60, %v16829_v41 }
 0xab7   :  { %v16834_v22 = vsel %vm32361_vm11, %v32024_v9, %v16831_v23  ;;  %v18380_v35 = vand.u32 4294901760, %v18379_v5 }
 0xab8   :  { %17457 = vmatpush1.msra.mxu0 %v17456_v20  ;;  %28554 = vcosq.f32 %v16834_v22 }
 0xab9   :  { %17522 = vmatmul.mubr.f32.vlgmr.msra.gmra.mrb[24].mxu0 %v29065_v33  ;;  %17530 = vmatprep.subr.mxu0 %v32311_v29  ;;  %28556 = vsinq.f32 %v16834_v22  ;;  %v17914_v29 = vsub.f32 %v32377_v46, %v17913_v42  ;;  %v18842_v22 = vsub.f32 %v32330_v1, %v18763_v16 }
 0xaba   :  { %17533 = vmatpush1.msra.mxu0 %v17453_v6  ;;  %17596 = vmatprep.mubr.f32.mxu0 %v28695_v0 }
 0xabb   :  { %17606 = vmatprep.subr.mxu0 %v32267_v18  ;;  %v17915_v21 = vand.u32 4294901760, %v17914_v29  ;;  %v18843_v9 = vand.u32 4294901760, %v18842_v22 }
 0xabd   :  { %v18844_v24 = vsub.f32 %v18842_v22, %v18843_v9 }
 0xabf   :  { %v18845_v19 = vand.u32 4294901760, %v18844_v24 }
 0xac1   :  { %17599 = vmatmul.mubr.f32.vlgmr.msra.gmra.mrb[24].mxu0 %v29077_v13 }
 0xac2   :  { %17608 = vmatpush1.msra.mxu0 %v32351_v45  ;;  %17671 = vmatprep.mubr.f32.mxu0 %v28695_v0  ;;  %v32391_v39 = vpop.eup %28554 }
 0xac3   :  { %17684 = vmatprep.subr.mxu0 %v17448_v50  ;;  %v32393_v55 = vpop.eup %28556  ;;  %v16845_v62 = vxor.u32 2147483648, %v32391_v39  ;;  %v17054_v50 = vsel %vm17047_vm3, %v17050_v44, %v17053_v58 }
 0xac4   :  { %v16842_v26 = vxor.u32 2147483648, %v32393_v55  ;;  %v32411_v37 = vsel %vm16632_vm0, nan, %v17054_v50 }
 0xac5   :  { %v16846_v11 = vsel %vm16844_vm4, %v16845_v62, %v32393_v55  ;;  %v32423_v25 = vand.u32 4294901760, %v32411_v37 }
 0xac6   :  { %v16843_v2 = vsel %vm16841_vm5, %v32391_v39, %v16842_v26 }
 0xac7   :  { %v16847_v56 = vsel %vm16840_vm6, %v16843_v2, %v16846_v11 }
 0xac8   :  { %v32415_v52 = vsel %vm16838_vm7, nan, %v16847_v56 }
 0xac9   :  { %17675 = vmatmul.mubr.f32.vlgmr.msra.gmra.mrb[24].mxu0 %v29086_v59  ;;  %v32419_v31 = vand.u32 4294901760, %v32415_v52 }
 0xaca   :  { %17688 = vmatpush1.msra.mxu0 %v17454_v3  ;;  %17751 = vmatprep.mubr.f32.mxu0 %v28695_v0  ;;  %v17254_v3 = vand.u32 3, %v17253_v51 }
 0xacb   :  { %17760 = vmatprep.subr.mxu0 %v32267_v18  ;;  %17836 = vmatpush1.msra.mxu1 %v32419_v31  ;;  %v17918_v53 = vsub.f32 %v32415_v52, %v32419_v31  ;;  %v32436_v18 = vsub.f32 %v32411_v37, %v32423_v25 }
 0xacc   :  { %17905 = vmatmul.mubr.f32.vlgmr.msra.gmra.mrb[24].mxu1 %v29109_v28  ;;  %17916 = vmatprep.subr.mxu1 %v17915_v21  ;;  %vm17256_vm12 = vcmp.eq.s32.totalorder %v17254_v3, 0  ;;  %vm17259_vm15 = vcmp.eq.s32.totalorder %v17254_v3, 2  ;;  %vm17255_vm10 = vcmp.lt.s32.totalorder %v17254_v3, 2 }
 0xacd   :  { %v17919_v12 = vand.u32 4294901760, %v17918_v53  ;;  %17985 = vmatprep.mubr.f32.mxu1 %v28695_v0  ;;  %v18384_v6 = vand.u32 4294901760, %v32436_v18  ;;  %v17258_v63 = vsel %vm17256_vm12, %v32391_v39, %v16842_v26  ;;  %v17261_v60 = vsel %vm17259_vm15, %v16845_v62, %v32393_v55 }
 0xace   :  { %v17262_v20 = vsel %vm17255_vm10, %v17258_v63, %v17261_v60 }
 0xacf   :  { %v17920_v4 = vsub.f32 %v17918_v53, %v17919_v12  ;;  %v32470_v23 = vsel %vm16838_vm7, nan, %v17262_v20 }
 0xad0   :  { %v18765_v57 = vand.u32 4294901760, %v32470_v23 }
 0xad1   :  { %17753 = vmatmul.mubr.f32.vlgmr.msra.gmra.mrb[24].mxu0 %v29065_v33  ;;  %v17921_v27 = vand.u32 4294901760, %v17920_v4 }
 0xad2   :  { %17762 = vmatpush1.msra.mxu0 %v32351_v45  ;;  %17825 = vmatprep.mubr.f32.mxu0 %v28695_v0  ;;  %v18385_v45 = vsub.f32 %v32436_v18, %v18384_v6  ;;  %v18848_v15 = vsub.f32 %v32470_v23, %v18765_v57 }
 0xad3   :  { %18299 = vmatprep.subr.mxu0 %v32407_v43  ;;  %17922 = vmatpush1.msra.mxu1 %v17921_v27 }
 0xad4   :  { %17987 = vmatmul.mubr.f32.vlgmr.msra.gmra.mrb[24].mxu1 %v29065_v33  ;;  %17995 = vmatprep.subr.mxu1 %v32377_v46  ;;  %v18386_v41 = vand.u32 4294901760, %v18385_v45 }
 0xad5   :  { %17998 = vmatpush1.msra.mxu1 %v17918_v53  ;;  %18061 = vmatprep.mubr.f32.mxu1 %v28695_v0 }
 0xad6   :  { %18071 = vmatprep.subr.mxu1 %v32333_v47 }
 0xad9   :  { %17827 = vmatmul.mubr.f32.vlgmr.msra.gmra.mrb[24].mxu0 %v29065_v33 }
 0xada   :  { %18301 = vmatpush1.msra.mxu0 %v32423_v25  ;;  %18364 = vmatprep.mubr.f32.mxu0 %v28695_v0 }
 0xadb   :  { %18381 = vmatprep.subr.mxu0 %v18380_v35 }
 0xadc   :  { %18064 = vmatmul.mubr.f32.vlgmr.msra.gmra.mrb[24].mxu1 %v29077_v13 }
 0xadd   :  { %18370 = vmatmul.mubr.f32.vlgmr.msra.gmra.mrb[26].mxu0 %v29109_v28  ;;  %18073 = vmatpush1.msra.mxu1 %v32419_v31 }
 0xade   :  { %18387 = vmatpush1.msra.mxu0 %v18386_v41  ;;  %18136 = vmatprep.mubr.f32.mxu1 %v28695_v0 }
 0xadf   :  { %18149 = vmatprep.subr.mxu1 %v17913_v42  ;;  %18460 = vmatprep.subr.mxu0 %v32430_v61  ;;  %v28630_v61 = vld [vmem:[#allocation5 + $0xc0] sm:$0xff] }
 0xae0   :  { %18450 = vmatprep.mubr.f32.mxu0 %v28695_v0 }
 0xae4   :  { %18140 = vmatmul.mubr.f32.vlgmr.msra.gmra.mrb[24].mxu1 %v29086_v59 }
 0xae5   :  { %18452 = vmatmul.mubr.f32.vlgmr.msra.gmra.mrb[26].mxu0 %v29065_v33  ;;  %18153 = vmatpush1.msra.mxu1 %v17919_v12 }
 0xae6   :  { %18463 = vmatpush1.msra.mxu0 %v32436_v18  ;;  %18216 = vmatprep.mubr.f32.mxu1 %v28695_v0 }
 0xae7   :  { %18225 = vmatprep.subr.mxu1 %v32333_v47  ;;  %18536 = vmatprep.subr.mxu0 %v32407_v43  ;;  %v18849_v47 = vand.u32 4294901760, %v18848_v15 }
 0xae8   :  { %18526 = vmatprep.mubr.f32.mxu0 %v28695_v0 }
 0xae9   :  { %v18850_v46 = vsub.f32 %v18848_v15, %v18849_v47 }
 0xaeb   :  { %v18851_v17 = vand.u32 4294901760, %v18850_v46 }
 0xaec   :  { %18218 = vmatmul.mubr.f32.vlgmr.msra.gmra.mrb[24].mxu1 %v29065_v33 }
 0xaed   :  { %18529 = vmatmul.mubr.f32.vlgmr.msra.gmra.mrb[26].mxu0 %v29077_v13  ;;  %18227 = vmatpush1.msra.mxu1 %v32419_v31 }
 0xaee   :  { %18538 = vmatpush1.msra.mxu0 %v32423_v25  ;;  %18290 = vmatprep.mubr.f32.mxu1 %v28695_v0 }
 0xaef   :  { %18764 = vmatprep.subr.mxu1 %v18763_v16  ;;  %18614 = vmatprep.subr.mxu0 %v18378_v7 }
 0xaf0   :  { %18601 = vmatprep.mubr.f32.mxu0 %v28695_v0 }
 0xaf4   :  { %18292 = vmatmul.mubr.f32.vlgmr.msra.gmra.mrb[24].mxu1 %v29065_v33 }
 0xaf5   :  { %18605 = vmatmul.mubr.f32.vlgmr.msra.gmra.mrb[26].mxu0 %v29086_v59  ;;  %18766 = vmatpush1.msra.mxu1 %v18765_v57 }
 0xaf6   :  { %18618 = vmatpush1.msra.mxu0 %v18384_v6  ;;  %18829 = vmatprep.mubr.f32.mxu1 %v28695_v0 }
 0xaf7   :  { %18846 = vmatprep.subr.mxu1 %v18845_v19  ;;  %18690 = vmatprep.subr.mxu0 %v32407_v43 }
 0xaf8   :  { %18681 = vmatprep.mubr.f32.mxu0 %v28695_v0  ;;  %18835 = vmatmul.mubr.f32.vlgmr.msra.gmra.mrb[26].mxu1 %v29109_v28 }
 0xaf9   :  { %18852 = vmatpush1.msra.mxu1 %v18851_v17  ;;  %18915 = vmatprep.mubr.f32.mxu1 %v28695_v0 }
 0xafa   :  { %18925 = vmatprep.subr.mxu1 %v18842_v22 }
 0xafd   :  { %18683 = vmatmul.mubr.f32.vlgmr.msra.gmra.mrb[26].mxu0 %v29065_v33 }
 0xafe   :  { %18692 = vmatpush1.msra.mxu0 %v32423_v25  ;;  %18755 = vmatprep.mubr.f32.mxu0 %v28695_v0 }
 0xb00   :  { %18917 = vmatmul.mubr.f32.vlgmr.msra.gmra.mrb[26].mxu1 %v29065_v33 }
 0xb01   :  { %18928 = vmatpush1.msra.mxu1 %v18848_v15  ;;  %18991 = vmatprep.mubr.f32.mxu1 %v28695_v0 }
 0xb02   :  { %19001 = vmatprep.subr.mxu1 %v18763_v16 }
 0xb05   :  { %18757 = vmatmul.mubr.f32.vlgmr.msra.gmra.mrb[26].mxu0 %v29065_v33 }
 0xb06   :  { %20183 = vmatprep.mubr.f32.mxu0 %v28695_v0 }
 0xb08   :  { %18994 = vmatmul.mubr.f32.vlgmr.msra.gmra.mrb[26].mxu1 %v29077_v13 }
 0xb09   :  { %19003 = vmatpush1.msra.mxu1 %v18765_v57  ;;  %19066 = vmatprep.mubr.f32.mxu1 %v28695_v0 }
 0xb0a   :  { %19079 = vmatprep.subr.mxu1 %v18843_v9 }
 0xb10   :  { %19070 = vmatmul.mubr.f32.vlgmr.msra.gmra.mrb[26].mxu1 %v29086_v59 }
 0xb11   :  { %19083 = vmatpush1.msra.mxu1 %v18849_v47  ;;  %19146 = vmatprep.mubr.f32.mxu1 %v28695_v0 }
 0xb12   :  { %19155 = vmatprep.subr.mxu1 %v18763_v16 }
 0xb18   :  { %19148 = vmatmul.mubr.f32.vlgmr.msra.gmra.mrb[26].mxu1 %v29065_v33 }
 0xb19   :  { %19157 = vmatpush1.msra.mxu1 %v18765_v57  ;;  %19220 = vmatprep.mubr.f32.mxu1 %v28695_v0 }
 0xb20   :  { %19222 = vmatmul.mubr.f32.vlgmr.msra.gmra.mrb[26].mxu1 %v29065_v33 }
 0xb21   :  { %20648 = vmatprep.mubr.f32.mxu1 %v28695_v0 }
 0xbac   :  { %v17828_v54 = vpop.f32.mrb[24].mxu0 }
 0xbad   :  { %v17830_v42 = vpop.f32.mrb[25].mxu0  ;;  %v19228_v55 = vmul.f32 %v17828_v54, %v32411_v37  ;;  %v28631_v37 = vld [vmem:[#allocation5 + $0xc8] sm:$0xff] }
 0xbae   :  { %v19229_v29 = vmul.f32 %v17830_v42, %v32299_v10 }
 0xbc7   :  { %v18293_v44 = vpop.f32.mrb[24].mxu1 }
 0xbc8   :  { %v18295_v58 = vpop.f32.mrb[25].mxu1  ;;  %v19230_v46 = vmul.f32 %v18293_v44, %v32470_v23 }
 0xbd8   :  { %v18758_v39 = vpop.f32.mrb[26].mxu0 }
 0xbd9   :  { %v19232_v62 = vmul.f32 %v18758_v39, %v32348_v30  ;;  %v18760_v26 = vpop.f32.mrb[27].mxu0  ;;  %v19231_v39 = vmul.f32 %v18295_v58, %v32330_v1 }
 0xbda   :  { %v19233_v50 = vmul.f32 %v18760_v26, %v32264_v14 }
 0xbdb   :  { %v19236_v11 = vsub.f32 %v19228_v55, %v19232_v62 }
 0xbdc   :  { %v19237_v2 = vsub.f32 %v19229_v29, %v19233_v50 }
 0xbdd   :  { %v19240_v56 = vmul.f32 0.125, %v19236_v11 }
 0xbde   :  { %v19241_v43 = vmul.f32 0.125, %v19237_v2 }
 0xbdf   :  { %v19244_v21 = vadd.f32 %v19240_v56, %v29255_v49 }
 0xbe0   :  { %v19245_v31 = vadd.f32 %v19241_v43, %v29255_v49 }
 0xbe1   :  { %v19248_v25 = vmul.f32 0.01, %v19244_v21 }
 0xbe2   :  { %v19249_v53 = vmul.f32 0.01, %v19245_v31 }
 0xbe3   :  { %v19252_v12 = vadd.f32 %v28630_v61, %v19248_v25 }
 0xbe4   :  { %v19253_v18 = vadd.f32 %v28631_v37, %v19249_v53 }
 0xbe5   :  { %v19256_v30 = vmul.f32 0.15915494, %v19252_v12 }
 0xbe6   :  { %v19257_v4 = vmul.f32 0.15915494, %v19253_v18 }
 0xbe7   :  { %vm19260_vm8 = vcmp.lt.f32.partialorder %v19256_v30, 0.0  ;;  %v19264_v10 = vceil.f32 %v19256_v30  ;;  %v19268_v7 = vfloor.f32 %v19256_v30 }
 0xbe8   :  { %vm19261_vm9 = vcmp.lt.f32.partialorder %v19257_v4, 0.0  ;;  %v19265_v14 = vceil.f32 %v19257_v4  ;;  %v19269_v27 = vfloor.f32 %v19257_v4 }
 0xbe9   :  { %v19272_v6 = vsel %vm19260_vm8, %v19264_v10, %v19268_v7 }
 0xbea   :  { %v19276_v5 = vmul.f32 6.2831855, %v19272_v6  ;;  %v19273_v51 = vsel %vm19261_vm9, %v19265_v14, %v19269_v27  ;;  %v28632_v6 = vld [vmem:[#allocation5 + $0xd0] sm:$0xff] }
 0xbeb   :  { %v19277_v45 = vmul.f32 6.2831855, %v19273_v51 }
 0xbec   :  { %v32514_v35 = vsub.f32 %v19252_v12, %v19276_v5 }
 0xbed   :  { %v32516_v3 = vsub.f32 %v19253_v18, %v19277_v45 }
 0xbee   :  { %19285 = vst [vmem:[#allocation5 + $0xe0] sm:$0xff] %v32514_v35  ;;  %v19292_v41 = vand.u32 2139095040, %v32514_v35  ;;  %v19289_v42 = vand.u32 2147483647, %v32514_v35 }
 0xbef   :  { %19286 = vst [vmem:[#allocation5 + $0xe8] sm:$0xff] %v32516_v3  ;;  %v19395_v63 = vand.u32 2139095040, %v32516_v3  ;;  %v19392_v60 = vand.u32 2147483647, %v32516_v3 }
 0xbf0   :  { %v19293_v20 = vshrl.u32 %v19292_v41, 23  ;;  %v28633_v41 = vld [vmem:[#allocation5 + $0xd8] sm:$0xff] }
 0xbf1   :  { %v19396_v16 = vshrl.u32 %v19395_v63, 23  ;;  %v19399_v22 = vand.u32 8388607, %v19392_v60 }
 0xbf2   :  { %v27777_v57 = vadd.s32 4294967169, %v19293_v20 }
 0xbf3   :  { %v27781_v15 = vadd.s32 4294967169, %v19396_v16  ;;  %v19223_v47 = vpop.f32.mrb[26].mxu1  ;;  %v19400_v54 = vor.u32 8388608, %v19399_v22 }
 0xbf4   :  { %v19299_v9 = vadd.s32 1, %v27777_v57  ;;  %v19234_v19 = vmul.f32 %v19223_v47, %v32415_v52  ;;  %v19225_v17 = vpop.f32.mrb[27].mxu1  ;;  %v32534_v52 = vand.u32 8388607, %v19289_v42 }
 0xbf5   :  { %v19402_v24 = vadd.s32 1, %v27781_v15  ;;  %v19235_v55 = vmul.f32 %v19225_v17, %v32325_v8  ;;  %v32530_v2 = vshll.u32 %v19400_v54, 8 }
 0xbf6   :  { %vm19300_vm0 = vcmp.gt.s32.totalorder %v19299_v9, 0  ;;  %v19238_v62 = vsub.f32 %v19230_v46, %v19234_v19 }
 0xbf7   :  { %vm19403_vm13 = vcmp.gt.s32.totalorder %v19402_v24, 0  ;;  %v19239_v50 = vsub.f32 %v19231_v39, %v19235_v55  ;;  %v32536_v23 = vsel %vm19300_vm0, %v19299_v9, 0 }
 0xbf8   :  { %v19404_v26 = vsel %vm19403_vm13, %v19402_v24, 0  ;;  %v19242_v11 = vmul.f32 0.125, %v19238_v62  ;;  %v32551_v27 = vand.u32 31, %v32536_v23 }
 0xbf9   :  { %v19406_v29 = vand.u32 31, %v19404_v26  ;;  %v19405_v44 = vshrl.u32 %v19404_v26, 5  ;;  %v19243_v56 = vmul.f32 0.125, %v19239_v50 }
 0xbfa   :  { %v19246_v58 = vadd.f32 %v19242_v11, %v29255_v49 }
 0xbfb   :  { %v19407_v1 = vsub.s32 32, %v19406_v29  ;;  %v19409_v8 = vshll.u32 %v28696_v32, %v19406_v29  ;;  %v19412_v43 = vshll.u32 %v28697_v34, %v19406_v29  ;;  %v19415_v21 = vshll.u32 %v28698_v36, %v19406_v29 }
 0xbfc   :  { %v19247_v31 = vadd.f32 %v19243_v56, %v29255_v49  ;;  %v19418_v61 = vshll.u32 %v28699_v38, %v19406_v29  ;;  %v19250_v12 = vmul.f32 0.01, %v19246_v58  ;;  %v19421_v14 = vshll.u32 %v28700_v40, %v19406_v29 }
 0xbfd   :  { %v19410_v25 = vshrl.u32 %v28697_v34, %v19407_v1  ;;  %v19413_v53 = vshrl.u32 %v28698_v36, %v19407_v1  ;;  %v19416_v37 = vshrl.u32 %v28699_v38, %v19407_v1  ;;  %v19419_v18 = vshrl.u32 %v28700_v40, %v19407_v1 }
 0xbfe   :  { %v19422_v30 = vshrl.u32 %v28701_v48, %v19407_v1  ;;  %v19251_v4 = vmul.f32 0.01, %v19247_v31  ;;  %v19254_v5 = vadd.f32 %v28632_v6, %v19250_v12  ;;  %v19408_v20 = vshrl.u32 %v28696_v32, %v19407_v1 }
 0xbff   :  { %v19411_v10 = vor.u32 %v19410_v25, %v19409_v8  ;;  %v19414_v7 = vor.u32 %v19413_v53, %v19412_v43  ;;  %v19417_v51 = vor.u32 %v19416_v37, %v19415_v21  ;;  %v19420_v45 = vor.u32 %v19419_v18, %v19418_v61 }
 0xc00   :  { %v19255_v63 = vadd.f32 %v28633_v41, %v19251_v4  ;;  %v19423_v16 = vor.u32 %v19422_v30, %v19421_v14  ;;  %vm19424_vm14 = vcmp.lt.s32.totalorder %v19405_v44, 1  ;;  %v19258_v57 = vmul.f32 0.15915494, %v19254_v5 }
 0xc01   :  { %vm19425_vm11 = vcmp.lt.s32.totalorder %v19405_v44, 2  ;;  %vm19426_vm1 = vcmp.lt.s32.totalorder %v19405_v44, 3  ;;  %vm19427_vm2 = vcmp.lt.s32.totalorder %v19405_v44, 4  ;;  %v19432_v9 = vsel %vm19424_vm14, %v19411_v10, %v19414_v7 }
 0xc02   :  { %v19259_v22 = vmul.f32 0.15915494, %v19255_v63  ;;  %v19429_v15 = vsel %vm19427_vm2, %v19417_v51, 2102212464  ;;  %v19433_v47 = vsel %vm19427_vm2, %v19420_v45, 920167782  ;;  %v19266_v24 = vceil.f32 %v19258_v57 }
 0xc03   :  { %vm19262_vm3 = vcmp.lt.f32.partialorder %v19258_v57, 0.0  ;;  %v19270_v46 = vfloor.f32 %v19258_v57  ;;  %v19436_v19 = vsel %vm19424_vm14, %v19414_v7, %v19417_v51  ;;  %v19434_v39 = vsel %vm19426_vm1, %v19417_v51, %v19433_v47 }
 0xc04   :  { %vm19263_vm4 = vcmp.lt.f32.partialorder %v19259_v22, 0.0  ;;  %v19267_v17 = vceil.f32 %v19259_v22  ;;  %v19271_v54 = vfloor.f32 %v19259_v22  ;;  %v19428_v62 = vsel %vm19424_vm14, %v19408_v20, %v19411_v10 }
 0xc05   :  { %v19274_v55 = vsel %vm19262_vm3, %v19266_v24, %v19270_v46  ;;  %v19435_v26 = vsel %vm19425_vm11, %v19432_v9, %v19434_v39  ;;  %v19437_v29 = vsel %vm19427_vm2, %v19423_v16, 1326507024  ;;  %v19430_v56 = vsel %vm19426_vm1, %v19414_v7, %v19429_v15 }
 0xc06   :  { %v19278_v50 = vmul.f32 6.2831855, %v19274_v55  ;;  %v19275_v11 = vsel %vm19263_vm4, %v19267_v17, %v19271_v54  ;;  %v19438_v1 = vsel %vm19426_vm1, %v19420_v45, %v19437_v29  ;;  %v19431_v12 = vsel %vm19425_vm11, %v19428_v62, %v19430_v56 }
 0xc07   :  { %v19279_v58 = vmul.f32 6.2831855, %v19275_v11  ;;  %v19439_v8 = vsel %vm19425_vm11, %v19436_v19, %v19438_v1  ;;  %v32566_v43 = vmul.u32.u64.low %v32530_v2, %v19435_v26  ;;  %v32567_v21 = vmul.u32.u64.high %v32530_v2, %v19435_v26, %v32566_v43 }
 0xc08   :  { %v32569_v31 = vsub.f32 %v19254_v5, %v19278_v50  ;;  %v32572_v25 = vmul.u32.u64.low %v32530_v2, %v19439_v8  ;;  %v32573_v53 = vmul.u32.u64.high %v32530_v2, %v19439_v8, %v32572_v25  ;;  %v19297_v18 = vor.u32 8388608, %v32534_v52 }
 0xc09   :  { %v32575_v61 = vsub.f32 %v19255_v63, %v19279_v58  ;;  %v19450_v4 = vadd.s32 1, %v32567_v21  ;;  %v19304_v7 = vsub.s32 32, %v32551_v27  ;;  %v19447_v44 = vmul.u32 %v32530_v2, %v19431_v12 }
 0xc0a   :  { %19287 = vst [vmem:[#allocation5 + $0xf0] sm:$0xff] %v32569_v31  ;;  %v19498_v37 = vand.u32 2139095040, %v32569_v31  ;;  %vm19449_vm5 = vc.u32 %v32573_v53, %v32566_v43  ;;  %v32591_v41 = vshll.u32 %v19297_v18, 8  ;;  %v32594_v63 = vshrl.u32 %v32536_v23, 5 }
 0xc0b   :  { %19288 = vst [vmem:[#allocation5 + $0xf8] sm:$0xff] %v32575_v61  ;;  %v19601_v30 = vand.u32 2139095040, %v32575_v61  ;;  %v19598_v10 = vand.u32 2147483647, %v32575_v61  ;;  %v19451_v5 = vsel %vm19449_vm5, %v19450_v4, %v32567_v21  ;;  %v19307_v16 = vshrl.u32 %v28697_v34, %v19304_v7 }
 0xc0c   :  { %v19499_v14 = vshrl.u32 %v19498_v37, 23  ;;  %v19452_v52 = vadd.s32 %v19451_v5, %v19447_v44  ;;  %v19313_v2 = vshrl.u32 %v28699_v38, %v19304_v7  ;;  %v19306_v15 = vshll.u32 %v28696_v32, %v32551_v27 }
 0xc0d   :  { %v19602_v6 = vshrl.u32 %v19601_v30, 23  ;;  %v19605_v45 = vand.u32 8388607, %v19598_v10  ;;  %v19309_v9 = vshll.u32 %v28697_v34, %v32551_v27  ;;  %v19310_v24 = vshrl.u32 %v28698_v36, %v19304_v7 }
 0xc0e   :  { %v27785_v51 = vadd.s32 4294967169, %v19499_v14  ;;  %v19453_v22 = vadd.s32 536870912, %v19452_v52  ;;  %v19312_v23 = vshll.u32 %v28698_v36, %v32551_v27  ;;  %v19316_v46 = vshrl.u32 %v28700_v40, %v19304_v7 }
 0xc0f   :  { %v27789_v20 = vadd.s32 4294967169, %v19602_v6  ;;  %v19606_v17 = vor.u32 8388608, %v19605_v45  ;;  %v19305_v54 = vshrl.u32 %v28696_v32, %v19304_v7  ;;  %v32610_v39 = vshrl.u32 %v28701_v48, %v19304_v7 }
 0xc10   :  { %v19505_v57 = vadd.s32 1, %v27785_v51  ;;  %v32606_v19 = vshrl.u32 %v19453_v22, 30  ;;  %v19308_v55 = vor.u32 %v19307_v16, %v19306_v15  ;;  %v32612_v62 = vor.u32 %v19313_v2, %v19312_v23 }
 0xc11   :  { %v19608_v47 = vadd.s32 1, %v27789_v20  ;;  %v19315_v26 = vshll.u32 %v28699_v38, %v32551_v27  ;;  %v32619_v11 = vshll.u32 %v28700_v40, %v32551_v27  ;;  %v19448_v1 = vadd.s32 %v32566_v43, %v32573_v53 }
 0xc12   :  { %vm19506_vm7 = vcmp.gt.s32.totalorder %v19505_v57, 0  ;;  %v19455_v50 = vshll.u32 %v32606_v19, 30  ;;  %v32622_v58 = vor.u32 %v19310_v24, %v19309_v9  ;;  %v32628_v25 = vshll.u32 %v19606_v17, 8 }
 0xc13   :  { %vm19609_vm6 = vcmp.gt.s32.totalorder %v19608_v47, 0  ;;  %v32624_v8 = vor.u32 %v19316_v46, %v19315_v26  ;;  %v19320_v12 = vor.u32 %v32610_v39, %v32619_v11  ;;  %vm19321_vm12 = vcmp.lt.s32.totalorder %v32594_v63, 1 }
 0xc14   :  { %v19610_v29 = vsel %vm19609_vm6, %v19608_v47, 0  ;;  %v32626_v21 = vsub.s32 %v19452_v52, %v19455_v50  ;;  %v32633_v37 = vsel %vm19506_vm7, %v19505_v57, 0  ;;  %vm19324_vm15 = vcmp.lt.s32.totalorder %v32594_v63, 4 }
 0xc15   :  { %v19612_v56 = vand.u32 31, %v19610_v29  ;;  %v32638_v43 = vsel %vm19321_vm12, %v19305_v54, %v19308_v55  ;;  %v19611_v53 = vshrl.u32 %v19610_v29, 5  ;;  %v19326_v4 = vsel %vm19324_vm15, %v32612_v62, 2102212464 }
 0xc16   :  { %v19458_v18 = vsub.s32 0, %v32626_v21  ;;  %vm19323_vm10 = vcmp.lt.s32.totalorder %v32594_v63, 3  ;;  %v19478_v20 = vsub.s32 4, %v32606_v19  ;;  %v19329_v2 = vsel %vm19321_vm12, %v19308_v55, %v32622_v58 }
 0xc17   :  { %v19613_v27 = vsub.s32 32, %v19612_v56  ;;  %v19615_v30 = vshll.u32 %v28696_v32, %v19612_v56  ;;  %v19618_v14 = vshll.u32 %v28697_v34, %v19612_v56  ;;  %v19621_v6 = vshll.u32 %v28698_v36, %v19612_v56 }
 0xc18   :  { %v27782_v5 = vmin.u32 %v19458_v18, %v32626_v21  ;;  %v19624_v52 = vshll.u32 %v28699_v38, %v19612_v56  ;;  %v19330_v57 = vsel %vm19324_vm15, %v32624_v8, 920167782  ;;  %vm19322_vm8 = vcmp.lt.s32.totalorder %v32594_v63, 2 }
 0xc19   :  { %v19616_v7 = vshrl.u32 %v28697_v34, %v19613_v27  ;;  %v19619_v44 = vshrl.u32 %v28698_v36, %v19613_v27  ;;  %v19622_v51 = vshrl.u32 %v28699_v38, %v19613_v27  ;;  %v19625_v45 = vshrl.u32 %v28700_v40, %v19613_v27 }
 0xc1a   :  { %v19460_v22 = vclz %v27782_v5  ;;  %v19614_v24 = vshrl.u32 %v28696_v32, %v19613_v27  ;;  %v19627_v23 = vshll.u32 %v28700_v40, %v19612_v56  ;;  %v19628_v46 = vshrl.u32 %v28701_v48, %v19613_v27 }
 0xc1b   :  { %v19617_v16 = vor.u32 %v19616_v7, %v19615_v30  ;;  %v19620_v15 = vor.u32 %v19619_v44, %v19618_v14  ;;  %v19623_v9 = vor.u32 %v19622_v51, %v19621_v6  ;;  %v19626_v47 = vor.u32 %v19625_v45, %v19624_v52 }
 0xc1c   :  { %vm19630_vm9 = vcmp.lt.s32.totalorder %v19611_v53, 1  ;;  %v27783_v17 = vadd.s32 4294967294, %v19460_v22  ;;  %vm19631_vm13 = vcmp.lt.s32.totalorder %v19611_v53, 2  ;;  %vm19633_vm0 = vcmp.lt.s32.totalorder %v19611_v53, 4 }
 0xc1d   :  { %v19638_v54 = vsel %vm19630_vm9, %v19617_v16, %v19620_v15  ;;  %v19629_v55 = vor.u32 %v19628_v46, %v19627_v23  ;;  %vm19632_vm14 = vcmp.lt.s32.totalorder %v19611_v53, 3  ;;  %v19635_v26 = vsel %vm19633_vm0, %v19623_v9, 2102212464 }
 0xc1e   :  { %v19639_v29 = vsel %vm19633_vm0, %v19626_v47, 920167782  ;;  %vm27784_vm11 = vcmp.lt.s32.totalorder %v27783_v17, 0  ;;  %v19634_v50 = vsel %vm19630_vm9, %v19614_v24, %v19617_v16  ;;  %v19642_v30 = vsel %vm19630_vm9, %v19620_v15, %v19623_v9 }
 0xc1f   :  { %v19640_v18 = vsel %vm19632_vm14, %v19623_v9, %v19639_v29  ;;  %vm19394_vm1 = vcmp.lt.s32.totalorder %v32516_v3, 0  ;;  %v19463_v7 = vsel %vm27784_vm11, 0, %v27783_v17  ;;  %v19636_v14 = vsel %vm19632_vm14, %v19620_v15, %v19635_v26 }
 0xc20   :  { %v19641_v56 = vsel %vm19631_vm13, %v19638_v54, %v19640_v18  ;;  %v19643_v27 = vsel %vm19633_vm0, %v19629_v55, 1326507024  ;;  %v19464_v44 = vsub.s32 32, %v19463_v7  ;;  %v19468_v6 = vsub.s32 4294967266, %v19463_v7 }
 0xc21   :  { %v19644_v5 = vsel %vm19632_vm14, %v19626_v47, %v19643_v27  ;;  %v19331_v51 = vsel %vm19323_vm10, %v32612_v62, %v19330_v57  ;;  %v19465_v52 = vshll.u32 %v32626_v21, %v19463_v7  ;;  %v19637_v47 = vsel %vm19631_vm13, %v19634_v50, %v19636_v14 }
 0xc22   :  { %v19645_v45 = vsel %vm19631_vm13, %v19642_v30, %v19644_v5  ;;  %v32673_v16 = vmul.u32.u64.low %v32628_v25, %v19641_v56  ;;  %v32674_v22 = vmul.u32.u64.high %v32628_v25, %v19641_v56, %v32673_v16  ;;  %v19466_v15 = vshrl.u32 %v19448_v1, %v19464_v44 }
 0xc23   :  { %v19469_v9 = vadd.s32 127, %v19468_v6  ;;  %v32678_v24 = vmul.u32.u64.low %v32628_v25, %v19645_v45  ;;  %v32679_v23 = vmul.u32.u64.high %v32628_v25, %v19645_v45, %v32678_v24  ;;  %v19332_v57 = vsel %vm19322_vm8, %v19329_v2, %v19331_v51 }
 0xc24   :  { %v19333_v21 = vsel %vm19321_vm12, %v32622_v58, %v32612_v62  ;;  %v19334_v1 = vsel %vm19324_vm15, %v19320_v12, 1326507024  ;;  %v19467_v46 = vor.u32 %v19466_v15, %v19465_v52  ;;  %v19327_v53 = vsel %vm19323_vm10, %v32622_v58, %v19326_v4 }
 0xc25   :  { %v19470_v17 = vshll.u32 %v19469_v9, 23  ;;  %v19335_v2 = vsel %vm19323_vm10, %v32624_v8, %v19334_v1  ;;  %v19656_v54 = vadd.s32 1, %v32674_v22  ;;  %v19509_v12 = vand.u32 31, %v32633_v37 }
 0xc26   :  { %v19336_v62 = vsel %vm19322_vm8, %v19333_v21, %v19335_v2  ;;  %v32703_v39 = vmul.u32.u64.low %v32591_v41, %v19332_v57  ;;  %v32704_v11 = vmul.u32.u64.high %v32591_v41, %v19332_v57, %v32703_v39  ;;  %v19653_v26 = vmul.u32 %v32628_v25, %v19637_v47 }
 0xc27   :  { %v19471_v55 = vor.u32 4788187, %v19470_v17  ;;  %vm19655_vm2 = vc.u32 %v32679_v23, %v32673_v16  ;;  %v19328_v8 = vsel %vm19322_vm8, %v32638_v43, %v19327_v53  ;;  %v19474_v18 = vcvt.s32.f32 %v19467_v46 }
 0xc28   :  { %v19657_v58 = vsel %vm19655_vm2, %v19656_v54, %v32674_v22  ;;  %v32715_v4 = vmul.u32.u64.low %v32591_v41, %v19336_v62  ;;  %v32716_v29 = vmul.u32.u64.high %v32591_v41, %v19336_v62, %v32715_v4  ;;  %v19479_v25 = vsel %vm19394_vm1, %v19478_v20, %v32606_v19 }
 0xc29   :  { %v19472_v50 = vand.u32 2147483647, %v19471_v55  ;;  %v19658_v30 = vadd.s32 %v19657_v58, %v19653_v26  ;;  %v19347_v7 = vadd.s32 1, %v32704_v11  ;;  %vm19393_vm3 = vcmp.le.f32.partialorder %v19392_v60, 0.7853982 }
 0xc2a   :  { %v32726_v14 = vsel %vm19393_vm3, 0, %v19479_v25  ;;  %v19344_v56 = vmul.u32 %v32591_v41, %v19328_v8  ;;  %vm19346_vm4 = vc.u32 %v32716_v29, %v32703_v39  ;;  %v19510_v19 = vsub.s32 32, %v19509_v12 }
 0xc2b   :  { %v19475_v63 = vmul.f32 %v19474_v18, %v19472_v50  ;;  %v19659_v43 = vadd.s32 536870912, %v19658_v30  ;;  %v19348_v6 = vsel %vm19346_vm4, %v19347_v7, %v32704_v11  ;;  %v19495_v51 = vand.u32 2147483647, %v32569_v31 }
 0xc2c   :  { %v19349_v20 = vadd.s32 %v19348_v6, %v19344_v56  ;;  %v32738_v52 = vshrl.u32 %v32633_v37, 5  ;;  %v32742_v45 = vand.u32 3, %v32726_v14  ;;  %v19513_v9 = vshrl.u32 %v28697_v34, %v19510_v19 }
 0xc2d   :  { %v19476_v27 = vxor.u32 2147483648, %v19475_v63  ;;  %v32730_v44 = vshrl.u32 %v19659_v43, 30  ;;  %v19522_v24 = vshrl.u32 %v28700_v40, %v19510_v19  ;;  %v19516_v57 = vshrl.u32 %v28698_v36, %v19510_v19 }
 0xc2e   :  { %v19350_v22 = vadd.s32 536870912, %v19349_v20  ;;  %v19519_v37 = vshrl.u32 %v28699_v38, %v19510_v19  ;;  %v19502_v1 = vand.u32 8388607, %v19495_v51  ;;  %v19521_v46 = vshll.u32 %v28699_v38, %v19509_v12 }
 0xc2f   :  { %v19477_v5 = vsel %vm19394_vm1, %v19476_v27, %v19475_v63  ;;  %v19661_v60 = vshll.u32 %v32730_v44, 30  ;;  %v19525_v17 = vshrl.u32 %v28701_v48, %v19510_v19  ;;  %v19512_v2 = vshll.u32 %v28696_v32, %v19509_v12 }
 0xc30   :  { %v19480_v41 = vsel %vm19393_vm3, %v32516_v3, %v19477_v5  ;;  %v32748_v47 = vshrl.u32 %v19350_v22, 30  ;;  %v19515_v54 = vshll.u32 %v28697_v34, %v19509_v12  ;;  %v19518_v62 = vshll.u32 %v28698_v36, %v19509_v12 }
 0xc31   :  { %28558 = vcosq.f32 %v19480_v41  ;;  %v32744_v15 = vsub.s32 %v19658_v30, %v19661_v60  ;;  %vm19490_vm5 = vcmp.eq.s32.totalorder %v32742_v45, 2  ;;  %v19654_v11 = vadd.s32 %v32673_v16, %v32679_v23 }
 0xc32   :  { %28560 = vsinq.f32 %v19480_v41  ;;  %v19352_v53 = vshll.u32 %v32748_v47, 30  ;;  %v19523_v26 = vor.u32 %v19522_v24, %v19521_v46  ;;  %v19524_v58 = vshll.u32 %v28700_v40, %v19509_v12 }
 0xc33   :  { %v19664_v21 = vsub.s32 0, %v32744_v15  ;;  %vm19487_vm6 = vcmp.eq.s32.totalorder %v32742_v45, 0  ;;  %v19514_v4 = vor.u32 %v19513_v9, %v19512_v2  ;;  %v19517_v50 = vor.u32 %v19516_v57, %v19515_v54 }
 0xc34   :  { %v32767_v8 = vsub.s32 %v19349_v20, %v19352_v53  ;;  %v19520_v18 = vor.u32 %v19519_v37, %v19518_v62  ;;  %vm19486_vm7 = vcmp.lt.s32.totalorder %v32742_v45, 2  ;;  %v19345_v30 = vadd.s32 %v32703_v39, %v32716_v29 }
 0xc35   :  { %v27790_v55 = vmin.u32 %v19664_v21, %v32744_v15  ;;  %v19503_v7 = vor.u32 8388608, %v19502_v1  ;;  %v19526_v63 = vor.u32 %v19525_v17, %v19524_v58  ;;  %vm19484_vm12 = vweird.f32 %v32516_v3 }
 0xc36   :  { %v19355_v16 = vsub.s32 0, %v32767_v8  ;;  %v19511_v23 = vshrl.u32 %v28696_v32, %v19510_v19  ;;  %vm19527_vm15 = vcmp.lt.s32.totalorder %v32738_v52, 1  ;;  %vm19530_vm10 = vcmp.lt.s32.totalorder %v32738_v52, 4 }
 0xc37   :  { %v19666_v25 = vclz %v27790_v55  ;;  %vm19528_vm8 = vcmp.lt.s32.totalorder %v32738_v52, 2  ;;  %vm19529_vm9 = vcmp.lt.s32.totalorder %v32738_v52, 3  ;;  %v19536_v43 = vsel %vm19530_vm10, %v19523_v26, 920167782 }
 0xc38   :  { %v27778_v39 = vmin.u32 %v19355_v16, %v32767_v8  ;;  %v19531_v29 = vsel %vm19527_vm15, %v19511_v23, %v19514_v4  ;;  %v19532_v56 = vsel %vm19530_vm10, %v19520_v18, 2102212464  ;;  %v19535_v27 = vsel %vm19527_vm15, %v19514_v4, %v19517_v50 }
 0xc39   :  { %v27791_v12 = vadd.s32 4294967294, %v19666_v25  ;;  %v19537_v19 = vsel %vm19529_vm9, %v19520_v18, %v19536_v43  ;;  %v19539_v20 = vsel %vm19527_vm15, %v19517_v50, %v19520_v18  ;;  %v19540_v5 = vsel %vm19530_vm10, %v19526_v63, 1326507024 }
 0xc3a   :  { %v19357_v9 = vclz %v27778_v39  ;;  %v19543_v24 = vshll.u32 %v19503_v7, 8  ;;  %v19538_v1 = vsel %vm19528_vm8, %v19535_v27, %v19537_v19  ;;  %v19541_v2 = vsel %vm19529_vm9, %v19523_v26, %v19540_v5 }
 0xc3b   :  { %v32779_v6 = vpop.eup %28558  ;;  %vm27792_vm13 = vcmp.lt.s32.totalorder %v27791_v12, 0  ;;  %v19542_v58 = vsel %vm19528_vm8, %v19539_v20, %v19541_v2  ;;  %v19533_v45 = vsel %vm19529_vm9, %v19517_v50, %v19532_v56  ;;  %v19684_v27 = vsub.s32 4, %v32730_v44 }
 0xc3c   :  { %v32783_v60 = vpop.eup %28560  ;;  %v19491_v41 = vxor.u32 2147483648, %v32779_v6  ;;  %v19669_v22 = vsel %vm27792_vm13, 0, %v27791_v12  ;;  %v27779_v53 = vadd.s32 4294967294, %v19357_v9  ;;  %v19898_v50 = vadd.s32 3, %v32726_v14 }
 0xc3d   :  { %v19488_v57 = vxor.u32 2147483648, %v32783_v60  ;;  %v19670_v37 = vsub.s32 32, %v19669_v22  ;;  %v19674_v21 = vsub.s32 4294967266, %v19669_v22  ;;  %v19671_v17 = vshll.u32 %v32744_v15, %v19669_v22 }
 0xc3e   :  { %v19492_v46 = vsel %vm19490_vm5, %v19491_v41, %v32783_v60  ;;  %vm27780_vm0 = vcmp.lt.s32.totalorder %v27779_v53, 0  ;;  %v32804_v18 = vmul.u32.u64.low %v19543_v24, %v19542_v58  ;;  %v32805_v25 = vmul.u32.u64.high %v19543_v24, %v19542_v58, %v32804_v18 }
 0xc3f   :  { %v19489_v54 = vsel %vm19487_vm6, %v32779_v6, %v19488_v57  ;;  %v19672_v62 = vshrl.u32 %v19654_v11, %v19670_v37  ;;  %v19675_v55 = vadd.s32 127, %v19674_v21  ;;  %v19360_v63 = vsel %vm27780_vm0, 0, %v27779_v53 }
 0xc40   :  { %v19493_v4 = vsel %vm19486_vm7, %v19489_v54, %v19492_v46  ;;  %v19361_v16 = vsub.s32 32, %v19360_v63  ;;  %v19365_v23 = vsub.s32 4294967266, %v19360_v63  ;;  %v19362_v19 = vshll.u32 %v32767_v8, %v19360_v63 }
 0xc41   :  { %v32809_v15 = vsel %vm19484_vm12, nan, %v19493_v4  ;;  %v19673_v26 = vor.u32 %v19672_v62, %v19671_v17  ;;  %v19676_v7 = vshll.u32 %v19675_v55, 23  ;;  %v19534_v37 = vsel %vm19528_vm8, %v19531_v29, %v19533_v45 }
 0xc42   :  { %v32812_v11 = vand.u32 4294901760, %v32809_v15  ;;  %v32816_v43 = vmul.u32.u64.low %v19543_v24, %v19538_v1  ;;  %v32817_v39 = vmul.u32.u64.high %v19543_v24, %v19538_v1, %v32816_v43  ;;  %v19363_v20 = vshrl.u32 %v19345_v30, %v19361_v16 }
 0xc43   :  { %v19677_v12 = vor.u32 4788187, %v19676_v7  ;;  %v19366_v5 = vadd.s32 127, %v19365_v23  ;;  %v19680_v9 = vcvt.s32.f32 %v19673_v26  ;;  %v19899_v17 = vand.u32 3, %v19898_v50 }
 0xc44   :  { %20118 = vmatprep.subr.mxu0 %v32812_v11  ;;  %v19364_v56 = vor.u32 %v19363_v20, %v19362_v19  ;;  %vm19552_vm14 = vc.u32 %v32805_v25, %v32816_v43  ;;  %v19553_v46 = vadd.s32 1, %v32817_v39  ;;  %vm19600_vm11 = vcmp.lt.s32.totalorder %v32575_v61, 0 }
 0xc45   :  { %v19678_v22 = vand.u32 2147483647, %v19677_v12  ;;  %v19367_v21 = vshll.u32 %v19366_v5, 23  ;;  %v19550_v30 = vmul.u32 %v19543_v24, %v19534_v37  ;;  %v19685_v2 = vsel %vm19600_vm11, %v19684_v27, %v32730_v44 }
 0xc46   :  { %v19554_v52 = vsel %vm19552_vm14, %v19553_v46, %v32817_v39  ;;  %vm19901_vm1 = vcmp.eq.s32.totalorder %v19899_v17, 0  ;;  %v19371_v29 = vcvt.s32.f32 %v19364_v56  ;;  %vm19599_vm2 = vcmp.le.f32.partialorder %v19598_v10, 0.7853982 }
 0xc47   :  { %v19681_v1 = vmul.f32 %v19680_v9, %v19678_v22  ;;  %v19368_v8 = vor.u32 4788187, %v19367_v21  ;;  %v19555_v54 = vadd.s32 %v19554_v52, %v19550_v30  ;;  %v19903_v62 = vsel %vm19901_vm1, %v32779_v6, %v19488_v57 }
 0xc48   :  { %vm19900_vm3 = vcmp.lt.s32.totalorder %v19899_v17, 2  ;;  %vm19904_vm4 = vcmp.eq.s32.totalorder %v19899_v17, 2  ;;  %v19687_v18 = vsel %vm19599_vm2, 0, %v19685_v2  ;;  %v19375_v26 = vsub.s32 4, %v32748_v47 }
 0xc49   :  { %v19682_v53 = vxor.u32 2147483648, %v19681_v1  ;;  %v19369_v14 = vand.u32 2147483647, %v19368_v8  ;;  %v19556_v4 = vadd.s32 536870912, %v19555_v54  ;;  %v19906_v44 = vsel %vm19904_vm4, %v19491_v41, %v32783_v60 }
 0xc4a   :  { %v19907_v7 = vsel %vm19900_vm3, %v19903_v62, %v19906_v44  ;;  %vm19291_vm5 = vcmp.lt.s32.totalorder %v32514_v35, 0  ;;  %vm19290_vm6 = vcmp.le.f32.partialorder %v19289_v42, 0.7853982  ;;  %v20106_v23 = vadd.s32 3, %v19687_v18 }
 0xc4b   :  { %v19683_v55 = vsel %vm19600_vm11, %v19682_v53, %v19681_v1  ;;  %v19372_v24 = vmul.f32 %v19371_v29, %v19369_v14  ;;  %v32840_v63 = vshrl.u32 %v19556_v4, 30  ;;  %v32844_v10 = vsel %vm19484_vm12, nan, %v19907_v7 }
 0xc4c   :  { %v19686_v58 = vsel %vm19599_vm2, %v32575_v61, %v19683_v55  ;;  %v19376_v41 = vsel %vm19291_vm5, %v19375_v26, %v32748_v47  ;;  %v19691_v12 = vand.u32 3, %v19687_v18  ;;  %v32856_v27 = vsub.f32 %v32809_v15, %v32812_v11 }
 0xc4d   :  { %28562 = vcosq.f32 %v19686_v58  ;;  %v19373_v57 = vxor.u32 2147483648, %v19372_v24  ;;  %v19558_v60 = vshll.u32 %v32840_v63, 30  ;;  %v32852_v3 = vsel %vm19290_vm6, 0, %v19376_v41 }
 0xc4e   :  { %28564 = vsinq.f32 %v19686_v58  ;;  %v20107_v42 = vand.u32 3, %v20106_v23  ;;  %vm19690_vm7 = vweird.f32 %v32575_v61  ;;  %v19382_v47 = vand.u32 3, %v32852_v3 }
 0xc4f   :  { %v19374_v6 = vsel %vm19291_vm5, %v19373_v57, %v19372_v24  ;;  %v19559_v45 = vsub.s32 %v19555_v54, %v19558_v60  ;;  %vm19692_vm12 = vcmp.lt.s32.totalorder %v19691_v12, 2  ;;  %vm19693_vm15 = vcmp.eq.s32.totalorder %v19691_v12, 0 }
 0xc50   :  { %v19377_v16 = vsel %vm19290_vm6, %v32514_v35, %v19374_v6  ;;  %vm19696_vm10 = vcmp.eq.s32.totalorder %v19691_v12, 2  ;;  %v20197_v50 = vand.u32 4294901760, %v32856_v27  ;;  %vm20112_vm8 = vcmp.eq.s32.totalorder %v20107_v42, 2 }
 0xc51   :  { %28566 = vcosq.f32 %v19377_v16  ;;  %v19561_v39 = vsub.s32 0, %v19559_v45  ;;  %vm20109_vm9 = vcmp.eq.s32.totalorder %v20107_v42, 0  ;;  %vm19387_vm13 = vcmp.eq.s32.totalorder %v19382_v47, 2 }
 0xc52   :  { %28568 = vsinq.f32 %v19377_v16  ;;  %vm20108_vm0 = vcmp.lt.s32.totalorder %v20107_v42, 2  ;;  %v19551_v53 = vadd.s32 %v32816_v43, %v32805_v25  ;;  %v20198_v58 = vsub.f32 %v32856_v27, %v20197_v50 }
 0xc53   :  { %v27786_v19 = vmin.u32 %v19561_v39, %v19559_v45  ;;  %vm19384_vm11 = vcmp.eq.s32.totalorder %v19382_v47, 0  ;;  %vm19383_vm1 = vcmp.lt.s32.totalorder %v19382_v47, 2  ;;  %vm19381_vm2 = vweird.f32 %v32514_v35 }
 0xc54   :  { %v20199_v6 = vand.u32 4294901760, %v20198_v58  ;;  %vm19497_vm3 = vcmp.lt.s32.totalorder %v32569_v31, 0  ;;  %vm32906_vm4 = vcmp.le.f32.partialorder %v19495_v51, 0.7853982  ;;  %v19794_v51 = vadd.s32 3, %v32852_v3 }
 0xc55   :  { %v19563_v9 = vclz %v27786_v19 }
 0xc57   :  { %v28563_v20 = vpop.eup %28562  ;;  %v27787_v21 = vadd.s32 4294967294, %v19563_v9 }
 0xc58   :  { %v28565_v5 = vpop.eup %28564  ;;  %v19697_v22 = vxor.u32 2147483648, %v28563_v20 }
 0xc59   :  { %v19694_v37 = vxor.u32 2147483648, %v28565_v5  ;;  %vm27788_vm14 = vcmp.lt.s32.totalorder %v27787_v21, 0 }
 0xc5a   :  { %v19698_v56 = vsel %vm19696_vm10, %v19697_v22, %v28565_v5  ;;  %v20114_v1 = vsel %vm20112_vm8, %v19697_v22, %v28565_v5  ;;  %v19566_v54 = vsel %vm27788_vm14, 0, %v27787_v21  ;;  %vm19587_vm8 = vweird.f32 %v32569_v31 }
 0xc5b   :  { %v19695_v46 = vsel %vm19693_vm15, %v28563_v20, %v19694_v37  ;;  %v20111_v17 = vsel %vm20109_vm9, %v28563_v20, %v19694_v37  ;;  %v32861_v8 = vpop.eup %28566  ;;  %v19567_v43 = vsub.s32 32, %v19566_v54  ;;  %v19571_v4 = vsub.s32 4294967266, %v19566_v54 }
 0xc5c   :  { %v19699_v30 = vsel %vm19692_vm12, %v19695_v46, %v19698_v56  ;;  %v20115_v2 = vsel %vm20108_vm0, %v20111_v17, %v20114_v1  ;;  %v32866_v52 = vpop.eup %28568  ;;  %v19388_v29 = vxor.u32 2147483648, %v32861_v8  ;;  %v19568_v26 = vshll.u32 %v19559_v45, %v19566_v54 }
 0xc5d   :  { %v32870_v14 = vsel %vm19690_vm7, nan, %v19699_v30  ;;  %v32875_v62 = vsel %vm19690_vm7, nan, %v20115_v2  ;;  %v19385_v25 = vxor.u32 2147483648, %v32866_v52  ;;  %v19569_v44 = vshrl.u32 %v19551_v53, %v19567_v43 }
 0xc5e   :  { %v32878_v55 = vand.u32 4294901760, %v32870_v14  ;;  %v19389_v24 = vsel %vm19387_vm13, %v19388_v29, %v32866_v52  ;;  %v19572_v7 = vadd.s32 127, %v19571_v4  ;;  %v19581_v37 = vsub.s32 4, %v32840_v63 }
 0xc5f   :  { %v19386_v61 = vsel %vm19384_vm11, %v32861_v8, %v19385_v25  ;;  %v19570_v41 = vor.u32 %v19569_v44, %v19568_v26  ;;  %v19795_v46 = vand.u32 3, %v19794_v51  ;;  %v21512_v22 = vand.u32 4294901760, %v32875_v62 }
 0xc60   :  { %20583 = vmatprep.subr.mxu1 %v32878_v55  ;;  %v19390_v18 = vsel %vm19383_vm1, %v19386_v61, %v19389_v24  ;;  %v19573_v16 = vshll.u32 %v19572_v7, 23  ;;  %v19582_v21 = vsel %vm19497_vm3, %v19581_v37, %v32840_v63  ;;  %v32922_v1 = vsub.f32 %v32870_v14, %v32878_v55 }
 0xc61   :  { %v32893_v57 = vsel %vm19381_vm2, nan, %v19390_v18  ;;  %v19577_v39 = vcvt.s32.f32 %v19570_v41  ;;  %v19584_v17 = vsel %vm32906_vm4, 0, %v19582_v21  ;;  %vm19797_vm5 = vcmp.eq.s32.totalorder %v19795_v46, 0 }
 0xc62   :  { %v32896_v60 = vand.u32 4294901760, %v32893_v57  ;;  %v19574_v12 = vor.u32 4788187, %v19573_v16  ;;  %v19588_v30 = vand.u32 3, %v19584_v17  ;;  %v20662_v53 = vand.u32 4294901760, %v32922_v1 }
 0xc63   :  { %vm19800_vm6 = vcmp.eq.s32.totalorder %v19795_v46, 2  ;;  %v19799_v63 = vsel %vm19797_vm5, %v32861_v8, %v19385_v25  ;;  %vm19796_vm7 = vcmp.lt.s32.totalorder %v19795_v46, 2  ;;  %v32952_v25 = vand.u32 4294901760, %v32844_v10 }
 0xc64   :  { %20120 = vmatpush1.msra.mxu0 %v32896_v60  ;;  %v20202_v23 = vsub.f32 %v32893_v57, %v32896_v60  ;;  %v19575_v45 = vand.u32 2147483647, %v19574_v12  ;;  %v19802_v3 = vsel %vm19800_vm6, %v19388_v29, %v32866_v52  ;;  %vm19593_vm12 = vcmp.eq.s32.totalorder %v19588_v30, 2 }
 0xc65   :  { %20189 = vmatmul.mubr.f32.vlgmr.msra.gmra.mrb[28].mxu0 %v29109_v28  ;;  %20200 = vmatprep.subr.mxu0 %v20199_v6  ;;  %vm19590_vm15 = vcmp.eq.s32.totalorder %v19588_v30, 0  ;;  %vm19589_vm10 = vcmp.lt.s32.totalorder %v19588_v30, 2  ;;  %v32975_v26 = vsub.f32 %v32844_v10, %v32952_v25 }
 0xc66   :  { %v20203_v42 = vand.u32 4294901760, %v20202_v23  ;;  %20269 = vmatprep.mubr.f32.mxu0 %v28695_v0  ;;  %v19578_v19 = vmul.f32 %v19577_v39, %v19575_v45  ;;  %v20002_v45 = vadd.s32 3, %v19584_v17 }
 0xc67   :  { %v21127_v41 = vand.u32 4294901760, %v32975_v26 }
 0xc68   :  { %v20204_v20 = vsub.f32 %v20202_v23, %v20203_v42  ;;  %v19579_v47 = vxor.u32 2147483648, %v19578_v19 }
 0xc69   :  { %v21128_v12 = vsub.f32 %v32975_v26, %v21127_v41 }
 0xc6a   :  { %v20205_v5 = vand.u32 4294901760, %v20204_v20  ;;  %v19580_v9 = vsel %vm19497_vm3, %v19579_v47, %v19578_v19 }
 0xc6b   :  { %v19583_v56 = vsel %vm32906_vm4, %v32569_v31, %v19580_v9  ;;  %v21129_v39 = vand.u32 4294901760, %v21128_v12 }
 0xc6c   :  { %20206 = vmatpush1.msra.mxu0 %v20205_v5  ;;  %28570 = vcosq.f32 %v19583_v56 }
 0xc6d   :  { %20271 = vmatmul.mubr.f32.vlgmr.msra.gmra.mrb[28].mxu0 %v29065_v33  ;;  %20279 = vmatprep.subr.mxu0 %v32856_v27  ;;  %28572 = vsinq.f32 %v19583_v56  ;;  %v20663_v27 = vsub.f32 %v32922_v1, %v20662_v53  ;;  %v21591_v56 = vsub.f32 %v32875_v62, %v21512_v22 }
 0xc6e   :  { %20282 = vmatpush1.msra.mxu0 %v20202_v23  ;;  %20345 = vmatprep.mubr.f32.mxu0 %v28695_v0 }
 0xc6f   :  { %20355 = vmatprep.subr.mxu0 %v32812_v11  ;;  %v20664_v61 = vand.u32 4294901760, %v20663_v27  ;;  %v21592_v31 = vand.u32 4294901760, %v21591_v56 }
 0xc71   :  { %v21593_v21 = vsub.f32 %v21591_v56, %v21592_v31 }
 0xc73   :  { %v21594_v46 = vand.u32 4294901760, %v21593_v21 }
 0xc75   :  { %20348 = vmatmul.mubr.f32.vlgmr.msra.gmra.mrb[28].mxu0 %v29077_v13 }
 0xc76   :  { %20357 = vmatpush1.msra.mxu0 %v32896_v60  ;;  %20420 = vmatprep.mubr.f32.mxu0 %v28695_v0  ;;  %v32936_v2 = vpop.eup %28570 }
 0xc77   :  { %20433 = vmatprep.subr.mxu0 %v20197_v50  ;;  %v32938_v54 = vpop.eup %28572  ;;  %v19594_v43 = vxor.u32 2147483648, %v32936_v2  ;;  %v19803_v50 = vsel %vm19796_vm7, %v19799_v63, %v19802_v3 }
 0xc78   :  { %v19591_v58 = vxor.u32 2147483648, %v32938_v54  ;;  %v32956_v24 = vsel %vm19381_vm2, nan, %v19803_v50 }
 0xc79   :  { %v19595_v8 = vsel %vm19593_vm12, %v19594_v43, %v32938_v54  ;;  %v32968_v18 = vand.u32 4294901760, %v32956_v24 }
 0xc7a   :  { %v19592_v52 = vsel %vm19590_vm15, %v32936_v2, %v19591_v58 }
 0xc7b   :  { %v19596_v29 = vsel %vm19589_vm10, %v19592_v52, %v19595_v8 }
 0xc7c   :  { %v32960_v4 = vsel %vm19587_vm8, nan, %v19596_v29 }
 0xc7d   :  { %20424 = vmatmul.mubr.f32.vlgmr.msra.gmra.mrb[28].mxu0 %v29086_v59  ;;  %v32964_v44 = vand.u32 4294901760, %v32960_v4 }
 0xc7e   :  { %20437 = vmatpush1.msra.mxu0 %v20203_v42  ;;  %20500 = vmatprep.mubr.f32.mxu0 %v28695_v0  ;;  %v20003_v42 = vand.u32 3, %v20002_v45 }
 0xc7f   :  { %20509 = vmatprep.subr.mxu0 %v32812_v11  ;;  %20585 = vmatpush1.msra.mxu1 %v32964_v44  ;;  %v20667_v35 = vsub.f32 %v32960_v4, %v32964_v44  ;;  %v32981_v11 = vsub.f32 %v32956_v24, %v32968_v18 }
 0xc80   :  { %20654 = vmatmul.mubr.f32.vlgmr.msra.gmra.mrb[28].mxu1 %v29109_v28  ;;  %20665 = vmatprep.subr.mxu1 %v20664_v61  ;;  %vm20005_vm9 = vcmp.eq.s32.totalorder %v20003_v42, 0  ;;  %vm20008_vm13 = vcmp.eq.s32.totalorder %v20003_v42, 2  ;;  %vm20004_vm0 = vcmp.lt.s32.totalorder %v20003_v42, 2 }
 0xc81   :  { %v20668_v7 = vand.u32 4294901760, %v20667_v35  ;;  %20734 = vmatprep.mubr.f32.mxu1 %v28695_v0  ;;  %v21133_v23 = vand.u32 4294901760, %v32981_v11  ;;  %v20007_v20 = vsel %vm20005_vm9, %v32936_v2, %v19591_v58  ;;  %v20010_v47 = vsel %vm20008_vm13, %v19594_v43, %v32938_v54 }
 0xc82   :  { %v20011_v5 = vsel %vm20004_vm0, %v20007_v20, %v20010_v47 }
 0xc83   :  { %v20669_v6 = vsub.f32 %v20667_v35, %v20668_v7  ;;  %v33015_v9 = vsel %vm19587_vm8, nan, %v20011_v5 }
 0xc84   :  { %v21514_v37 = vand.u32 4294901760, %v33015_v9 }
 0xc85   :  { %20502 = vmatmul.mubr.f32.vlgmr.msra.gmra.mrb[28].mxu0 %v29065_v33  ;;  %v20670_v16 = vand.u32 4294901760, %v20669_v6 }
 0xc86   :  { %20511 = vmatpush1.msra.mxu0 %v32896_v60  ;;  %20574 = vmatprep.mubr.f32.mxu0 %v28695_v0  ;;  %v21134_v60 = vsub.f32 %v32981_v11, %v21133_v23  ;;  %v21597_v51 = vsub.f32 %v33015_v9, %v21514_v37 }
 0xc87   :  { %21048 = vmatprep.subr.mxu0 %v32952_v25  ;;  %20671 = vmatpush1.msra.mxu1 %v20670_v16 }
 0xc88   :  { %20736 = vmatmul.mubr.f32.vlgmr.msra.gmra.mrb[28].mxu1 %v29065_v33  ;;  %20744 = vmatprep.subr.mxu1 %v32922_v1  ;;  %v21135_v19 = vand.u32 4294901760, %v21134_v60 }
 0xc89   :  { %20747 = vmatpush1.msra.mxu1 %v20667_v35  ;;  %20810 = vmatprep.mubr.f32.mxu1 %v28695_v0 }
 0xc8a   :  { %20820 = vmatprep.subr.mxu1 %v32878_v55 }
 0xc8d   :  { %20576 = vmatmul.mubr.f32.vlgmr.msra.gmra.mrb[28].mxu0 %v29065_v33 }
 0xc8e   :  { %21050 = vmatpush1.msra.mxu0 %v32968_v18  ;;  %21113 = vmatprep.mubr.f32.mxu0 %v28695_v0 }
 0xc8f   :  { %21130 = vmatprep.subr.mxu0 %v21129_v39 }
 0xc90   :  { %20813 = vmatmul.mubr.f32.vlgmr.msra.gmra.mrb[28].mxu1 %v29077_v13 }
 0xc91   :  { %21119 = vmatmul.mubr.f32.vlgmr.msra.gmra.mrb[30].mxu0 %v29109_v28  ;;  %20822 = vmatpush1.msra.mxu1 %v32964_v44 }
 0xc92   :  { %21136 = vmatpush1.msra.mxu0 %v21135_v19  ;;  %20885 = vmatprep.mubr.f32.mxu1 %v28695_v0 }
 0xc93   :  { %20898 = vmatprep.subr.mxu1 %v20662_v53  ;;  %21209 = vmatprep.subr.mxu0 %v32975_v26  ;;  %v28634_v26 = vld [vmem:[#allocation5 + $0xe0] sm:$0xff] }
 0xc94   :  { %21199 = vmatprep.mubr.f32.mxu0 %v28695_v0 }
 0xc98   :  { %20889 = vmatmul.mubr.f32.vlgmr.msra.gmra.mrb[28].mxu1 %v29086_v59 }
 0xc99   :  { %21201 = vmatmul.mubr.f32.vlgmr.msra.gmra.mrb[30].mxu0 %v29065_v33  ;;  %20902 = vmatpush1.msra.mxu1 %v20668_v7 }
 0xc9a   :  { %21212 = vmatpush1.msra.mxu0 %v32981_v11  ;;  %20965 = vmatprep.mubr.f32.mxu1 %v28695_v0 }
 0xc9b   :  { %20974 = vmatprep.subr.mxu1 %v32878_v55  ;;  %21285 = vmatprep.subr.mxu0 %v32952_v25  ;;  %v21598_v55 = vand.u32 4294901760, %v21597_v51 }
 0xc9c   :  { %21275 = vmatprep.mubr.f32.mxu0 %v28695_v0 }
 0xc9d   :  { %v21599_v1 = vsub.f32 %v21597_v51, %v21598_v55 }
 0xc9f   :  { %v21600_v17 = vand.u32 4294901760, %v21599_v1 }
 0xca0   :  { %20967 = vmatmul.mubr.f32.vlgmr.msra.gmra.mrb[28].mxu1 %v29065_v33 }
 0xca1   :  { %21278 = vmatmul.mubr.f32.vlgmr.msra.gmra.mrb[30].mxu0 %v29077_v13  ;;  %20976 = vmatpush1.msra.mxu1 %v32964_v44 }
 0xca2   :  { %21287 = vmatpush1.msra.mxu0 %v32968_v18  ;;  %21039 = vmatprep.mubr.f32.mxu1 %v28695_v0 }
 0xca3   :  { %21513 = vmatprep.subr.mxu1 %v21512_v22  ;;  %21363 = vmatprep.subr.mxu0 %v21127_v41 }
 0xca4   :  { %21350 = vmatprep.mubr.f32.mxu0 %v28695_v0 }
 0xca8   :  { %21041 = vmatmul.mubr.f32.vlgmr.msra.gmra.mrb[28].mxu1 %v29065_v33 }
 0xca9   :  { %21354 = vmatmul.mubr.f32.vlgmr.msra.gmra.mrb[30].mxu0 %v29086_v59  ;;  %21515 = vmatpush1.msra.mxu1 %v21514_v37 }
 0xcaa   :  { %21367 = vmatpush1.msra.mxu0 %v21133_v23  ;;  %21578 = vmatprep.mubr.f32.mxu1 %v28695_v0 }
 0xcab   :  { %21595 = vmatprep.subr.mxu1 %v21594_v46  ;;  %21439 = vmatprep.subr.mxu0 %v32952_v25 }
 0xcac   :  { %21430 = vmatprep.mubr.f32.mxu0 %v28695_v0  ;;  %21584 = vmatmul.mubr.f32.vlgmr.msra.gmra.mrb[30].mxu1 %v29109_v28 }
 0xcad   :  { %21601 = vmatpush1.msra.mxu1 %v21600_v17  ;;  %21664 = vmatprep.mubr.f32.mxu1 %v28695_v0 }
 0xcae   :  { %21674 = vmatprep.subr.mxu1 %v21591_v56 }
 0xcb1   :  { %21432 = vmatmul.mubr.f32.vlgmr.msra.gmra.mrb[30].mxu0 %v29065_v33 }
 0xcb2   :  { %21441 = vmatpush1.msra.mxu0 %v32968_v18  ;;  %21504 = vmatprep.mubr.f32.mxu0 %v28695_v0 }
 0xcb4   :  { %21666 = vmatmul.mubr.f32.vlgmr.msra.gmra.mrb[30].mxu1 %v29065_v33 }
 0xcb5   :  { %21677 = vmatpush1.msra.mxu1 %v21597_v51  ;;  %21740 = vmatprep.mubr.f32.mxu1 %v28695_v0 }
 0xcb6   :  { %21750 = vmatprep.subr.mxu1 %v21512_v22 }
 0xcb9   :  { %21506 = vmatmul.mubr.f32.vlgmr.msra.gmra.mrb[30].mxu0 %v29065_v33 }
 0xcba   :  { %22932 = vmatprep.mubr.f32.mxu0 %v28695_v0 }
 0xcbc   :  { %21743 = vmatmul.mubr.f32.vlgmr.msra.gmra.mrb[30].mxu1 %v29077_v13 }
 0xcbd   :  { %21752 = vmatpush1.msra.mxu1 %v21514_v37  ;;  %21815 = vmatprep.mubr.f32.mxu1 %v28695_v0 }
 0xcbe   :  { %21828 = vmatprep.subr.mxu1 %v21592_v31 }
 0xcc4   :  { %21819 = vmatmul.mubr.f32.vlgmr.msra.gmra.mrb[30].mxu1 %v29086_v59 }
 0xcc5   :  { %21832 = vmatpush1.msra.mxu1 %v21598_v55  ;;  %21895 = vmatprep.mubr.f32.mxu1 %v28695_v0 }
 0xcc6   :  { %21904 = vmatprep.subr.mxu1 %v21512_v22 }
 0xccc   :  { %21897 = vmatmul.mubr.f32.vlgmr.msra.gmra.mrb[30].mxu1 %v29065_v33 }
 0xccd   :  { %21906 = vmatpush1.msra.mxu1 %v21514_v37  ;;  %21969 = vmatprep.mubr.f32.mxu1 %v28695_v0 }
 0xcd4   :  { %21971 = vmatmul.mubr.f32.vlgmr.msra.gmra.mrb[30].mxu1 %v29065_v33 }
 0xcd5   :  { %23397 = vmatprep.mubr.f32.mxu1 %v28695_v0 }
 0xd60   :  { %v20577_v30 = vpop.f32.mrb[28].mxu0 }
 0xd61   :  { %v20579_v53 = vpop.f32.mrb[29].mxu0  ;;  %v21977_v54 = vmul.f32 %v20577_v30, %v32956_v24  ;;  %v28635_v24 = vld [vmem:[#allocation5 + $0xe8] sm:$0xff] }
 0xd62   :  { %v21978_v27 = vmul.f32 %v20579_v53, %v32844_v10 }
 0xd7b   :  { %v21042_v63 = vpop.f32.mrb[28].mxu1 }
 0xd7c   :  { %v21044_v3 = vpop.f32.mrb[29].mxu1  ;;  %v21979_v1 = vmul.f32 %v21042_v63, %v33015_v9 }
 0xd8c   :  { %v21507_v2 = vpop.f32.mrb[30].mxu0 }
 0xd8d   :  { %v21981_v43 = vmul.f32 %v21507_v2, %v32893_v57  ;;  %v21509_v58 = vpop.f32.mrb[31].mxu0  ;;  %v21980_v2 = vmul.f32 %v21044_v3, %v32875_v62 }
 0xd8e   :  { %v21982_v50 = vmul.f32 %v21509_v58, %v32809_v15 }
 0xd8f   :  { %v21985_v8 = vsub.f32 %v21977_v54, %v21981_v43 }
 0xd90   :  { %v21986_v52 = vsub.f32 %v21978_v27, %v21982_v50 }
 0xd91   :  { %v21989_v29 = vmul.f32 0.125, %v21985_v8 }
 0xd92   :  { %v21990_v25 = vmul.f32 0.125, %v21986_v52 }
 0xd93   :  { %v21993_v61 = vadd.f32 %v21989_v29, %v29255_v49 }
 0xd94   :  { %v21994_v44 = vadd.f32 %v21990_v25, %v29255_v49 }
 0xd95   :  { %v21997_v18 = vmul.f32 0.01, %v21993_v61 }
 0xd96   :  { %v21998_v35 = vmul.f32 0.01, %v21994_v44 }
 0xd97   :  { %v22001_v7 = vadd.f32 %v28634_v26, %v21997_v18 }
 0xd98   :  { %v22002_v11 = vadd.f32 %v28635_v24, %v21998_v35 }
 0xd99   :  { %v22005_v57 = vmul.f32 0.15915494, %v22001_v7 }
 0xd9a   :  { %v22006_v6 = vmul.f32 0.15915494, %v22002_v11 }
 0xd9b   :  { %vm22009_vm14 = vcmp.lt.f32.partialorder %v22005_v57, 0.0  ;;  %v22013_v10 = vceil.f32 %v22005_v57  ;;  %v22017_v41 = vfloor.f32 %v22005_v57 }
 0xd9c   :  { %vm22010_vm11 = vcmp.lt.f32.partialorder %v22006_v6, 0.0  ;;  %v22014_v15 = vceil.f32 %v22006_v6  ;;  %v22018_v16 = vfloor.f32 %v22006_v6 }
 0xd9d   :  { %v22021_v23 = vsel %vm22009_vm14, %v22013_v10, %v22017_v41 }
 0xd9e   :  { %v22025_v12 = vmul.f32 6.2831855, %v22021_v23  ;;  %v22022_v45 = vsel %vm22010_vm11, %v22014_v15, %v22018_v16  ;;  %v28636_v23 = vld [vmem:[#allocation5 + $0xf0] sm:$0xff] }
 0xd9f   :  { %v22026_v60 = vmul.f32 6.2831855, %v22022_v45 }
 0xda0   :  { %v33059_v39 = vsub.f32 %v22001_v7, %v22025_v12 }
 0xda1   :  { %v33061_v42 = vsub.f32 %v22002_v11, %v22026_v60 }
 0xda2   :  { %22034 = vst [vmem:[#allocation5 + $0x100] sm:$0xff] %v33059_v39  ;;  %v22041_v19 = vand.u32 2139095040, %v33059_v39  ;;  %v22038_v53 = vand.u32 2147483647, %v33059_v39 }
 0xda3   :  { %22035 = vst [vmem:[#allocation5 + $0x108] sm:$0xff] %v33061_v42  ;;  %v22144_v20 = vand.u32 2139095040, %v33061_v42  ;;  %v22141_v47 = vand.u32 2147483647, %v33061_v42 }
 0xda4   :  { %v22042_v5 = vshrl.u32 %v22041_v19, 23  ;;  %v28637_v19 = vld [vmem:[#allocation5 + $0xf8] sm:$0xff] }
 0xda5   :  { %v22145_v22 = vshrl.u32 %v22144_v20, 23  ;;  %v22148_v56 = vand.u32 8388607, %v22141_v47 }
 0xda6   :  { %v27809_v37 = vadd.s32 4294967169, %v22042_v5 }
 0xda7   :  { %v27813_v51 = vadd.s32 4294967169, %v22145_v22  ;;  %v21972_v55 = vpop.f32.mrb[30].mxu1  ;;  %v22149_v30 = vor.u32 8388608, %v22148_v56 }
 0xda8   :  { %v22048_v31 = vadd.s32 1, %v27809_v37  ;;  %v21983_v46 = vmul.f32 %v21972_v55, %v32960_v4  ;;  %v21974_v17 = vpop.f32.mrb[31].mxu1  ;;  %v33079_v4 = vand.u32 8388607, %v22038_v53 }
 0xda9   :  { %v22151_v21 = vadd.s32 1, %v27813_v51  ;;  %v21984_v54 = vmul.f32 %v21974_v17, %v32870_v14  ;;  %v33075_v52 = vshll.u32 %v22149_v30, 8 }
 0xdaa   :  { %vm22049_vm2 = vcmp.gt.s32.totalorder %v22048_v31, 0  ;;  %v21987_v43 = vsub.f32 %v21979_v1, %v21983_v46 }
 0xdab   :  { %vm22152_vm1 = vcmp.gt.s32.totalorder %v22151_v21, 0  ;;  %v21988_v50 = vsub.f32 %v21980_v2, %v21984_v54  ;;  %v33081_v9 = vsel %vm22049_vm2, %v22048_v31, 0 }
 0xdac   :  { %v22153_v58 = vsel %vm22152_vm1, %v22151_v21, 0  ;;  %v21991_v8 = vmul.f32 0.125, %v21987_v43  ;;  %v33096_v16 = vand.u32 31, %v33081_v9 }
 0xdad   :  { %v22155_v27 = vand.u32 31, %v22153_v58  ;;  %v22154_v63 = vshrl.u32 %v22153_v58, 5  ;;  %v21992_v29 = vmul.f32 0.125, %v21988_v50 }
 0xdae   :  { %v21995_v3 = vadd.f32 %v21991_v8, %v29255_v49 }
 0xdaf   :  { %v22156_v62 = vsub.s32 32, %v22155_v27  ;;  %v22158_v14 = vshll.u32 %v28696_v32, %v22155_v27  ;;  %v22161_v25 = vshll.u32 %v28697_v34, %v22155_v27  ;;  %v22164_v61 = vshll.u32 %v28698_v36, %v22155_v27 }
 0xdb0   :  { %v21996_v44 = vadd.f32 %v21992_v29, %v29255_v49  ;;  %v22167_v26 = vshll.u32 %v28699_v38, %v22155_v27  ;;  %v21999_v7 = vmul.f32 0.01, %v21995_v3  ;;  %v22170_v15 = vshll.u32 %v28700_v40, %v22155_v27 }
 0xdb1   :  { %v22159_v18 = vshrl.u32 %v28697_v34, %v22156_v62  ;;  %v22162_v35 = vshrl.u32 %v28698_v36, %v22156_v62  ;;  %v22165_v24 = vshrl.u32 %v28699_v38, %v22156_v62  ;;  %v22168_v11 = vshrl.u32 %v28700_v40, %v22156_v62 }
 0xdb2   :  { %v22171_v57 = vshrl.u32 %v28701_v48, %v22156_v62  ;;  %v22000_v6 = vmul.f32 0.01, %v21996_v44  ;;  %v22003_v12 = vadd.f32 %v28636_v23, %v21999_v7  ;;  %v22157_v5 = vshrl.u32 %v28696_v32, %v22156_v62 }
 0xdb3   :  { %v22160_v10 = vor.u32 %v22159_v18, %v22158_v14  ;;  %v22163_v41 = vor.u32 %v22162_v35, %v22161_v25  ;;  %v22166_v45 = vor.u32 %v22165_v24, %v22164_v61  ;;  %v22169_v60 = vor.u32 %v22168_v11, %v22167_v26 }
 0xdb4   :  { %v22004_v20 = vadd.f32 %v28637_v19, %v22000_v6  ;;  %v22172_v22 = vor.u32 %v22171_v57, %v22170_v15  ;;  %vm22173_vm3 = vcmp.lt.s32.totalorder %v22154_v63, 1  ;;  %v22007_v37 = vmul.f32 0.15915494, %v22003_v12 }
 0xdb5   :  { %vm22174_vm4 = vcmp.lt.s32.totalorder %v22154_v63, 2  ;;  %vm22175_vm5 = vcmp.lt.s32.totalorder %v22154_v63, 3  ;;  %vm22176_vm6 = vcmp.lt.s32.totalorder %v22154_v63, 4  ;;  %v22181_v31 = vsel %vm22173_vm3, %v22160_v10, %v22163_v41 }
 0xdb6   :  { %v22008_v56 = vmul.f32 0.15915494, %v22004_v20  ;;  %v22178_v51 = vsel %vm22176_vm6, %v22166_v45, 2102212464  ;;  %v22182_v55 = vsel %vm22176_vm6, %v22169_v60, 920167782  ;;  %v22015_v21 = vceil.f32 %v22007_v37 }
 0xdb7   :  { %vm22011_vm7 = vcmp.lt.f32.partialorder %v22007_v37, 0.0  ;;  %v22019_v1 = vfloor.f32 %v22007_v37  ;;  %v22185_v46 = vsel %vm22173_vm3, %v22163_v41, %v22166_v45  ;;  %v22183_v2 = vsel %vm22175_vm5, %v22166_v45, %v22182_v55 }
 0xdb8   :  { %vm22012_vm12 = vcmp.lt.f32.partialorder %v22008_v56, 0.0  ;;  %v22016_v17 = vceil.f32 %v22008_v56  ;;  %v22020_v30 = vfloor.f32 %v22008_v56  ;;  %v22177_v43 = vsel %vm22173_vm3, %v22157_v5, %v22160_v10 }
 0xdb9   :  { %v22023_v54 = vsel %vm22011_vm7, %v22015_v21, %v22019_v1  ;;  %v22184_v58 = vsel %vm22174_vm4, %v22181_v31, %v22183_v2  ;;  %v22186_v27 = vsel %vm22176_vm6, %v22172_v22, 1326507024  ;;  %v22179_v29 = vsel %vm22175_vm5, %v22163_v41, %v22178_v51 }
 0xdba   :  { %v22027_v50 = vmul.f32 6.2831855, %v22023_v54  ;;  %v22024_v8 = vsel %vm22012_vm12, %v22016_v17, %v22020_v30  ;;  %v22187_v62 = vsel %vm22175_vm5, %v22169_v60, %v22186_v27  ;;  %v22180_v7 = vsel %vm22174_vm4, %v22177_v43, %v22179_v29 }
 0xdbb   :  { %v22028_v3 = vmul.f32 6.2831855, %v22024_v8  ;;  %v22188_v14 = vsel %vm22174_vm4, %v22185_v46, %v22187_v62  ;;  %v33111_v25 = vmul.u32.u64.low %v33075_v52, %v22184_v58  ;;  %v33112_v61 = vmul.u32.u64.high %v33075_v52, %v22184_v58, %v33111_v25 }
 0xdbc   :  { %v33114_v44 = vsub.f32 %v22003_v12, %v22027_v50  ;;  %v33117_v18 = vmul.u32.u64.low %v33075_v52, %v22188_v14  ;;  %v33118_v35 = vmul.u32.u64.high %v33075_v52, %v22188_v14, %v33117_v18  ;;  %v22046_v11 = vor.u32 8388608, %v33079_v4 }
 0xdbd   :  { %v33120_v26 = vsub.f32 %v22004_v20, %v22028_v3  ;;  %v22199_v6 = vadd.s32 1, %v33112_v61  ;;  %v22053_v41 = vsub.s32 32, %v33096_v16  ;;  %v22196_v63 = vmul.u32 %v33075_v52, %v22180_v7 }
 0xdbe   :  { %22036 = vst [vmem:[#allocation5 + $0x110] sm:$0xff] %v33114_v44  ;;  %v22247_v24 = vand.u32 2139095040, %v33114_v44  ;;  %vm22198_vm15 = vc.u32 %v33118_v35, %v33111_v25  ;;  %v33136_v19 = vshll.u32 %v22046_v11, 8  ;;  %v33139_v20 = vshrl.u32 %v33081_v9, 5 }
 0xdbf   :  { %22037 = vst [vmem:[#allocation5 + $0x118] sm:$0xff] %v33120_v26  ;;  %v22350_v57 = vand.u32 2139095040, %v33120_v26  ;;  %v22347_v10 = vand.u32 2147483647, %v33120_v26  ;;  %v22200_v12 = vsel %vm22198_vm15, %v22199_v6, %v33112_v61  ;;  %v22056_v22 = vshrl.u32 %v28697_v34, %v22053_v41 }
 0xdc0   :  { %v22248_v15 = vshrl.u32 %v22247_v24, 23  ;;  %v22201_v4 = vadd.s32 %v22200_v12, %v22196_v63  ;;  %v22062_v52 = vshrl.u32 %v28699_v38, %v22053_v41  ;;  %v22055_v51 = vshll.u32 %v28696_v32, %v33096_v16 }
 0xdc1   :  { %v22351_v23 = vshrl.u32 %v22350_v57, 23  ;;  %v22354_v60 = vand.u32 8388607, %v22347_v10  ;;  %v22058_v31 = vshll.u32 %v28697_v34, %v33096_v16  ;;  %v22059_v21 = vshrl.u32 %v28698_v36, %v22053_v41 }
 0xdc2   :  { %v27817_v45 = vadd.s32 4294967169, %v22248_v15  ;;  %v22202_v56 = vadd.s32 536870912, %v22201_v4  ;;  %v22061_v9 = vshll.u32 %v28698_v36, %v33096_v16  ;;  %v22065_v1 = vshrl.u32 %v28700_v40, %v22053_v41 }
 0xdc3   :  { %v27821_v5 = vadd.s32 4294967169, %v22351_v23  ;;  %v22355_v17 = vor.u32 8388608, %v22354_v60  ;;  %v22054_v30 = vshrl.u32 %v28696_v32, %v22053_v41  ;;  %v33155_v2 = vshrl.u32 %v28701_v48, %v22053_v41 }
 0xdc4   :  { %v22254_v37 = vadd.s32 1, %v27817_v45  ;;  %v33151_v46 = vshrl.u32 %v22202_v56, 30  ;;  %v22057_v54 = vor.u32 %v22056_v22, %v22055_v51  ;;  %v33157_v43 = vor.u32 %v22062_v52, %v22061_v9 }
 0xdc5   :  { %v22357_v55 = vadd.s32 1, %v27821_v5  ;;  %v22064_v58 = vshll.u32 %v28699_v38, %v33096_v16  ;;  %v33164_v8 = vshll.u32 %v28700_v40, %v33096_v16  ;;  %v22197_v62 = vadd.s32 %v33111_v25, %v33118_v35 }
 0xdc6   :  { %vm22255_vm8 = vcmp.gt.s32.totalorder %v22254_v37, 0  ;;  %v22204_v50 = vshll.u32 %v33151_v46, 30  ;;  %v33167_v3 = vor.u32 %v22059_v21, %v22058_v31  ;;  %v33173_v18 = vshll.u32 %v22355_v17, 8 }
 0xdc7   :  { %vm22358_vm10 = vcmp.gt.s32.totalorder %v22357_v55, 0  ;;  %v33169_v14 = vor.u32 %v22065_v1, %v22064_v58  ;;  %v22069_v7 = vor.u32 %v33155_v2, %v33164_v8  ;;  %vm22070_vm9 = vcmp.lt.s32.totalorder %v33139_v20, 1 }
 0xdc8   :  { %v22359_v27 = vsel %vm22358_vm10, %v22357_v55, 0  ;;  %v33171_v61 = vsub.s32 %v22201_v4, %v22204_v50  ;;  %v33178_v24 = vsel %vm22255_vm8, %v22254_v37, 0  ;;  %vm22073_vm13 = vcmp.lt.s32.totalorder %v33139_v20, 4 }
 0xdc9   :  { %v22361_v29 = vand.u32 31, %v22359_v27  ;;  %v33183_v25 = vsel %vm22070_vm9, %v22054_v30, %v22057_v54  ;;  %v22360_v35 = vshrl.u32 %v22359_v27, 5  ;;  %v22075_v6 = vsel %vm22073_vm13, %v33157_v43, 2102212464 }
 0xdca   :  { %v22207_v11 = vsub.s32 0, %v33171_v61  ;;  %vm22072_vm0 = vcmp.lt.s32.totalorder %v33139_v20, 3  ;;  %v22227_v5 = vsub.s32 4, %v33151_v46  ;;  %v22078_v52 = vsel %vm22070_vm9, %v22057_v54, %v33167_v3 }
 0xdcb   :  { %v22362_v16 = vsub.s32 32, %v22361_v29  ;;  %v22364_v57 = vshll.u32 %v28696_v32, %v22361_v29  ;;  %v22367_v15 = vshll.u32 %v28697_v34, %v22361_v29  ;;  %v22370_v23 = vshll.u32 %v28698_v36, %v22361_v29 }
 0xdcc   :  { %v27814_v12 = vmin.u32 %v22207_v11, %v33171_v61  ;;  %v22373_v4 = vshll.u32 %v28699_v38, %v22361_v29  ;;  %v22079_v37 = vsel %vm22073_vm13, %v33169_v14, 920167782  ;;  %vm22071_vm14 = vcmp.lt.s32.totalorder %v33139_v20, 2 }
 0xdcd   :  { %v22365_v41 = vshrl.u32 %v28697_v34, %v22362_v16  ;;  %v22368_v63 = vshrl.u32 %v28698_v36, %v22362_v16  ;;  %v22371_v45 = vshrl.u32 %v28699_v38, %v22362_v16  ;;  %v22374_v60 = vshrl.u32 %v28700_v40, %v22362_v16 }
 0xdce   :  { %v22209_v56 = vclz %v27814_v12  ;;  %v22363_v21 = vshrl.u32 %v28696_v32, %v22362_v16  ;;  %v22376_v9 = vshll.u32 %v28700_v40, %v22361_v29  ;;  %v22377_v1 = vshrl.u32 %v28701_v48, %v22362_v16 }
 0xdcf   :  { %v22366_v22 = vor.u32 %v22365_v41, %v22364_v57  ;;  %v22369_v51 = vor.u32 %v22368_v63, %v22367_v15  ;;  %v22372_v31 = vor.u32 %v22371_v45, %v22370_v23  ;;  %v22375_v55 = vor.u32 %v22374_v60, %v22373_v4 }
 0xdd0   :  { %vm22379_vm11 = vcmp.lt.s32.totalorder %v22360_v35, 1  ;;  %v27815_v17 = vadd.s32 4294967294, %v22209_v56  ;;  %vm22380_vm1 = vcmp.lt.s32.totalorder %v22360_v35, 2  ;;  %vm22382_vm2 = vcmp.lt.s32.totalorder %v22360_v35, 4 }
 0xdd1   :  { %v22387_v30 = vsel %vm22379_vm11, %v22366_v22, %v22369_v51  ;;  %v22378_v54 = vor.u32 %v22377_v1, %v22376_v9  ;;  %vm22381_vm3 = vcmp.lt.s32.totalorder %v22360_v35, 3  ;;  %v22384_v58 = vsel %vm22382_vm2, %v22372_v31, 2102212464 }
 0xdd2   :  { %v22388_v27 = vsel %vm22382_vm2, %v22375_v55, 920167782  ;;  %vm27816_vm4 = vcmp.lt.s32.totalorder %v27815_v17, 0  ;;  %v22383_v50 = vsel %vm22379_vm11, %v22363_v21, %v22366_v22  ;;  %v22391_v57 = vsel %vm22379_vm11, %v22369_v51, %v22372_v31 }
 0xdd3   :  { %v22389_v11 = vsel %vm22381_vm3, %v22372_v31, %v22388_v27  ;;  %vm22143_vm5 = vcmp.lt.s32.totalorder %v33061_v42, 0  ;;  %v22212_v41 = vsel %vm27816_vm4, 0, %v27815_v17  ;;  %v22385_v15 = vsel %vm22381_vm3, %v22369_v51, %v22384_v58 }
 0xdd4   :  { %v22390_v29 = vsel %vm22380_vm1, %v22387_v30, %v22389_v11  ;;  %v22392_v16 = vsel %vm22382_vm2, %v22378_v54, 1326507024  ;;  %v22213_v63 = vsub.s32 32, %v22212_v41  ;;  %v22217_v23 = vsub.s32 4294967266, %v22212_v41 }
 0xdd5   :  { %v22393_v12 = vsel %vm22381_vm3, %v22375_v55, %v22392_v16  ;;  %v22080_v45 = vsel %vm22072_vm0, %v33157_v43, %v22079_v37  ;;  %v22214_v4 = vshll.u32 %v33171_v61, %v22212_v41  ;;  %v22386_v55 = vsel %vm22380_vm1, %v22383_v50, %v22385_v15 }
 0xdd6   :  { %v22394_v60 = vsel %vm22380_vm1, %v22391_v57, %v22393_v12  ;;  %v33218_v22 = vmul.u32.u64.low %v33173_v18, %v22390_v29  ;;  %v33219_v56 = vmul.u32.u64.high %v33173_v18, %v22390_v29, %v33218_v22  ;;  %v22215_v51 = vshrl.u32 %v22197_v62, %v22213_v63 }
 0xdd7   :  { %v22218_v31 = vadd.s32 127, %v22217_v23  ;;  %v33223_v21 = vmul.u32.u64.low %v33173_v18, %v22394_v60  ;;  %v33224_v9 = vmul.u32.u64.high %v33173_v18, %v22394_v60, %v33223_v21  ;;  %v22081_v37 = vsel %vm22071_vm14, %v22078_v52, %v22080_v45 }
 0xdd8   :  { %v22082_v61 = vsel %vm22070_vm9, %v33167_v3, %v33157_v43  ;;  %v22083_v62 = vsel %vm22073_vm13, %v22069_v7, 1326507024  ;;  %v22216_v1 = vor.u32 %v22215_v51, %v22214_v4  ;;  %v22076_v35 = vsel %vm22072_vm0, %v33167_v3, %v22075_v6 }
 0xdd9   :  { %v22219_v17 = vshll.u32 %v22218_v31, 23  ;;  %v22084_v52 = vsel %vm22072_vm0, %v33169_v14, %v22083_v62  ;;  %v22405_v30 = vadd.s32 1, %v33219_v56  ;;  %v22258_v7 = vand.u32 31, %v33178_v24 }
 0xdda   :  { %v22085_v43 = vsel %vm22071_vm14, %v22082_v61, %v22084_v52  ;;  %v33248_v2 = vmul.u32.u64.low %v33136_v19, %v22081_v37  ;;  %v33249_v8 = vmul.u32.u64.high %v33136_v19, %v22081_v37, %v33248_v2  ;;  %v22402_v58 = vmul.u32 %v33173_v18, %v22386_v55 }
 0xddb   :  { %v22220_v54 = vor.u32 4788187, %v22219_v17  ;;  %vm22404_vm6 = vc.u32 %v33224_v9, %v33218_v22  ;;  %v22077_v14 = vsel %vm22071_vm14, %v33183_v25, %v22076_v35  ;;  %v22223_v11 = vcvt.s32.f32 %v22216_v1 }
 0xddc   :  { %v22406_v3 = vsel %vm22404_vm6, %v22405_v30, %v33219_v56  ;;  %v33260_v6 = vmul.u32.u64.low %v33136_v19, %v22085_v43  ;;  %v33261_v27 = vmul.u32.u64.high %v33136_v19, %v22085_v43, %v33260_v6  ;;  %v22228_v18 = vsel %vm22143_vm5, %v22227_v5, %v33151_v46 }
 0xddd   :  { %v22221_v50 = vand.u32 2147483647, %v22220_v54  ;;  %v22407_v57 = vadd.s32 %v22406_v3, %v22402_v58  ;;  %v22096_v41 = vadd.s32 1, %v33249_v8  ;;  %vm22142_vm7 = vcmp.le.f32.partialorder %v22141_v47, 0.7853982 }
 0xdde   :  { %v33271_v15 = vsel %vm22142_vm7, 0, %v22228_v18  ;;  %v22093_v29 = vmul.u32 %v33136_v19, %v22077_v14  ;;  %vm22095_vm12 = vc.u32 %v33261_v27, %v33248_v2  ;;  %v22259_v46 = vsub.s32 32, %v22258_v7 }
 0xddf   :  { %v22224_v20 = vmul.f32 %v22223_v11, %v22221_v50  ;;  %v22408_v25 = vadd.s32 536870912, %v22407_v57  ;;  %v22097_v23 = vsel %vm22095_vm12, %v22096_v41, %v33249_v8  ;;  %v22244_v45 = vand.u32 2147483647, %v33114_v44 }
 0xde0   :  { %v22098_v5 = vadd.s32 %v22097_v23, %v22093_v29  ;;  %v33283_v4 = vshrl.u32 %v33178_v24, 5  ;;  %v33287_v60 = vand.u32 3, %v33271_v15  ;;  %v22262_v31 = vshrl.u32 %v28697_v34, %v22259_v46 }
 0xde1   :  { %v22225_v16 = vxor.u32 2147483648, %v22224_v20  ;;  %v33275_v63 = vshrl.u32 %v22408_v25, 30  ;;  %v22271_v21 = vshrl.u32 %v28700_v40, %v22259_v46  ;;  %v22265_v37 = vshrl.u32 %v28698_v36, %v22259_v46 }
 0xde2   :  { %v22099_v56 = vadd.s32 536870912, %v22098_v5  ;;  %v22268_v24 = vshrl.u32 %v28699_v38, %v22259_v46  ;;  %v22251_v62 = vand.u32 8388607, %v22244_v45  ;;  %v22270_v1 = vshll.u32 %v28699_v38, %v22258_v7 }
 0xde3   :  { %v22226_v12 = vsel %vm22143_vm5, %v22225_v16, %v22224_v20  ;;  %v22410_v47 = vshll.u32 %v33275_v63, 30  ;;  %v22274_v17 = vshrl.u32 %v28701_v48, %v22259_v46  ;;  %v22261_v52 = vshll.u32 %v28696_v32, %v22258_v7 }
 0xde4   :  { %v22229_v19 = vsel %vm22142_vm7, %v33061_v42, %v22226_v12  ;;  %v33293_v55 = vshrl.u32 %v22099_v56, 30  ;;  %v22264_v30 = vshll.u32 %v28697_v34, %v22258_v7  ;;  %v22267_v43 = vshll.u32 %v28698_v36, %v22258_v7 }
 0xde5   :  { %28574 = vcosq.f32 %v22229_v19  ;;  %v33289_v51 = vsub.s32 %v22407_v57, %v22410_v47  ;;  %vm22239_vm15 = vcmp.eq.s32.totalorder %v33287_v60, 2  ;;  %v22403_v8 = vadd.s32 %v33218_v22, %v33224_v9 }
 0xde6   :  { %28576 = vsinq.f32 %v22229_v19  ;;  %v22101_v35 = vshll.u32 %v33293_v55, 30  ;;  %v22272_v58 = vor.u32 %v22271_v21, %v22270_v1  ;;  %v22273_v3 = vshll.u32 %v28700_v40, %v22258_v7 }
 0xde7   :  { %v22413_v61 = vsub.s32 0, %v33289_v51  ;;  %vm22236_vm10 = vcmp.eq.s32.totalorder %v33287_v60, 0  ;;  %v22263_v6 = vor.u32 %v22262_v31, %v22261_v52  ;;  %v22266_v50 = vor.u32 %v22265_v37, %v22264_v30 }
 0xde8   :  { %v33312_v14 = vsub.s32 %v22098_v5, %v22101_v35  ;;  %v22269_v11 = vor.u32 %v22268_v24, %v22267_v43  ;;  %vm22235_vm8 = vcmp.lt.s32.totalorder %v33287_v60, 2  ;;  %v22094_v57 = vadd.s32 %v33248_v2, %v33261_v27 }
 0xde9   :  { %v27822_v54 = vmin.u32 %v22413_v61, %v33289_v51  ;;  %v22252_v41 = vor.u32 8388608, %v22251_v62  ;;  %v22275_v20 = vor.u32 %v22274_v17, %v22273_v3  ;;  %vm22233_vm9 = vweird.f32 %v33061_v42 }
 0xdea   :  { %v22104_v22 = vsub.s32 0, %v33312_v14  ;;  %v22260_v9 = vshrl.u32 %v28696_v32, %v22259_v46  ;;  %vm22276_vm13 = vcmp.lt.s32.totalorder %v33283_v4, 1  ;;  %vm22279_vm0 = vcmp.lt.s32.totalorder %v33283_v4, 4 }
 0xdeb   :  { %v22415_v18 = vclz %v27822_v54  ;;  %vm22277_vm14 = vcmp.lt.s32.totalorder %v33283_v4, 2  ;;  %vm22278_vm11 = vcmp.lt.s32.totalorder %v33283_v4, 3  ;;  %v22285_v25 = vsel %vm22279_vm0, %v22272_v58, 920167782 }
 0xdec   :  { %v27810_v2 = vmin.u32 %v22104_v22, %v33312_v14  ;;  %v22280_v27 = vsel %vm22276_vm13, %v22260_v9, %v22263_v6  ;;  %v22281_v29 = vsel %vm22279_vm0, %v22269_v11, 2102212464  ;;  %v22284_v16 = vsel %vm22276_vm13, %v22263_v6, %v22266_v50 }
 0xded   :  { %v27823_v7 = vadd.s32 4294967294, %v22415_v18  ;;  %v22286_v46 = vsel %vm22278_vm11, %v22269_v11, %v22285_v25  ;;  %v22288_v5 = vsel %vm22276_vm13, %v22266_v50, %v22269_v11  ;;  %v22289_v12 = vsel %vm22279_vm0, %v22275_v20, 1326507024 }
 0xdee   :  { %v22106_v31 = vclz %v27810_v2  ;;  %v22292_v21 = vshll.u32 %v22252_v41, 8  ;;  %v22287_v62 = vsel %vm22277_vm14, %v22284_v16, %v22286_v46  ;;  %v22290_v52 = vsel %vm22278_vm11, %v22272_v58, %v22289_v12 }
 0xdef   :  { %v33324_v23 = vpop.eup %28574  ;;  %vm27824_vm1 = vcmp.lt.s32.totalorder %v27823_v7, 0  ;;  %v22291_v3 = vsel %vm22277_vm14, %v22288_v5, %v22290_v52  ;;  %v22282_v60 = vsel %vm22278_vm11, %v22266_v50, %v22281_v29  ;;  %v22433_v16 = vsub.s32 4, %v33275_v63 }
 0xdf0   :  { %v33328_v47 = vpop.eup %28576  ;;  %v22240_v19 = vxor.u32 2147483648, %v33324_v23  ;;  %v22418_v56 = vsel %vm27824_vm1, 0, %v27823_v7  ;;  %v27811_v35 = vadd.s32 4294967294, %v22106_v31  ;;  %v22647_v50 = vadd.s32 3, %v33271_v15 }
 0xdf1   :  { %v22237_v37 = vxor.u32 2147483648, %v33328_v47  ;;  %v22419_v24 = vsub.s32 32, %v22418_v56  ;;  %v22423_v61 = vsub.s32 4294967266, %v22418_v56  ;;  %v22420_v17 = vshll.u32 %v33289_v51, %v22418_v56 }
 0xdf2   :  { %v22241_v1 = vsel %vm22239_vm15, %v22240_v19, %v33328_v47  ;;  %vm27812_vm2 = vcmp.lt.s32.totalorder %v27811_v35, 0  ;;  %v33349_v11 = vmul.u32.u64.low %v22292_v21, %v22291_v3  ;;  %v33350_v18 = vmul.u32.u64.high %v22292_v21, %v22291_v3, %v33349_v11 }
 0xdf3   :  { %v22238_v30 = vsel %vm22236_vm10, %v33324_v23, %v22237_v37  ;;  %v22421_v43 = vshrl.u32 %v22403_v8, %v22419_v24  ;;  %v22424_v54 = vadd.s32 127, %v22423_v61  ;;  %v22109_v20 = vsel %vm27812_vm2, 0, %v27811_v35 }
 0xdf4   :  { %v22242_v6 = vsel %vm22235_vm8, %v22238_v30, %v22241_v1  ;;  %v22110_v22 = vsub.s32 32, %v22109_v20  ;;  %v22114_v9 = vsub.s32 4294967266, %v22109_v20  ;;  %v22111_v46 = vshll.u32 %v33312_v14, %v22109_v20 }
 0xdf5   :  { %v33354_v51 = vsel %vm22233_vm9, nan, %v22242_v6  ;;  %v22422_v58 = vor.u32 %v22421_v43, %v22420_v17  ;;  %v22425_v41 = vshll.u32 %v22424_v54, 23  ;;  %v22283_v24 = vsel %vm22277_vm14, %v22280_v27, %v22282_v60 }
 0xdf6   :  { %v33357_v8 = vand.u32 4294901760, %v33354_v51  ;;  %v33361_v25 = vmul.u32.u64.low %v22292_v21, %v22287_v62  ;;  %v33362_v2 = vmul.u32.u64.high %v22292_v21, %v22287_v62, %v33361_v25  ;;  %v22112_v5 = vshrl.u32 %v22094_v57, %v22110_v22 }
 0xdf7   :  { %v22426_v7 = vor.u32 4788187, %v22425_v41  ;;  %v22115_v12 = vadd.s32 127, %v22114_v9  ;;  %v22429_v31 = vcvt.s32.f32 %v22422_v58  ;;  %v22648_v17 = vand.u32 3, %v22647_v50 }
 0xdf8   :  { %22867 = vmatprep.subr.mxu0 %v33357_v8  ;;  %v22113_v29 = vor.u32 %v22112_v5, %v22111_v46  ;;  %vm22301_vm3 = vc.u32 %v33350_v18, %v33361_v25  ;;  %v22302_v1 = vadd.s32 1, %v33362_v2  ;;  %vm22349_vm4 = vcmp.lt.s32.totalorder %v33120_v26, 0 }
 0xdf9   :  { %v22427_v56 = vand.u32 2147483647, %v22426_v7  ;;  %v22116_v61 = vshll.u32 %v22115_v12, 23  ;;  %v22299_v57 = vmul.u32 %v22292_v21, %v22283_v24  ;;  %v22434_v52 = vsel %vm22349_vm4, %v22433_v16, %v33275_v63 }
 0xdfa   :  { %v22303_v4 = vsel %vm22301_vm3, %v22302_v1, %v33362_v2  ;;  %vm22650_vm5 = vcmp.eq.s32.totalorder %v22648_v17, 0  ;;  %v22120_v27 = vcvt.s32.f32 %v22113_v29  ;;  %vm22348_vm6 = vcmp.le.f32.partialorder %v22347_v10, 0.7853982 }
 0xdfb   :  { %v22430_v62 = vmul.f32 %v22429_v31, %v22427_v56  ;;  %v22117_v14 = vor.u32 4788187, %v22116_v61  ;;  %v22304_v30 = vadd.s32 %v22303_v4, %v22299_v57  ;;  %v22652_v43 = vsel %vm22650_vm5, %v33324_v23, %v22237_v37 }
 0xdfc   :  { %vm22649_vm7 = vcmp.lt.s32.totalorder %v22648_v17, 2  ;;  %vm22653_vm12 = vcmp.eq.s32.totalorder %v22648_v17, 2  ;;  %v22436_v11 = vsel %vm22348_vm6, 0, %v22434_v52  ;;  %v22124_v58 = vsub.s32 4, %v33293_v55 }
 0xdfd   :  { %v22431_v35 = vxor.u32 2147483648, %v22430_v62  ;;  %v22118_v15 = vand.u32 2147483647, %v22117_v14  ;;  %v22305_v6 = vadd.s32 536870912, %v22304_v30  ;;  %v22655_v63 = vsel %vm22653_vm12, %v22240_v19, %v33328_v47 }
 0xdfe   :  { %v22656_v41 = vsel %vm22649_vm7, %v22652_v43, %v22655_v63  ;;  %vm22040_vm15 = vcmp.lt.s32.totalorder %v33059_v39, 0  ;;  %vm22039_vm10 = vcmp.le.f32.partialorder %v22038_v53, 0.7853982  ;;  %v22855_v9 = vadd.s32 3, %v22436_v11 }
 0xdff   :  { %v22432_v54 = vsel %vm22349_vm4, %v22431_v35, %v22430_v62  ;;  %v22121_v21 = vmul.f32 %v22120_v27, %v22118_v15  ;;  %v33385_v20 = vshrl.u32 %v22305_v6, 30  ;;  %v33389_v10 = vsel %vm22233_vm9, nan, %v22656_v41 }
 0xe00   :  { %v22435_v3 = vsel %vm22348_vm6, %v33120_v26, %v22432_v54  ;;  %v22125_v19 = vsel %vm22040_vm15, %v22124_v58, %v33293_v55  ;;  %v22440_v7 = vand.u32 3, %v22436_v11  ;;  %v33401_v16 = vsub.f32 %v33354_v51, %v33357_v8 }
 0xe01   :  { %28578 = vcosq.f32 %v22435_v3  ;;  %v22122_v37 = vxor.u32 2147483648, %v22121_v21  ;;  %v22307_v47 = vshll.u32 %v33385_v20, 30  ;;  %v33397_v42 = vsel %vm22039_vm10, 0, %v22125_v19 }
 0xe02   :  { %28580 = vsinq.f32 %v22435_v3  ;;  %v22856_v53 = vand.u32 3, %v22855_v9  ;;  %vm22439_vm8 = vweird.f32 %v33120_v26  ;;  %v22131_v55 = vand.u32 3, %v33397_v42 }
 0xe03   :  { %v22123_v23 = vsel %vm22040_vm15, %v22122_v37, %v22121_v21  ;;  %v22308_v60 = vsub.s32 %v22304_v30, %v22307_v47  ;;  %vm22441_vm9 = vcmp.lt.s32.totalorder %v22440_v7, 2  ;;  %vm22442_vm13 = vcmp.eq.s32.totalorder %v22440_v7, 0 }
 0xe04   :  { %v22126_v22 = vsel %vm22039_vm10, %v33059_v39, %v22123_v23  ;;  %vm22445_vm0 = vcmp.eq.s32.totalorder %v22440_v7, 2  ;;  %v22946_v50 = vand.u32 4294901760, %v33401_v16  ;;  %vm22861_vm14 = vcmp.eq.s32.totalorder %v22856_v53, 2 }
 0xe05   :  { %28582 = vcosq.f32 %v22126_v22  ;;  %v22310_v2 = vsub.s32 0, %v22308_v60  ;;  %vm22858_vm11 = vcmp.eq.s32.totalorder %v22856_v53, 0  ;;  %vm22136_vm1 = vcmp.eq.s32.totalorder %v22131_v55, 2 }
 0xe06   :  { %28584 = vsinq.f32 %v22126_v22  ;;  %vm22857_vm2 = vcmp.lt.s32.totalorder %v22856_v53, 2  ;;  %v22300_v35 = vadd.s32 %v33361_v25, %v33350_v18  ;;  %v22947_v3 = vsub.f32 %v33401_v16, %v22946_v50 }
 0xe07   :  { %v27818_v46 = vmin.u32 %v22310_v2, %v22308_v60  ;;  %vm22133_vm4 = vcmp.eq.s32.totalorder %v22131_v55, 0  ;;  %vm22132_vm5 = vcmp.lt.s32.totalorder %v22131_v55, 2  ;;  %vm22130_vm6 = vweird.f32 %v33059_v39 }
 0xe08   :  { %v22948_v23 = vand.u32 4294901760, %v22947_v3  ;;  %vm22246_vm7 = vcmp.lt.s32.totalorder %v33114_v44, 0  ;;  %vm33451_vm12 = vcmp.le.f32.partialorder %v22244_v45, 0.7853982  ;;  %v22543_v45 = vadd.s32 3, %v33397_v42 }
 0xe09   :  { %v22312_v31 = vclz %v27818_v46 }
 0xe0b   :  { %v28579_v5 = vpop.eup %28578  ;;  %v27819_v61 = vadd.s32 4294967294, %v22312_v31 }
 0xe0c   :  { %v28581_v12 = vpop.eup %28580  ;;  %v22446_v56 = vxor.u32 2147483648, %v28579_v5 }
 0xe0d   :  { %v22443_v24 = vxor.u32 2147483648, %v28581_v12  ;;  %vm27820_vm3 = vcmp.lt.s32.totalorder %v27819_v61, 0 }
 0xe0e   :  { %v22447_v29 = vsel %vm22445_vm0, %v22446_v56, %v28581_v12  ;;  %v22863_v62 = vsel %vm22861_vm14, %v22446_v56, %v28581_v12  ;;  %v22315_v30 = vsel %vm27820_vm3, 0, %v27819_v61  ;;  %vm22336_vm14 = vweird.f32 %v33114_v44 }
 0xe0f   :  { %v22444_v1 = vsel %vm22442_vm13, %v28579_v5, %v22443_v24  ;;  %v22860_v17 = vsel %vm22858_vm11, %v28579_v5, %v22443_v24  ;;  %v33406_v14 = vpop.eup %28582  ;;  %v22316_v25 = vsub.s32 32, %v22315_v30  ;;  %v22320_v6 = vsub.s32 4294967266, %v22315_v30 }
 0xe10   :  { %v22448_v57 = vsel %vm22441_vm9, %v22444_v1, %v22447_v29  ;;  %v22864_v52 = vsel %vm22857_vm2, %v22860_v17, %v22863_v62  ;;  %v33411_v4 = vpop.eup %28584  ;;  %v22137_v27 = vxor.u32 2147483648, %v33406_v14  ;;  %v22317_v58 = vshll.u32 %v22308_v60, %v22315_v30 }
 0xe11   :  { %v33415_v15 = vsel %vm22439_vm8, nan, %v22448_v57  ;;  %v33420_v43 = vsel %vm22439_vm8, nan, %v22864_v52  ;;  %v22134_v18 = vxor.u32 2147483648, %v33411_v4  ;;  %v22318_v63 = vshrl.u32 %v22300_v35, %v22316_v25 }
 0xe12   :  { %v33423_v54 = vand.u32 4294901760, %v33415_v15  ;;  %v22138_v21 = vsel %vm22136_vm1, %v22137_v27, %v33411_v4  ;;  %v22321_v41 = vadd.s32 127, %v22320_v6  ;;  %v22330_v24 = vsub.s32 4, %v33385_v20 }
 0xe13   :  { %v22135_v26 = vsel %vm22133_vm4, %v33406_v14, %v22134_v18  ;;  %v22319_v19 = vor.u32 %v22318_v63, %v22317_v58  ;;  %v22544_v1 = vand.u32 3, %v22543_v45  ;;  %v24261_v56 = vand.u32 4294901760, %v33420_v43 }
 0xe14   :  { %23332 = vmatprep.subr.mxu1 %v33423_v54  ;;  %v22139_v11 = vsel %vm22132_vm5, %v22135_v26, %v22138_v21  ;;  %v22322_v22 = vshll.u32 %v22321_v41, 23  ;;  %v22331_v61 = vsel %vm22246_vm7, %v22330_v24, %v33385_v20  ;;  %v33467_v62 = vsub.f32 %v33415_v15, %v33423_v54 }
 0xe15   :  { %v33438_v37 = vsel %vm22130_vm6, nan, %v22139_v11  ;;  %v22326_v2 = vcvt.s32.f32 %v22319_v19  ;;  %v22333_v17 = vsel %vm33451_vm12, 0, %v22331_v61  ;;  %vm22546_vm15 = vcmp.eq.s32.totalorder %v22544_v1, 0 }
 0xe16   :  { %v33441_v47 = vand.u32 4294901760, %v33438_v37  ;;  %v22323_v7 = vor.u32 4788187, %v22322_v22  ;;  %v22337_v57 = vand.u32 3, %v22333_v17  ;;  %v23411_v35 = vand.u32 4294901760, %v33467_v62 }
 0xe17   :  { %vm22549_vm10 = vcmp.eq.s32.totalorder %v22544_v1, 2  ;;  %v22548_v20 = vsel %vm22546_vm15, %v33406_v14, %v22134_v18  ;;  %vm22545_vm8 = vcmp.lt.s32.totalorder %v22544_v1, 2  ;;  %v33497_v18 = vand.u32 4294901760, %v33389_v10 }
 0xe18   :  { %22869 = vmatpush1.msra.mxu0 %v33441_v47  ;;  %v22951_v9 = vsub.f32 %v33438_v37, %v33441_v47  ;;  %v22324_v60 = vand.u32 2147483647, %v22323_v7  ;;  %v22551_v42 = vsel %vm22549_vm10, %v22137_v27, %v33411_v4  ;;  %vm22342_vm9 = vcmp.eq.s32.totalorder %v22337_v57, 2 }
 0xe19   :  { %22938 = vmatmul.mubr.f32.vlgmr.msra.gmra.mrb[32].mxu0 %v29109_v28  ;;  %22949 = vmatprep.subr.mxu0 %v22948_v23  ;;  %vm22339_vm13 = vcmp.eq.s32.totalorder %v22337_v57, 0  ;;  %vm22338_vm0 = vcmp.lt.s32.totalorder %v22337_v57, 2  ;;  %v33520_v58 = vsub.f32 %v33389_v10, %v33497_v18 }
 0xe1a   :  { %v22952_v53 = vand.u32 4294901760, %v22951_v9  ;;  %23018 = vmatprep.mubr.f32.mxu0 %v28695_v0  ;;  %v22327_v46 = vmul.f32 %v22326_v2, %v22324_v60  ;;  %v22751_v60 = vadd.s32 3, %v22333_v17 }
 0xe1b   :  { %v23876_v19 = vand.u32 4294901760, %v33520_v58 }
 0xe1c   :  { %v22953_v5 = vsub.f32 %v22951_v9, %v22952_v53  ;;  %v22328_v55 = vxor.u32 2147483648, %v22327_v46 }
 0xe1d   :  { %v23877_v7 = vsub.f32 %v33520_v58, %v23876_v19 }
 0xe1e   :  { %v22954_v12 = vand.u32 4294901760, %v22953_v5  ;;  %v22329_v31 = vsel %vm22246_vm7, %v22328_v55, %v22327_v46 }
 0xe1f   :  { %v22332_v29 = vsel %vm33451_vm12, %v33114_v44, %v22329_v31  ;;  %v23878_v2 = vand.u32 4294901760, %v23877_v7 }
 0xe20   :  { %22955 = vmatpush1.msra.mxu0 %v22954_v12  ;;  %28586 = vcosq.f32 %v22332_v29 }
 0xe21   :  { %23020 = vmatmul.mubr.f32.vlgmr.msra.gmra.mrb[32].mxu0 %v29065_v33  ;;  %23028 = vmatprep.subr.mxu0 %v33401_v16  ;;  %28588 = vsinq.f32 %v22332_v29  ;;  %v23412_v16 = vsub.f32 %v33467_v62, %v23411_v35  ;;  %v24340_v29 = vsub.f32 %v33420_v43, %v24261_v56 }
 0xe22   :  { %23031 = vmatpush1.msra.mxu0 %v22951_v9  ;;  %23094 = vmatprep.mubr.f32.mxu0 %v28695_v0 }
 0xe23   :  { %23104 = vmatprep.subr.mxu0 %v33357_v8  ;;  %v23413_v26 = vand.u32 4294901760, %v23412_v16  ;;  %v24341_v44 = vand.u32 4294901760, %v24340_v29 }
 0xe25   :  { %v24342_v61 = vsub.f32 %v24340_v29, %v24341_v44 }
 0xe27   :  { %v24343_v1 = vand.u32 4294901760, %v24342_v61 }
 0xe29   :  { %23097 = vmatmul.mubr.f32.vlgmr.msra.gmra.mrb[32].mxu0 %v29077_v13 }
 0xe2a   :  { %23106 = vmatpush1.msra.mxu0 %v33441_v47  ;;  %23169 = vmatprep.mubr.f32.mxu0 %v28695_v0  ;;  %v33481_v52 = vpop.eup %28586 }
 0xe2b   :  { %23182 = vmatprep.subr.mxu0 %v22946_v50  ;;  %v33483_v30 = vpop.eup %28588  ;;  %v22343_v25 = vxor.u32 2147483648, %v33481_v52  ;;  %v22552_v50 = vsel %vm22545_vm8, %v22548_v20, %v22551_v42 }
 0xe2c   :  { %v22340_v3 = vxor.u32 2147483648, %v33483_v30  ;;  %v33501_v21 = vsel %vm22130_vm6, nan, %v22552_v50 }
 0xe2d   :  { %v22344_v14 = vsel %vm22342_vm9, %v22343_v25, %v33483_v30  ;;  %v33513_v11 = vand.u32 4294901760, %v33501_v21 }
 0xe2e   :  { %v22341_v4 = vsel %vm22339_vm13, %v33481_v52, %v22340_v3 }
 0xe2f   :  { %v22345_v27 = vsel %vm22338_vm0, %v22341_v4, %v22344_v14 }
 0xe30   :  { %v33505_v6 = vsel %vm22336_vm14, nan, %v22345_v27 }
 0xe31   :  { %23173 = vmatmul.mubr.f32.vlgmr.msra.gmra.mrb[32].mxu0 %v29086_v59  ;;  %v33509_v63 = vand.u32 4294901760, %v33505_v6 }
 0xe32   :  { %23186 = vmatpush1.msra.mxu0 %v22952_v53  ;;  %23249 = vmatprep.mubr.f32.mxu0 %v28695_v0  ;;  %v22752_v53 = vand.u32 3, %v22751_v60 }
 0xe33   :  { %23258 = vmatprep.subr.mxu0 %v33357_v8  ;;  %23334 = vmatpush1.msra.mxu1 %v33509_v63  ;;  %v23416_v39 = vsub.f32 %v33505_v6, %v33509_v63  ;;  %v33526_v8 = vsub.f32 %v33501_v21, %v33513_v11 }
 0xe34   :  { %23403 = vmatmul.mubr.f32.vlgmr.msra.gmra.mrb[32].mxu1 %v29109_v28  ;;  %23414 = vmatprep.subr.mxu1 %v23413_v26  ;;  %vm22754_vm11 = vcmp.eq.s32.totalorder %v22752_v53, 0  ;;  %vm22757_vm1 = vcmp.eq.s32.totalorder %v22752_v53, 2  ;;  %vm22753_vm2 = vcmp.lt.s32.totalorder %v22752_v53, 2 }
 0xe35   :  { %v23417_v41 = vand.u32 4294901760, %v23416_v39  ;;  %23483 = vmatprep.mubr.f32.mxu1 %v28695_v0  ;;  %v23882_v9 = vand.u32 4294901760, %v33526_v8  ;;  %v22756_v5 = vsel %vm22754_vm11, %v33481_v52, %v22340_v3  ;;  %v22759_v55 = vsel %vm22757_vm1, %v22343_v25, %v33483_v30 }
 0xe36   :  { %v22760_v12 = vsel %vm22753_vm2, %v22756_v5, %v22759_v55 }
 0xe37   :  { %v23418_v23 = vsub.f32 %v23416_v39, %v23417_v41  ;;  %v33560_v31 = vsel %vm22336_vm14, nan, %v22760_v12 }
 0xe38   :  { %v24263_v24 = vand.u32 4294901760, %v33560_v31 }
 0xe39   :  { %23251 = vmatmul.mubr.f32.vlgmr.msra.gmra.mrb[32].mxu0 %v29065_v33  ;;  %v23419_v22 = vand.u32 4294901760, %v23418_v23 }
 0xe3a   :  { %23260 = vmatpush1.msra.mxu0 %v33441_v47  ;;  %23323 = vmatprep.mubr.f32.mxu0 %v28695_v0  ;;  %v23883_v47 = vsub.f32 %v33526_v8, %v23882_v9  ;;  %v24346_v45 = vsub.f32 %v33560_v31, %v24263_v24 }
 0xe3b   :  { %23797 = vmatprep.subr.mxu0 %v33497_v18  ;;  %23420 = vmatpush1.msra.mxu1 %v23419_v22 }
 0xe3c   :  { %23485 = vmatmul.mubr.f32.vlgmr.msra.gmra.mrb[32].mxu1 %v29065_v33  ;;  %23493 = vmatprep.subr.mxu1 %v33467_v62  ;;  %v23884_v46 = vand.u32 4294901760, %v23883_v47 }
 0xe3d   :  { %23496 = vmatpush1.msra.mxu1 %v23416_v39  ;;  %23559 = vmatprep.mubr.f32.mxu1 %v28695_v0 }
 0xe3e   :  { %23569 = vmatprep.subr.mxu1 %v33423_v54 }
 0xe41   :  { %23325 = vmatmul.mubr.f32.vlgmr.msra.gmra.mrb[32].mxu0 %v29065_v33 }
 0xe42   :  { %23799 = vmatpush1.msra.mxu0 %v33513_v11  ;;  %23862 = vmatprep.mubr.f32.mxu0 %v28695_v0 }
 0xe43   :  { %23879 = vmatprep.subr.mxu0 %v23878_v2 }
 0xe44   :  { %23562 = vmatmul.mubr.f32.vlgmr.msra.gmra.mrb[32].mxu1 %v29077_v13 }
 0xe45   :  { %23868 = vmatmul.mubr.f32.vlgmr.msra.gmra.mrb[34].mxu0 %v29109_v28  ;;  %23571 = vmatpush1.msra.mxu1 %v33509_v63 }
 0xe46   :  { %23885 = vmatpush1.msra.mxu0 %v23884_v46  ;;  %23634 = vmatprep.mubr.f32.mxu1 %v28695_v0 }
 0xe47   :  { %23647 = vmatprep.subr.mxu1 %v23411_v35  ;;  %23958 = vmatprep.subr.mxu0 %v33520_v58  ;;  %v28638_v58 = vld [vmem:[#allocation5 + $0x100] sm:$0xff] }
 0xe48   :  { %23948 = vmatprep.mubr.f32.mxu0 %v28695_v0 }
 0xe4c   :  { %23638 = vmatmul.mubr.f32.vlgmr.msra.gmra.mrb[32].mxu1 %v29086_v59 }
 0xe4d   :  { %23950 = vmatmul.mubr.f32.vlgmr.msra.gmra.mrb[34].mxu0 %v29065_v33  ;;  %23651 = vmatpush1.msra.mxu1 %v23417_v41 }
 0xe4e   :  { %23961 = vmatpush1.msra.mxu0 %v33526_v8  ;;  %23714 = vmatprep.mubr.f32.mxu1 %v28695_v0 }
 0xe4f   :  { %23723 = vmatprep.subr.mxu1 %v33423_v54  ;;  %24034 = vmatprep.subr.mxu0 %v33497_v18  ;;  %v24347_v54 = vand.u32 4294901760, %v24346_v45 }
 0xe50   :  { %24024 = vmatprep.mubr.f32.mxu0 %v28695_v0 }
 0xe51   :  { %v24348_v62 = vsub.f32 %v24346_v45, %v24347_v54 }
 0xe53   :  { %v24349_v17 = vand.u32 4294901760, %v24348_v62 }
 0xe54   :  { %23716 = vmatmul.mubr.f32.vlgmr.msra.gmra.mrb[32].mxu1 %v29065_v33 }
 0xe55   :  { %24027 = vmatmul.mubr.f32.vlgmr.msra.gmra.mrb[34].mxu0 %v29077_v13  ;;  %23725 = vmatpush1.msra.mxu1 %v33509_v63 }
 0xe56   :  { %24036 = vmatpush1.msra.mxu0 %v33513_v11  ;;  %23788 = vmatprep.mubr.f32.mxu1 %v28695_v0 }
 0xe57   :  { %24262 = vmatprep.subr.mxu1 %v24261_v56  ;;  %24112 = vmatprep.subr.mxu0 %v23876_v19 }
 0xe58   :  { %24099 = vmatprep.mubr.f32.mxu0 %v28695_v0 }
 0xe5c   :  { %23790 = vmatmul.mubr.f32.vlgmr.msra.gmra.mrb[32].mxu1 %v29065_v33 }
 0xe5d   :  { %24103 = vmatmul.mubr.f32.vlgmr.msra.gmra.mrb[34].mxu0 %v29086_v59  ;;  %24264 = vmatpush1.msra.mxu1 %v24263_v24 }
 0xe5e   :  { %24116 = vmatpush1.msra.mxu0 %v23882_v9  ;;  %24327 = vmatprep.mubr.f32.mxu1 %v28695_v0 }
 0xe5f   :  { %24344 = vmatprep.subr.mxu1 %v24343_v1  ;;  %24188 = vmatprep.subr.mxu0 %v33497_v18 }
 0xe60   :  { %24179 = vmatprep.mubr.f32.mxu0 %v28695_v0  ;;  %24333 = vmatmul.mubr.f32.vlgmr.msra.gmra.mrb[34].mxu1 %v29109_v28 }
 0xe61   :  { %24350 = vmatpush1.msra.mxu1 %v24349_v17  ;;  %24413 = vmatprep.mubr.f32.mxu1 %v28695_v0 }
 0xe62   :  { %24423 = vmatprep.subr.mxu1 %v24340_v29 }
 0xe65   :  { %24181 = vmatmul.mubr.f32.vlgmr.msra.gmra.mrb[34].mxu0 %v29065_v33 }
 0xe66   :  { %24190 = vmatpush1.msra.mxu0 %v33513_v11  ;;  %24253 = vmatprep.mubr.f32.mxu0 %v28695_v0 }
 0xe68   :  { %24415 = vmatmul.mubr.f32.vlgmr.msra.gmra.mrb[34].mxu1 %v29065_v33 }
 0xe69   :  { %24426 = vmatpush1.msra.mxu1 %v24346_v45  ;;  %24489 = vmatprep.mubr.f32.mxu1 %v28695_v0 }
 0xe6a   :  { %24499 = vmatprep.subr.mxu1 %v24261_v56 }
 0xe6d   :  { %24255 = vmatmul.mubr.f32.vlgmr.msra.gmra.mrb[34].mxu0 %v29065_v33 }
 0xe6e   :  { %25681 = vmatprep.mubr.f32.mxu0 %v28695_v0 }
 0xe70   :  { %24492 = vmatmul.mubr.f32.vlgmr.msra.gmra.mrb[34].mxu1 %v29077_v13 }
 0xe71   :  { %24501 = vmatpush1.msra.mxu1 %v24263_v24  ;;  %24564 = vmatprep.mubr.f32.mxu1 %v28695_v0 }
 0xe72   :  { %24577 = vmatprep.subr.mxu1 %v24341_v44 }
 0xe78   :  { %24568 = vmatmul.mubr.f32.vlgmr.msra.gmra.mrb[34].mxu1 %v29086_v59 }
 0xe79   :  { %24581 = vmatpush1.msra.mxu1 %v24347_v54  ;;  %24644 = vmatprep.mubr.f32.mxu1 %v28695_v0 }
 0xe7a   :  { %24653 = vmatprep.subr.mxu1 %v24261_v56 }
 0xe80   :  { %24646 = vmatmul.mubr.f32.vlgmr.msra.gmra.mrb[34].mxu1 %v29065_v33 }
 0xe81   :  { %24655 = vmatpush1.msra.mxu1 %v24263_v24  ;;  %24718 = vmatprep.mubr.f32.mxu1 %v28695_v0 }
 0xe88   :  { %24720 = vmatmul.mubr.f32.vlgmr.msra.gmra.mrb[34].mxu1 %v29065_v33 }
 0xe89   :  { %26146 = vmatprep.mubr.f32.mxu1 %v28695_v0 }
 0xf14   :  { %v23326_v57 = vpop.f32.mrb[32].mxu0 }
 0xf15   :  { %v23328_v35 = vpop.f32.mrb[33].mxu0  ;;  %v24726_v30 = vmul.f32 %v23326_v57, %v33501_v21  ;;  %v28639_v21 = vld [vmem:[#allocation5 + $0x108] sm:$0xff] }
 0xf16   :  { %v24727_v16 = vmul.f32 %v23328_v35, %v33389_v10 }
 0xf2f   :  { %v23791_v20 = vpop.f32.mrb[32].mxu1 }
 0xf30   :  { %v23793_v42 = vpop.f32.mrb[33].mxu1  ;;  %v24728_v62 = vmul.f32 %v23791_v20, %v33560_v31 }
 0xf40   :  { %v24256_v52 = vpop.f32.mrb[34].mxu0 }
 0xf41   :  { %v24730_v25 = vmul.f32 %v24256_v52, %v33438_v37  ;;  %v24258_v3 = vpop.f32.mrb[35].mxu0  ;;  %v24729_v52 = vmul.f32 %v23793_v42, %v33420_v43 }
 0xf42   :  { %v24731_v50 = vmul.f32 %v24258_v3, %v33354_v51 }
 0xf43   :  { %v24734_v14 = vsub.f32 %v24726_v30, %v24730_v25 }
 0xf44   :  { %v24735_v4 = vsub.f32 %v24727_v16, %v24731_v50 }
 0xf45   :  { %v24738_v27 = vmul.f32 0.125, %v24734_v14 }
 0xf46   :  { %v24739_v18 = vmul.f32 0.125, %v24735_v4 }
 0xf47   :  { %v24742_v26 = vadd.f32 %v24738_v27, %v29255_v49 }
 0xf48   :  { %v24743_v63 = vadd.f32 %v24739_v18, %v29255_v49 }
 0xf49   :  { %v24746_v11 = vmul.f32 0.01, %v24742_v26 }
 0xf4a   :  { %v24747_v39 = vmul.f32 0.01, %v24743_v63 }
 0xf4b   :  { %v24750_v41 = vadd.f32 %v28638_v58, %v24746_v11 }
 0xf4c   :  { %v24751_v8 = vadd.f32 %v28639_v21, %v24747_v39 }
 0xf4d   :  { %v24754_v37 = vmul.f32 0.15915494, %v24750_v41 }
 0xf4e   :  { %v24755_v23 = vmul.f32 0.15915494, %v24751_v8 }
 0xf4f   :  { %vm24758_vm3 = vcmp.lt.f32.partialorder %v24754_v37, 0.0  ;;  %v24762_v10 = vceil.f32 %v24754_v37  ;;  %v24766_v19 = vfloor.f32 %v24754_v37 }
 0xf50   :  { %vm24759_vm4 = vcmp.lt.f32.partialorder %v24755_v23, 0.0  ;;  %v24763_v51 = vceil.f32 %v24755_v23  ;;  %v24767_v22 = vfloor.f32 %v24755_v23 }
 0xf51   :  { %v24770_v9 = vsel %vm24758_vm3, %v24762_v10, %v24766_v19 }
 0xf52   :  { %v24774_v7 = vmul.f32 6.2831855, %v24770_v9  ;;  %v24771_v60 = vsel %vm24759_vm4, %v24763_v51, %v24767_v22  ;;  %v28640_v9 = vld [vmem:[#allocation5 + $0x110] sm:$0xff] }
 0xf53   :  { %v24775_v47 = vmul.f32 6.2831855, %v24771_v60 }
 0xf54   :  { %v33604_v2 = vsub.f32 %v24750_v41, %v24774_v7 }
 0xf55   :  { %v33606_v53 = vsub.f32 %v24751_v8, %v24775_v47 }
 0xf56   :  { %24783 = vst [vmem:[#allocation5 + $0x120] sm:$0xff] %v33604_v2  ;;  %v24790_v46 = vand.u32 2139095040, %v33604_v2  ;;  %v24787_v35 = vand.u32 2147483647, %v33604_v2 }
 0xf57   :  { %24784 = vst [vmem:[#allocation5 + $0x128] sm:$0xff] %v33606_v53  ;;  %v24893_v5 = vand.u32 2139095040, %v33606_v53  ;;  %v24890_v55 = vand.u32 2147483647, %v33606_v53 }
 0xf58   :  { %v24791_v12 = vshrl.u32 %v24790_v46, 23  ;;  %v28641_v46 = vld [vmem:[#allocation5 + $0x118] sm:$0xff] }
 0xf59   :  { %v24894_v56 = vshrl.u32 %v24893_v5, 23  ;;  %v24897_v29 = vand.u32 8388607, %v24890_v55 }
 0xf5a   :  { %v27841_v24 = vadd.s32 4294967169, %v24791_v12 }
 0xf5b   :  { %v27845_v45 = vadd.s32 4294967169, %v24894_v56  ;;  %v24721_v54 = vpop.f32.mrb[34].mxu1  ;;  %v24898_v57 = vor.u32 8388608, %v24897_v29 }
 0xf5c   :  { %v24797_v44 = vadd.s32 1, %v27841_v24  ;;  %v24732_v1 = vmul.f32 %v24721_v54, %v33505_v6  ;;  %v24723_v17 = vpop.f32.mrb[35].mxu1  ;;  %v33624_v6 = vand.u32 8388607, %v24787_v35 }
 0xf5d   :  { %v24900_v61 = vadd.s32 1, %v27845_v45  ;;  %v24733_v30 = vmul.f32 %v24723_v17, %v33415_v15  ;;  %v33620_v4 = vshll.u32 %v24898_v57, 8 }
 0xf5e   :  { %vm24798_vm6 = vcmp.gt.s32.totalorder %v24797_v44, 0  ;;  %v24736_v25 = vsub.f32 %v24728_v62, %v24732_v1 }
 0xf5f   :  { %vm24901_vm5 = vcmp.gt.s32.totalorder %v24900_v61, 0  ;;  %v24737_v50 = vsub.f32 %v24729_v52, %v24733_v30  ;;  %v33626_v31 = vsel %vm24798_vm6, %v24797_v44, 0 }
 0xf60   :  { %v24902_v3 = vsel %vm24901_vm5, %v24900_v61, 0  ;;  %v24740_v14 = vmul.f32 0.125, %v24736_v25  ;;  %v33641_v22 = vand.u32 31, %v33626_v31 }
 0xf61   :  { %v24904_v16 = vand.u32 31, %v24902_v3  ;;  %v24903_v20 = vshrl.u32 %v24902_v3, 5  ;;  %v24741_v27 = vmul.f32 0.125, %v24737_v50 }
 0xf62   :  { %v24744_v42 = vadd.f32 %v24740_v14, %v29255_v49 }
 0xf63   :  { %v24905_v43 = vsub.s32 32, %v24904_v16  ;;  %v24907_v15 = vshll.u32 %v28696_v32, %v24904_v16  ;;  %v24910_v18 = vshll.u32 %v28697_v34, %v24904_v16  ;;  %v24913_v26 = vshll.u32 %v28698_v36, %v24904_v16 }
 0xf64   :  { %v24745_v63 = vadd.f32 %v24741_v27, %v29255_v49  ;;  %v24916_v58 = vshll.u32 %v28699_v38, %v24904_v16  ;;  %v24748_v41 = vmul.f32 0.01, %v24744_v42  ;;  %v24919_v51 = vshll.u32 %v28700_v40, %v24904_v16 }
 0xf65   :  { %v24908_v11 = vshrl.u32 %v28697_v34, %v24905_v43  ;;  %v24911_v39 = vshrl.u32 %v28698_v36, %v24905_v43  ;;  %v24914_v21 = vshrl.u32 %v28699_v38, %v24905_v43  ;;  %v24917_v8 = vshrl.u32 %v28700_v40, %v24905_v43 }
 0xf66   :  { %v24920_v37 = vshrl.u32 %v28701_v48, %v24905_v43  ;;  %v24749_v23 = vmul.f32 0.01, %v24745_v63  ;;  %v24752_v7 = vadd.f32 %v28640_v9, %v24748_v41  ;;  %v24906_v12 = vshrl.u32 %v28696_v32, %v24905_v43 }
 0xf67   :  { %v24909_v10 = vor.u32 %v24908_v11, %v24907_v15  ;;  %v24912_v19 = vor.u32 %v24911_v39, %v24910_v18  ;;  %v24915_v60 = vor.u32 %v24914_v21, %v24913_v26  ;;  %v24918_v47 = vor.u32 %v24917_v8, %v24916_v58 }
 0xf68   :  { %v24753_v5 = vadd.f32 %v28641_v46, %v24749_v23  ;;  %v24921_v56 = vor.u32 %v24920_v37, %v24919_v51  ;;  %vm24922_vm7 = vcmp.lt.s32.totalorder %v24903_v20, 1  ;;  %v24756_v24 = vmul.f32 0.15915494, %v24752_v7 }
 0xf69   :  { %vm24923_vm12 = vcmp.lt.s32.totalorder %v24903_v20, 2  ;;  %vm24924_vm15 = vcmp.lt.s32.totalorder %v24903_v20, 3  ;;  %vm24925_vm10 = vcmp.lt.s32.totalorder %v24903_v20, 4  ;;  %v24930_v44 = vsel %vm24922_vm7, %v24909_v10, %v24912_v19 }
 0xf6a   :  { %v24757_v29 = vmul.f32 0.15915494, %v24753_v5  ;;  %v24927_v45 = vsel %vm24925_vm10, %v24915_v60, 2102212464  ;;  %v24931_v54 = vsel %vm24925_vm10, %v24918_v47, 920167782  ;;  %v24764_v61 = vceil.f32 %v24756_v24 }
 0xf6b   :  { %vm24760_vm8 = vcmp.lt.f32.partialorder %v24756_v24, 0.0  ;;  %v24768_v62 = vfloor.f32 %v24756_v24  ;;  %v24934_v1 = vsel %vm24922_vm7, %v24912_v19, %v24915_v60  ;;  %v24932_v52 = vsel %vm24924_vm15, %v24915_v60, %v24931_v54 }
 0xf6c   :  { %vm24761_vm9 = vcmp.lt.f32.partialorder %v24757_v29, 0.0  ;;  %v24765_v17 = vceil.f32 %v24757_v29  ;;  %v24769_v57 = vfloor.f32 %v24757_v29  ;;  %v24926_v25 = vsel %vm24922_vm7, %v24906_v12, %v24909_v10 }
 0xf6d   :  { %v24772_v30 = vsel %vm24760_vm8, %v24764_v61, %v24768_v62  ;;  %v24933_v3 = vsel %vm24923_vm12, %v24930_v44, %v24932_v52  ;;  %v24935_v16 = vsel %vm24925_vm10, %v24921_v56, 1326507024  ;;  %v24928_v27 = vsel %vm24924_vm15, %v24912_v19, %v24927_v45 }
 0xf6e   :  { %v24776_v50 = vmul.f32 6.2831855, %v24772_v30  ;;  %v24773_v14 = vsel %vm24761_vm9, %v24765_v17, %v24769_v57  ;;  %v24936_v43 = vsel %vm24924_vm15, %v24918_v47, %v24935_v16  ;;  %v24929_v41 = vsel %vm24923_vm12, %v24926_v25, %v24928_v27 }
 0xf6f   :  { %v24777_v42 = vmul.f32 6.2831855, %v24773_v14  ;;  %v24937_v15 = vsel %vm24923_vm12, %v24934_v1, %v24936_v43  ;;  %v33656_v18 = vmul.u32.u64.low %v33620_v4, %v24933_v3  ;;  %v33657_v26 = vmul.u32.u64.high %v33620_v4, %v24933_v3, %v33656_v18 }
 0xf70   :  { %v33659_v63 = vsub.f32 %v24752_v7, %v24776_v50  ;;  %v33662_v11 = vmul.u32.u64.low %v33620_v4, %v24937_v15  ;;  %v33663_v39 = vmul.u32.u64.high %v33620_v4, %v24937_v15, %v33662_v11  ;;  %v24795_v8 = vor.u32 8388608, %v33624_v6 }
 0xf71   :  { %v33665_v58 = vsub.f32 %v24753_v5, %v24777_v42  ;;  %v24948_v23 = vadd.s32 1, %v33657_v26  ;;  %v24802_v19 = vsub.s32 32, %v33641_v22  ;;  %v24945_v20 = vmul.u32 %v33620_v4, %v24929_v41 }
 0xf72   :  { %24785 = vst [vmem:[#allocation5 + $0x130] sm:$0xff] %v33659_v63  ;;  %v24996_v21 = vand.u32 2139095040, %v33659_v63  ;;  %vm24947_vm13 = vc.u32 %v33663_v39, %v33656_v18  ;;  %v33681_v46 = vshll.u32 %v24795_v8, 8  ;;  %v33684_v5 = vshrl.u32 %v33626_v31, 5 }
 0xf73   :  { %24786 = vst [vmem:[#allocation5 + $0x138] sm:$0xff] %v33665_v58  ;;  %v25099_v37 = vand.u32 2139095040, %v33665_v58  ;;  %v25096_v10 = vand.u32 2147483647, %v33665_v58  ;;  %v24949_v7 = vsel %vm24947_vm13, %v24948_v23, %v33657_v26  ;;  %v24805_v56 = vshrl.u32 %v28697_v34, %v24802_v19 }
 0xf74   :  { %v24997_v51 = vshrl.u32 %v24996_v21, 23  ;;  %v24950_v6 = vadd.s32 %v24949_v7, %v24945_v20  ;;  %v24811_v4 = vshrl.u32 %v28699_v38, %v24802_v19  ;;  %v24804_v45 = vshll.u32 %v28696_v32, %v33641_v22 }
 0xf75   :  { %v25100_v9 = vshrl.u32 %v25099_v37, 23  ;;  %v25103_v47 = vand.u32 8388607, %v25096_v10  ;;  %v24807_v44 = vshll.u32 %v28697_v34, %v33641_v22  ;;  %v24808_v61 = vshrl.u32 %v28698_v36, %v24802_v19 }
 0xf76   :  { %v27849_v60 = vadd.s32 4294967169, %v24997_v51  ;;  %v24951_v29 = vadd.s32 536870912, %v24950_v6  ;;  %v24810_v31 = vshll.u32 %v28698_v36, %v33641_v22  ;;  %v24814_v62 = vshrl.u32 %v28700_v40, %v24802_v19 }
 0xf77   :  { %v27853_v12 = vadd.s32 4294967169, %v25100_v9  ;;  %v25104_v17 = vor.u32 8388608, %v25103_v47  ;;  %v24803_v57 = vshrl.u32 %v28696_v32, %v24802_v19  ;;  %v33700_v52 = vshrl.u32 %v28701_v48, %v24802_v19 }
 0xf78   :  { %v25003_v24 = vadd.s32 1, %v27849_v60  ;;  %v33696_v1 = vshrl.u32 %v24951_v29, 30  ;;  %v24806_v30 = vor.u32 %v24805_v56, %v24804_v45  ;;  %v33702_v25 = vor.u32 %v24811_v4, %v24810_v31 }
 0xf79   :  { %v25106_v54 = vadd.s32 1, %v27853_v12  ;;  %v24813_v3 = vshll.u32 %v28699_v38, %v33641_v22  ;;  %v33709_v14 = vshll.u32 %v28700_v40, %v33641_v22  ;;  %v24946_v43 = vadd.s32 %v33656_v18, %v33663_v39 }
 0xf7a   :  { %vm25004_vm14 = vcmp.gt.s32.totalorder %v25003_v24, 0  ;;  %v24953_v50 = vshll.u32 %v33696_v1, 30  ;;  %v33712_v42 = vor.u32 %v24808_v61, %v24807_v44  ;;  %v33718_v11 = vshll.u32 %v25104_v17, 8 }
 0xf7b   :  { %vm25107_vm0 = vcmp.gt.s32.totalorder %v25106_v54, 0  ;;  %v33714_v15 = vor.u32 %v24814_v62, %v24813_v3  ;;  %v24818_v41 = vor.u32 %v33700_v52, %v33709_v14  ;;  %vm24819_vm11 = vcmp.lt.s32.totalorder %v33684_v5, 1 }
 0xf7c   :  { %v25108_v16 = vsel %vm25107_vm0, %v25106_v54, 0  ;;  %v33716_v26 = vsub.s32 %v24950_v6, %v24953_v50  ;;  %v33723_v21 = vsel %vm25004_vm14, %v25003_v24, 0  ;;  %vm24822_vm1 = vcmp.lt.s32.totalorder %v33684_v5, 4 }
 0xf7d   :  { %v25110_v27 = vand.u32 31, %v25108_v16  ;;  %v33728_v18 = vsel %vm24819_vm11, %v24803_v57, %v24806_v30  ;;  %v25109_v39 = vshrl.u32 %v25108_v16, 5  ;;  %v24824_v23 = vsel %vm24822_vm1, %v33702_v25, 2102212464 }
 0xf7e   :  { %v24956_v8 = vsub.s32 0, %v33716_v26  ;;  %vm24821_vm2 = vcmp.lt.s32.totalorder %v33684_v5, 3  ;;  %v24976_v12 = vsub.s32 4, %v33696_v1  ;;  %v24827_v4 = vsel %vm24819_vm11, %v24806_v30, %v33712_v42 }
 0xf7f   :  { %v25111_v22 = vsub.s32 32, %v25110_v27  ;;  %v25113_v37 = vshll.u32 %v28696_v32, %v25110_v27  ;;  %v25116_v51 = vshll.u32 %v28697_v34, %v25110_v27  ;;  %v25119_v9 = vshll.u32 %v28698_v36, %v25110_v27 }
 0xf80   :  { %v27846_v7 = vmin.u32 %v24956_v8, %v33716_v26  ;;  %v25122_v6 = vshll.u32 %v28699_v38, %v25110_v27  ;;  %v24828_v24 = vsel %vm24822_vm1, %v33714_v15, 920167782  ;;  %vm24820_vm3 = vcmp.lt.s32.totalorder %v33684_v5, 2 }
 0xf81   :  { %v25114_v19 = vshrl.u32 %v28697_v34, %v25111_v22  ;;  %v25117_v20 = vshrl.u32 %v28698_v36, %v25111_v22  ;;  %v25120_v60 = vshrl.u32 %v28699_v38, %v25111_v22  ;;  %v25123_v47 = vshrl.u32 %v28700_v40, %v25111_v22 }
 0xf82   :  { %v24958_v29 = vclz %v27846_v7  ;;  %v25112_v61 = vshrl.u32 %v28696_v32, %v25111_v22  ;;  %v25125_v31 = vshll.u32 %v28700_v40, %v25110_v27  ;;  %v25126_v62 = vshrl.u32 %v28701_v48, %v25111_v22 }
 0xf83   :  { %v25115_v56 = vor.u32 %v25114_v19, %v25113_v37  ;;  %v25118_v45 = vor.u32 %v25117_v20, %v25116_v51  ;;  %v25121_v44 = vor.u32 %v25120_v60, %v25119_v9  ;;  %v25124_v54 = vor.u32 %v25123_v47, %v25122_v6 }
 0xf84   :  { %vm25128_vm4 = vcmp.lt.s32.totalorder %v25109_v39, 1  ;;  %v27847_v17 = vadd.s32 4294967294, %v24958_v29  ;;  %vm25129_vm5 = vcmp.lt.s32.totalorder %v25109_v39, 2  ;;  %vm25131_vm6 = vcmp.lt.s32.totalorder %v25109_v39, 4 }
 0xf85   :  { %v25136_v57 = vsel %vm25128_vm4, %v25115_v56, %v25118_v45  ;;  %v25127_v30 = vor.u32 %v25126_v62, %v25125_v31  ;;  %vm25130_vm7 = vcmp.lt.s32.totalorder %v25109_v39, 3  ;;  %v25133_v3 = vsel %vm25131_vm6, %v25121_v44, 2102212464 }
 0xf86   :  { %v25137_v16 = vsel %vm25131_vm6, %v25124_v54, 920167782  ;;  %vm27848_vm12 = vcmp.lt.s32.totalorder %v27847_v17, 0  ;;  %v25132_v50 = vsel %vm25128_vm4, %v25112_v61, %v25115_v56  ;;  %v25140_v37 = vsel %vm25128_vm4, %v25118_v45, %v25121_v44 }
 0xf87   :  { %v25138_v8 = vsel %vm25130_vm7, %v25121_v44, %v25137_v16  ;;  %vm24892_vm15 = vcmp.lt.s32.totalorder %v33606_v53, 0  ;;  %v24961_v19 = vsel %vm27848_vm12, 0, %v27847_v17  ;;  %v25134_v51 = vsel %vm25130_vm7, %v25118_v45, %v25133_v3 }
 0xf88   :  { %v25139_v27 = vsel %vm25129_vm5, %v25136_v57, %v25138_v8  ;;  %v25141_v22 = vsel %vm25131_vm6, %v25127_v30, 1326507024  ;;  %v24962_v20 = vsub.s32 32, %v24961_v19  ;;  %v24966_v9 = vsub.s32 4294967266, %v24961_v19 }
 0xf89   :  { %v25142_v7 = vsel %vm25130_vm7, %v25124_v54, %v25141_v22  ;;  %v24829_v60 = vsel %vm24821_vm2, %v33702_v25, %v24828_v24  ;;  %v24963_v6 = vshll.u32 %v33716_v26, %v24961_v19  ;;  %v25135_v54 = vsel %vm25129_vm5, %v25132_v50, %v25134_v51 }
 0xf8a   :  { %v25143_v47 = vsel %vm25129_vm5, %v25140_v37, %v25142_v7  ;;  %v33763_v56 = vmul.u32.u64.low %v33718_v11, %v25139_v27  ;;  %v33764_v29 = vmul.u32.u64.high %v33718_v11, %v25139_v27, %v33763_v56  ;;  %v24964_v45 = vshrl.u32 %v24946_v43, %v24962_v20 }
 0xf8b   :  { %v24967_v44 = vadd.s32 127, %v24966_v9  ;;  %v33768_v61 = vmul.u32.u64.low %v33718_v11, %v25143_v47  ;;  %v33769_v31 = vmul.u32.u64.high %v33718_v11, %v25143_v47, %v33768_v61  ;;  %v24830_v24 = vsel %vm24820_vm3, %v24827_v4, %v24829_v60 }
 0xf8c   :  { %v24831_v26 = vsel %vm24819_vm11, %v33712_v42, %v33702_v25  ;;  %v24832_v43 = vsel %vm24822_vm1, %v24818_v41, 1326507024  ;;  %v24965_v62 = vor.u32 %v24964_v45, %v24963_v6  ;;  %v24825_v39 = vsel %vm24821_vm2, %v33712_v42, %v24824_v23 }
 0xf8d   :  { %v24968_v17 = vshll.u32 %v24967_v44, 23  ;;  %v24833_v4 = vsel %vm24821_vm2, %v33714_v15, %v24832_v43  ;;  %v25154_v57 = vadd.s32 1, %v33764_v29  ;;  %v25007_v41 = vand.u32 31, %v33723_v21 }
 0xf8e   :  { %v24834_v25 = vsel %vm24820_vm3, %v24831_v26, %v24833_v4  ;;  %v33793_v52 = vmul.u32.u64.low %v33681_v46, %v24830_v24  ;;  %v33794_v14 = vmul.u32.u64.high %v33681_v46, %v24830_v24, %v33793_v52  ;;  %v25151_v3 = vmul.u32 %v33718_v11, %v25135_v54 }
 0xf8f   :  { %v24969_v30 = vor.u32 4788187, %v24968_v17  ;;  %vm25153_vm10 = vc.u32 %v33769_v31, %v33763_v56  ;;  %v24826_v15 = vsel %vm24820_vm3, %v33728_v18, %v24825_v39  ;;  %v24972_v8 = vcvt.s32.f32 %v24965_v62 }
 0xf90   :  { %v25155_v42 = vsel %vm25153_vm10, %v25154_v57, %v33764_v29  ;;  %v33805_v23 = vmul.u32.u64.low %v33681_v46, %v24834_v25  ;;  %v33806_v16 = vmul.u32.u64.high %v33681_v46, %v24834_v25, %v33805_v23  ;;  %v24977_v11 = vsel %vm24892_vm15, %v24976_v12, %v33696_v1 }
 0xf91   :  { %v24970_v50 = vand.u32 2147483647, %v24969_v30  ;;  %v25156_v37 = vadd.s32 %v25155_v42, %v25151_v3  ;;  %v24845_v19 = vadd.s32 1, %v33794_v14  ;;  %vm24891_vm8 = vcmp.le.f32.partialorder %v24890_v55, 0.7853982 }
 0xf92   :  { %v33816_v51 = vsel %vm24891_vm8, 0, %v24977_v11  ;;  %v24842_v27 = vmul.u32 %v33681_v46, %v24826_v15  ;;  %vm24844_vm9 = vc.u32 %v33806_v16, %v33793_v52  ;;  %v25008_v1 = vsub.s32 32, %v25007_v41 }
 0xf93   :  { %v24973_v5 = vmul.f32 %v24972_v8, %v24970_v50  ;;  %v25157_v18 = vadd.s32 536870912, %v25156_v37  ;;  %v24846_v9 = vsel %vm24844_vm9, %v24845_v19, %v33794_v14  ;;  %v24993_v60 = vand.u32 2147483647, %v33659_v63 }
 0xf94   :  { %v24847_v12 = vadd.s32 %v24846_v9, %v24842_v27  ;;  %v33828_v6 = vshrl.u32 %v33723_v21, 5  ;;  %v33832_v47 = vand.u32 3, %v33816_v51  ;;  %v25011_v44 = vshrl.u32 %v28697_v34, %v25008_v1 }
 0xf95   :  { %v24974_v22 = vxor.u32 2147483648, %v24973_v5  ;;  %v33820_v20 = vshrl.u32 %v25157_v18, 30  ;;  %v25020_v61 = vshrl.u32 %v28700_v40, %v25008_v1  ;;  %v25014_v24 = vshrl.u32 %v28698_v36, %v25008_v1 }
 0xf96   :  { %v24848_v29 = vadd.s32 536870912, %v24847_v12  ;;  %v25017_v21 = vshrl.u32 %v28699_v38, %v25008_v1  ;;  %v25000_v43 = vand.u32 8388607, %v24993_v60  ;;  %v25019_v62 = vshll.u32 %v28699_v38, %v25007_v41 }
 0xf97   :  { %v24975_v7 = vsel %vm24892_vm15, %v24974_v22, %v24973_v5  ;;  %v25159_v55 = vshll.u32 %v33820_v20, 30  ;;  %v25023_v17 = vshrl.u32 %v28701_v48, %v25008_v1  ;;  %v25010_v4 = vshll.u32 %v28696_v32, %v25007_v41 }
 0xf98   :  { %v24978_v46 = vsel %vm24891_vm8, %v33606_v53, %v24975_v7  ;;  %v33838_v54 = vshrl.u32 %v24848_v29, 30  ;;  %v25013_v57 = vshll.u32 %v28697_v34, %v25007_v41  ;;  %v25016_v25 = vshll.u32 %v28698_v36, %v25007_v41 }
 0xf99   :  { %28590 = vcosq.f32 %v24978_v46  ;;  %v33834_v45 = vsub.s32 %v25156_v37, %v25159_v55  ;;  %vm24988_vm13 = vcmp.eq.s32.totalorder %v33832_v47, 2  ;;  %v25152_v14 = vadd.s32 %v33763_v56, %v33769_v31 }
 0xf9a   :  { %28592 = vsinq.f32 %v24978_v46  ;;  %v24850_v39 = vshll.u32 %v33838_v54, 30  ;;  %v25021_v3 = vor.u32 %v25020_v61, %v25019_v62  ;;  %v25022_v38 = vshll.u32 %v28700_v40, %v25007_v41 }
 0xf9b   :  { %v25162_v26 = vsub.s32 0, %v33834_v45  ;;  %vm24985_vm0 = vcmp.eq.s32.totalorder %v33832_v47, 0  ;;  %v25012_v42 = vor.u32 %v25011_v44, %v25010_v4  ;;  %v25015_v15 = vor.u32 %v25014_v24, %v25013_v57 }
 0xf9c   :  { %v33857_v48 = vsub.s32 %v24847_v12, %v24850_v39  ;;  %v25018_v23 = vor.u32 %v25017_v21, %v25016_v25  ;;  %vm24984_vm14 = vcmp.lt.s32.totalorder %v33832_v47, 2  ;;  %v24843_v36 = vadd.s32 %v33793_v52, %v33806_v16 }
 0xf9d   :  { %v27854_v30 = vmin.u32 %v25162_v26, %v33834_v45  ;;  %v25001_v50 = vor.u32 8388608, %v25000_v43  ;;  %v25024_v8 = vor.u32 %v25023_v17, %v25022_v38  ;;  %vm24982_vm11 = vweird.f32 %v33606_v53 }
 0xf9e   :  { %v24853_v56 = vsub.s32 0, %v33857_v48  ;;  %v25009_v40 = vshrl.u32 %v28696_v32, %v25008_v1  ;;  %vm25025_vm1 = vcmp.lt.s32.totalorder %v33828_v6, 1  ;;  %vm25028_vm2 = vcmp.lt.s32.totalorder %v33828_v6, 4 }
 0xf9f   :  { %v25164_v34 = vclz %v27854_v30  ;;  %vm25026_vm3 = vcmp.lt.s32.totalorder %v33828_v6, 2  ;;  %vm25027_vm4 = vcmp.lt.s32.totalorder %v33828_v6, 3  ;;  %v25034_v41 = vsel %vm25028_vm2, %v25021_v3, 920167782 }
 0xfa0   :  { %v27842_v52 = vmin.u32 %v24853_v56, %v33857_v48  ;;  %v25029_v16 = vsel %vm25025_vm1, %v25009_v40, %v25012_v42  ;;  %v25030_v11 = vsel %vm25028_vm2, %v25018_v23, 2102212464  ;;  %v25033_v37 = vsel %vm25025_vm1, %v25012_v42, %v25015_v15 }
 0xfa1   :  { %v27855_v31 = vadd.s32 4294967294, %v25164_v34  ;;  %v25035_v32 = vsel %vm25027_vm4, %v25018_v23, %v25034_v41  ;;  %v25037_v5 = vsel %vm25025_vm1, %v25015_v15, %v25018_v23  ;;  %v25038_v18 = vsel %vm25028_vm2, %v25024_v8, 1326507024 }
 0xfa2   :  { %v24855_v1 = vclz %v27842_v52  ;;  %v25041_v12 = vshll.u32 %v25001_v50, 8  ;;  %v25036_v29 = vsel %vm25026_vm3, %v25033_v37, %v25035_v32  ;;  %v25039_v21 = vsel %vm25027_vm4, %v25021_v3, %v25038_v18 }
 0xfa3   :  { %v33869_v19 = vpop.eup %28590  ;;  %vm27856_vm5 = vcmp.lt.s32.totalorder %v27855_v31, 0  ;;  %v25040_v17 = vsel %vm25026_vm3, %v25037_v5, %v25039_v21  ;;  %v25031_v47 = vsel %vm25027_vm4, %v25015_v15, %v25030_v11  ;;  %v25182_v8 = vsub.s32 4, %v33820_v20 }
 0xfa4   :  { %v33873_v27 = vpop.eup %28592  ;;  %v24989_v22 = vxor.u32 2147483648, %v33869_v19  ;;  %v25167_v9 = vsel %vm27856_vm5, 0, %v27855_v31  ;;  %v27843_v24 = vadd.s32 4294967294, %v24855_v1  ;;  %v25032_v37 = vsel %vm25026_vm3, %v25029_v16, %v25031_v47 }
 0xfa5   :  { %v24986_v7 = vxor.u32 2147483648, %v33873_v27  ;;  %v25168_v55 = vsub.s32 32, %v25167_v9  ;;  %v25172_v46 = vsub.s32 4294967266, %v25167_v9  ;;  %v25169_v61 = vshll.u32 %v33834_v45, %v25167_v9 }
 0xfa6   :  { %v24990_v44 = vsel %vm24988_vm13, %v24989_v22, %v33873_v27  ;;  %vm27844_vm6 = vcmp.lt.s32.totalorder %v27843_v24, 0  ;;  %v33894_v4 = vmul.u32.u64.low %v25041_v12, %v25040_v17  ;;  %v33895_v57 = vmul.u32.u64.high %v25041_v12, %v25040_v17, %v33894_v4 }
 0xfa7   :  { %v24987_v26 = vsel %vm24985_vm0, %v33869_v19, %v24986_v7  ;;  %v25170_v43 = vshrl.u32 %v25152_v14, %v25168_v55  ;;  %v25173_v62 = vadd.s32 127, %v25172_v46  ;;  %v24858_v3 = vsel %vm27844_vm6, 0, %v27843_v24 }
 0xfa8   :  { %v24991_v39 = vsel %vm24984_vm14, %v24987_v26, %v24990_v44  ;;  %v24859_v38 = vsub.s32 32, %v24858_v3  ;;  %v24863_v42 = vsub.s32 4294967266, %v24858_v3  ;;  %v24860_v56 = vshll.u32 %v33857_v48, %v24858_v3 }
 0xfa9   :  { %v33899_v45 = vsel %vm24982_vm11, nan, %v24991_v39  ;;  %v25171_v25 = vor.u32 %v25170_v43, %v25169_v61  ;;  %v25174_v30 = vshll.u32 %v25173_v62, 23  ;;  %v25396_v15 = vadd.s32 3, %v33816_v51 }
 0xfaa   :  { %v33902_v14 = vand.u32 4294901760, %v33899_v45  ;;  %v33906_v34 = vmul.u32.u64.low %v25041_v12, %v25036_v29  ;;  %v33907_v50 = vmul.u32.u64.high %v25041_v12, %v25036_v29, %v33906_v34  ;;  %v24861_v40 = vshrl.u32 %v24843_v36, %v24859_v38 }
 0xfab   :  { %v25175_v23 = vor.u32 4788187, %v25174_v30  ;;  %v24864_v31 = vadd.s32 127, %v24863_v42  ;;  %v25178_v52 = vcvt.s32.f32 %v25171_v25  ;;  %v25397_v9 = vand.u32 3, %v25396_v15 }
 0xfac   :  { %25616 = vmatprep.subr.mxu0 %v33902_v14  ;;  %v24862_v11 = vor.u32 %v24861_v40, %v24860_v56  ;;  %vm25050_vm7 = vc.u32 %v33895_v57, %v33906_v34  ;;  %v25051_v18 = vadd.s32 1, %v33907_v50  ;;  %vm25098_vm12 = vcmp.lt.s32.totalorder %v33665_v58, 0 }
 0xfad   :  { %v25176_v41 = vand.u32 2147483647, %v25175_v23  ;;  %v24865_v32 = vshll.u32 %v24864_v31, 23  ;;  %v25048_v36 = vmul.u32 %v25041_v12, %v25032_v37  ;;  %v25183_v55 = vsel %vm25098_vm12, %v25182_v8, %v33820_v20 }
 0xfae   :  { %v25052_v6 = vsel %vm25050_vm7, %v25051_v18, %v33907_v50  ;;  %vm25399_vm15 = vcmp.eq.s32.totalorder %v25397_v9, 0  ;;  %v24869_v16 = vcvt.s32.f32 %v24862_v11  ;;  %vm25097_vm10 = vcmp.le.f32.partialorder %v25096_v10, 0.7853982 }
 0xfaf   :  { %v25179_v5 = vmul.f32 %v25178_v52, %v25176_v41  ;;  %v24866_v48 = vor.u32 4788187, %v24865_v32  ;;  %v25053_v46 = vadd.s32 %v25052_v6, %v25048_v36  ;;  %v25401_v29 = vsel %vm25399_vm15, %v33869_v19, %v24986_v7 }
 0xfb0   :  { %vm25398_vm8 = vcmp.lt.s32.totalorder %v25397_v9, 2  ;;  %vm25402_vm9 = vcmp.eq.s32.totalorder %v25397_v9, 2  ;;  %v25185_v21 = vsel %vm25097_vm10, 0, %v25183_v55  ;;  %v24873_v26 = vsub.s32 4, %v33838_v54 }
 0xfb1   :  { %v25180_v1 = vxor.u32 2147483648, %v25179_v5  ;;  %v24867_v51 = vand.u32 2147483647, %v24866_v48  ;;  %v25054_v24 = vadd.s32 536870912, %v25053_v46  ;;  %v25404_v20 = vsel %vm25402_vm9, %v24989_v22, %v33873_v27 }
 0xfb2   :  { %v25405_v43 = vsel %vm25398_vm8, %v25401_v29, %v25404_v20  ;;  %vm24789_vm13 = vcmp.lt.s32.totalorder %v33604_v2, 0  ;;  %vm24788_vm0 = vcmp.le.f32.partialorder %v24787_v35, 0.7853982  ;;  %v25604_v39 = vadd.s32 3, %v25185_v21 }
 0xfb3   :  { %v25181_v44 = vsel %vm25098_vm12, %v25180_v1, %v25179_v5  ;;  %v24870_v12 = vmul.f32 %v24869_v16, %v24867_v51  ;;  %v33930_v62 = vshrl.u32 %v25054_v24, 30  ;;  %v33934_v10 = vsel %vm24982_vm11, nan, %v25405_v43 }
 0xfb4   :  { %v25184_v61 = vsel %vm25097_vm10, %v33665_v58, %v25181_v44  ;;  %v24874_v22 = vsel %vm24789_vm13, %v24873_v26, %v33838_v54  ;;  %v25189_v25 = vand.u32 3, %v25185_v21  ;;  %v33946_v3 = vsub.f32 %v33899_v45, %v33902_v14 }
 0xfb5   :  { %28594 = vcosq.f32 %v25184_v61  ;;  %v24871_v7 = vxor.u32 2147483648, %v24870_v12  ;;  %v25056_v27 = vshll.u32 %v33930_v62, 30  ;;  %v33942_v53 = vsel %vm24788_vm0, 0, %v24874_v22 }
 0xfb6   :  { %28596 = vsinq.f32 %v25184_v61  ;;  %v25605_v35 = vand.u32 3, %v25604_v39  ;;  %vm25188_vm14 = vweird.f32 %v33665_v58  ;;  %v24880_v54 = vand.u32 3, %v33942_v53 }
 0xfb7   :  { %v24872_v19 = vsel %vm24789_vm13, %v24871_v7, %v24870_v12  ;;  %v25057_v4 = vsub.s32 %v25053_v46, %v25056_v27  ;;  %vm25190_vm11 = vcmp.lt.s32.totalorder %v25189_v25, 2  ;;  %vm25191_vm1 = vcmp.eq.s32.totalorder %v25189_v25, 0 }
 0xfb8   :  { %v24875_v17 = vsel %vm24788_vm0, %v33604_v2, %v24872_v19  ;;  %vm25194_vm2 = vcmp.eq.s32.totalorder %v25189_v25, 2  ;;  %v25695_v56 = vand.u32 4294901760, %v33946_v3  ;;  %vm25610_vm3 = vcmp.eq.s32.totalorder %v25605_v35, 2 }
 0xfb9   :  { %28598 = vcosq.f32 %v24875_v17  ;;  %v25059_v30 = vsub.s32 0, %v25057_v4  ;;  %vm25607_vm4 = vcmp.eq.s32.totalorder %v25605_v35, 0  ;;  %vm24885_vm5 = vcmp.eq.s32.totalorder %v24880_v54, 2 }
 0xfba   :  { %28600 = vsinq.f32 %v24875_v17  ;;  %vm25606_vm6 = vcmp.lt.s32.totalorder %v25605_v35, 2  ;;  %v25049_v32 = vadd.s32 %v33906_v34, %v33895_v57  ;;  %v25696_v6 = vsub.f32 %v33946_v3, %v25695_v56 }
 0xfbb   :  { %v27850_v38 = vmin.u32 %v25059_v30, %v25057_v4  ;;  %vm24882_vm12 = vcmp.eq.s32.totalorder %v24880_v54, 0  ;;  %vm24881_vm15 = vcmp.lt.s32.totalorder %v24880_v54, 2  ;;  %vm24879_vm10 = vweird.f32 %v33604_v2 }
 0xfbc   :  { %v25697_v24 = vand.u32 4294901760, %v25696_v6  ;;  %vm24995_vm8 = vcmp.lt.s32.totalorder %v33659_v63, 0  ;;  %vm33996_vm9 = vcmp.le.f32.partialorder %v24993_v60, 0.7853982  ;;  %v25292_v60 = vadd.s32 3, %v33942_v53 }
 0xfbd   :  { %v25061_v50 = vclz %v27850_v38  ;;  %v25079_v38 = vsub.s32 4, %v33930_v62 }
 0xfbf   :  { %v28595_v42 = vpop.eup %28594  ;;  %v27851_v31 = vadd.s32 4294967294, %v25061_v50  ;;  %v25080_v54 = vsel %vm24995_vm8, %v25079_v38, %v33930_v62 }
 0xfc0   :  { %v28597_v47 = vpop.eup %28596  ;;  %v25195_v23 = vxor.u32 2147483648, %v28595_v42  ;;  %v25082_v50 = vsel %vm33996_vm9, 0, %v25080_v54 }
 0xfc1   :  { %v25192_v8 = vxor.u32 2147483648, %v28597_v47  ;;  %vm27852_vm7 = vcmp.lt.s32.totalorder %v27851_v31, 0 }
 0xfc2   :  { %v25196_v40 = vsel %vm25194_vm2, %v25195_v23, %v28597_v47  ;;  %v25612_v41 = vsel %vm25610_vm3, %v25195_v23, %v28597_v47  ;;  %v25064_v36 = vsel %vm27852_vm7, 0, %v27851_v31  ;;  %v25293_v23 = vand.u32 3, %v25292_v60 }
 0xfc3   :  { %v25193_v52 = vsel %vm25191_vm1, %v28595_v42, %v25192_v8  ;;  %v25609_v37 = vsel %vm25607_vm4, %v28595_v42, %v25192_v8  ;;  %v33951_v15 = vpop.eup %28598  ;;  %v25065_v34 = vsub.s32 32, %v25064_v36  ;;  %v25069_v16 = vsub.s32 4294967266, %v25064_v36 }
 0xfc4   :  { %v25197_v11 = vsel %vm25190_vm11, %v25193_v52, %v25196_v40  ;;  %v25613_v5 = vsel %vm25606_vm6, %v25609_v37, %v25612_v41  ;;  %v33956_v18 = vpop.eup %28600  ;;  %v24886_v48 = vxor.u32 2147483648, %v33951_v15  ;;  %v25066_v44 = vshll.u32 %v25057_v4, %v25064_v36 }
 0xfc5   :  { %v33960_v9 = vsel %vm25188_vm14, nan, %v25197_v11  ;;  %v33965_v1 = vsel %vm25188_vm14, nan, %v25613_v5  ;;  %v24883_v57 = vxor.u32 2147483648, %v33956_v18  ;;  %v25067_v46 = vshrl.u32 %v25049_v32, %v25065_v34 }
 0xfc6   :  { %v33968_v55 = vand.u32 4294901760, %v33960_v9  ;;  %v24887_v51 = vsel %vm24885_vm5, %v24886_v48, %v33956_v18  ;;  %v25070_v61 = vadd.s32 127, %v25069_v16  ;;  %v25086_v8 = vand.u32 3, %v25082_v50 }
 0xfc7   :  { %v24884_v58 = vsel %vm24882_vm12, %v33951_v15, %v24883_v57  ;;  %v25068_v21 = vor.u32 %v25067_v46, %v25066_v44  ;;  %vm25295_vm13 = vcmp.eq.s32.totalorder %v25293_v23, 0  ;;  %vm25298_vm0 = vcmp.eq.s32.totalorder %v25293_v23, 2 }
 0xfc8   :  { %26081 = vmatprep.subr.mxu1 %v33968_v55  ;;  %v24888_v29 = vsel %vm24881_vm15, %v24884_v58, %v24887_v51  ;;  %v25071_v26 = vshll.u32 %v25070_v61, 23  ;;  %v34012_v47 = vsub.f32 %v33960_v9, %v33968_v55  ;;  %v25297_v62 = vsel %vm25295_vm13, %v33951_v15, %v24883_v57 }
 0xfc9   :  { %v33983_v12 = vsel %vm24879_vm10, nan, %v24888_v29  ;;  %v25075_v27 = vcvt.s32.f32 %v25068_v21  ;;  %v25300_v53 = vsel %vm25298_vm0, %v24886_v48, %v33956_v18  ;;  %vm25294_vm14 = vcmp.lt.s32.totalorder %v25293_v23, 2 }
 0xfca   :  { %v33986_v20 = vand.u32 4294901760, %v33983_v12  ;;  %v25072_v7 = vor.u32 4788187, %v25071_v26  ;;  %v26160_v40 = vand.u32 4294901760, %v34012_v47  ;;  %vm25091_vm11 = vcmp.eq.s32.totalorder %v25086_v8, 2 }
 0xfcb   :  { %vm25088_vm1 = vcmp.eq.s32.totalorder %v25086_v8, 0  ;;  %vm25087_vm2 = vcmp.lt.s32.totalorder %v25086_v8, 2  ;;  %vm25085_vm3 = vweird.f32 %v33659_v63  ;;  %v34042_v5 = vand.u32 4294901760, %v33934_v10 }
 0xfcc   :  { %25618 = vmatpush1.msra.mxu0 %v33986_v20  ;;  %v25700_v43 = vsub.f32 %v33983_v12, %v33986_v20  ;;  %v25073_v19 = vand.u32 2147483647, %v25072_v7  ;;  %v25500_v61 = vadd.s32 3, %v25082_v50 }
 0xfcd   :  { %25687 = vmatmul.mubr.f32.vlgmr.msra.gmra.mrb[36].mxu0 %v29109_v28  ;;  %25698 = vmatprep.subr.mxu0 %v25697_v24  ;;  %v34065_v6 = vsub.f32 %v33934_v10, %v34042_v5 }
 0xfce   :  { %v25701_v22 = vand.u32 4294901760, %v25700_v43  ;;  %25767 = vmatprep.mubr.f32.mxu0 %v28695_v0  ;;  %v25076_v17 = vmul.f32 %v25075_v27, %v25073_v19  ;;  %v25501_v21 = vand.u32 3, %v25500_v61  ;;  %v27010_v27 = vand.u32 4294901760, %v33965_v1 }
 0xfcf   :  { %v26625_v58 = vand.u32 4294901760, %v34065_v6 }
 0xfd0   :  { %v25702_v39 = vsub.f32 %v25700_v43, %v25701_v22  ;;  %v25077_v4 = vxor.u32 2147483648, %v25076_v17  ;;  %vm25503_vm4 = vcmp.eq.s32.totalorder %v25501_v21, 0  ;;  %vm25506_vm5 = vcmp.eq.s32.totalorder %v25501_v21, 2 }
 0xfd1   :  { %v26626_v44 = vsub.f32 %v34065_v6, %v26625_v58  ;;  %vm25502_vm6 = vcmp.lt.s32.totalorder %v25501_v21, 2 }
 0xfd2   :  { %v25703_v25 = vand.u32 4294901760, %v25702_v39  ;;  %v25078_v35 = vsel %vm24995_vm8, %v25077_v4, %v25076_v17  ;;  %v27089_v39 = vsub.f32 %v33965_v1, %v27010_v27 }
 0xfd3   :  { %v25081_v42 = vsel %vm33996_vm9, %v33659_v63, %v25078_v35 }
 0xfd4   :  { %25704 = vmatpush1.msra.mxu0 %v25703_v25  ;;  %28602 = vcosq.f32 %v25081_v42  ;;  %v27090_v63 = vand.u32 4294901760, %v27089_v39 }
 0xfd5   :  { %25769 = vmatmul.mubr.f32.vlgmr.msra.gmra.mrb[36].mxu0 %v29065_v33  ;;  %25777 = vmatprep.subr.mxu0 %v33946_v3  ;;  %28604 = vsinq.f32 %v25081_v42  ;;  %v26161_v3 = vsub.f32 %v34012_v47, %v26160_v40 }
 0xfd6   :  { %25780 = vmatpush1.msra.mxu0 %v25700_v43  ;;  %25843 = vmatprep.mubr.f32.mxu0 %v28695_v0  ;;  %v27091_v25 = vsub.f32 %v27089_v39, %v27090_v63 }
 0xfd7   :  { %25853 = vmatprep.subr.mxu0 %v33902_v14  ;;  %v26162_v36 = vand.u32 4294901760, %v26161_v3 }
 0xfd8   :  { %v27092_v35 = vand.u32 4294901760, %v27091_v25 }
 0xfdd   :  { %25846 = vmatmul.mubr.f32.vlgmr.msra.gmra.mrb[36].mxu0 %v29077_v13 }
 0xfde   :  { %25855 = vmatpush1.msra.mxu0 %v33986_v20  ;;  %25918 = vmatprep.mubr.f32.mxu0 %v28695_v0  ;;  %v34026_v31 = vpop.eup %28602 }
 0xfdf   :  { %25931 = vmatprep.subr.mxu0 %v25695_v56  ;;  %v34028_v41 = vpop.eup %28604  ;;  %v25092_v52 = vxor.u32 2147483648, %v34026_v31  ;;  %v25301_v56 = vsel %vm25294_vm14, %v25297_v62, %v25300_v53 }
 0xfe0   :  { %v25089_v37 = vxor.u32 2147483648, %v34028_v41  ;;  %v34046_v18 = vsel %vm24879_vm10, nan, %v25301_v56  ;;  %v28643_v56 = vld [vmem:[#allocation5 + $0x128] sm:$0xff] }
 0xfe1   :  { %v25093_v15 = vsel %vm25091_vm11, %v25092_v52, %v34028_v41  ;;  %v34058_v34 = vand.u32 4294901760, %v34046_v18  ;;  %v25508_v7 = vsel %vm25506_vm5, %v25092_v52, %v34028_v41 }
 0xfe2   :  { %v25090_v11 = vsel %vm25088_vm1, %v34026_v31, %v25089_v37  ;;  %v25505_v43 = vsel %vm25503_vm4, %v34026_v31, %v25089_v37  ;;  %v28642_v37 = vld [vmem:[#allocation5 + $0x120] sm:$0xff] }
 0xfe3   :  { %v25094_v32 = vsel %vm25087_vm2, %v25090_v11, %v25093_v15  ;;  %v25509_v19 = vsel %vm25502_vm6, %v25505_v43, %v25508_v7 }
 0xfe4   :  { %v34050_v48 = vsel %vm25085_vm3, nan, %v25094_v32 }
 0xfe5   :  { %25922 = vmatmul.mubr.f32.vlgmr.msra.gmra.mrb[36].mxu0 %v29086_v59  ;;  %v34054_v57 = vand.u32 4294901760, %v34050_v48 }
 0xfe6   :  { %25935 = vmatpush1.msra.mxu0 %v25701_v22  ;;  %25998 = vmatprep.mubr.f32.mxu0 %v28695_v0  ;;  %v34105_v22 = vsel %vm25085_vm3, nan, %v25509_v19  ;;  %v28644_v19 = vld [vmem:[#allocation5 + $0x130] sm:$0xff] }
 0xfe7   :  { %26007 = vmatprep.subr.mxu0 %v33902_v14  ;;  %26083 = vmatpush1.msra.mxu1 %v34054_v57  ;;  %v26165_v2 = vsub.f32 %v34050_v48, %v34054_v57  ;;  %v34071_v14 = vsub.f32 %v34046_v18, %v34058_v34  ;;  %v27012_v17 = vand.u32 4294901760, %v34105_v22 }
 0xfe8   :  { %26152 = vmatmul.mubr.f32.vlgmr.msra.gmra.mrb[36].mxu1 %v29109_v28  ;;  %26163 = vmatprep.subr.mxu1 %v26162_v36 }
 0xfe9   :  { %v26166_v51 = vand.u32 4294901760, %v26165_v2  ;;  %26232 = vmatprep.mubr.f32.mxu1 %v28695_v0  ;;  %v26631_v29 = vand.u32 4294901760, %v34071_v14  ;;  %v27095_v4 = vsub.f32 %v34105_v22, %v27012_v17 }
 0xfeb   :  { %v26167_v16 = vsub.f32 %v26165_v2, %v26166_v51  ;;  %v26632_v24 = vsub.f32 %v34071_v14, %v26631_v29 }
 0xfed   :  { %26000 = vmatmul.mubr.f32.vlgmr.msra.gmra.mrb[36].mxu0 %v29065_v33  ;;  %v26168_v46 = vand.u32 4294901760, %v26167_v16  ;;  %v26633_v26 = vand.u32 4294901760, %v26632_v24 }
 0xfee   :  { %26009 = vmatpush1.msra.mxu0 %v33986_v20  ;;  %26072 = vmatprep.mubr.f32.mxu0 %v28695_v0  ;;  %v26627_v20 = vand.u32 4294901760, %v26626_v44 }
 0xfef   :  { %26546 = vmatprep.subr.mxu0 %v34042_v5  ;;  %26169 = vmatpush1.msra.mxu1 %v26168_v46 }
 0xff0   :  { %26234 = vmatmul.mubr.f32.vlgmr.msra.gmra.mrb[36].mxu1 %v29065_v33  ;;  %26242 = vmatprep.subr.mxu1 %v34012_v47 }
 0xff1   :  { %26245 = vmatpush1.msra.mxu1 %v26165_v2  ;;  %26308 = vmatprep.mubr.f32.mxu1 %v28695_v0 }
 0xff2   :  { %26318 = vmatprep.subr.mxu1 %v33968_v55 }
 0xff5   :  { %26074 = vmatmul.mubr.f32.vlgmr.msra.gmra.mrb[36].mxu0 %v29065_v33 }
 0xff6   :  { %26548 = vmatpush1.msra.mxu0 %v34058_v34  ;;  %26611 = vmatprep.mubr.f32.mxu0 %v28695_v0 }
 0xff7   :  { %26628 = vmatprep.subr.mxu0 %v26627_v20 }
 0xff8   :  { %26311 = vmatmul.mubr.f32.vlgmr.msra.gmra.mrb[36].mxu1 %v29077_v13 }
 0xff9   :  { %26617 = vmatmul.mubr.f32.vlgmr.msra.gmra.mrb[38].mxu0 %v29109_v28  ;;  %26320 = vmatpush1.msra.mxu1 %v34054_v57 }
 0xffa   :  { %26634 = vmatpush1.msra.mxu0 %v26633_v26  ;;  %26383 = vmatprep.mubr.f32.mxu1 %v28695_v0 }
 0xffb   :  { %26396 = vmatprep.subr.mxu1 %v26160_v40  ;;  %26707 = vmatprep.subr.mxu0 %v34065_v6 }
 0xffc   :  { %26697 = vmatprep.mubr.f32.mxu0 %v28695_v0 }
0x1000   :  { %26387 = vmatmul.mubr.f32.vlgmr.msra.gmra.mrb[36].mxu1 %v29086_v59 }
0x1001   :  { %26699 = vmatmul.mubr.f32.vlgmr.msra.gmra.mrb[38].mxu0 %v29065_v33  ;;  %26400 = vmatpush1.msra.mxu1 %v26166_v51 }
0x1002   :  { %26710 = vmatpush1.msra.mxu0 %v34071_v14  ;;  %26463 = vmatprep.mubr.f32.mxu1 %v28695_v0 }
0x1003   :  { %26472 = vmatprep.subr.mxu1 %v33968_v55  ;;  %26783 = vmatprep.subr.mxu0 %v34042_v5  ;;  %v27096_v55 = vand.u32 4294901760, %v27095_v4 }
0x1004   :  { %26773 = vmatprep.mubr.f32.mxu0 %v28695_v0 }
0x1005   :  { %v27097_v30 = vsub.f32 %v27095_v4, %v27096_v55 }
0x1007   :  { %v27098_v38 = vand.u32 4294901760, %v27097_v30 }
0x1008   :  { %26465 = vmatmul.mubr.f32.vlgmr.msra.gmra.mrb[36].mxu1 %v29065_v33 }
0x1009   :  { %26776 = vmatmul.mubr.f32.vlgmr.msra.gmra.mrb[38].mxu0 %v29077_v13  ;;  %26474 = vmatpush1.msra.mxu1 %v34054_v57 }
0x100a   :  { %26785 = vmatpush1.msra.mxu0 %v34058_v34  ;;  %26537 = vmatprep.mubr.f32.mxu1 %v28695_v0 }
0x100b   :  { %27011 = vmatprep.subr.mxu1 %v27010_v27  ;;  %26861 = vmatprep.subr.mxu0 %v26625_v58 }
0x100c   :  { %26848 = vmatprep.mubr.f32.mxu0 %v28695_v0 }
0x1010   :  { %26539 = vmatmul.mubr.f32.vlgmr.msra.gmra.mrb[36].mxu1 %v29065_v33 }
0x1011   :  { %26852 = vmatmul.mubr.f32.vlgmr.msra.gmra.mrb[38].mxu0 %v29086_v59  ;;  %27013 = vmatpush1.msra.mxu1 %v27012_v17 }
0x1012   :  { %26865 = vmatpush1.msra.mxu0 %v26631_v29  ;;  %27076 = vmatprep.mubr.f32.mxu1 %v28695_v0 }
0x1013   :  { %27093 = vmatprep.subr.mxu1 %v27092_v35  ;;  %26937 = vmatprep.subr.mxu0 %v34042_v5 }
0x1014   :  { %26928 = vmatprep.mubr.f32.mxu0 %v28695_v0  ;;  %27082 = vmatmul.mubr.f32.vlgmr.msra.gmra.mrb[38].mxu1 %v29109_v28 }
0x1015   :  { %27099 = vmatpush1.msra.mxu1 %v27098_v38  ;;  %27162 = vmatprep.mubr.f32.mxu1 %v28695_v0 }
0x1016   :  { %27172 = vmatprep.subr.mxu1 %v27089_v39 }
0x1019   :  { %26930 = vmatmul.mubr.f32.vlgmr.msra.gmra.mrb[38].mxu0 %v29065_v33 }
0x101a   :  { %26939 = vmatpush1.msra.mxu0 %v34058_v34  ;;  %27002 = vmatprep.mubr.f32.mxu0 %v28695_v0 }
0x101c   :  { %27164 = vmatmul.mubr.f32.vlgmr.msra.gmra.mrb[38].mxu1 %v29065_v33 }
0x101d   :  { %27175 = vmatpush1.msra.mxu1 %v27095_v4  ;;  %27238 = vmatprep.mubr.f32.mxu1 %v28695_v0 }
0x101e   :  { %27248 = vmatprep.subr.mxu1 %v27010_v27 }
0x1021   :  { %27004 = vmatmul.mubr.f32.vlgmr.msra.gmra.mrb[38].mxu0 %v29065_v33 }
0x1024   :  { %27241 = vmatmul.mubr.f32.vlgmr.msra.gmra.mrb[38].mxu1 %v29077_v13 }
0x1025   :  { %27250 = vmatpush1.msra.mxu1 %v27012_v17  ;;  %27313 = vmatprep.mubr.f32.mxu1 %v28695_v0 }
0x1026   :  { %27326 = vmatprep.subr.mxu1 %v27090_v63 }
0x102c   :  { %27317 = vmatmul.mubr.f32.vlgmr.msra.gmra.mrb[38].mxu1 %v29086_v59 }
0x102d   :  { %27330 = vmatpush1.msra.mxu1 %v27096_v55  ;;  %27393 = vmatprep.mubr.f32.mxu1 %v28695_v0 }
0x102e   :  { %27402 = vmatprep.subr.mxu1 %v27010_v27 }
0x1034   :  { %27395 = vmatmul.mubr.f32.vlgmr.msra.gmra.mrb[38].mxu1 %v29065_v33 }
0x1035   :  { %27404 = vmatpush1.msra.mxu1 %v27012_v17  ;;  %27467 = vmatprep.mubr.f32.mxu1 %v28695_v0 }
0x103c   :  { %27469 = vmatmul.mubr.f32.vlgmr.msra.gmra.mrb[38].mxu1 %v29065_v33 }
0x10c8   :  { %v26075_v28 = vpop.f32.mrb[36].mxu0 }
0x10c9   :  { %v26077_v42 = vpop.f32.mrb[37].mxu0  ;;  %v27475_v47 = vmul.f32 %v26075_v28, %v34046_v18 }
0x10ca   :  { %v27476_v50 = vmul.f32 %v26077_v42, %v33934_v10 }
0x10e3   :  { %v26540_v13 = vpop.f32.mrb[36].mxu1 }
0x10e4   :  { %v26542_v60 = vpop.f32.mrb[37].mxu1  ;;  %v27477_v14 = vmul.f32 %v26540_v13, %v34105_v22  ;;  %v28645_v22 = vld [vmem:[#allocation5 + $0x138] sm:$0xff] }
0x10e5   :  { %v27478_v46 = vmul.f32 %v26542_v60, %v33965_v1 }
0x10f4   :  { %v27005_v54 = vpop.f32.mrb[38].mxu0 }
0x10f5   :  { %v27479_v59 = vmul.f32 %v27005_v54, %v33983_v12  ;;  %v27007_v23 = vpop.f32.mrb[39].mxu0 }
0x10f6   :  { %v27480_v8 = vmul.f32 %v27007_v23, %v33899_v45 }
0x10f7   :  { %v27483_v40 = vsub.f32 %v27475_v47, %v27479_v59 }
0x10f8   :  { %v27484_v62 = vsub.f32 %v27476_v50, %v27480_v8 }
0x10f9   :  { %v27487_v53 = vmul.f32 0.125, %v27483_v40 }
0x10fa   :  { %v27488_v0 = vmul.f32 0.125, %v27484_v62 }
0x10fb   :  { %v27491_v33 = vadd.f32 %v27487_v53, %v29255_v49 }
0x10fc   :  { %v27492_v31 = vadd.f32 %v27488_v0, %v29255_v49 }
0x10fd   :  { %v27495_v41 = vmul.f32 0.01, %v27491_v33 }
0x10fe   :  { %v27496_v52 = vmul.f32 0.01, %v27492_v31 }
0x10ff   :  { %v27499_v3 = vadd.f32 %v28642_v37, %v27495_v41 }
0x1100   :  { %v27500_v15 = vadd.f32 %v28643_v56, %v27496_v52 }
0x1101   :  { %v27503_v12 = vmul.f32 0.15915494, %v27499_v3 }
0x1102   :  { %v27504_v11 = vmul.f32 0.15915494, %v27500_v15 }
0x1103   :  { %vm27507_vm7 = vcmp.lt.f32.partialorder %v27503_v12, 0.0  ;;  %v27511_v10 = vceil.f32 %v27503_v12  ;;  %v27515_v32 = vfloor.f32 %v27503_v12 }
0x1104   :  { %vm27508_vm12 = vcmp.lt.f32.partialorder %v27504_v11, 0.0  ;;  %v27512_v45 = vceil.f32 %v27504_v11  ;;  %v27516_v5 = vfloor.f32 %v27504_v11 }
0x1105   :  { %v27519_v18 = vsel %vm27507_vm7, %v27511_v10, %v27515_v32 }
0x1106   :  { %v27523_v36 = vmul.f32 6.2831855, %v27519_v18  ;;  %v27520_v57 = vsel %vm27508_vm12, %v27512_v45, %v27516_v5 }
0x1107   :  { %v27524_v34 = vmul.f32 6.2831855, %v27520_v57 }
0x1108   :  { %v27527_v2 = vsub.f32 %v27499_v3, %v27523_v36 }
0x1109   :  { %v27528_v6 = vsub.f32 %v27500_v15, %v27524_v34 }
0x110a   :  { %27532 = vst [vmem:[#allocation5 + $0x140] sm:$0xff] %v27527_v2 }
0x110b   :  { %27533 = vst [vmem:[#allocation5 + $0x148] sm:$0xff] %v27528_v6 }
0x110f   :  { %v27470_v51 = vpop.f32.mrb[38].mxu1 }
0x1110   :  { %v27481_v16 = vmul.f32 %v27470_v51, %v34050_v48  ;;  %v27472_v58 = vpop.f32.mrb[39].mxu1 }
0x1111   :  { %v27482_v29 = vmul.f32 %v27472_v58, %v33960_v9 }
0x1112   :  { %v27485_v44 = vsub.f32 %v27477_v14, %v27481_v16 }
0x1113   :  { %v27486_v61 = vsub.f32 %v27478_v46, %v27482_v29 }
0x1114   :  { %v27489_v24 = vmul.f32 0.125, %v27485_v44 }
0x1115   :  { %v27490_v20 = vmul.f32 0.125, %v27486_v61 }
0x1116   :  { %v27493_v21 = vadd.f32 %v27489_v24, %v29255_v49 }
0x1117   :  { %v27494_v26 = vadd.f32 %v27490_v20, %v29255_v49 }
0x1118   :  { %v27497_v43 = vmul.f32 0.01, %v27493_v21 }
0x1119   :  { %v27498_v7 = vmul.f32 0.01, %v27494_v26 }
0x111a   :  { %v27501_v27 = vadd.f32 %v28644_v19, %v27497_v43 }
0x111b   :  { %v27502_v17 = vadd.f32 %v28645_v22, %v27498_v7 }
0x111c   :  { %v27505_v48 = vmul.f32 0.15915494, %v27501_v27 }
0x111d   :  { %v27506_v39 = vmul.f32 0.15915494, %v27502_v17 }
0x111e   :  { %vm27509_vm15 = vcmp.lt.f32.partialorder %v27505_v48, 0.0  ;;  %v27513_v1 = vceil.f32 %v27505_v48  ;;  %v27517_v4 = vfloor.f32 %v27505_v48 }
0x111f   :  { %vm27510_vm10 = vcmp.lt.f32.partialorder %v27506_v39, 0.0  ;;  %v27514_v9 = vceil.f32 %v27506_v39  ;;  %v27518_v63 = vfloor.f32 %v27506_v39 }
0x1120   :  { %v27521_v55 = vsel %vm27509_vm15, %v27513_v1, %v27517_v4 }
0x1121   :  { %v27525_v25 = vmul.f32 6.2831855, %v27521_v55  ;;  %v27522_v30 = vsel %vm27510_vm10, %v27514_v9, %v27518_v63 }
0x1122   :  { %v27526_v49 = vmul.f32 6.2831855, %v27522_v30 }
0x1123   :  { %v27529_v35 = vsub.f32 %v27501_v27, %v27525_v25 }
0x1124   :  { %v27530_v38 = vsub.f32 %v27502_v17, %v27526_v49 }
0x1125   :  { %27534 = vst [vmem:[#allocation5 + $0x150] sm:$0xff] %v27529_v35 }
0x1126   :  { %27535 = vst [vmem:[#allocation5 + $0x158] sm:$0xff] %v27530_v38 }
0x1127   :  { %28679 = shalt.err (!%p28676_p12)
}
0x1128   :  { %s28680_s30 = scalar_lea.hbm %s34168_s3, 5632 }
0x1129   :  { %p28681_p13 = scmp.ne.s32.totalorder %s34168_s3, %s28680_s30  ;;  %p28684_p0 = scmp.lt.u32.totalorder %s28680_s30, %s34168_s3 }
0x112b   :  { %p28686_p1 = pnand %p28684_p0, %p28681_p13 }
0x112d   :  { %28689 = shalt.err (!%p28686_p1)
}
0x112e   :  { %s28704_s8 = smov 512   ;;  %s28705_s9 = smov 32  }
0x112f   :  { %27547 = dma.vmem_to_hbm [thread:$0]  %s27542_s26, 5632, %s34168_s3, [#allocation4], %s28704_s8, %s28704_s8, %s28705_s9  }
0x1130   :  { %28692 = dma.done.wait [#allocation4], 5632  }
0x1131   :  { %28693 = vsyncadd [#allocation4], 4294961664 }
0x1132   :  { %27551 = vsyncpa [#allocation3], 1 }
0x1133   :  { %27552 = vsyncpa [#allocation4], 1 }

</bundles_post_ra>
